<compile_context>
chip_gen: v5e
topology: v5e:2x2
jax: 0.10.0
libtpu: 0.0.40
codegen_flags: <defaults>
</compile_context>

<pallas_src>
import functools
import math

import numpy as np
import jax
import jax.numpy as jnp
from jax.experimental import pallas as pl
from jax.experimental.pallas import tpu as pltpu

# ----------------------------- config (small) ------------------------------
VOCAB = 32
D_MODEL = 32           # encoder_hidden == decoder_hidden
N_HEAD = 2
D_K = 16
D_V = 16
D_FF = 64              # conv_filter_size
ENC_KERNEL = 9         # conv_kernel_size[0] in FFT block FFN (second conv has k=1)
N_ENC_LAYERS = 2
N_DEC_LAYERS = 2
VP_FILTER = 32         # variance predictor filter size
VP_KERNEL = 3
N_BINS = 8
N_MEL = 20             # n_mel_channels
MAX_SEQ_LEN = 64
LN_EPS = 1e-5


# ----------------------------- in-kernel helpers ---------------------------
def _ln(h, gamma, beta):
    """LayerNorm over the last (lane) dim."""
    mu = jnp.mean(h, axis=-1, keepdims=True)
    var = jnp.mean(jnp.square(h - mu), axis=-1, keepdims=True)
    return (h - mu) * jax.lax.rsqrt(var + LN_EPS) * gamma + beta


def _shifted_slab(y, off, total, seq_len, tpos):
    """z[r] = y[r + off] when the shifted row stays inside the same (max-length)
    sequence window, else 0 (zero-padded conv shift).  Works on the flattened
    (B*T, C) slab; tpos is the within-sequence position of each row."""
    if off == 0:
        return y
    rolled = pltpu.roll(y, shift=(-off) % total, axis=0)
    src = tpos + off
    valid = jnp.logical_and(src >= 0, src < seq_len)
    return jnp.where(valid, rolled, 0.0)


def _conv1d_im2col(y, w_flat, bias, k, total, seq_len, tpos):
    """Zero-padded 1-D conv over time as one matmul on an in-VMEM im2col slab.
    y: (B*T, Cin); w_flat: (K*Cin, Cout) with row index k*Cin + c; bias: (1, Cout)."""
    pad = (k - 1) // 2
    if k == 1:
        cols = y
    else:
        cols = jnp.concatenate(
            [_shifted_slab(y, i - pad, total, seq_len, tpos) for i in range(k)],
            axis=-1)
    return jnp.dot(cols, w_flat, preferred_element_type=jnp.float32) + bias


def _fft_stack(x, mrow_ref, mcol,
               wqkv_ref, bqkv_ref, wo_ref, bo_ref, g1_ref, be1_ref,
               w1_ref, b1_ref, w2_ref, b2_ref, g2_ref, be2_ref,
               *, n_batch, seq_len, n_layers, n_head, d_k, d_v, k1):
    """Runs n_layers FastSpeech2 FFT blocks on a (B*T, D) slab kept in vregs/VMEM."""
    total = n_batch * seq_len
    scale = 1.0 / math.sqrt(d_k)
    pad_col = mcol > 0.5                                  # (B*T, 1) padding frames
    tpos = jax.lax.broadcasted_iota(jnp.int32, (total, 1), 0) % seq_len
    koff = n_head * d_k
    voff = 2 * n_head * d_k
    key_pad = [mrow_ref[b] > 0.5 for b in range(n_batch)]  # each (1, T)

    for l in range(n_layers):
        wqkv, bqkv = wqkv_ref[l], bqkv_ref[l]
        wo, bo = wo_ref[l], bo_ref[l]
        g1, be1 = g1_ref[l], be1_ref[l]
        w1, b1 = w1_ref[l], b1_ref[l]
        w2, b2 = w2_ref[l], b2_ref[l]
        g2, be2 = g2_ref[l], be2_ref[l]

        # ---- stacked QKV projection on the whole slab: one (BT, D)x(D, 3*H*Dk) ----
        qkv = jnp.dot(x, wqkv, preferred_element_type=jnp.float32) + bqkv

        # ---- per-sequence multi-head self-attention (scores must stay per batch) --
        attn_rows = []
        for b in range(n_batch):
            qkv_b = qkv[b * seq_len:(b + 1) * seq_len, :]
            acc = None
            for h in range(n_head):
                q = qkv_b[:, h * d_k:(h + 1) * d_k]
                kh = qkv_b[:, koff + h * d_k:koff + (h + 1) * d_k]
                v = qkv_b[:, voff + h * d_v:voff + (h + 1) * d_v]
                s = jax.lax.dot_general(q, kh, (((1,), (1,)), ((), ())),
                                        preferred_element_type=jnp.float32) * scale
                s = jnp.where(key_pad[b], -1e9, s)
                smax = jnp.max(s, axis=-1, keepdims=True)
                pexp = jnp.exp(s - smax)
                denom = jnp.sum(pexp, axis=-1, keepdims=True)
                pexp = pexp * pl.reciprocal(denom, approx=True)
                head = jnp.dot(pexp, v, preferred_element_type=jnp.float32)
                # accumulate head @ wo[h*Dv:(h+1)*Dv, :] instead of lane-concat + matmul
                contrib = jnp.dot(head, wo[h * d_v:(h + 1) * d_v, :],
                                  preferred_element_type=jnp.float32)
                acc = contrib if acc is None else acc + contrib
            attn_rows.append(acc)
        attn = (attn_rows[0] if n_batch == 1
                else jnp.concatenate(attn_rows, axis=0)) + bo      # (B*T, D)

        # residual + LN1 + mask (slab ops)
        y = _ln(attn + x, g1, be1)
        y = jnp.where(pad_col, 0.0, y)

        # ---- position-wise conv FFN: conv(k=9) via im2col + ReLU, then 1x1 conv ----
        hff = jnp.maximum(
            _conv1d_im2col(y, w1, b1, k1, total, seq_len, tpos), 0.0)
        h2 = jnp.dot(hff, w2, preferred_element_type=jnp.float32) + b2

        # residual + LN2 + mask
        x = _ln(h2 + y, g2, be2)
        x = jnp.where(pad_col, 0.0, x)
    return x


def _vp_branch(h, mcol, idx, refs, *, n_batch, seq_len, kconv):
    """One variance predictor (conv3+ReLU+LN -> conv3+ReLU+LN -> linear -> mask)
    on a (B*T, D) slab; idx selects which of the 3 stacked predictors to use."""
    (w1_ref, b1_ref, g1_ref, be1_ref, w2_ref, b2_ref, g2_ref, be2_ref,
     wl_ref, bl_ref) = refs
    total = n_batch * seq_len
    tpos = jax.lax.broadcasted_iota(jnp.int32, (total, 1), 0) % seq_len
    h = jnp.maximum(
        _conv1d_im2col(h, w1_ref[idx], b1_ref[idx], kconv, total, seq_len, tpos), 0.0)
    h = _ln(h, g1_ref[idx], be1_ref[idx])
    h = jnp.maximum(
        _conv1d_im2col(h, w2_ref[idx], b2_ref[idx], kconv, total, seq_len, tpos), 0.0)
    h = _ln(h, g2_ref[idx], be2_ref[idx])
    out = jnp.dot(h, wl_ref[idx], preferred_element_type=jnp.float32) + bl_ref[idx]
    return jnp.where(mcol > 0.5, 0.0, out)                 # (B*T, 1)


# ----------------------------- fused encoder kernel -------------------------
def _encoder_kernel(tok_ref, pos_ref, wemb_ref, mrow_ref, mcol_ref,
                    wqkv_ref, bqkv_ref, wo_ref, bo_ref, g1_ref, be1_ref,
                    w1_ref, b1_ref, w2_ref, b2_ref, g2_ref, be2_ref,
                    o_ref, *, n_batch, seq_len, n_layers, n_head, d_k, d_v,
                    k1, vocab):
    total = n_batch * seq_len
    tok = tok_ref[...]                                     # (B*T, 1) int32
    onehot = (jax.lax.broadcasted_iota(jnp.int32, (total, vocab), 1)
              == tok).astype(jnp.float32)
    x = jnp.dot(onehot, wemb_ref[...],
                preferred_element_type=jnp.float32) + pos_ref[...]
    o_ref[...] = _fft_stack(
        x, mrow_ref, mcol_ref[...],
        wqkv_ref, bqkv_ref, wo_ref, bo_ref, g1_ref, be1_ref,
        w1_ref, b1_ref, w2_ref, b2_ref, g2_ref, be2_ref,
        n_batch=n_batch, seq_len=seq_len, n_layers=n_layers,
        n_head=n_head, d_k=d_k, d_v=d_v, k1=k1)


def encoder_forward(p, texts, src_mask):
    bsz, t = texts.shape
    tok = texts.reshape(bsz * t, 1).astype(jnp.int32)
    pos = jnp.tile(p["pos"][:t], (bsz, 1))                 # (B*T, D)
    mrow = src_mask[:, None, :].astype(jnp.float32)        # (B, 1, T)
    mcol = src_mask.reshape(bsz * t, 1).astype(jnp.float32)
    kern = functools.partial(
        _encoder_kernel, n_batch=bsz, seq_len=t, n_layers=N_ENC_LAYERS,
        n_head=N_HEAD, d_k=D_K, d_v=D_V, k1=ENC_KERNEL, vocab=VOCAB)
    return pl.pallas_call(
        kern,
        out_shape=jax.ShapeDtypeStruct((bsz * t, D_MODEL), jnp.float32),
    )(tok, pos, p["word_emb"], mrow, mcol,
      p["wqkv"], p["bqkv"], p["wo"], p["bo"], p["ln1_g"], p["ln1_b"],
      p["w1"], p["b1"], p["w2"], p["b2"], p["ln2_g"], p["ln2_b"])


# ----------------------------- fused decoder (+ mel_linear) kernel ----------
def _decoder_kernel(x_ref, pos_ref, mrow_ref, mcol_ref,
                    wqkv_ref, bqkv_ref, wo_ref, bo_ref, g1_ref, be1_ref,
                    w1_ref, b1_ref, w2_ref, b2_ref, g2_ref, be2_ref,
                    wmel_ref, bmel_ref, o_ref,
                    *, n_batch, seq_len, n_layers, n_head, d_k, d_v, k1):
    x = x_ref[...] + pos_ref[...]
    x = _fft_stack(
        x, mrow_ref, mcol_ref[...],
        wqkv_ref, bqkv_ref, wo_ref, bo_ref, g1_ref, be1_ref,
        w1_ref, b1_ref, w2_ref, b2_ref, g2_ref, be2_ref,
        n_batch=n_batch, seq_len=seq_len, n_layers=n_layers,
        n_head=n_head, d_k=d_k, d_v=d_v, k1=k1)
    o_ref[...] = (jnp.dot(x, wmel_ref[...], preferred_element_type=jnp.float32)
                  + bmel_ref[...])


def decoder_forward(p, x_slab, mel_mask, mel_w, mel_b):
    bsz, t = mel_mask.shape
    pos = jnp.tile(p["pos"][:t], (bsz, 1))
    mrow = mel_mask[:, None, :].astype(jnp.float32)
    mcol = mel_mask.reshape(bsz * t, 1).astype(jnp.float32)
    kern = functools.partial(
        _decoder_kernel, n_batch=bsz, seq_len=t, n_layers=N_DEC_LAYERS,
        n_head=N_HEAD, d_k=D_K, d_v=D_V, k1=ENC_KERNEL)
    return pl.pallas_call(
        kern,
        out_shape=jax.ShapeDtypeStruct((bsz * t, N_MEL), jnp.float32),
    )(x_slab, pos, mrow, mcol,
      p["wqkv"], p["bqkv"], p["wo"], p["bo"], p["ln1_g"], p["ln1_b"],
      p["w1"], p["b1"], p["w2"], p["b2"], p["ln2_g"], p["ln2_b"],
      mel_w, mel_b)


# ----------------------------- fused variance adaptor kernel ----------------
def _variance_adaptor_kernel(x_ref, src_mcol_ref, mel_mcol_ref, mel2ph_ref,
                             ptgt_ref, etgt_ref, pctl_ref, ectl_ref,
                             w1_ref, b1_ref, g1_ref, be1_ref,
                             w2_ref, b2_ref, g2_ref, be2_ref,
                             wl_ref, bl_ref,
                             pemb_ref, pbins_ref, eemb_ref, ebins_ref,
                             xmel_ref, logd_ref, ppred_ref, epred_ref,
                             *, n_batch, t_src, t_mel, kconv, n_bins,
                             use_p_target, use_e_target):
    vp_refs = (w1_ref, b1_ref, g1_ref, be1_ref, w2_ref, b2_ref, g2_ref, be2_ref,
               wl_ref, bl_ref)
    x = x_ref[...]                                         # (B*T_src, D)

    # ---- duration predictor (phoneme level), predictor index 0 ----
    logd_ref[...] = _vp_branch(x, src_mcol_ref[...], 0, vp_refs,
                               n_batch=n_batch, seq_len=t_src, kconv=kconv)

    # ---- length regulation: mel2ph gather as per-batch one-hot matmul ----
    # mel2ph is 1-indexed, 0 = padding -> zero row.
    m2p = mel2ph_ref[...]                                  # (B*T_mel, 1) int32
    rows = []
    for b in range(n_batch):
        m2p_b = m2p[b * t_mel:(b + 1) * t_mel, :]
        lane = jax.lax.broadcasted_iota(jnp.int32, (t_mel, t_src), 1)
        sel = jnp.logical_and(lane == (m2p_b - 1), m2p_b > 0).astype(jnp.float32)
        rows.append(jnp.dot(sel, x[b * t_src:(b + 1) * t_src, :],
                            preferred_element_type=jnp.float32))
    x_mel = rows[0] if n_batch == 1 else jnp.concatenate(rows, axis=0)

    mel_mcol = mel_mcol_ref[...]
    bin_lane = jax.lax.broadcasted_iota(jnp.int32, (n_batch * t_mel, n_bins), 1)

    # ---- frame-level pitch: predictor index 1 + bucket embedding add ----
    p_pred = _vp_branch(x_mel, mel_mcol, 1, vp_refs,
                        n_batch=n_batch, seq_len=t_mel, kconv=kconv)
    ppred_ref[...] = p_pred
    pitch_val = ptgt_ref[...] if use_p_target else p_pred * pctl_ref[...]
    pidx = jnp.sum((pitch_val >= pbins_ref[...]).astype(jnp.int32),
                   axis=-1, keepdims=True)                 # == jnp.digitize
    ponehot = (bin_lane == pidx).astype(jnp.float32)
    x_mel = x_mel + jnp.dot(ponehot, pemb_ref[...],
                            preferred_element_type=jnp.float32)

    # ---- frame-level energy: predictor index 2 + bucket embedding add ----
    e_pred = _vp_branch(x_mel, mel_mcol, 2, vp_refs,
                        n_batch=n_batch, seq_len=t_mel, kconv=kconv)
    epred_ref[...] = e_pred
    energy_val = etgt_ref[...] if use_e_target else e_pred * ectl_ref[...]
    eidx = jnp.sum((energy_val >= ebins_ref[...]).astype(jnp.int32),
                   axis=-1, keepdims=True)
    eonehot = (bin_lane == eidx).astype(jnp.float32)
    x_mel = x_mel + jnp.dot(eonehot, eemb_ref[...],
                            preferred_element_type=jnp.float32)

    xmel_ref[...] = x_mel


def variance_adaptor_forward(p, x_slab, src_mask, mel_mask, mel2ph,
                             p_targets, e_targets, p_control, e_control):
    bsz, t_src = src_mask.shape
    t_mel = mel_mask.shape[1]
    src_mcol = src_mask.reshape(bsz * t_src, 1).astype(jnp.float32)
    mel_mcol = mel_mask.reshape(bsz * t_mel, 1).astype(jnp.float32)
    m2p = mel2ph.reshape(bsz * t_mel, 1).astype(jnp.int32)
    zeros_mel = jnp.zeros((bsz * t_mel, 1), jnp.float32)
    ptgt = (p_targets.reshape(bsz * t_mel, 1).astype(jnp.float32)
            if p_targets is not None else zeros_mel)
    etgt = (e_targets.reshape(bsz * t_mel, 1).astype(jnp.float32)
            if e_targets is not None else zeros_mel)
    pctl = jnp.full((1, 1), p_control, jnp.float32)
    ectl = jnp.full((1, 1), e_control, jnp.float32)

    kern = functools.partial(
        _variance_adaptor_kernel, n_batch=bsz, t_src=t_src, t_mel=t_mel,
        kconv=VP_KERNEL, n_bins=N_BINS,
        use_p_target=p_targets is not None,
        use_e_target=e_targets is not None)
    out_shapes = (
        jax.ShapeDtypeStruct((bsz * t_mel, D_MODEL), jnp.float32),  # x_mel slab
        jax.ShapeDtypeStruct((bsz * t_src, 1), jnp.float32),        # log duration
        jax.ShapeDtypeStruct((bsz * t_mel, 1), jnp.float32),        # pitch pred
        jax.ShapeDtypeStruct((bsz * t_mel, 1), jnp.float32),        # energy pred
    )
    x_mel, logd, ppred, epred = pl.pallas_call(kern, out_shape=out_shapes)(
        x_slab, src_mcol, mel_mcol, m2p, ptgt, etgt, pctl, ectl,
        p["w1"], p["b1"], p["ln1_g"], p["ln1_b"],
        p["w2"], p["b2"], p["ln2_g"], p["ln2_b"],
        p["wl"], p["bl"],
        p["pitch_emb"], p["pitch_bins"], p["energy_emb"], p["energy_bins"])
    return (x_mel,
            logd.reshape(bsz, t_src),
            ppred.reshape(bsz, t_mel),
            epred.reshape(bsz, t_mel))


# ----------------------------- model glue -----------------------------------
def get_mask_from_lengths(lengths, max_len):
    ids = jnp.arange(max_len)[None, :]
    return ids >= lengths[:, None]          # True = padding


@functools.partial(jax.jit, static_argnames=("max_src_len", "max_mel_len"))
def diffsinger_forward(params, speakers, texts, src_lens, max_src_len,
                       mels=None, mel_lens=None, max_mel_len=None,
                       p_targets=None, e_targets=None, d_targets=None,
                       mel2phs=None, p_control=1.0, e_control=1.0, d_control=1.0):
    del speakers, mels   # speaker_emb is None (multi_speaker=False); mels unused ('aux')
    bsz = texts.shape[0]
    src_masks = get_mask_from_lengths(src_lens, max_src_len)
    mel_masks = (get_mask_from_lengths(mel_lens, max_mel_len)
                 if mel_lens is not None else None)

    # ---- FastspeechEncoder (one fused pallas_call) ----
    enc_slab = encoder_forward(params["encoder"], texts, src_masks)
    # TODO(synk): multi-speaker embedding requires speakers.json file load — not translated.

    # ---- VarianceAdaptor (one fused pallas_call) ----
    # TODO(synk): inference-time length regulation from predicted durations needs dynamic
    #             output lengths; this port follows DiffSinger's mel2ph path.
    (dec_in_slab, log_d_predictions, p_predictions, e_predictions) = \
        variance_adaptor_forward(params["variance_adaptor"], enc_slab,
                                 src_masks, mel_masks, mel2phs,
                                 p_targets, e_targets, p_control, e_control)

    if d_targets is not None:
        d_rounded = d_targets
    else:
        d_rounded = jnp.clip(
            jnp.round((jnp.exp(log_d_predictions) - 1.0) * d_control), 0, None
        ).astype(jnp.int32)

    # ---- model == 'aux': FastspeechDecoder + mel_linear (one fused pallas_call) ----
    epsilon_predictions = noise_loss = diffusion_step = None
    mel_slab = decoder_forward(params["decoder"], dec_in_slab, mel_masks,
                               params["mel_linear_w"], params["mel_linear_b"])
    output = mel_slab.reshape(bsz, max_mel_len, N_MEL)
    # TODO(synk): GaussianDiffusion / GaussianDiffusionShallow ('naive'/'shallow' branches)
    #             and the diffusion.aux_mel side-effect are not executed in the 'aux' forward.

    return ((output, epsilon_predictions, noise_loss, diffusion_step,
             p_predictions, e_predictions, log_d_predictions, d_rounded,
             src_masks, mel_masks, src_lens, mel_lens), p_targets)


# ----------------------------- parameter init -------------------------------
def sinusoid_table(n_position, d_hid):
    pos = jnp.arange(n_position, dtype=jnp.float32)[:, None]
    i = jnp.arange(d_hid)[None, :]
    angle = pos / jnp.power(10000.0, (2.0 * (i // 2)).astype(jnp.float32) / d_hid)
    return jnp.where(i % 2 == 0, jnp.sin(angle), jnp.cos(angle)).astype(jnp.float32)


def init_params(key):
    keys = iter(jax.random.split(key, 64))

    def nrm(shape, scale=0.02):
        return jax.random.normal(next(keys), shape, jnp.float32) * scale

    qkv_width = N_HEAD * (2 * D_K + D_V)      # [Q heads | K heads | V heads]

    def fft_stack_params(n_layers):
        return {
            "wqkv": nrm((n_layers, D_MODEL, qkv_width)),
            "bqkv": jnp.zeros((n_layers, 1, qkv_width), jnp.float32),
            "wo": nrm((n_layers, N_HEAD * D_V, D_MODEL)),
            "bo": jnp.zeros((n_layers, 1, D_MODEL), jnp.float32),
            "ln1_g": jnp.ones((n_layers, 1, D_MODEL), jnp.float32),
            "ln1_b": jnp.zeros((n_layers, 1, D_MODEL), jnp.float32),
            # conv kernel=9 stored pre-flattened for im2col: row index = k*Cin + c
            "w1": nrm((n_layers, ENC_KERNEL * D_MODEL, D_FF)),
            "b1": jnp.zeros((n_layers, 1, D_FF), jnp.float32),
            "w2": nrm((n_layers, D_FF, D_MODEL)),            # kernel=1 -> dense
            "b2": jnp.zeros((n_layers, 1, D_MODEL), jnp.float32),
            "ln2_g": jnp.ones((n_layers, 1, D_MODEL), jnp.float32),
            "ln2_b": jnp.zeros((n_layers, 1, D_MODEL), jnp.float32),
        }

    def vp_stack_params():
        # 3 predictors stacked on the leading dim: [duration, pitch, energy]
        return {
            "w1": nrm((3, VP_KERNEL * D_MODEL, VP_FILTER)),
            "b1": jnp.zeros((3, 1, VP_FILTER), jnp.float32),
            "ln1_g": jnp.ones((3, 1, VP_FILTER), jnp.float32),
            "ln1_b": jnp.zeros((3, 1, VP_FILTER), jnp.float32),
            "w2": nrm((3, VP_KERNEL * VP_FILTER, VP_FILTER)),
            "b2": jnp.zeros((3, 1, VP_FILTER), jnp.float32),
            "ln2_g": jnp.ones((3, 1, VP_FILTER), jnp.float32),
            "ln2_b": jnp.zeros((3, 1, VP_FILTER), jnp.float32),
            "wl": nrm((3, VP_FILTER, 1)),
            "bl": jnp.zeros((3, 1, 1), jnp.float32),
        }

    word_emb = jax.random.normal(next(keys), (VOCAB, D_MODEL), jnp.float32) * 0.02
    word_emb = word_emb.at[0].set(0.0)   # padding_idx = 0

    enc = fft_stack_params(N_ENC_LAYERS)
    enc["word_emb"] = word_emb
    enc["pos"] = sinusoid_table(MAX_SEQ_LEN, D_MODEL)
    dec = fft_stack_params(N_DEC_LAYERS)
    dec["pos"] = sinusoid_table(MAX_SEQ_LEN, D_MODEL)

    va = vp_stack_params()
    va["pitch_emb"] = jax.random.normal(next(keys), (N_BINS, D_MODEL), jnp.float32) * 0.02
    va["energy_emb"] = jax.random.normal(next(keys), (N_BINS, D_MODEL), jnp.float32) * 0.02
    va["pitch_bins"] = jnp.linspace(-2.0, 2.0, N_BINS - 1).reshape(1, N_BINS - 1).astype(jnp.float32)
    va["energy_bins"] = jnp.linspace(-2.0, 2.0, N_BINS - 1).reshape(1, N_BINS - 1).astype(jnp.float32)

    return {"encoder": enc, "decoder": dec, "variance_adaptor": va,
            "mel_linear_w": nrm((D_MODEL, N_MEL)),
            "mel_linear_b": jnp.zeros((1, N_MEL), jnp.float32)}


# ----------------------------- main ------------------------------------------
if __name__ == "__main__":
    B, T_SRC, T_MEL = 2, 8, 16
    key = jax.random.PRNGKey(0)
    params = init_params(key)

    kt, kp, ke = jax.random.split(jax.random.PRNGKey(0), 3)

    src_lens = jnp.array([8, 6], jnp.int32)
    mel_lens = jnp.array([16, 12], jnp.int32)
    max_src_len, max_mel_len = T_SRC, T_MEL

    texts_np = np.array(jax.random.randint(kt, (B, T_SRC), 1, VOCAB))
    for b, L in enumerate(np.array(src_lens)):
        texts_np[b, L:] = 0
    texts = jnp.asarray(texts_np, jnp.int32)

    d_np = np.zeros((B, T_SRC), np.int32)
    for b, L in enumerate(np.array(src_lens)):
        d_np[b, :L] = 2                      # durations sum to mel_lens
    d_targets = jnp.asarray(d_np)

    mel2ph_np = np.zeros((B, T_MEL), np.int32)
    for b in range(B):
        pos = 0
        for ph in range(T_SRC):
            dur = int(d_np[b, ph])
            mel2ph_np[b, pos:pos + dur] = ph + 1
            pos += dur
    mel2phs = jnp.asarray(mel2ph_np)

    mel_pad = (jnp.arange(T_MEL)[None, :] < mel_lens[:, None]).astype(jnp.float32)
    p_targets = jax.random.normal(kp, (B, T_MEL), jnp.float32) * mel_pad
    e_targets = jax.random.normal(ke, (B, T_MEL), jnp.float32) * mel_pad

    speakers = jnp.zeros((B,), jnp.int32)

    (outs, p_t) = diffsinger_forward(
        params, speakers, texts, src_lens,
        max_src_len=max_src_len,
        mels=None, mel_lens=mel_lens, max_mel_len=max_mel_len,
        p_targets=p_targets, e_targets=e_targets, d_targets=d_targets,
        mel2phs=mel2phs, p_control=1.0, e_control=1.0, d_control=1.0)

    mel_out = outs[0]
    jax.block_until_ready(mel_out)
    assert mel_out.shape == (B, T_MEL, N_MEL)
    assert bool(jnp.all(jnp.isfinite(mel_out)))
    assert outs[4].shape == (B, T_MEL)   # pitch predictions
    assert outs[6].shape == (B, T_SRC)   # log duration predictions
    print("KERNEL_OK")
</pallas_src>

<mosaic_0001>
module attributes {stable_mosaic.version = 11 : i64} {
  func.func @_encoder_kernel(%arg0: memref<16x1xi32, #tpu.memory_space<vmem>>, %arg1: memref<16x32xf32, #tpu.memory_space<vmem>>, %arg2: memref<32x32xf32, #tpu.memory_space<vmem>>, %arg3: memref<2x1x8xf32, #tpu.memory_space<vmem>>, %arg4: memref<16x1xf32, #tpu.memory_space<vmem>>, %arg5: memref<2x32x96xf32, #tpu.memory_space<vmem>>, %arg6: memref<2x1x96xf32, #tpu.memory_space<vmem>>, %arg7: memref<2x32x32xf32, #tpu.memory_space<vmem>>, %arg8: memref<2x1x32xf32, #tpu.memory_space<vmem>>, %arg9: memref<2x1x32xf32, #tpu.memory_space<vmem>>, %arg10: memref<2x1x32xf32, #tpu.memory_space<vmem>>, %arg11: memref<2x288x64xf32, #tpu.memory_space<vmem>>, %arg12: memref<2x1x64xf32, #tpu.memory_space<vmem>>, %arg13: memref<2x64x32xf32, #tpu.memory_space<vmem>>, %arg14: memref<2x1x32xf32, #tpu.memory_space<vmem>>, %arg15: memref<2x1x32xf32, #tpu.memory_space<vmem>>, %arg16: memref<2x1x32xf32, #tpu.memory_space<vmem>>, %arg17: memref<16x32xf32, #tpu.memory_space<vmem>>) attributes {dimension_semantics = [], scalar_prefetch = 0 : i64, scratch_operands = 0 : i64, tpu.core_type = #tpu.core_type<tc>} {
    %c0 = arith.constant 0 : index
    %c0_0 = arith.constant 0 : index
    %0 = vector.load %arg0[%c0, %c0_0] : memref<16x1xi32, #tpu.memory_space<vmem>>, vector<16x1xi32>
    %1 = tpu.iota {dimensions = array<i32: 1>} : vector<16x32xi32>
    %2 = vector.broadcast %0 : vector<16x1xi32> to vector<16x32xi32>
    %3 = arith.cmpi eq, %1, %2 : vector<16x32xi32>
    %4 = arith.extui %3 : vector<16x32xi1> to vector<16x32xi32>
    %5 = arith.sitofp %4 : vector<16x32xi32> to vector<16x32xf32>
    %c0_1 = arith.constant 0 : index
    %c0_2 = arith.constant 0 : index
    %6 = vector.load %arg2[%c0_1, %c0_2] : memref<32x32xf32, #tpu.memory_space<vmem>>, vector<32x32xf32>
    %cst = arith.constant dense<0.000000e+00> : vector<16x32xf32>
    %7 = tpu.matmul %5, %6, %cst {dimension_numbers = #tpu.dot_dimension_numbers<[1], [0], [0], [1], [0, 0, 1, 1], [], []>} : vector<16x32xf32>, vector<32x32xf32>, vector<16x32xf32> -> vector<16x32xf32>
    %c0_3 = arith.constant 0 : index
    %c0_4 = arith.constant 0 : index
    %8 = vector.load %arg1[%c0_3, %c0_4] : memref<16x32xf32, #tpu.memory_space<vmem>>, vector<16x32xf32>
    %9 = arith.addf %7, %8 : vector<16x32xf32>
    %c0_5 = arith.constant 0 : index
    %c0_6 = arith.constant 0 : index
    %10 = vector.load %arg4[%c0_5, %c0_6] : memref<16x1xf32, #tpu.memory_space<vmem>>, vector<16x1xf32>
    %cst_7 = arith.constant 5.000000e-01 : f32
    %11 = vector.broadcast %cst_7 : f32 to vector<16x1xf32>
    %12 = arith.cmpf ogt, %10, %11 : vector<16x1xf32>
    %13 = tpu.iota {dimensions = array<i32: 0>} : vector<16x1xi32>
    %c8_i32 = arith.constant 8 : i32
    %c0_i32 = arith.constant 0 : i32
    %14 = arith.cmpi eq, %c8_i32, %c0_i32 : i32
    %c1_i32 = arith.constant 1 : i32
    %15 = arith.select %14, %c1_i32, %c8_i32 : i32
    %16 = vector.broadcast %15 : i32 to vector<16x1xi32>
    %17 = arith.remsi %13, %16 : vector<16x1xi32>
    %c0_i32_8 = arith.constant 0 : i32
    %18 = vector.broadcast %c0_i32_8 : i32 to vector<16x1xi32>
    %19 = arith.cmpi ne, %17, %18 : vector<16x1xi32>
    %c0_i32_9 = arith.constant 0 : i32
    %20 = vector.broadcast %c0_i32_9 : i32 to vector<16x1xi32>
    %21 = arith.cmpi slt, %17, %20 : vector<16x1xi32>
    %c0_i32_10 = arith.constant 0 : i32
    %22 = arith.cmpi slt, %15, %c0_i32_10 : i32
    %23 = vector.broadcast %22 : i1 to vector<16x1xi1>
    %24 = vector.broadcast %23 : vector<16x1xi1> to vector<16x1xi1>
    %25 = arith.xori %21, %24 : vector<16x1xi1>
    %26 = arith.andi %25, %19 : vector<16x1xi1>
    %27 = vector.broadcast %15 : i32 to vector<16x1xi32>
    %28 = arith.addi %17, %27 : vector<16x1xi32>
    %29 = arith.select %26, %28, %17 : vector<16x1xi1>, vector<16x1xi32>
    %c0_11 = arith.constant 0 : index
    %c0_12 = arith.constant 0 : index
    %c0_13 = arith.constant 0 : index
    %30 = vector.load %arg3[%c0_11, %c0_12, %c0_13] : memref<2x1x8xf32, #tpu.memory_space<vmem>>, vector<1x1x8xf32>
    %31 = vector.shape_cast %30 : vector<1x1x8xf32> to vector<1x8xf32>
    %cst_14 = arith.constant 5.000000e-01 : f32
    %32 = vector.broadcast %cst_14 : f32 to vector<1x8xf32>
    %33 = arith.cmpf ogt, %31, %32 : vector<1x8xf32>
    %c1 = arith.constant 1 : index
    %c0_15 = arith.constant 0 : index
    %c0_16 = arith.constant 0 : index
    %34 = vector.load %arg3[%c1, %c0_15, %c0_16] : memref<2x1x8xf32, #tpu.memory_space<vmem>>, vector<1x1x8xf32>
    %35 = vector.shape_cast %34 : vector<1x1x8xf32> to vector<1x8xf32>
    %cst_17 = arith.constant 5.000000e-01 : f32
    %36 = vector.broadcast %cst_17 : f32 to vector<1x8xf32>
    %37 = arith.cmpf ogt, %35, %36 : vector<1x8xf32>
    %c0_18 = arith.constant 0 : index
    %c0_19 = arith.constant 0 : index
    %c0_20 = arith.constant 0 : index
    %38 = vector.load %arg5[%c0_18, %c0_19, %c0_20] : memref<2x32x96xf32, #tpu.memory_space<vmem>>, vector<1x32x96xf32>
    %39 = vector.shape_cast %38 : vector<1x32x96xf32> to vector<32x96xf32>
    %c0_21 = arith.constant 0 : index
    %c0_22 = arith.constant 0 : index
    %c0_23 = arith.constant 0 : index
    %40 = vector.load %arg6[%c0_21, %c0_22, %c0_23] : memref<2x1x96xf32, #tpu.memory_space<vmem>>, vector<1x1x96xf32>
    %41 = vector.shape_cast %40 : vector<1x1x96xf32> to vector<1x96xf32>
    %c0_24 = arith.constant 0 : index
    %c0_25 = arith.constant 0 : index
    %c0_26 = arith.constant 0 : index
    %42 = vector.load %arg7[%c0_24, %c0_25, %c0_26] : memref<2x32x32xf32, #tpu.memory_space<vmem>>, vector<1x32x32xf32>
    %43 = vector.shape_cast %42 : vector<1x32x32xf32> to vector<32x32xf32>
    %c0_27 = arith.constant 0 : index
    %c0_28 = arith.constant 0 : index
    %c0_29 = arith.constant 0 : index
    %44 = vector.load %arg8[%c0_27, %c0_28, %c0_29] : memref<2x1x32xf32, #tpu.memory_space<vmem>>, vector<1x1x32xf32>
    %45 = vector.shape_cast %44 : vector<1x1x32xf32> to vector<1x32xf32>
    %c0_30 = arith.constant 0 : index
    %c0_31 = arith.constant 0 : index
    %c0_32 = arith.constant 0 : index
    %46 = vector.load %arg9[%c0_30, %c0_31, %c0_32] : memref<2x1x32xf32, #tpu.memory_space<vmem>>, vector<1x1x32xf32>
    %47 = vector.shape_cast %46 : vector<1x1x32xf32> to vector<1x32xf32>
    %c0_33 = arith.constant 0 : index
    %c0_34 = arith.constant 0 : index
    %c0_35 = arith.constant 0 : index
    %48 = vector.load %arg10[%c0_33, %c0_34, %c0_35] : memref<2x1x32xf32, #tpu.memory_space<vmem>>, vector<1x1x32xf32>
    %49 = vector.shape_cast %48 : vector<1x1x32xf32> to vector<1x32xf32>
    %c0_36 = arith.constant 0 : index
    %c0_37 = arith.constant 0 : index
    %c0_38 = arith.constant 0 : index
    %50 = vector.load %arg11[%c0_36, %c0_37, %c0_38] : memref<2x288x64xf32, #tpu.memory_space<vmem>>, vector<1x288x64xf32>
    %51 = vector.shape_cast %50 : vector<1x288x64xf32> to vector<288x64xf32>
    %c0_39 = arith.constant 0 : index
    %c0_40 = arith.constant 0 : index
    %c0_41 = arith.constant 0 : index
    %52 = vector.load %arg12[%c0_39, %c0_40, %c0_41] : memref<2x1x64xf32, #tpu.memory_space<vmem>>, vector<1x1x64xf32>
    %53 = vector.shape_cast %52 : vector<1x1x64xf32> to vector<1x64xf32>
    %c0_42 = arith.constant 0 : index
    %c0_43 = arith.constant 0 : index
    %c0_44 = arith.constant 0 : index
    %54 = vector.load %arg13[%c0_42, %c0_43, %c0_44] : memref<2x64x32xf32, #tpu.memory_space<vmem>>, vector<1x64x32xf32>
    %55 = vector.shape_cast %54 : vector<1x64x32xf32> to vector<64x32xf32>
    %c0_45 = arith.constant 0 : index
    %c0_46 = arith.constant 0 : index
    %c0_47 = arith.constant 0 : index
    %56 = vector.load %arg14[%c0_45, %c0_46, %c0_47] : memref<2x1x32xf32, #tpu.memory_space<vmem>>, vector<1x1x32xf32>
    %57 = vector.shape_cast %56 : vector<1x1x32xf32> to vector<1x32xf32>
    %c0_48 = arith.constant 0 : index
    %c0_49 = arith.constant 0 : index
    %c0_50 = arith.constant 0 : index
    %58 = vector.load %arg15[%c0_48, %c0_49, %c0_50] : memref<2x1x32xf32, #tpu.memory_space<vmem>>, vector<1x1x32xf32>
    %59 = vector.shape_cast %58 : vector<1x1x32xf32> to vector<1x32xf32>
    %c0_51 = arith.constant 0 : index
    %c0_52 = arith.constant 0 : index
    %c0_53 = arith.constant 0 : index
    %60 = vector.load %arg16[%c0_51, %c0_52, %c0_53] : memref<2x1x32xf32, #tpu.memory_space<vmem>>, vector<1x1x32xf32>
    %61 = vector.shape_cast %60 : vector<1x1x32xf32> to vector<1x32xf32>
    %cst_54 = arith.constant dense<0.000000e+00> : vector<16x96xf32>
    %62 = tpu.matmul %9, %39, %cst_54 {dimension_numbers = #tpu.dot_dimension_numbers<[1], [0], [0], [1], [0, 0, 1, 1], [], []>} : vector<16x32xf32>, vector<32x96xf32>, vector<16x96xf32> -> vector<16x96xf32>
    %63 = vector.broadcast %41 : vector<1x96xf32> to vector<16x96xf32>
    %64 = arith.addf %62, %63 : vector<16x96xf32>
    %65 = vector.extract_strided_slice %64 {offsets = [0, 0], sizes = [8, 96], strides = [1, 1]} : vector<16x96xf32> to vector<8x96xf32>
    %66 = vector.extract_strided_slice %65 {offsets = [0, 0], sizes = [8, 16], strides = [1, 1]} : vector<8x96xf32> to vector<8x16xf32>
    %67 = vector.extract_strided_slice %65 {offsets = [0, 32], sizes = [8, 16], strides = [1, 1]} : vector<8x96xf32> to vector<8x16xf32>
    %68 = vector.extract_strided_slice %65 {offsets = [0, 64], sizes = [8, 16], strides = [1, 1]} : vector<8x96xf32> to vector<8x16xf32>
    %cst_55 = arith.constant dense<0.000000e+00> : vector<8x8xf32>
    %69 = tpu.matmul %66, %67, %cst_55 {dimension_numbers = #tpu.dot_dimension_numbers<[1], [1], [0], [0], [0, 0, 1, 0], [], []>} : vector<8x16xf32>, vector<8x16xf32>, vector<8x8xf32> -> vector<8x8xf32>
    %cst_56 = arith.constant 2.500000e-01 : f32
    %70 = vector.broadcast %cst_56 : f32 to vector<8x8xf32>
    %71 = arith.mulf %69, %70 : vector<8x8xf32>
    %cst_57 = arith.constant -1.000000e+09 : f32
    %72 = vector.shape_cast %33 : vector<1x8xi1> to vector<1x8xi1>
    %73 = vector.broadcast %72 : vector<1x8xi1> to vector<8x8xi1>
    %74 = vector.broadcast %cst_57 : f32 to vector<8x8xf32>
    %75 = arith.select %73, %74, %71 : vector<8x8xi1>, vector<8x8xf32>
    %cst_58 = arith.constant dense<0xFF800000> : vector<8xf32>
    %76 = vector.multi_reduction <maximumf>, %75, %cst_58 [1] : vector<8x8xf32> to vector<8xf32>
    %77 = vector.shape_cast %76 : vector<8xf32> to vector<8x1xf32>
    %78 = vector.broadcast %77 : vector<8x1xf32> to vector<8x8xf32>
    %79 = arith.subf %75, %78 : vector<8x8xf32>
    %80 = math.exp %79 : vector<8x8xf32>
    %cst_59 = arith.constant dense<0.000000e+00> : vector<8xf32>
    %81 = vector.multi_reduction <add>, %80, %cst_59 [1] : vector<8x8xf32> to vector<8xf32>
    %82 = vector.shape_cast %81 : vector<8xf32> to vector<8x1xf32>
    %83 = tpu.reciprocal %82 {approx = true} : vector<8x1xf32> -> vector<8x1xf32>
    %84 = vector.broadcast %83 : vector<8x1xf32> to vector<8x8xf32>
    %85 = arith.mulf %80, %84 : vector<8x8xf32>
    %cst_60 = arith.constant dense<0.000000e+00> : vector<8x16xf32>
    %86 = tpu.matmul %85, %68, %cst_60 {dimension_numbers = #tpu.dot_dimension_numbers<[1], [0], [0], [1], [0, 0, 1, 1], [], []>} : vector<8x8xf32>, vector<8x16xf32>, vector<8x16xf32> -> vector<8x16xf32>
    %87 = vector.extract_strided_slice %43 {offsets = [0, 0], sizes = [16, 32], strides = [1, 1]} : vector<32x32xf32> to vector<16x32xf32>
    %cst_61 = arith.constant dense<0.000000e+00> : vector<8x32xf32>
    %88 = tpu.matmul %86, %87, %cst_61 {dimension_numbers = #tpu.dot_dimension_numbers<[1], [0], [0], [1], [0, 0, 1, 1], [], []>} : vector<8x16xf32>, vector<16x32xf32>, vector<8x32xf32> -> vector<8x32xf32>
    %89 = vector.extract_strided_slice %65 {offsets = [0, 16], sizes = [8, 16], strides = [1, 1]} : vector<8x96xf32> to vector<8x16xf32>
    %90 = vector.extract_strided_slice %65 {offsets = [0, 48], sizes = [8, 16], strides = [1, 1]} : vector<8x96xf32> to vector<8x16xf32>
    %91 = vector.extract_strided_slice %65 {offsets = [0, 80], sizes = [8, 16], strides = [1, 1]} : vector<8x96xf32> to vector<8x16xf32>
    %cst_62 = arith.constant dense<0.000000e+00> : vector<8x8xf32>
    %92 = tpu.matmul %89, %90, %cst_62 {dimension_numbers = #tpu.dot_dimension_numbers<[1], [1], [0], [0], [0, 0, 1, 0], [], []>} : vector<8x16xf32>, vector<8x16xf32>, vector<8x8xf32> -> vector<8x8xf32>
    %cst_63 = arith.constant 2.500000e-01 : f32
    %93 = vector.broadcast %cst_63 : f32 to vector<8x8xf32>
    %94 = arith.mulf %92, %93 : vector<8x8xf32>
    %cst_64 = arith.constant -1.000000e+09 : f32
    %95 = vector.shape_cast %33 : vector<1x8xi1> to vector<1x8xi1>
    %96 = vector.broadcast %95 : vector<1x8xi1> to vector<8x8xi1>
    %97 = vector.broadcast %cst_64 : f32 to vector<8x8xf32>
    %98 = arith.select %96, %97, %94 : vector<8x8xi1>, vector<8x8xf32>
    %cst_65 = arith.constant dense<0xFF800000> : vector<8xf32>
    %99 = vector.multi_reduction <maximumf>, %98, %cst_65 [1] : vector<8x8xf32> to vector<8xf32>
    %100 = vector.shape_cast %99 : vector<8xf32> to vector<8x1xf32>
    %101 = vector.broadcast %100 : vector<8x1xf32> to vector<8x8xf32>
    %102 = arith.subf %98, %101 : vector<8x8xf32>
    %103 = math.exp %102 : vector<8x8xf32>
    %cst_66 = arith.constant dense<0.000000e+00> : vector<8xf32>
    %104 = vector.multi_reduction <add>, %103, %cst_66 [1] : vector<8x8xf32> to vector<8xf32>
    %105 = vector.shape_cast %104 : vector<8xf32> to vector<8x1xf32>
    %106 = tpu.reciprocal %105 {approx = true} : vector<8x1xf32> -> vector<8x1xf32>
    %107 = vector.broadcast %106 : vector<8x1xf32> to vector<8x8xf32>
    %108 = arith.mulf %103, %107 : vector<8x8xf32>
    %cst_67 = arith.constant dense<0.000000e+00> : vector<8x16xf32>
    %109 = tpu.matmul %108, %91, %cst_67 {dimension_numbers = #tpu.dot_dimension_numbers<[1], [0], [0], [1], [0, 0, 1, 1], [], []>} : vector<8x8xf32>, vector<8x16xf32>, vector<8x16xf32> -> vector<8x16xf32>
    %110 = vector.extract_strided_slice %43 {offsets = [16, 0], sizes = [16, 32], strides = [1, 1]} : vector<32x32xf32> to vector<16x32xf32>
    %cst_68 = arith.constant dense<0.000000e+00> : vector<8x32xf32>
    %111 = tpu.matmul %109, %110, %cst_68 {dimension_numbers = #tpu.dot_dimension_numbers<[1], [0], [0], [1], [0, 0, 1, 1], [], []>} : vector<8x16xf32>, vector<16x32xf32>, vector<8x32xf32> -> vector<8x32xf32>
    %112 = arith.addf %88, %111 : vector<8x32xf32>
    %113 = vector.extract_strided_slice %64 {offsets = [8, 0], sizes = [8, 96], strides = [1, 1]} : vector<16x96xf32> to vector<8x96xf32>
    %114 = vector.extract_strided_slice %113 {offsets = [0, 0], sizes = [8, 16], strides = [1, 1]} : vector<8x96xf32> to vector<8x16xf32>
    %115 = vector.extract_strided_slice %113 {offsets = [0, 32], sizes = [8, 16], strides = [1, 1]} : vector<8x96xf32> to vector<8x16xf32>
    %116 = vector.extract_strided_slice %113 {offsets = [0, 64], sizes = [8, 16], strides = [1, 1]} : vector<8x96xf32> to vector<8x16xf32>
    %cst_69 = arith.constant dense<0.000000e+00> : vector<8x8xf32>
    %117 = tpu.matmul %114, %115, %cst_69 {dimension_numbers = #tpu.dot_dimension_numbers<[1], [1], [0], [0], [0, 0, 1, 0], [], []>} : vector<8x16xf32>, vector<8x16xf32>, vector<8x8xf32> -> vector<8x8xf32>
    %cst_70 = arith.constant 2.500000e-01 : f32
    %118 = vector.broadcast %cst_70 : f32 to vector<8x8xf32>
    %119 = arith.mulf %117, %118 : vector<8x8xf32>
    %cst_71 = arith.constant -1.000000e+09 : f32
    %120 = vector.shape_cast %37 : vector<1x8xi1> to vector<1x8xi1>
    %121 = vector.broadcast %120 : vector<1x8xi1> to vector<8x8xi1>
    %122 = vector.broadcast %cst_71 : f32 to vector<8x8xf32>
    %123 = arith.select %121, %122, %119 : vector<8x8xi1>, vector<8x8xf32>
    %cst_72 = arith.constant dense<0xFF800000> : vector<8xf32>
    %124 = vector.multi_reduction <maximumf>, %123, %cst_72 [1] : vector<8x8xf32> to vector<8xf32>
    %125 = vector.shape_cast %124 : vector<8xf32> to vector<8x1xf32>
    %126 = vector.broadcast %125 : vector<8x1xf32> to vector<8x8xf32>
    %127 = arith.subf %123, %126 : vector<8x8xf32>
    %128 = math.exp %127 : vector<8x8xf32>
    %cst_73 = arith.constant dense<0.000000e+00> : vector<8xf32>
    %129 = vector.multi_reduction <add>, %128, %cst_73 [1] : vector<8x8xf32> to vector<8xf32>
    %130 = vector.shape_cast %129 : vector<8xf32> to vector<8x1xf32>
    %131 = tpu.reciprocal %130 {approx = true} : vector<8x1xf32> -> vector<8x1xf32>
    %132 = vector.broadcast %131 : vector<8x1xf32> to vector<8x8xf32>
    %133 = arith.mulf %128, %132 : vector<8x8xf32>
    %cst_74 = arith.constant dense<0.000000e+00> : vector<8x16xf32>
    %134 = tpu.matmul %133, %116, %cst_74 {dimension_numbers = #tpu.dot_dimension_numbers<[1], [0], [0], [1], [0, 0, 1, 1], [], []>} : vector<8x8xf32>, vector<8x16xf32>, vector<8x16xf32> -> vector<8x16xf32>
    %135 = vector.extract_strided_slice %43 {offsets = [0, 0], sizes = [16, 32], strides = [1, 1]} : vector<32x32xf32> to vector<16x32xf32>
    %cst_75 = arith.constant dense<0.000000e+00> : vector<8x32xf32>
    %136 = tpu.matmul %134, %135, %cst_75 {dimension_numbers = #tpu.dot_dimension_numbers<[1], [0], [0], [1], [0, 0, 1, 1], [], []>} : vector<8x16xf32>, vector<16x32xf32>, vector<8x32xf32> -> vector<8x32xf32>
    %137 = vector.extract_strided_slice %113 {offsets = [0, 16], sizes = [8, 16], strides = [1, 1]} : vector<8x96xf32> to vector<8x16xf32>
    %138 = vector.extract_strided_slice %113 {offsets = [0, 48], sizes = [8, 16], strides = [1, 1]} : vector<8x96xf32> to vector<8x16xf32>
    %139 = vector.extract_strided_slice %113 {offsets = [0, 80], sizes = [8, 16], strides = [1, 1]} : vector<8x96xf32> to vector<8x16xf32>
    %cst_76 = arith.constant dense<0.000000e+00> : vector<8x8xf32>
    %140 = tpu.matmul %137, %138, %cst_76 {dimension_numbers = #tpu.dot_dimension_numbers<[1], [1], [0], [0], [0, 0, 1, 0], [], []>} : vector<8x16xf32>, vector<8x16xf32>, vector<8x8xf32> -> vector<8x8xf32>
    %cst_77 = arith.constant 2.500000e-01 : f32
    %141 = vector.broadcast %cst_77 : f32 to vector<8x8xf32>
    %142 = arith.mulf %140, %141 : vector<8x8xf32>
    %cst_78 = arith.constant -1.000000e+09 : f32
    %143 = vector.shape_cast %37 : vector<1x8xi1> to vector<1x8xi1>
    %144 = vector.broadcast %143 : vector<1x8xi1> to vector<8x8xi1>
    %145 = vector.broadcast %cst_78 : f32 to vector<8x8xf32>
    %146 = arith.select %144, %145, %142 : vector<8x8xi1>, vector<8x8xf32>
    %cst_79 = arith.constant dense<0xFF800000> : vector<8xf32>
    %147 = vector.multi_reduction <maximumf>, %146, %cst_79 [1] : vector<8x8xf32> to vector<8xf32>
    %148 = vector.shape_cast %147 : vector<8xf32> to vector<8x1xf32>
    %149 = vector.broadcast %148 : vector<8x1xf32> to vector<8x8xf32>
    %150 = arith.subf %146, %149 : vector<8x8xf32>
    %151 = math.exp %150 : vector<8x8xf32>
    %cst_80 = arith.constant dense<0.000000e+00> : vector<8xf32>
    %152 = vector.multi_reduction <add>, %151, %cst_80 [1] : vector<8x8xf32> to vector<8xf32>
    %153 = vector.shape_cast %152 : vector<8xf32> to vector<8x1xf32>
    %154 = tpu.reciprocal %153 {approx = true} : vector<8x1xf32> -> vector<8x1xf32>
    %155 = vector.broadcast %154 : vector<8x1xf32> to vector<8x8xf32>
    %156 = arith.mulf %151, %155 : vector<8x8xf32>
    %cst_81 = arith.constant dense<0.000000e+00> : vector<8x16xf32>
    %157 = tpu.matmul %156, %139, %cst_81 {dimension_numbers = #tpu.dot_dimension_numbers<[1], [0], [0], [1], [0, 0, 1, 1], [], []>} : vector<8x8xf32>, vector<8x16xf32>, vector<8x16xf32> -> vector<8x16xf32>
    %158 = vector.extract_strided_slice %43 {offsets = [16, 0], sizes = [16, 32], strides = [1, 1]} : vector<32x32xf32> to vector<16x32xf32>
    %cst_82 = arith.constant dense<0.000000e+00> : vector<8x32xf32>
    %159 = tpu.matmul %157, %158, %cst_82 {dimension_numbers = #tpu.dot_dimension_numbers<[1], [0], [0], [1], [0, 0, 1, 1], [], []>} : vector<8x16xf32>, vector<16x32xf32>, vector<8x32xf32> -> vector<8x32xf32>
    %160 = arith.addf %136, %159 : vector<8x32xf32>
    %161 = tpu.concatenate %112, %160 in 0 : vector<8x32xf32>, vector<8x32xf32> -> vector<16x32xf32>
    %162 = vector.broadcast %45 : vector<1x32xf32> to vector<16x32xf32>
    %163 = arith.addf %161, %162 : vector<16x32xf32>
    %164 = arith.addf %163, %9 : vector<16x32xf32>
    %cst_83 = arith.constant dense<0.000000e+00> : vector<16xf32>
    %165 = vector.multi_reduction <add>, %164, %cst_83 [1] : vector<16x32xf32> to vector<16xf32>
    %166 = vector.shape_cast %165 : vector<16xf32> to vector<16x1xf32>
    %cst_84 = arith.constant 3.200000e+01 : f32
    %167 = vector.broadcast %cst_84 : f32 to vector<16x1xf32>
    %168 = arith.divf %166, %167 : vector<16x1xf32>
    %169 = vector.broadcast %168 : vector<16x1xf32> to vector<16x32xf32>
    %170 = arith.subf %164, %169 : vector<16x32xf32>
    %171 = arith.mulf %170, %170 : vector<16x32xf32>
    %cst_85 = arith.constant dense<0.000000e+00> : vector<16xf32>
    %172 = vector.multi_reduction <add>, %171, %cst_85 [1] : vector<16x32xf32> to vector<16xf32>
    %173 = vector.shape_cast %172 : vector<16xf32> to vector<16x1xf32>
    %cst_86 = arith.constant 3.200000e+01 : f32
    %174 = vector.broadcast %cst_86 : f32 to vector<16x1xf32>
    %175 = arith.divf %173, %174 : vector<16x1xf32>
    %176 = vector.broadcast %168 : vector<16x1xf32> to vector<16x32xf32>
    %177 = arith.subf %164, %176 : vector<16x32xf32>
    %cst_87 = arith.constant 9.99999974E-6 : f32
    %178 = vector.broadcast %cst_87 : f32 to vector<16x1xf32>
    %179 = arith.addf %175, %178 : vector<16x1xf32>
    %180 = math.rsqrt %179 : vector<16x1xf32>
    %181 = vector.broadcast %180 : vector<16x1xf32> to vector<16x32xf32>
    %182 = arith.mulf %177, %181 : vector<16x32xf32>
    %183 = vector.broadcast %47 : vector<1x32xf32> to vector<16x32xf32>
    %184 = arith.mulf %182, %183 : vector<16x32xf32>
    %185 = vector.broadcast %49 : vector<1x32xf32> to vector<16x32xf32>
    %186 = arith.addf %184, %185 : vector<16x32xf32>
    %cst_88 = arith.constant 0.000000e+00 : f32
    %187 = vector.shape_cast %12 : vector<16x1xi1> to vector<16x1xi1>
    %188 = vector.broadcast %187 : vector<16x1xi1> to vector<16x32xi1>
    %189 = vector.broadcast %cst_88 : f32 to vector<16x32xf32>
    %190 = arith.select %188, %189, %186 : vector<16x32xi1>, vector<16x32xf32>
    %c4_i32 = arith.constant 4 : i32
    %191 = tpu.dynamic_rotate %190 by %c4_i32 dim 0 : vector<16x32xf32>, i32 -> vector<16x32xf32>
    %c-4_i32 = arith.constant -4 : i32
    %192 = vector.broadcast %c-4_i32 : i32 to vector<16x1xi32>
    %193 = arith.addi %29, %192 : vector<16x1xi32>
    %c0_i32_89 = arith.constant 0 : i32
    %194 = vector.broadcast %c0_i32_89 : i32 to vector<16x1xi32>
    %195 = arith.cmpi sge, %193, %194 : vector<16x1xi32>
    %c8_i32_90 = arith.constant 8 : i32
    %196 = vector.broadcast %c8_i32_90 : i32 to vector<16x1xi32>
    %197 = arith.cmpi slt, %193, %196 : vector<16x1xi32>
    %198 = arith.andi %195, %197 : vector<16x1xi1>
    %cst_91 = arith.constant 0.000000e+00 : f32
    %199 = vector.shape_cast %198 : vector<16x1xi1> to vector<16x1xi1>
    %200 = vector.broadcast %199 : vector<16x1xi1> to vector<16x32xi1>
    %201 = vector.broadcast %cst_91 : f32 to vector<16x32xf32>
    %202 = arith.select %200, %191, %201 : vector<16x32xi1>, vector<16x32xf32>
    %c3_i32 = arith.constant 3 : i32
    %203 = tpu.dynamic_rotate %190 by %c3_i32 dim 0 : vector<16x32xf32>, i32 -> vector<16x32xf32>
    %c-3_i32 = arith.constant -3 : i32
    %204 = vector.broadcast %c-3_i32 : i32 to vector<16x1xi32>
    %205 = arith.addi %29, %204 : vector<16x1xi32>
    %c0_i32_92 = arith.constant 0 : i32
    %206 = vector.broadcast %c0_i32_92 : i32 to vector<16x1xi32>
    %207 = arith.cmpi sge, %205, %206 : vector<16x1xi32>
    %c8_i32_93 = arith.constant 8 : i32
    %208 = vector.broadcast %c8_i32_93 : i32 to vector<16x1xi32>
    %209 = arith.cmpi slt, %205, %208 : vector<16x1xi32>
    %210 = arith.andi %207, %209 : vector<16x1xi1>
    %cst_94 = arith.constant 0.000000e+00 : f32
    %211 = vector.shape_cast %210 : vector<16x1xi1> to vector<16x1xi1>
    %212 = vector.broadcast %211 : vector<16x1xi1> to vector<16x32xi1>
    %213 = vector.broadcast %cst_94 : f32 to vector<16x32xf32>
    %214 = arith.select %212, %203, %213 : vector<16x32xi1>, vector<16x32xf32>
    %c2_i32 = arith.constant 2 : i32
    %215 = tpu.dynamic_rotate %190 by %c2_i32 dim 0 : vector<16x32xf32>, i32 -> vector<16x32xf32>
    %c-2_i32 = arith.constant -2 : i32
    %216 = vector.broadcast %c-2_i32 : i32 to vector<16x1xi32>
    %217 = arith.addi %29, %216 : vector<16x1xi32>
    %c0_i32_95 = arith.constant 0 : i32
    %218 = vector.broadcast %c0_i32_95 : i32 to vector<16x1xi32>
    %219 = arith.cmpi sge, %217, %218 : vector<16x1xi32>
    %c8_i32_96 = arith.constant 8 : i32
    %220 = vector.broadcast %c8_i32_96 : i32 to vector<16x1xi32>
    %221 = arith.cmpi slt, %217, %220 : vector<16x1xi32>
    %222 = arith.andi %219, %221 : vector<16x1xi1>
    %cst_97 = arith.constant 0.000000e+00 : f32
    %223 = vector.shape_cast %222 : vector<16x1xi1> to vector<16x1xi1>
    %224 = vector.broadcast %223 : vector<16x1xi1> to vector<16x32xi1>
    %225 = vector.broadcast %cst_97 : f32 to vector<16x32xf32>
    %226 = arith.select %224, %215, %225 : vector<16x32xi1>, vector<16x32xf32>
    %c1_i32_98 = arith.constant 1 : i32
    %227 = tpu.dynamic_rotate %190 by %c1_i32_98 dim 0 : vector<16x32xf32>, i32 -> vector<16x32xf32>
    %c-1_i32 = arith.constant -1 : i32
    %228 = vector.broadcast %c-1_i32 : i32 to vector<16x1xi32>
    %229 = arith.addi %29, %228 : vector<16x1xi32>
    %c0_i32_99 = arith.constant 0 : i32
    %230 = vector.broadcast %c0_i32_99 : i32 to vector<16x1xi32>
    %231 = arith.cmpi sge, %229, %230 : vector<16x1xi32>
    %c8_i32_100 = arith.constant 8 : i32
    %232 = vector.broadcast %c8_i32_100 : i32 to vector<16x1xi32>
    %233 = arith.cmpi slt, %229, %232 : vector<16x1xi32>
    %234 = arith.andi %231, %233 : vector<16x1xi1>
    %cst_101 = arith.constant 0.000000e+00 : f32
    %235 = vector.shape_cast %234 : vector<16x1xi1> to vector<16x1xi1>
    %236 = vector.broadcast %235 : vector<16x1xi1> to vector<16x32xi1>
    %237 = vector.broadcast %cst_101 : f32 to vector<16x32xf32>
    %238 = arith.select %236, %227, %237 : vector<16x32xi1>, vector<16x32xf32>
    %c15_i32 = arith.constant 15 : i32
    %239 = tpu.dynamic_rotate %190 by %c15_i32 dim 0 : vector<16x32xf32>, i32 -> vector<16x32xf32>
    %c1_i32_102 = arith.constant 1 : i32
    %240 = vector.broadcast %c1_i32_102 : i32 to vector<16x1xi32>
    %241 = arith.addi %29, %240 : vector<16x1xi32>
    %c0_i32_103 = arith.constant 0 : i32
    %242 = vector.broadcast %c0_i32_103 : i32 to vector<16x1xi32>
    %243 = arith.cmpi sge, %241, %242 : vector<16x1xi32>
    %c8_i32_104 = arith.constant 8 : i32
    %244 = vector.broadcast %c8_i32_104 : i32 to vector<16x1xi32>
    %245 = arith.cmpi slt, %241, %244 : vector<16x1xi32>
    %246 = arith.andi %243, %245 : vector<16x1xi1>
    %cst_105 = arith.constant 0.000000e+00 : f32
    %247 = vector.shape_cast %246 : vector<16x1xi1> to vector<16x1xi1>
    %248 = vector.broadcast %247 : vector<16x1xi1> to vector<16x32xi1>
    %249 = vector.broadcast %cst_105 : f32 to vector<16x32xf32>
    %250 = arith.select %248, %239, %249 : vector<16x32xi1>, vector<16x32xf32>
    %c14_i32 = arith.constant 14 : i32
    %251 = tpu.dynamic_rotate %190 by %c14_i32 dim 0 : vector<16x32xf32>, i32 -> vector<16x32xf32>
    %c2_i32_106 = arith.constant 2 : i32
    %252 = vector.broadcast %c2_i32_106 : i32 to vector<16x1xi32>
    %253 = arith.addi %29, %252 : vector<16x1xi32>
    %c0_i32_107 = arith.constant 0 : i32
    %254 = vector.broadcast %c0_i32_107 : i32 to vector<16x1xi32>
    %255 = arith.cmpi sge, %253, %254 : vector<16x1xi32>
    %c8_i32_108 = arith.constant 8 : i32
    %256 = vector.broadcast %c8_i32_108 : i32 to vector<16x1xi32>
    %257 = arith.cmpi slt, %253, %256 : vector<16x1xi32>
    %258 = arith.andi %255, %257 : vector<16x1xi1>
    %cst_109 = arith.constant 0.000000e+00 : f32
    %259 = vector.shape_cast %258 : vector<16x1xi1> to vector<16x1xi1>
    %260 = vector.broadcast %259 : vector<16x1xi1> to vector<16x32xi1>
    %261 = vector.broadcast %cst_109 : f32 to vector<16x32xf32>
    %262 = arith.select %260, %251, %261 : vector<16x32xi1>, vector<16x32xf32>
    %c13_i32 = arith.constant 13 : i32
    %263 = tpu.dynamic_rotate %190 by %c13_i32 dim 0 : vector<16x32xf32>, i32 -> vector<16x32xf32>
    %c3_i32_110 = arith.constant 3 : i32
    %264 = vector.broadcast %c3_i32_110 : i32 to vector<16x1xi32>
    %265 = arith.addi %29, %264 : vector<16x1xi32>
    %c0_i32_111 = arith.constant 0 : i32
    %266 = vector.broadcast %c0_i32_111 : i32 to vector<16x1xi32>
    %267 = arith.cmpi sge, %265, %266 : vector<16x1xi32>
    %c8_i32_112 = arith.constant 8 : i32
    %268 = vector.broadcast %c8_i32_112 : i32 to vector<16x1xi32>
    %269 = arith.cmpi slt, %265, %268 : vector<16x1xi32>
    %270 = arith.andi %267, %269 : vector<16x1xi1>
    %cst_113 = arith.constant 0.000000e+00 : f32
    %271 = vector.shape_cast %270 : vector<16x1xi1> to vector<16x1xi1>
    %272 = vector.broadcast %271 : vector<16x1xi1> to vector<16x32xi1>
    %273 = vector.broadcast %cst_113 : f32 to vector<16x32xf32>
    %274 = arith.select %272, %263, %273 : vector<16x32xi1>, vector<16x32xf32>
    %c12_i32 = arith.constant 12 : i32
    %275 = tpu.dynamic_rotate %190 by %c12_i32 dim 0 : vector<16x32xf32>, i32 -> vector<16x32xf32>
    %c4_i32_114 = arith.constant 4 : i32
    %276 = vector.broadcast %c4_i32_114 : i32 to vector<16x1xi32>
    %277 = arith.addi %29, %276 : vector<16x1xi32>
    %c0_i32_115 = arith.constant 0 : i32
    %278 = vector.broadcast %c0_i32_115 : i32 to vector<16x1xi32>
    %279 = arith.cmpi sge, %277, %278 : vector<16x1xi32>
    %c8_i32_116 = arith.constant 8 : i32
    %280 = vector.broadcast %c8_i32_116 : i32 to vector<16x1xi32>
    %281 = arith.cmpi slt, %277, %280 : vector<16x1xi32>
    %282 = arith.andi %279, %281 : vector<16x1xi1>
    %cst_117 = arith.constant 0.000000e+00 : f32
    %283 = vector.shape_cast %282 : vector<16x1xi1> to vector<16x1xi1>
    %284 = vector.broadcast %283 : vector<16x1xi1> to vector<16x32xi1>
    %285 = vector.broadcast %cst_117 : f32 to vector<16x32xf32>
    %286 = arith.select %284, %275, %285 : vector<16x32xi1>, vector<16x32xf32>
    %287 = tpu.concatenate %202, %214, %226, %238, %190, %250, %262, %274, %286 in 1 : vector<16x32xf32>, vector<16x32xf32>, vector<16x32xf32>, vector<16x32xf32>, vector<16x32xf32>, vector<16x32xf32>, vector<16x32xf32>, vector<16x32xf32>, vector<16x32xf32> -> vector<16x288xf32>
    %cst_118 = arith.constant dense<0.000000e+00> : vector<16x64xf32>
    %288 = tpu.matmul %287, %51, %cst_118 {dimension_numbers = #tpu.dot_dimension_numbers<[1], [0], [0], [1], [0, 0, 1, 1], [], []>} : vector<16x288xf32>, vector<288x64xf32>, vector<16x64xf32> -> vector<16x64xf32>
    %289 = vector.broadcast %53 : vector<1x64xf32> to vector<16x64xf32>
    %290 = arith.addf %288, %289 : vector<16x64xf32>
    %cst_119 = arith.constant 0.000000e+00 : f32
    %291 = vector.broadcast %cst_119 : f32 to vector<16x64xf32>
    %292 = arith.maximumf %290, %291 : vector<16x64xf32>
    %cst_120 = arith.constant dense<0.000000e+00> : vector<16x32xf32>
    %293 = tpu.matmul %292, %55, %cst_120 {dimension_numbers = #tpu.dot_dimension_numbers<[1], [0], [0], [1], [0, 0, 1, 1], [], []>} : vector<16x64xf32>, vector<64x32xf32>, vector<16x32xf32> -> vector<16x32xf32>
    %294 = vector.broadcast %57 : vector<1x32xf32> to vector<16x32xf32>
    %295 = arith.addf %293, %294 : vector<16x32xf32>
    %296 = arith.addf %295, %190 : vector<16x32xf32>
    %cst_121 = arith.constant dense<0.000000e+00> : vector<16xf32>
    %297 = vector.multi_reduction <add>, %296, %cst_121 [1] : vector<16x32xf32> to vector<16xf32>
    %298 = vector.shape_cast %297 : vector<16xf32> to vector<16x1xf32>
    %cst_122 = arith.constant 3.200000e+01 : f32
    %299 = vector.broadcast %cst_122 : f32 to vector<16x1xf32>
    %300 = arith.divf %298, %299 : vector<16x1xf32>
    %301 = vector.broadcast %300 : vector<16x1xf32> to vector<16x32xf32>
    %302 = arith.subf %296, %301 : vector<16x32xf32>
    %303 = arith.mulf %302, %302 : vector<16x32xf32>
    %cst_123 = arith.constant dense<0.000000e+00> : vector<16xf32>
    %304 = vector.multi_reduction <add>, %303, %cst_123 [1] : vector<16x32xf32> to vector<16xf32>
    %305 = vector.shape_cast %304 : vector<16xf32> to vector<16x1xf32>
    %cst_124 = arith.constant 3.200000e+01 : f32
    %306 = vector.broadcast %cst_124 : f32 to vector<16x1xf32>
    %307 = arith.divf %305, %306 : vector<16x1xf32>
    %308 = vector.broadcast %300 : vector<16x1xf32> to vector<16x32xf32>
    %309 = arith.subf %296, %308 : vector<16x32xf32>
    %cst_125 = arith.constant 9.99999974E-6 : f32
    %310 = vector.broadcast %cst_125 : f32 to vector<16x1xf32>
    %311 = arith.addf %307, %310 : vector<16x1xf32>
    %312 = math.rsqrt %311 : vector<16x1xf32>
    %313 = vector.broadcast %312 : vector<16x1xf32> to vector<16x32xf32>
    %314 = arith.mulf %309, %313 : vector<16x32xf32>
    %315 = vector.broadcast %59 : vector<1x32xf32> to vector<16x32xf32>
    %316 = arith.mulf %314, %315 : vector<16x32xf32>
    %317 = vector.broadcast %61 : vector<1x32xf32> to vector<16x32xf32>
    %318 = arith.addf %316, %317 : vector<16x32xf32>
    %cst_126 = arith.constant 0.000000e+00 : f32
    %319 = vector.shape_cast %12 : vector<16x1xi1> to vector<16x1xi1>
    %320 = vector.broadcast %319 : vector<16x1xi1> to vector<16x32xi1>
    %321 = vector.broadcast %cst_126 : f32 to vector<16x32xf32>
    %322 = arith.select %320, %321, %318 : vector<16x32xi1>, vector<16x32xf32>
    %c1_127 = arith.constant 1 : index
    %c0_128 = arith.constant 0 : index
    %c0_129 = arith.constant 0 : index
    %323 = vector.load %arg5[%c1_127, %c0_128, %c0_129] : memref<2x32x96xf32, #tpu.memory_space<vmem>>, vector<1x32x96xf32>
    %324 = vector.shape_cast %323 : vector<1x32x96xf32> to vector<32x96xf32>
    %c1_130 = arith.constant 1 : index
    %c0_131 = arith.constant 0 : index
    %c0_132 = arith.constant 0 : index
    %325 = vector.load %arg6[%c1_130, %c0_131, %c0_132] : memref<2x1x96xf32, #tpu.memory_space<vmem>>, vector<1x1x96xf32>
    %326 = vector.shape_cast %325 : vector<1x1x96xf32> to vector<1x96xf32>
    %c1_133 = arith.constant 1 : index
    %c0_134 = arith.constant 0 : index
    %c0_135 = arith.constant 0 : index
    %327 = vector.load %arg7[%c1_133, %c0_134, %c0_135] : memref<2x32x32xf32, #tpu.memory_space<vmem>>, vector<1x32x32xf32>
    %328 = vector.shape_cast %327 : vector<1x32x32xf32> to vector<32x32xf32>
    %c1_136 = arith.constant 1 : index
    %c0_137 = arith.constant 0 : index
    %c0_138 = arith.constant 0 : index
    %329 = vector.load %arg8[%c1_136, %c0_137, %c0_138] : memref<2x1x32xf32, #tpu.memory_space<vmem>>, vector<1x1x32xf32>
    %330 = vector.shape_cast %329 : vector<1x1x32xf32> to vector<1x32xf32>
    %c1_139 = arith.constant 1 : index
    %c0_140 = arith.constant 0 : index
    %c0_141 = arith.constant 0 : index
    %331 = vector.load %arg9[%c1_139, %c0_140, %c0_141] : memref<2x1x32xf32, #tpu.memory_space<vmem>>, vector<1x1x32xf32>
    %332 = vector.shape_cast %331 : vector<1x1x32xf32> to vector<1x32xf32>
    %c1_142 = arith.constant 1 : index
    %c0_143 = arith.constant 0 : index
    %c0_144 = arith.constant 0 : index
    %333 = vector.load %arg10[%c1_142, %c0_143, %c0_144] : memref<2x1x32xf32, #tpu.memory_space<vmem>>, vector<1x1x32xf32>
    %334 = vector.shape_cast %333 : vector<1x1x32xf32> to vector<1x32xf32>
    %c1_145 = arith.constant 1 : index
    %c0_146 = arith.constant 0 : index
    %c0_147 = arith.constant 0 : index
    %335 = vector.load %arg11[%c1_145, %c0_146, %c0_147] : memref<2x288x64xf32, #tpu.memory_space<vmem>>, vector<1x288x64xf32>
    %336 = vector.shape_cast %335 : vector<1x288x64xf32> to vector<288x64xf32>
    %c1_148 = arith.constant 1 : index
    %c0_149 = arith.constant 0 : index
    %c0_150 = arith.constant 0 : index
    %337 = vector.load %arg12[%c1_148, %c0_149, %c0_150] : memref<2x1x64xf32, #tpu.memory_space<vmem>>, vector<1x1x64xf32>
    %338 = vector.shape_cast %337 : vector<1x1x64xf32> to vector<1x64xf32>
    %c1_151 = arith.constant 1 : index
    %c0_152 = arith.constant 0 : index
    %c0_153 = arith.constant 0 : index
    %339 = vector.load %arg13[%c1_151, %c0_152, %c0_153] : memref<2x64x32xf32, #tpu.memory_space<vmem>>, vector<1x64x32xf32>
    %340 = vector.shape_cast %339 : vector<1x64x32xf32> to vector<64x32xf32>
    %c1_154 = arith.constant 1 : index
    %c0_155 = arith.constant 0 : index
    %c0_156 = arith.constant 0 : index
    %341 = vector.load %arg14[%c1_154, %c0_155, %c0_156] : memref<2x1x32xf32, #tpu.memory_space<vmem>>, vector<1x1x32xf32>
    %342 = vector.shape_cast %341 : vector<1x1x32xf32> to vector<1x32xf32>
    %c1_157 = arith.constant 1 : index
    %c0_158 = arith.constant 0 : index
    %c0_159 = arith.constant 0 : index
    %343 = vector.load %arg15[%c1_157, %c0_158, %c0_159] : memref<2x1x32xf32, #tpu.memory_space<vmem>>, vector<1x1x32xf32>
    %344 = vector.shape_cast %343 : vector<1x1x32xf32> to vector<1x32xf32>
    %c1_160 = arith.constant 1 : index
    %c0_161 = arith.constant 0 : index
    %c0_162 = arith.constant 0 : index
    %345 = vector.load %arg16[%c1_160, %c0_161, %c0_162] : memref<2x1x32xf32, #tpu.memory_space<vmem>>, vector<1x1x32xf32>
    %346 = vector.shape_cast %345 : vector<1x1x32xf32> to vector<1x32xf32>
    %cst_163 = arith.constant dense<0.000000e+00> : vector<16x96xf32>
    %347 = tpu.matmul %322, %324, %cst_163 {dimension_numbers = #tpu.dot_dimension_numbers<[1], [0], [0], [1], [0, 0, 1, 1], [], []>} : vector<16x32xf32>, vector<32x96xf32>, vector<16x96xf32> -> vector<16x96xf32>
    %348 = vector.broadcast %326 : vector<1x96xf32> to vector<16x96xf32>
    %349 = arith.addf %347, %348 : vector<16x96xf32>
    %350 = vector.extract_strided_slice %349 {offsets = [0, 0], sizes = [8, 96], strides = [1, 1]} : vector<16x96xf32> to vector<8x96xf32>
    %351 = vector.extract_strided_slice %350 {offsets = [0, 0], sizes = [8, 16], strides = [1, 1]} : vector<8x96xf32> to vector<8x16xf32>
    %352 = vector.extract_strided_slice %350 {offsets = [0, 32], sizes = [8, 16], strides = [1, 1]} : vector<8x96xf32> to vector<8x16xf32>
    %353 = vector.extract_strided_slice %350 {offsets = [0, 64], sizes = [8, 16], strides = [1, 1]} : vector<8x96xf32> to vector<8x16xf32>
    %cst_164 = arith.constant dense<0.000000e+00> : vector<8x8xf32>
    %354 = tpu.matmul %351, %352, %cst_164 {dimension_numbers = #tpu.dot_dimension_numbers<[1], [1], [0], [0], [0, 0, 1, 0], [], []>} : vector<8x16xf32>, vector<8x16xf32>, vector<8x8xf32> -> vector<8x8xf32>
    %cst_165 = arith.constant 2.500000e-01 : f32
    %355 = vector.broadcast %cst_165 : f32 to vector<8x8xf32>
    %356 = arith.mulf %354, %355 : vector<8x8xf32>
    %cst_166 = arith.constant -1.000000e+09 : f32
    %357 = vector.shape_cast %33 : vector<1x8xi1> to vector<1x8xi1>
    %358 = vector.broadcast %357 : vector<1x8xi1> to vector<8x8xi1>
    %359 = vector.broadcast %cst_166 : f32 to vector<8x8xf32>
    %360 = arith.select %358, %359, %356 : vector<8x8xi1>, vector<8x8xf32>
    %cst_167 = arith.constant dense<0xFF800000> : vector<8xf32>
    %361 = vector.multi_reduction <maximumf>, %360, %cst_167 [1] : vector<8x8xf32> to vector<8xf32>
    %362 = vector.shape_cast %361 : vector<8xf32> to vector<8x1xf32>
    %363 = vector.broadcast %362 : vector<8x1xf32> to vector<8x8xf32>
    %364 = arith.subf %360, %363 : vector<8x8xf32>
    %365 = math.exp %364 : vector<8x8xf32>
    %cst_168 = arith.constant dense<0.000000e+00> : vector<8xf32>
    %366 = vector.multi_reduction <add>, %365, %cst_168 [1] : vector<8x8xf32> to vector<8xf32>
    %367 = vector.shape_cast %366 : vector<8xf32> to vector<8x1xf32>
    %368 = tpu.reciprocal %367 {approx = true} : vector<8x1xf32> -> vector<8x1xf32>
    %369 = vector.broadcast %368 : vector<8x1xf32> to vector<8x8xf32>
    %370 = arith.mulf %365, %369 : vector<8x8xf32>
    %cst_169 = arith.constant dense<0.000000e+00> : vector<8x16xf32>
    %371 = tpu.matmul %370, %353, %cst_169 {dimension_numbers = #tpu.dot_dimension_numbers<[1], [0], [0], [1], [0, 0, 1, 1], [], []>} : vector<8x8xf32>, vector<8x16xf32>, vector<8x16xf32> -> vector<8x16xf32>
    %372 = vector.extract_strided_slice %328 {offsets = [0, 0], sizes = [16, 32], strides = [1, 1]} : vector<32x32xf32> to vector<16x32xf32>
    %cst_170 = arith.constant dense<0.000000e+00> : vector<8x32xf32>
    %373 = tpu.matmul %371, %372, %cst_170 {dimension_numbers = #tpu.dot_dimension_numbers<[1], [0], [0], [1], [0, 0, 1, 1], [], []>} : vector<8x16xf32>, vector<16x32xf32>, vector<8x32xf32> -> vector<8x32xf32>
    %374 = vector.extract_strided_slice %350 {offsets = [0, 16], sizes = [8, 16], strides = [1, 1]} : vector<8x96xf32> to vector<8x16xf32>
    %375 = vector.extract_strided_slice %350 {offsets = [0, 48], sizes = [8, 16], strides = [1, 1]} : vector<8x96xf32> to vector<8x16xf32>
    %376 = vector.extract_strided_slice %350 {offsets = [0, 80], sizes = [8, 16], strides = [1, 1]} : vector<8x96xf32> to vector<8x16xf32>
    %cst_171 = arith.constant dense<0.000000e+00> : vector<8x8xf32>
    %377 = tpu.matmul %374, %375, %cst_171 {dimension_numbers = #tpu.dot_dimension_numbers<[1], [1], [0], [0], [0, 0, 1, 0], [], []>} : vector<8x16xf32>, vector<8x16xf32>, vector<8x8xf32> -> vector<8x8xf32>
    %cst_172 = arith.constant 2.500000e-01 : f32
    %378 = vector.broadcast %cst_172 : f32 to vector<8x8xf32>
    %379 = arith.mulf %377, %378 : vector<8x8xf32>
    %cst_173 = arith.constant -1.000000e+09 : f32
    %380 = vector.shape_cast %33 : vector<1x8xi1> to vector<1x8xi1>
    %381 = vector.broadcast %380 : vector<1x8xi1> to vector<8x8xi1>
    %382 = vector.broadcast %cst_173 : f32 to vector<8x8xf32>
    %383 = arith.select %381, %382, %379 : vector<8x8xi1>, vector<8x8xf32>
    %cst_174 = arith.constant dense<0xFF800000> : vector<8xf32>
    %384 = vector.multi_reduction <maximumf>, %383, %cst_174 [1] : vector<8x8xf32> to vector<8xf32>
    %385 = vector.shape_cast %384 : vector<8xf32> to vector<8x1xf32>
    %386 = vector.broadcast %385 : vector<8x1xf32> to vector<8x8xf32>
    %387 = arith.subf %383, %386 : vector<8x8xf32>
    %388 = math.exp %387 : vector<8x8xf32>
    %cst_175 = arith.constant dense<0.000000e+00> : vector<8xf32>
    %389 = vector.multi_reduction <add>, %388, %cst_175 [1] : vector<8x8xf32> to vector<8xf32>
    %390 = vector.shape_cast %389 : vector<8xf32> to vector<8x1xf32>
    %391 = tpu.reciprocal %390 {approx = true} : vector<8x1xf32> -> vector<8x1xf32>
    %392 = vector.broadcast %391 : vector<8x1xf32> to vector<8x8xf32>
    %393 = arith.mulf %388, %392 : vector<8x8xf32>
    %cst_176 = arith.constant dense<0.000000e+00> : vector<8x16xf32>
    %394 = tpu.matmul %393, %376, %cst_176 {dimension_numbers = #tpu.dot_dimension_numbers<[1], [0], [0], [1], [0, 0, 1, 1], [], []>} : vector<8x8xf32>, vector<8x16xf32>, vector<8x16xf32> -> vector<8x16xf32>
    %395 = vector.extract_strided_slice %328 {offsets = [16, 0], sizes = [16, 32], strides = [1, 1]} : vector<32x32xf32> to vector<16x32xf32>
    %cst_177 = arith.constant dense<0.000000e+00> : vector<8x32xf32>
    %396 = tpu.matmul %394, %395, %cst_177 {dimension_numbers = #tpu.dot_dimension_numbers<[1], [0], [0], [1], [0, 0, 1, 1], [], []>} : vector<8x16xf32>, vector<16x32xf32>, vector<8x32xf32> -> vector<8x32xf32>
    %397 = arith.addf %373, %396 : vector<8x32xf32>
    %398 = vector.extract_strided_slice %349 {offsets = [8, 0], sizes = [8, 96], strides = [1, 1]} : vector<16x96xf32> to vector<8x96xf32>
    %399 = vector.extract_strided_slice %398 {offsets = [0, 0], sizes = [8, 16], strides = [1, 1]} : vector<8x96xf32> to vector<8x16xf32>
    %400 = vector.extract_strided_slice %398 {offsets = [0, 32], sizes = [8, 16], strides = [1, 1]} : vector<8x96xf32> to vector<8x16xf32>
    %401 = vector.extract_strided_slice %398 {offsets = [0, 64], sizes = [8, 16], strides = [1, 1]} : vector<8x96xf32> to vector<8x16xf32>
    %cst_178 = arith.constant dense<0.000000e+00> : vector<8x8xf32>
    %402 = tpu.matmul %399, %400, %cst_178 {dimension_numbers = #tpu.dot_dimension_numbers<[1], [1], [0], [0], [0, 0, 1, 0], [], []>} : vector<8x16xf32>, vector<8x16xf32>, vector<8x8xf32> -> vector<8x8xf32>
    %cst_179 = arith.constant 2.500000e-01 : f32
    %403 = vector.broadcast %cst_179 : f32 to vector<8x8xf32>
    %404 = arith.mulf %402, %403 : vector<8x8xf32>
    %cst_180 = arith.constant -1.000000e+09 : f32
    %405 = vector.shape_cast %37 : vector<1x8xi1> to vector<1x8xi1>
    %406 = vector.broadcast %405 : vector<1x8xi1> to vector<8x8xi1>
    %407 = vector.broadcast %cst_180 : f32 to vector<8x8xf32>
    %408 = arith.select %406, %407, %404 : vector<8x8xi1>, vector<8x8xf32>
    %cst_181 = arith.constant dense<0xFF800000> : vector<8xf32>
    %409 = vector.multi_reduction <maximumf>, %408, %cst_181 [1] : vector<8x8xf32> to vector<8xf32>
    %410 = vector.shape_cast %409 : vector<8xf32> to vector<8x1xf32>
    %411 = vector.broadcast %410 : vector<8x1xf32> to vector<8x8xf32>
    %412 = arith.subf %408, %411 : vector<8x8xf32>
    %413 = math.exp %412 : vector<8x8xf32>
    %cst_182 = arith.constant dense<0.000000e+00> : vector<8xf32>
    %414 = vector.multi_reduction <add>, %413, %cst_182 [1] : vector<8x8xf32> to vector<8xf32>
    %415 = vector.shape_cast %414 : vector<8xf32> to vector<8x1xf32>
    %416 = tpu.reciprocal %415 {approx = true} : vector<8x1xf32> -> vector<8x1xf32>
    %417 = vector.broadcast %416 : vector<8x1xf32> to vector<8x8xf32>
    %418 = arith.mulf %413, %417 : vector<8x8xf32>
    %cst_183 = arith.constant dense<0.000000e+00> : vector<8x16xf32>
    %419 = tpu.matmul %418, %401, %cst_183 {dimension_numbers = #tpu.dot_dimension_numbers<[1], [0], [0], [1], [0, 0, 1, 1], [], []>} : vector<8x8xf32>, vector<8x16xf32>, vector<8x16xf32> -> vector<8x16xf32>
    %420 = vector.extract_strided_slice %328 {offsets = [0, 0], sizes = [16, 32], strides = [1, 1]} : vector<32x32xf32> to vector<16x32xf32>
    %cst_184 = arith.constant dense<0.000000e+00> : vector<8x32xf32>
    %421 = tpu.matmul %419, %420, %cst_184 {dimension_numbers = #tpu.dot_dimension_numbers<[1], [0], [0], [1], [0, 0, 1, 1], [], []>} : vector<8x16xf32>, vector<16x32xf32>, vector<8x32xf32> -> vector<8x32xf32>
    %422 = vector.extract_strided_slice %398 {offsets = [0, 16], sizes = [8, 16], strides = [1, 1]} : vector<8x96xf32> to vector<8x16xf32>
    %423 = vector.extract_strided_slice %398 {offsets = [0, 48], sizes = [8, 16], strides = [1, 1]} : vector<8x96xf32> to vector<8x16xf32>
    %424 = vector.extract_strided_slice %398 {offsets = [0, 80], sizes = [8, 16], strides = [1, 1]} : vector<8x96xf32> to vector<8x16xf32>
    %cst_185 = arith.constant dense<0.000000e+00> : vector<8x8xf32>
    %425 = tpu.matmul %422, %423, %cst_185 {dimension_numbers = #tpu.dot_dimension_numbers<[1], [1], [0], [0], [0, 0, 1, 0], [], []>} : vector<8x16xf32>, vector<8x16xf32>, vector<8x8xf32> -> vector<8x8xf32>
    %cst_186 = arith.constant 2.500000e-01 : f32
    %426 = vector.broadcast %cst_186 : f32 to vector<8x8xf32>
    %427 = arith.mulf %425, %426 : vector<8x8xf32>
    %cst_187 = arith.constant -1.000000e+09 : f32
    %428 = vector.shape_cast %37 : vector<1x8xi1> to vector<1x8xi1>
    %429 = vector.broadcast %428 : vector<1x8xi1> to vector<8x8xi1>
    %430 = vector.broadcast %cst_187 : f32 to vector<8x8xf32>
    %431 = arith.select %429, %430, %427 : vector<8x8xi1>, vector<8x8xf32>
    %cst_188 = arith.constant dense<0xFF800000> : vector<8xf32>
    %432 = vector.multi_reduction <maximumf>, %431, %cst_188 [1] : vector<8x8xf32> to vector<8xf32>
    %433 = vector.shape_cast %432 : vector<8xf32> to vector<8x1xf32>
    %434 = vector.broadcast %433 : vector<8x1xf32> to vector<8x8xf32>
    %435 = arith.subf %431, %434 : vector<8x8xf32>
    %436 = math.exp %435 : vector<8x8xf32>
    %cst_189 = arith.constant dense<0.000000e+00> : vector<8xf32>
    %437 = vector.multi_reduction <add>, %436, %cst_189 [1] : vector<8x8xf32> to vector<8xf32>
    %438 = vector.shape_cast %437 : vector<8xf32> to vector<8x1xf32>
    %439 = tpu.reciprocal %438 {approx = true} : vector<8x1xf32> -> vector<8x1xf32>
    %440 = vector.broadcast %439 : vector<8x1xf32> to vector<8x8xf32>
    %441 = arith.mulf %436, %440 : vector<8x8xf32>
    %cst_190 = arith.constant dense<0.000000e+00> : vector<8x16xf32>
    %442 = tpu.matmul %441, %424, %cst_190 {dimension_numbers = #tpu.dot_dimension_numbers<[1], [0], [0], [1], [0, 0, 1, 1], [], []>} : vector<8x8xf32>, vector<8x16xf32>, vector<8x16xf32> -> vector<8x16xf32>
    %443 = vector.extract_strided_slice %328 {offsets = [16, 0], sizes = [16, 32], strides = [1, 1]} : vector<32x32xf32> to vector<16x32xf32>
    %cst_191 = arith.constant dense<0.000000e+00> : vector<8x32xf32>
    %444 = tpu.matmul %442, %443, %cst_191 {dimension_numbers = #tpu.dot_dimension_numbers<[1], [0], [0], [1], [0, 0, 1, 1], [], []>} : vector<8x16xf32>, vector<16x32xf32>, vector<8x32xf32> -> vector<8x32xf32>
    %445 = arith.addf %421, %444 : vector<8x32xf32>
    %446 = tpu.concatenate %397, %445 in 0 : vector<8x32xf32>, vector<8x32xf32> -> vector<16x32xf32>
    %447 = vector.broadcast %330 : vector<1x32xf32> to vector<16x32xf32>
    %448 = arith.addf %446, %447 : vector<16x32xf32>
    %449 = arith.addf %448, %322 : vector<16x32xf32>
    %cst_192 = arith.constant dense<0.000000e+00> : vector<16xf32>
    %450 = vector.multi_reduction <add>, %449, %cst_192 [1] : vector<16x32xf32> to vector<16xf32>
    %451 = vector.shape_cast %450 : vector<16xf32> to vector<16x1xf32>
    %cst_193 = arith.constant 3.200000e+01 : f32
    %452 = vector.broadcast %cst_193 : f32 to vector<16x1xf32>
    %453 = arith.divf %451, %452 : vector<16x1xf32>
    %454 = vector.broadcast %453 : vector<16x1xf32> to vector<16x32xf32>
    %455 = arith.subf %449, %454 : vector<16x32xf32>
    %456 = arith.mulf %455, %455 : vector<16x32xf32>
    %cst_194 = arith.constant dense<0.000000e+00> : vector<16xf32>
    %457 = vector.multi_reduction <add>, %456, %cst_194 [1] : vector<16x32xf32> to vector<16xf32>
    %458 = vector.shape_cast %457 : vector<16xf32> to vector<16x1xf32>
    %cst_195 = arith.constant 3.200000e+01 : f32
    %459 = vector.broadcast %cst_195 : f32 to vector<16x1xf32>
    %460 = arith.divf %458, %459 : vector<16x1xf32>
    %461 = vector.broadcast %453 : vector<16x1xf32> to vector<16x32xf32>
    %462 = arith.subf %449, %461 : vector<16x32xf32>
    %cst_196 = arith.constant 9.99999974E-6 : f32
    %463 = vector.broadcast %cst_196 : f32 to vector<16x1xf32>
    %464 = arith.addf %460, %463 : vector<16x1xf32>
    %465 = math.rsqrt %464 : vector<16x1xf32>
    %466 = vector.broadcast %465 : vector<16x1xf32> to vector<16x32xf32>
    %467 = arith.mulf %462, %466 : vector<16x32xf32>
    %468 = vector.broadcast %332 : vector<1x32xf32> to vector<16x32xf32>
    %469 = arith.mulf %467, %468 : vector<16x32xf32>
    %470 = vector.broadcast %334 : vector<1x32xf32> to vector<16x32xf32>
    %471 = arith.addf %469, %470 : vector<16x32xf32>
    %cst_197 = arith.constant 0.000000e+00 : f32
    %472 = vector.shape_cast %12 : vector<16x1xi1> to vector<16x1xi1>
    %473 = vector.broadcast %472 : vector<16x1xi1> to vector<16x32xi1>
    %474 = vector.broadcast %cst_197 : f32 to vector<16x32xf32>
    %475 = arith.select %473, %474, %471 : vector<16x32xi1>, vector<16x32xf32>
    %c4_i32_198 = arith.constant 4 : i32
    %476 = tpu.dynamic_rotate %475 by %c4_i32_198 dim 0 : vector<16x32xf32>, i32 -> vector<16x32xf32>
    %c-4_i32_199 = arith.constant -4 : i32
    %477 = vector.broadcast %c-4_i32_199 : i32 to vector<16x1xi32>
    %478 = arith.addi %29, %477 : vector<16x1xi32>
    %c0_i32_200 = arith.constant 0 : i32
    %479 = vector.broadcast %c0_i32_200 : i32 to vector<16x1xi32>
    %480 = arith.cmpi sge, %478, %479 : vector<16x1xi32>
    %c8_i32_201 = arith.constant 8 : i32
    %481 = vector.broadcast %c8_i32_201 : i32 to vector<16x1xi32>
    %482 = arith.cmpi slt, %478, %481 : vector<16x1xi32>
    %483 = arith.andi %480, %482 : vector<16x1xi1>
    %cst_202 = arith.constant 0.000000e+00 : f32
    %484 = vector.shape_cast %483 : vector<16x1xi1> to vector<16x1xi1>
    %485 = vector.broadcast %484 : vector<16x1xi1> to vector<16x32xi1>
    %486 = vector.broadcast %cst_202 : f32 to vector<16x32xf32>
    %487 = arith.select %485, %476, %486 : vector<16x32xi1>, vector<16x32xf32>
    %c3_i32_203 = arith.constant 3 : i32
    %488 = tpu.dynamic_rotate %475 by %c3_i32_203 dim 0 : vector<16x32xf32>, i32 -> vector<16x32xf32>
    %c-3_i32_204 = arith.constant -3 : i32
    %489 = vector.broadcast %c-3_i32_204 : i32 to vector<16x1xi32>
    %490 = arith.addi %29, %489 : vector<16x1xi32>
    %c0_i32_205 = arith.constant 0 : i32
    %491 = vector.broadcast %c0_i32_205 : i32 to vector<16x1xi32>
    %492 = arith.cmpi sge, %490, %491 : vector<16x1xi32>
    %c8_i32_206 = arith.constant 8 : i32
    %493 = vector.broadcast %c8_i32_206 : i32 to vector<16x1xi32>
    %494 = arith.cmpi slt, %490, %493 : vector<16x1xi32>
    %495 = arith.andi %492, %494 : vector<16x1xi1>
    %cst_207 = arith.constant 0.000000e+00 : f32
    %496 = vector.shape_cast %495 : vector<16x1xi1> to vector<16x1xi1>
    %497 = vector.broadcast %496 : vector<16x1xi1> to vector<16x32xi1>
    %498 = vector.broadcast %cst_207 : f32 to vector<16x32xf32>
    %499 = arith.select %497, %488, %498 : vector<16x32xi1>, vector<16x32xf32>
    %c2_i32_208 = arith.constant 2 : i32
    %500 = tpu.dynamic_rotate %475 by %c2_i32_208 dim 0 : vector<16x32xf32>, i32 -> vector<16x32xf32>
    %c-2_i32_209 = arith.constant -2 : i32
    %501 = vector.broadcast %c-2_i32_209 : i32 to vector<16x1xi32>
    %502 = arith.addi %29, %501 : vector<16x1xi32>
    %c0_i32_210 = arith.constant 0 : i32
    %503 = vector.broadcast %c0_i32_210 : i32 to vector<16x1xi32>
    %504 = arith.cmpi sge, %502, %503 : vector<16x1xi32>
    %c8_i32_211 = arith.constant 8 : i32
    %505 = vector.broadcast %c8_i32_211 : i32 to vector<16x1xi32>
    %506 = arith.cmpi slt, %502, %505 : vector<16x1xi32>
    %507 = arith.andi %504, %506 : vector<16x1xi1>
    %cst_212 = arith.constant 0.000000e+00 : f32
    %508 = vector.shape_cast %507 : vector<16x1xi1> to vector<16x1xi1>
    %509 = vector.broadcast %508 : vector<16x1xi1> to vector<16x32xi1>
    %510 = vector.broadcast %cst_212 : f32 to vector<16x32xf32>
    %511 = arith.select %509, %500, %510 : vector<16x32xi1>, vector<16x32xf32>
    %c1_i32_213 = arith.constant 1 : i32
    %512 = tpu.dynamic_rotate %475 by %c1_i32_213 dim 0 : vector<16x32xf32>, i32 -> vector<16x32xf32>
    %c-1_i32_214 = arith.constant -1 : i32
    %513 = vector.broadcast %c-1_i32_214 : i32 to vector<16x1xi32>
    %514 = arith.addi %29, %513 : vector<16x1xi32>
    %c0_i32_215 = arith.constant 0 : i32
    %515 = vector.broadcast %c0_i32_215 : i32 to vector<16x1xi32>
    %516 = arith.cmpi sge, %514, %515 : vector<16x1xi32>
    %c8_i32_216 = arith.constant 8 : i32
    %517 = vector.broadcast %c8_i32_216 : i32 to vector<16x1xi32>
    %518 = arith.cmpi slt, %514, %517 : vector<16x1xi32>
    %519 = arith.andi %516, %518 : vector<16x1xi1>
    %cst_217 = arith.constant 0.000000e+00 : f32
    %520 = vector.shape_cast %519 : vector<16x1xi1> to vector<16x1xi1>
    %521 = vector.broadcast %520 : vector<16x1xi1> to vector<16x32xi1>
    %522 = vector.broadcast %cst_217 : f32 to vector<16x32xf32>
    %523 = arith.select %521, %512, %522 : vector<16x32xi1>, vector<16x32xf32>
    %c15_i32_218 = arith.constant 15 : i32
    %524 = tpu.dynamic_rotate %475 by %c15_i32_218 dim 0 : vector<16x32xf32>, i32 -> vector<16x32xf32>
    %c1_i32_219 = arith.constant 1 : i32
    %525 = vector.broadcast %c1_i32_219 : i32 to vector<16x1xi32>
    %526 = arith.addi %29, %525 : vector<16x1xi32>
    %c0_i32_220 = arith.constant 0 : i32
    %527 = vector.broadcast %c0_i32_220 : i32 to vector<16x1xi32>
    %528 = arith.cmpi sge, %526, %527 : vector<16x1xi32>
    %c8_i32_221 = arith.constant 8 : i32
    %529 = vector.broadcast %c8_i32_221 : i32 to vector<16x1xi32>
    %530 = arith.cmpi slt, %526, %529 : vector<16x1xi32>
    %531 = arith.andi %528, %530 : vector<16x1xi1>
    %cst_222 = arith.constant 0.000000e+00 : f32
    %532 = vector.shape_cast %531 : vector<16x1xi1> to vector<16x1xi1>
    %533 = vector.broadcast %532 : vector<16x1xi1> to vector<16x32xi1>
    %534 = vector.broadcast %cst_222 : f32 to vector<16x32xf32>
    %535 = arith.select %533, %524, %534 : vector<16x32xi1>, vector<16x32xf32>
    %c14_i32_223 = arith.constant 14 : i32
    %536 = tpu.dynamic_rotate %475 by %c14_i32_223 dim 0 : vector<16x32xf32>, i32 -> vector<16x32xf32>
    %c2_i32_224 = arith.constant 2 : i32
    %537 = vector.broadcast %c2_i32_224 : i32 to vector<16x1xi32>
    %538 = arith.addi %29, %537 : vector<16x1xi32>
    %c0_i32_225 = arith.constant 0 : i32
    %539 = vector.broadcast %c0_i32_225 : i32 to vector<16x1xi32>
    %540 = arith.cmpi sge, %538, %539 : vector<16x1xi32>
    %c8_i32_226 = arith.constant 8 : i32
    %541 = vector.broadcast %c8_i32_226 : i32 to vector<16x1xi32>
    %542 = arith.cmpi slt, %538, %541 : vector<16x1xi32>
    %543 = arith.andi %540, %542 : vector<16x1xi1>
    %cst_227 = arith.constant 0.000000e+00 : f32
    %544 = vector.shape_cast %543 : vector<16x1xi1> to vector<16x1xi1>
    %545 = vector.broadcast %544 : vector<16x1xi1> to vector<16x32xi1>
    %546 = vector.broadcast %cst_227 : f32 to vector<16x32xf32>
    %547 = arith.select %545, %536, %546 : vector<16x32xi1>, vector<16x32xf32>
    %c13_i32_228 = arith.constant 13 : i32
    %548 = tpu.dynamic_rotate %475 by %c13_i32_228 dim 0 : vector<16x32xf32>, i32 -> vector<16x32xf32>
    %c3_i32_229 = arith.constant 3 : i32
    %549 = vector.broadcast %c3_i32_229 : i32 to vector<16x1xi32>
    %550 = arith.addi %29, %549 : vector<16x1xi32>
    %c0_i32_230 = arith.constant 0 : i32
    %551 = vector.broadcast %c0_i32_230 : i32 to vector<16x1xi32>
    %552 = arith.cmpi sge, %550, %551 : vector<16x1xi32>
    %c8_i32_231 = arith.constant 8 : i32
    %553 = vector.broadcast %c8_i32_231 : i32 to vector<16x1xi32>
    %554 = arith.cmpi slt, %550, %553 : vector<16x1xi32>
    %555 = arith.andi %552, %554 : vector<16x1xi1>
    %cst_232 = arith.constant 0.000000e+00 : f32
    %556 = vector.shape_cast %555 : vector<16x1xi1> to vector<16x1xi1>
    %557 = vector.broadcast %556 : vector<16x1xi1> to vector<16x32xi1>
    %558 = vector.broadcast %cst_232 : f32 to vector<16x32xf32>
    %559 = arith.select %557, %548, %558 : vector<16x32xi1>, vector<16x32xf32>
    %c12_i32_233 = arith.constant 12 : i32
    %560 = tpu.dynamic_rotate %475 by %c12_i32_233 dim 0 : vector<16x32xf32>, i32 -> vector<16x32xf32>
    %c4_i32_234 = arith.constant 4 : i32
    %561 = vector.broadcast %c4_i32_234 : i32 to vector<16x1xi32>
    %562 = arith.addi %29, %561 : vector<16x1xi32>
    %c0_i32_235 = arith.constant 0 : i32
    %563 = vector.broadcast %c0_i32_235 : i32 to vector<16x1xi32>
    %564 = arith.cmpi sge, %562, %563 : vector<16x1xi32>
    %c8_i32_236 = arith.constant 8 : i32
    %565 = vector.broadcast %c8_i32_236 : i32 to vector<16x1xi32>
    %566 = arith.cmpi slt, %562, %565 : vector<16x1xi32>
    %567 = arith.andi %564, %566 : vector<16x1xi1>
    %cst_237 = arith.constant 0.000000e+00 : f32
    %568 = vector.shape_cast %567 : vector<16x1xi1> to vector<16x1xi1>
    %569 = vector.broadcast %568 : vector<16x1xi1> to vector<16x32xi1>
    %570 = vector.broadcast %cst_237 : f32 to vector<16x32xf32>
    %571 = arith.select %569, %560, %570 : vector<16x32xi1>, vector<16x32xf32>
    %572 = tpu.concatenate %487, %499, %511, %523, %475, %535, %547, %559, %571 in 1 : vector<16x32xf32>, vector<16x32xf32>, vector<16x32xf32>, vector<16x32xf32>, vector<16x32xf32>, vector<16x32xf32>, vector<16x32xf32>, vector<16x32xf32>, vector<16x32xf32> -> vector<16x288xf32>
    %cst_238 = arith.constant dense<0.000000e+00> : vector<16x64xf32>
    %573 = tpu.matmul %572, %336, %cst_238 {dimension_numbers = #tpu.dot_dimension_numbers<[1], [0], [0], [1], [0, 0, 1, 1], [], []>} : vector<16x288xf32>, vector<288x64xf32>, vector<16x64xf32> -> vector<16x64xf32>
    %574 = vector.broadcast %338 : vector<1x64xf32> to vector<16x64xf32>
    %575 = arith.addf %573, %574 : vector<16x64xf32>
    %cst_239 = arith.constant 0.000000e+00 : f32
    %576 = vector.broadcast %cst_239 : f32 to vector<16x64xf32>
    %577 = arith.maximumf %575, %576 : vector<16x64xf32>
    %cst_240 = arith.constant dense<0.000000e+00> : vector<16x32xf32>
    %578 = tpu.matmul %577, %340, %cst_240 {dimension_numbers = #tpu.dot_dimension_numbers<[1], [0], [0], [1], [0, 0, 1, 1], [], []>} : vector<16x64xf32>, vector<64x32xf32>, vector<16x32xf32> -> vector<16x32xf32>
    %579 = vector.broadcast %342 : vector<1x32xf32> to vector<16x32xf32>
    %580 = arith.addf %578, %579 : vector<16x32xf32>
    %581 = arith.addf %580, %475 : vector<16x32xf32>
    %cst_241 = arith.constant dense<0.000000e+00> : vector<16xf32>
    %582 = vector.multi_reduction <add>, %581, %cst_241 [1] : vector<16x32xf32> to vector<16xf32>
    %583 = vector.shape_cast %582 : vector<16xf32> to vector<16x1xf32>
    %cst_242 = arith.constant 3.200000e+01 : f32
    %584 = vector.broadcast %cst_242 : f32 to vector<16x1xf32>
    %585 = arith.divf %583, %584 : vector<16x1xf32>
    %586 = vector.broadcast %585 : vector<16x1xf32> to vector<16x32xf32>
    %587 = arith.subf %581, %586 : vector<16x32xf32>
    %588 = arith.mulf %587, %587 : vector<16x32xf32>
    %cst_243 = arith.constant dense<0.000000e+00> : vector<16xf32>
    %589 = vector.multi_reduction <add>, %588, %cst_243 [1] : vector<16x32xf32> to vector<16xf32>
    %590 = vector.shape_cast %589 : vector<16xf32> to vector<16x1xf32>
    %cst_244 = arith.constant 3.200000e+01 : f32
    %591 = vector.broadcast %cst_244 : f32 to vector<16x1xf32>
    %592 = arith.divf %590, %591 : vector<16x1xf32>
    %593 = vector.broadcast %585 : vector<16x1xf32> to vector<16x32xf32>
    %594 = arith.subf %581, %593 : vector<16x32xf32>
    %cst_245 = arith.constant 9.99999974E-6 : f32
    %595 = vector.broadcast %cst_245 : f32 to vector<16x1xf32>
    %596 = arith.addf %592, %595 : vector<16x1xf32>
    %597 = math.rsqrt %596 : vector<16x1xf32>
    %598 = vector.broadcast %597 : vector<16x1xf32> to vector<16x32xf32>
    %599 = arith.mulf %594, %598 : vector<16x32xf32>
    %600 = vector.broadcast %344 : vector<1x32xf32> to vector<16x32xf32>
    %601 = arith.mulf %599, %600 : vector<16x32xf32>
    %602 = vector.broadcast %346 : vector<1x32xf32> to vector<16x32xf32>
    %603 = arith.addf %601, %602 : vector<16x32xf32>
    %cst_246 = arith.constant 0.000000e+00 : f32
    %604 = vector.shape_cast %12 : vector<16x1xi1> to vector<16x1xi1>
    %605 = vector.broadcast %604 : vector<16x1xi1> to vector<16x32xi1>
    %606 = vector.broadcast %cst_246 : f32 to vector<16x32xf32>
    %607 = arith.select %605, %606, %603 : vector<16x32xi1>, vector<16x32xf32>
    %c0_247 = arith.constant 0 : index
    %c0_248 = arith.constant 0 : index
    %608 = vector.load %arg17[%c0_247, %c0_248] : memref<16x32xf32, #tpu.memory_space<vmem>>, vector<16x32xf32>
    tpu.vector_store %arg17[%c0_247, %c0_248], %607 {strides = array<i32>} : memref<16x32xf32, #tpu.memory_space<vmem>>, vector<16x32xf32>,
    return
  }
}

module attributes {stable_mosaic.version = 11 : i64} {
  func.func @_variance_adaptor_kernel(%arg0: memref<16x32xf32, #tpu.memory_space<vmem>>, %arg1: memref<16x1xf32, #tpu.memory_space<vmem>>, %arg2: memref<32x1xf32, #tpu.memory_space<vmem>>, %arg3: memref<32x1xi32, #tpu.memory_space<vmem>>, %arg4: memref<32x1xf32, #tpu.memory_space<vmem>>, %arg5: memref<32x1xf32, #tpu.memory_space<vmem>>, %arg6: memref<1x1xf32, #tpu.memory_space<vmem>>, %arg7: memref<1x1xf32, #tpu.memory_space<vmem>>, %arg8: memref<3x96x32xf32, #tpu.memory_space<vmem>>, %arg9: memref<3x1x32xf32, #tpu.memory_space<vmem>>, %arg10: memref<3x1x32xf32, #tpu.memory_space<vmem>>, %arg11: memref<3x1x32xf32, #tpu.memory_space<vmem>>, %arg12: memref<3x96x32xf32, #tpu.memory_space<vmem>>, %arg13: memref<3x1x32xf32, #tpu.memory_space<vmem>>, %arg14: memref<3x1x32xf32, #tpu.memory_space<vmem>>, %arg15: memref<3x1x32xf32, #tpu.memory_space<vmem>>, %arg16: memref<3x32x1xf32, #tpu.memory_space<vmem>>, %arg17: memref<3x1x1xf32, #tpu.memory_space<vmem>>, %arg18: memref<8x32xf32, #tpu.memory_space<vmem>>, %arg19: memref<1x7xf32, #tpu.memory_space<vmem>>, %arg20: memref<8x32xf32, #tpu.memory_space<vmem>>, %arg21: memref<1x7xf32, #tpu.memory_space<vmem>>, %arg22: memref<32x32xf32, #tpu.memory_space<vmem>>, %arg23: memref<16x1xf32, #tpu.memory_space<vmem>>, %arg24: memref<32x1xf32, #tpu.memory_space<vmem>>, %arg25: memref<32x1xf32, #tpu.memory_space<vmem>>) attributes {dimension_semantics = [], scalar_prefetch = 0 : i64, scratch_operands = 0 : i64, tpu.core_type = #tpu.core_type<tc>} {
    %c0 = arith.constant 0 : index
    %c0_0 = arith.constant 0 : index
    %0 = vector.load %arg0[%c0, %c0_0] : memref<16x32xf32, #tpu.memory_space<vmem>>, vector<16x32xf32>
    %c0_1 = arith.constant 0 : index
    %c0_2 = arith.constant 0 : index
    %1 = vector.load %arg1[%c0_1, %c0_2] : memref<16x1xf32, #tpu.memory_space<vmem>>, vector<16x1xf32>
    %2 = tpu.iota {dimensions = array<i32: 0>} : vector<16x1xi32>
    %c8_i32 = arith.constant 8 : i32
    %c0_i32 = arith.constant 0 : i32
    %3 = arith.cmpi eq, %c8_i32, %c0_i32 : i32
    %c1_i32 = arith.constant 1 : i32
    %4 = arith.select %3, %c1_i32, %c8_i32 : i32
    %5 = vector.broadcast %4 : i32 to vector<16x1xi32>
    %6 = arith.remsi %2, %5 : vector<16x1xi32>
    %c0_i32_3 = arith.constant 0 : i32
    %7 = vector.broadcast %c0_i32_3 : i32 to vector<16x1xi32>
    %8 = arith.cmpi ne, %6, %7 : vector<16x1xi32>
    %c0_i32_4 = arith.constant 0 : i32
    %9 = vector.broadcast %c0_i32_4 : i32 to vector<16x1xi32>
    %10 = arith.cmpi slt, %6, %9 : vector<16x1xi32>
    %c0_i32_5 = arith.constant 0 : i32
    %11 = arith.cmpi slt, %4, %c0_i32_5 : i32
    %12 = vector.broadcast %11 : i1 to vector<16x1xi1>
    %13 = vector.broadcast %12 : vector<16x1xi1> to vector<16x1xi1>
    %14 = arith.xori %10, %13 : vector<16x1xi1>
    %15 = arith.andi %14, %8 : vector<16x1xi1>
    %16 = vector.broadcast %4 : i32 to vector<16x1xi32>
    %17 = arith.addi %6, %16 : vector<16x1xi32>
    %18 = arith.select %15, %17, %6 : vector<16x1xi1>, vector<16x1xi32>
    %c0_6 = arith.constant 0 : index
    %c0_7 = arith.constant 0 : index
    %c0_8 = arith.constant 0 : index
    %19 = vector.load %arg8[%c0_6, %c0_7, %c0_8] : memref<3x96x32xf32, #tpu.memory_space<vmem>>, vector<1x96x32xf32>
    %20 = vector.shape_cast %19 : vector<1x96x32xf32> to vector<96x32xf32>
    %c0_9 = arith.constant 0 : index
    %c0_10 = arith.constant 0 : index
    %c0_11 = arith.constant 0 : index
    %21 = vector.load %arg9[%c0_9, %c0_10, %c0_11] : memref<3x1x32xf32, #tpu.memory_space<vmem>>, vector<1x1x32xf32>
    %22 = vector.shape_cast %21 : vector<1x1x32xf32> to vector<1x32xf32>
    %c1_i32_12 = arith.constant 1 : i32
    %23 = tpu.dynamic_rotate %0 by %c1_i32_12 dim 0 : vector<16x32xf32>, i32 -> vector<16x32xf32>
    %c-1_i32 = arith.constant -1 : i32
    %24 = vector.broadcast %c-1_i32 : i32 to vector<16x1xi32>
    %25 = arith.addi %18, %24 : vector<16x1xi32>
    %c0_i32_13 = arith.constant 0 : i32
    %26 = vector.broadcast %c0_i32_13 : i32 to vector<16x1xi32>
    %27 = arith.cmpi sge, %25, %26 : vector<16x1xi32>
    %c8_i32_14 = arith.constant 8 : i32
    %28 = vector.broadcast %c8_i32_14 : i32 to vector<16x1xi32>
    %29 = arith.cmpi slt, %25, %28 : vector<16x1xi32>
    %30 = arith.andi %27, %29 : vector<16x1xi1>
    %cst = arith.constant 0.000000e+00 : f32
    %31 = vector.shape_cast %30 : vector<16x1xi1> to vector<16x1xi1>
    %32 = vector.broadcast %31 : vector<16x1xi1> to vector<16x32xi1>
    %33 = vector.broadcast %cst : f32 to vector<16x32xf32>
    %34 = arith.select %32, %23, %33 : vector<16x32xi1>, vector<16x32xf32>
    %c15_i32 = arith.constant 15 : i32
    %35 = tpu.dynamic_rotate %0 by %c15_i32 dim 0 : vector<16x32xf32>, i32 -> vector<16x32xf32>
    %c1_i32_15 = arith.constant 1 : i32
    %36 = vector.broadcast %c1_i32_15 : i32 to vector<16x1xi32>
    %37 = arith.addi %18, %36 : vector<16x1xi32>
    %c0_i32_16 = arith.constant 0 : i32
    %38 = vector.broadcast %c0_i32_16 : i32 to vector<16x1xi32>
    %39 = arith.cmpi sge, %37, %38 : vector<16x1xi32>
    %c8_i32_17 = arith.constant 8 : i32
    %40 = vector.broadcast %c8_i32_17 : i32 to vector<16x1xi32>
    %41 = arith.cmpi slt, %37, %40 : vector<16x1xi32>
    %42 = arith.andi %39, %41 : vector<16x1xi1>
    %cst_18 = arith.constant 0.000000e+00 : f32
    %43 = vector.shape_cast %42 : vector<16x1xi1> to vector<16x1xi1>
    %44 = vector.broadcast %43 : vector<16x1xi1> to vector<16x32xi1>
    %45 = vector.broadcast %cst_18 : f32 to vector<16x32xf32>
    %46 = arith.select %44, %35, %45 : vector<16x32xi1>, vector<16x32xf32>
    %47 = tpu.concatenate %34, %0, %46 in 1 : vector<16x32xf32>, vector<16x32xf32>, vector<16x32xf32> -> vector<16x96xf32>
    %cst_19 = arith.constant dense<0.000000e+00> : vector<16x32xf32>
    %48 = tpu.matmul %47, %20, %cst_19 {dimension_numbers = #tpu.dot_dimension_numbers<[1], [0], [0], [1], [0, 0, 1, 1], [], []>} : vector<16x96xf32>, vector<96x32xf32>, vector<16x32xf32> -> vector<16x32xf32>
    %49 = vector.broadcast %22 : vector<1x32xf32> to vector<16x32xf32>
    %50 = arith.addf %48, %49 : vector<16x32xf32>
    %cst_20 = arith.constant 0.000000e+00 : f32
    %51 = vector.broadcast %cst_20 : f32 to vector<16x32xf32>
    %52 = arith.maximumf %50, %51 : vector<16x32xf32>
    %c0_21 = arith.constant 0 : index
    %c0_22 = arith.constant 0 : index
    %c0_23 = arith.constant 0 : index
    %53 = vector.load %arg10[%c0_21, %c0_22, %c0_23] : memref<3x1x32xf32, #tpu.memory_space<vmem>>, vector<1x1x32xf32>
    %54 = vector.shape_cast %53 : vector<1x1x32xf32> to vector<1x32xf32>
    %c0_24 = arith.constant 0 : index
    %c0_25 = arith.constant 0 : index
    %c0_26 = arith.constant 0 : index
    %55 = vector.load %arg11[%c0_24, %c0_25, %c0_26] : memref<3x1x32xf32, #tpu.memory_space<vmem>>, vector<1x1x32xf32>
    %56 = vector.shape_cast %55 : vector<1x1x32xf32> to vector<1x32xf32>
    %cst_27 = arith.constant dense<0.000000e+00> : vector<16xf32>
    %57 = vector.multi_reduction <add>, %52, %cst_27 [1] : vector<16x32xf32> to vector<16xf32>
    %58 = vector.shape_cast %57 : vector<16xf32> to vector<16x1xf32>
    %cst_28 = arith.constant 3.200000e+01 : f32
    %59 = vector.broadcast %cst_28 : f32 to vector<16x1xf32>
    %60 = arith.divf %58, %59 : vector<16x1xf32>
    %61 = vector.broadcast %60 : vector<16x1xf32> to vector<16x32xf32>
    %62 = arith.subf %52, %61 : vector<16x32xf32>
    %63 = arith.mulf %62, %62 : vector<16x32xf32>
    %cst_29 = arith.constant dense<0.000000e+00> : vector<16xf32>
    %64 = vector.multi_reduction <add>, %63, %cst_29 [1] : vector<16x32xf32> to vector<16xf32>
    %65 = vector.shape_cast %64 : vector<16xf32> to vector<16x1xf32>
    %cst_30 = arith.constant 3.200000e+01 : f32
    %66 = vector.broadcast %cst_30 : f32 to vector<16x1xf32>
    %67 = arith.divf %65, %66 : vector<16x1xf32>
    %68 = vector.broadcast %60 : vector<16x1xf32> to vector<16x32xf32>
    %69 = arith.subf %52, %68 : vector<16x32xf32>
    %cst_31 = arith.constant 9.99999974E-6 : f32
    %70 = vector.broadcast %cst_31 : f32 to vector<16x1xf32>
    %71 = arith.addf %67, %70 : vector<16x1xf32>
    %72 = math.rsqrt %71 : vector<16x1xf32>
    %73 = vector.broadcast %72 : vector<16x1xf32> to vector<16x32xf32>
    %74 = arith.mulf %69, %73 : vector<16x32xf32>
    %75 = vector.broadcast %54 : vector<1x32xf32> to vector<16x32xf32>
    %76 = arith.mulf %74, %75 : vector<16x32xf32>
    %77 = vector.broadcast %56 : vector<1x32xf32> to vector<16x32xf32>
    %78 = arith.addf %76, %77 : vector<16x32xf32>
    %c0_32 = arith.constant 0 : index
    %c0_33 = arith.constant 0 : index
    %c0_34 = arith.constant 0 : index
    %79 = vector.load %arg12[%c0_32, %c0_33, %c0_34] : memref<3x96x32xf32, #tpu.memory_space<vmem>>, vector<1x96x32xf32>
    %80 = vector.shape_cast %79 : vector<1x96x32xf32> to vector<96x32xf32>
    %c0_35 = arith.constant 0 : index
    %c0_36 = arith.constant 0 : index
    %c0_37 = arith.constant 0 : index
    %81 = vector.load %arg13[%c0_35, %c0_36, %c0_37] : memref<3x1x32xf32, #tpu.memory_space<vmem>>, vector<1x1x32xf32>
    %82 = vector.shape_cast %81 : vector<1x1x32xf32> to vector<1x32xf32>
    %c1_i32_38 = arith.constant 1 : i32
    %83 = tpu.dynamic_rotate %78 by %c1_i32_38 dim 0 : vector<16x32xf32>, i32 -> vector<16x32xf32>
    %c-1_i32_39 = arith.constant -1 : i32
    %84 = vector.broadcast %c-1_i32_39 : i32 to vector<16x1xi32>
    %85 = arith.addi %18, %84 : vector<16x1xi32>
    %c0_i32_40 = arith.constant 0 : i32
    %86 = vector.broadcast %c0_i32_40 : i32 to vector<16x1xi32>
    %87 = arith.cmpi sge, %85, %86 : vector<16x1xi32>
    %c8_i32_41 = arith.constant 8 : i32
    %88 = vector.broadcast %c8_i32_41 : i32 to vector<16x1xi32>
    %89 = arith.cmpi slt, %85, %88 : vector<16x1xi32>
    %90 = arith.andi %87, %89 : vector<16x1xi1>
    %cst_42 = arith.constant 0.000000e+00 : f32
    %91 = vector.shape_cast %90 : vector<16x1xi1> to vector<16x1xi1>
    %92 = vector.broadcast %91 : vector<16x1xi1> to vector<16x32xi1>
    %93 = vector.broadcast %cst_42 : f32 to vector<16x32xf32>
    %94 = arith.select %92, %83, %93 : vector<16x32xi1>, vector<16x32xf32>
    %c15_i32_43 = arith.constant 15 : i32
    %95 = tpu.dynamic_rotate %78 by %c15_i32_43 dim 0 : vector<16x32xf32>, i32 -> vector<16x32xf32>
    %c1_i32_44 = arith.constant 1 : i32
    %96 = vector.broadcast %c1_i32_44 : i32 to vector<16x1xi32>
    %97 = arith.addi %18, %96 : vector<16x1xi32>
    %c0_i32_45 = arith.constant 0 : i32
    %98 = vector.broadcast %c0_i32_45 : i32 to vector<16x1xi32>
    %99 = arith.cmpi sge, %97, %98 : vector<16x1xi32>
    %c8_i32_46 = arith.constant 8 : i32
    %100 = vector.broadcast %c8_i32_46 : i32 to vector<16x1xi32>
    %101 = arith.cmpi slt, %97, %100 : vector<16x1xi32>
    %102 = arith.andi %99, %101 : vector<16x1xi1>
    %cst_47 = arith.constant 0.000000e+00 : f32
    %103 = vector.shape_cast %102 : vector<16x1xi1> to vector<16x1xi1>
    %104 = vector.broadcast %103 : vector<16x1xi1> to vector<16x32xi1>
    %105 = vector.broadcast %cst_47 : f32 to vector<16x32xf32>
    %106 = arith.select %104, %95, %105 : vector<16x32xi1>, vector<16x32xf32>
    %107 = tpu.concatenate %94, %78, %106 in 1 : vector<16x32xf32>, vector<16x32xf32>, vector<16x32xf32> -> vector<16x96xf32>
    %cst_48 = arith.constant dense<0.000000e+00> : vector<16x32xf32>
    %108 = tpu.matmul %107, %80, %cst_48 {dimension_numbers = #tpu.dot_dimension_numbers<[1], [0], [0], [1], [0, 0, 1, 1], [], []>} : vector<16x96xf32>, vector<96x32xf32>, vector<16x32xf32> -> vector<16x32xf32>
    %109 = vector.broadcast %82 : vector<1x32xf32> to vector<16x32xf32>
    %110 = arith.addf %108, %109 : vector<16x32xf32>
    %cst_49 = arith.constant 0.000000e+00 : f32
    %111 = vector.broadcast %cst_49 : f32 to vector<16x32xf32>
    %112 = arith.maximumf %110, %111 : vector<16x32xf32>
    %c0_50 = arith.constant 0 : index
    %c0_51 = arith.constant 0 : index
    %c0_52 = arith.constant 0 : index
    %113 = vector.load %arg14[%c0_50, %c0_51, %c0_52] : memref<3x1x32xf32, #tpu.memory_space<vmem>>, vector<1x1x32xf32>
    %114 = vector.shape_cast %113 : vector<1x1x32xf32> to vector<1x32xf32>
    %c0_53 = arith.constant 0 : index
    %c0_54 = arith.constant 0 : index
    %c0_55 = arith.constant 0 : index
    %115 = vector.load %arg15[%c0_53, %c0_54, %c0_55] : memref<3x1x32xf32, #tpu.memory_space<vmem>>, vector<1x1x32xf32>
    %116 = vector.shape_cast %115 : vector<1x1x32xf32> to vector<1x32xf32>
    %cst_56 = arith.constant dense<0.000000e+00> : vector<16xf32>
    %117 = vector.multi_reduction <add>, %112, %cst_56 [1] : vector<16x32xf32> to vector<16xf32>
    %118 = vector.shape_cast %117 : vector<16xf32> to vector<16x1xf32>
    %cst_57 = arith.constant 3.200000e+01 : f32
    %119 = vector.broadcast %cst_57 : f32 to vector<16x1xf32>
    %120 = arith.divf %118, %119 : vector<16x1xf32>
    %121 = vector.broadcast %120 : vector<16x1xf32> to vector<16x32xf32>
    %122 = arith.subf %112, %121 : vector<16x32xf32>
    %123 = arith.mulf %122, %122 : vector<16x32xf32>
    %cst_58 = arith.constant dense<0.000000e+00> : vector<16xf32>
    %124 = vector.multi_reduction <add>, %123, %cst_58 [1] : vector<16x32xf32> to vector<16xf32>
    %125 = vector.shape_cast %124 : vector<16xf32> to vector<16x1xf32>
    %cst_59 = arith.constant 3.200000e+01 : f32
    %126 = vector.broadcast %cst_59 : f32 to vector<16x1xf32>
    %127 = arith.divf %125, %126 : vector<16x1xf32>
    %128 = vector.broadcast %120 : vector<16x1xf32> to vector<16x32xf32>
    %129 = arith.subf %112, %128 : vector<16x32xf32>
    %cst_60 = arith.constant 9.99999974E-6 : f32
    %130 = vector.broadcast %cst_60 : f32 to vector<16x1xf32>
    %131 = arith.addf %127, %130 : vector<16x1xf32>
    %132 = math.rsqrt %131 : vector<16x1xf32>
    %133 = vector.broadcast %132 : vector<16x1xf32> to vector<16x32xf32>
    %134 = arith.mulf %129, %133 : vector<16x32xf32>
    %135 = vector.broadcast %114 : vector<1x32xf32> to vector<16x32xf32>
    %136 = arith.mulf %134, %135 : vector<16x32xf32>
    %137 = vector.broadcast %116 : vector<1x32xf32> to vector<16x32xf32>
    %138 = arith.addf %136, %137 : vector<16x32xf32>
    %c0_61 = arith.constant 0 : index
    %c0_62 = arith.constant 0 : index
    %c0_63 = arith.constant 0 : index
    %139 = vector.load %arg16[%c0_61, %c0_62, %c0_63] : memref<3x32x1xf32, #tpu.memory_space<vmem>>, vector<1x32x1xf32>
    %140 = vector.shape_cast %139 : vector<1x32x1xf32> to vector<32x1xf32>
    %cst_64 = arith.constant dense<0.000000e+00> : vector<16x1xf32>
    %141 = tpu.matmul %138, %140, %cst_64 {dimension_numbers = #tpu.dot_dimension_numbers<[1], [0], [0], [1], [0, 0, 1, 1], [], []>} : vector<16x32xf32>, vector<32x1xf32>, vector<16x1xf32> -> vector<16x1xf32>
    %c0_65 = arith.constant 0 : index
    %c0_66 = arith.constant 0 : index
    %c0_67 = arith.constant 0 : index
    %142 = vector.load %arg17[%c0_65, %c0_66, %c0_67] : memref<3x1x1xf32, #tpu.memory_space<vmem>>, vector<1x1x1xf32>
    %143 = vector.shape_cast %142 : vector<1x1x1xf32> to vector<1x1xf32>
    %144 = vector.broadcast %143 : vector<1x1xf32> to vector<16x1xf32>
    %145 = arith.addf %141, %144 : vector<16x1xf32>
    %cst_68 = arith.constant 5.000000e-01 : f32
    %146 = vector.broadcast %cst_68 : f32 to vector<16x1xf32>
    %147 = arith.cmpf ogt, %1, %146 : vector<16x1xf32>
    %cst_69 = arith.constant 0.000000e+00 : f32
    %148 = vector.broadcast %cst_69 : f32 to vector<16x1xf32>
    %149 = arith.select %147, %148, %145 : vector<16x1xi1>, vector<16x1xf32>
    %c0_70 = arith.constant 0 : index
    %c0_71 = arith.constant 0 : index
    %150 = vector.load %arg23[%c0_70, %c0_71] : memref<16x1xf32, #tpu.memory_space<vmem>>, vector<16x1xf32>
    tpu.vector_store %arg23[%c0_70, %c0_71], %149 {strides = array<i32>} : memref<16x1xf32, #tpu.memory_space<vmem>>, vector<16x1xf32>,
    %c0_72 = arith.constant 0 : index
    %c0_73 = arith.constant 0 : index
    %151 = vector.load %arg3[%c0_72, %c0_73] : memref<32x1xi32, #tpu.memory_space<vmem>>, vector<32x1xi32>
    %152 = vector.extract_strided_slice %151 {offsets = [0, 0], sizes = [16, 1], strides = [1, 1]} : vector<32x1xi32> to vector<16x1xi32>
    %153 = tpu.iota {dimensions = array<i32: 1>} : vector<16x8xi32>
    %c1_i32_74 = arith.constant 1 : i32
    %154 = vector.broadcast %c1_i32_74 : i32 to vector<16x1xi32>
    %155 = arith.subi %152, %154 : vector<16x1xi32>
    %156 = vector.broadcast %155 : vector<16x1xi32> to vector<16x8xi32>
    %157 = arith.cmpi eq, %153, %156 : vector<16x8xi32>
    %c0_i32_75 = arith.constant 0 : i32
    %158 = vector.broadcast %c0_i32_75 : i32 to vector<16x1xi32>
    %159 = arith.cmpi sgt, %152, %158 : vector<16x1xi32>
    %160 = vector.broadcast %159 : vector<16x1xi1> to vector<16x8xi1>
    %161 = arith.andi %157, %160 : vector<16x8xi1>
    %162 = arith.extui %161 : vector<16x8xi1> to vector<16x8xi32>
    %163 = arith.sitofp %162 : vector<16x8xi32> to vector<16x8xf32>
    %164 = vector.extract_strided_slice %0 {offsets = [0, 0], sizes = [8, 32], strides = [1, 1]} : vector<16x32xf32> to vector<8x32xf32>
    %cst_76 = arith.constant dense<0.000000e+00> : vector<16x32xf32>
    %165 = tpu.matmul %163, %164, %cst_76 {dimension_numbers = #tpu.dot_dimension_numbers<[1], [0], [0], [1], [0, 0, 1, 1], [], []>} : vector<16x8xf32>, vector<8x32xf32>, vector<16x32xf32> -> vector<16x32xf32>
    %166 = vector.extract_strided_slice %151 {offsets = [16, 0], sizes = [16, 1], strides = [1, 1]} : vector<32x1xi32> to vector<16x1xi32>
    %167 = tpu.iota {dimensions = array<i32: 1>} : vector<16x8xi32>
    %c1_i32_77 = arith.constant 1 : i32
    %168 = vector.broadcast %c1_i32_77 : i32 to vector<16x1xi32>
    %169 = arith.subi %166, %168 : vector<16x1xi32>
    %170 = vector.broadcast %169 : vector<16x1xi32> to vector<16x8xi32>
    %171 = arith.cmpi eq, %167, %170 : vector<16x8xi32>
    %c0_i32_78 = arith.constant 0 : i32
    %172 = vector.broadcast %c0_i32_78 : i32 to vector<16x1xi32>
    %173 = arith.cmpi sgt, %166, %172 : vector<16x1xi32>
    %174 = vector.broadcast %173 : vector<16x1xi1> to vector<16x8xi1>
    %175 = arith.andi %171, %174 : vector<16x8xi1>
    %176 = arith.extui %175 : vector<16x8xi1> to vector<16x8xi32>
    %177 = arith.sitofp %176 : vector<16x8xi32> to vector<16x8xf32>
    %178 = vector.extract_strided_slice %0 {offsets = [8, 0], sizes = [8, 32], strides = [1, 1]} : vector<16x32xf32> to vector<8x32xf32>
    %cst_79 = arith.constant dense<0.000000e+00> : vector<16x32xf32>
    %179 = tpu.matmul %177, %178, %cst_79 {dimension_numbers = #tpu.dot_dimension_numbers<[1], [0], [0], [1], [0, 0, 1, 1], [], []>} : vector<16x8xf32>, vector<8x32xf32>, vector<16x32xf32> -> vector<16x32xf32>
    %180 = tpu.concatenate %165, %179 in 0 : vector<16x32xf32>, vector<16x32xf32> -> vector<32x32xf32>
    %c0_80 = arith.constant 0 : index
    %c0_81 = arith.constant 0 : index
    %181 = vector.load %arg2[%c0_80, %c0_81] : memref<32x1xf32, #tpu.memory_space<vmem>>, vector<32x1xf32>
    %182 = tpu.iota {dimensions = array<i32: 1>} : vector<32x8xi32>
    %183 = tpu.iota {dimensions = array<i32: 0>} : vector<32x1xi32>
    %c16_i32 = arith.constant 16 : i32
    %c0_i32_82 = arith.constant 0 : i32
    %184 = arith.cmpi eq, %c16_i32, %c0_i32_82 : i32
    %c1_i32_83 = arith.constant 1 : i32
    %185 = arith.select %184, %c1_i32_83, %c16_i32 : i32
    %186 = vector.broadcast %185 : i32 to vector<32x1xi32>
    %187 = arith.remsi %183, %186 : vector<32x1xi32>
    %c0_i32_84 = arith.constant 0 : i32
    %188 = vector.broadcast %c0_i32_84 : i32 to vector<32x1xi32>
    %189 = arith.cmpi ne, %187, %188 : vector<32x1xi32>
    %c0_i32_85 = arith.constant 0 : i32
    %190 = vector.broadcast %c0_i32_85 : i32 to vector<32x1xi32>
    %191 = arith.cmpi slt, %187, %190 : vector<32x1xi32>
    %c0_i32_86 = arith.constant 0 : i32
    %192 = arith.cmpi slt, %185, %c0_i32_86 : i32
    %193 = vector.broadcast %192 : i1 to vector<32x1xi1>
    %194 = vector.broadcast %193 : vector<32x1xi1> to vector<32x1xi1>
    %195 = arith.xori %191, %194 : vector<32x1xi1>
    %196 = arith.andi %195, %189 : vector<32x1xi1>
    %197 = vector.broadcast %185 : i32 to vector<32x1xi32>
    %198 = arith.addi %187, %197 : vector<32x1xi32>
    %199 = arith.select %196, %198, %187 : vector<32x1xi1>, vector<32x1xi32>
    %c1 = arith.constant 1 : index
    %c0_87 = arith.constant 0 : index
    %c0_88 = arith.constant 0 : index
    %200 = vector.load %arg8[%c1, %c0_87, %c0_88] : memref<3x96x32xf32, #tpu.memory_space<vmem>>, vector<1x96x32xf32>
    %201 = vector.shape_cast %200 : vector<1x96x32xf32> to vector<96x32xf32>
    %c1_89 = arith.constant 1 : index
    %c0_90 = arith.constant 0 : index
    %c0_91 = arith.constant 0 : index
    %202 = vector.load %arg9[%c1_89, %c0_90, %c0_91] : memref<3x1x32xf32, #tpu.memory_space<vmem>>, vector<1x1x32xf32>
    %203 = vector.shape_cast %202 : vector<1x1x32xf32> to vector<1x32xf32>
    %c1_i32_92 = arith.constant 1 : i32
    %204 = tpu.dynamic_rotate %180 by %c1_i32_92 dim 0 : vector<32x32xf32>, i32 -> vector<32x32xf32>
    %c-1_i32_93 = arith.constant -1 : i32
    %205 = vector.broadcast %c-1_i32_93 : i32 to vector<32x1xi32>
    %206 = arith.addi %199, %205 : vector<32x1xi32>
    %c0_i32_94 = arith.constant 0 : i32
    %207 = vector.broadcast %c0_i32_94 : i32 to vector<32x1xi32>
    %208 = arith.cmpi sge, %206, %207 : vector<32x1xi32>
    %c16_i32_95 = arith.constant 16 : i32
    %209 = vector.broadcast %c16_i32_95 : i32 to vector<32x1xi32>
    %210 = arith.cmpi slt, %206, %209 : vector<32x1xi32>
    %211 = arith.andi %208, %210 : vector<32x1xi1>
    %cst_96 = arith.constant 0.000000e+00 : f32
    %212 = vector.shape_cast %211 : vector<32x1xi1> to vector<32x1xi1>
    %213 = vector.broadcast %212 : vector<32x1xi1> to vector<32x32xi1>
    %214 = vector.broadcast %cst_96 : f32 to vector<32x32xf32>
    %215 = arith.select %213, %204, %214 : vector<32x32xi1>, vector<32x32xf32>
    %c31_i32 = arith.constant 31 : i32
    %216 = tpu.dynamic_rotate %180 by %c31_i32 dim 0 : vector<32x32xf32>, i32 -> vector<32x32xf32>
    %c1_i32_97 = arith.constant 1 : i32
    %217 = vector.broadcast %c1_i32_97 : i32 to vector<32x1xi32>
    %218 = arith.addi %199, %217 : vector<32x1xi32>
    %c0_i32_98 = arith.constant 0 : i32
    %219 = vector.broadcast %c0_i32_98 : i32 to vector<32x1xi32>
    %220 = arith.cmpi sge, %218, %219 : vector<32x1xi32>
    %c16_i32_99 = arith.constant 16 : i32
    %221 = vector.broadcast %c16_i32_99 : i32 to vector<32x1xi32>
    %222 = arith.cmpi slt, %218, %221 : vector<32x1xi32>
    %223 = arith.andi %220, %222 : vector<32x1xi1>
    %cst_100 = arith.constant 0.000000e+00 : f32
    %224 = vector.shape_cast %223 : vector<32x1xi1> to vector<32x1xi1>
    %225 = vector.broadcast %224 : vector<32x1xi1> to vector<32x32xi1>
    %226 = vector.broadcast %cst_100 : f32 to vector<32x32xf32>
    %227 = arith.select %225, %216, %226 : vector<32x32xi1>, vector<32x32xf32>
    %228 = tpu.concatenate %215, %180, %227 in 1 : vector<32x32xf32>, vector<32x32xf32>, vector<32x32xf32> -> vector<32x96xf32>
    %cst_101 = arith.constant dense<0.000000e+00> : vector<32x32xf32>
    %229 = tpu.matmul %228, %201, %cst_101 {dimension_numbers = #tpu.dot_dimension_numbers<[1], [0], [0], [1], [0, 0, 1, 1], [], []>} : vector<32x96xf32>, vector<96x32xf32>, vector<32x32xf32> -> vector<32x32xf32>
    %230 = vector.broadcast %203 : vector<1x32xf32> to vector<32x32xf32>
    %231 = arith.addf %229, %230 : vector<32x32xf32>
    %cst_102 = arith.constant 0.000000e+00 : f32
    %232 = vector.broadcast %cst_102 : f32 to vector<32x32xf32>
    %233 = arith.maximumf %231, %232 : vector<32x32xf32>
    %c1_103 = arith.constant 1 : index
    %c0_104 = arith.constant 0 : index
    %c0_105 = arith.constant 0 : index
    %234 = vector.load %arg10[%c1_103, %c0_104, %c0_105] : memref<3x1x32xf32, #tpu.memory_space<vmem>>, vector<1x1x32xf32>
    %235 = vector.shape_cast %234 : vector<1x1x32xf32> to vector<1x32xf32>
    %c1_106 = arith.constant 1 : index
    %c0_107 = arith.constant 0 : index
    %c0_108 = arith.constant 0 : index
    %236 = vector.load %arg11[%c1_106, %c0_107, %c0_108] : memref<3x1x32xf32, #tpu.memory_space<vmem>>, vector<1x1x32xf32>
    %237 = vector.shape_cast %236 : vector<1x1x32xf32> to vector<1x32xf32>
    %cst_109 = arith.constant dense<0.000000e+00> : vector<32xf32>
    %238 = vector.multi_reduction <add>, %233, %cst_109 [1] : vector<32x32xf32> to vector<32xf32>
    %239 = vector.shape_cast %238 : vector<32xf32> to vector<32x1xf32>
    %cst_110 = arith.constant 3.200000e+01 : f32
    %240 = vector.broadcast %cst_110 : f32 to vector<32x1xf32>
    %241 = arith.divf %239, %240 : vector<32x1xf32>
    %242 = vector.broadcast %241 : vector<32x1xf32> to vector<32x32xf32>
    %243 = arith.subf %233, %242 : vector<32x32xf32>
    %244 = arith.mulf %243, %243 : vector<32x32xf32>
    %cst_111 = arith.constant dense<0.000000e+00> : vector<32xf32>
    %245 = vector.multi_reduction <add>, %244, %cst_111 [1] : vector<32x32xf32> to vector<32xf32>
    %246 = vector.shape_cast %245 : vector<32xf32> to vector<32x1xf32>
    %cst_112 = arith.constant 3.200000e+01 : f32
    %247 = vector.broadcast %cst_112 : f32 to vector<32x1xf32>
    %248 = arith.divf %246, %247 : vector<32x1xf32>
    %249 = vector.broadcast %241 : vector<32x1xf32> to vector<32x32xf32>
    %250 = arith.subf %233, %249 : vector<32x32xf32>
    %cst_113 = arith.constant 9.99999974E-6 : f32
    %251 = vector.broadcast %cst_113 : f32 to vector<32x1xf32>
    %252 = arith.addf %248, %251 : vector<32x1xf32>
    %253 = math.rsqrt %252 : vector<32x1xf32>
    %254 = vector.broadcast %253 : vector<32x1xf32> to vector<32x32xf32>
    %255 = arith.mulf %250, %254 : vector<32x32xf32>
    %256 = vector.broadcast %235 : vector<1x32xf32> to vector<32x32xf32>
    %257 = arith.mulf %255, %256 : vector<32x32xf32>
    %258 = vector.broadcast %237 : vector<1x32xf32> to vector<32x32xf32>
    %259 = arith.addf %257, %258 : vector<32x32xf32>
    %c1_114 = arith.constant 1 : index
    %c0_115 = arith.constant 0 : index
    %c0_116 = arith.constant 0 : index
    %260 = vector.load %arg12[%c1_114, %c0_115, %c0_116] : memref<3x96x32xf32, #tpu.memory_space<vmem>>, vector<1x96x32xf32>
    %261 = vector.shape_cast %260 : vector<1x96x32xf32> to vector<96x32xf32>
    %c1_117 = arith.constant 1 : index
    %c0_118 = arith.constant 0 : index
    %c0_119 = arith.constant 0 : index
    %262 = vector.load %arg13[%c1_117, %c0_118, %c0_119] : memref<3x1x32xf32, #tpu.memory_space<vmem>>, vector<1x1x32xf32>
    %263 = vector.shape_cast %262 : vector<1x1x32xf32> to vector<1x32xf32>
    %c1_i32_120 = arith.constant 1 : i32
    %264 = tpu.dynamic_rotate %259 by %c1_i32_120 dim 0 : vector<32x32xf32>, i32 -> vector<32x32xf32>
    %c-1_i32_121 = arith.constant -1 : i32
    %265 = vector.broadcast %c-1_i32_121 : i32 to vector<32x1xi32>
    %266 = arith.addi %199, %265 : vector<32x1xi32>
    %c0_i32_122 = arith.constant 0 : i32
    %267 = vector.broadcast %c0_i32_122 : i32 to vector<32x1xi32>
    %268 = arith.cmpi sge, %266, %267 : vector<32x1xi32>
    %c16_i32_123 = arith.constant 16 : i32
    %269 = vector.broadcast %c16_i32_123 : i32 to vector<32x1xi32>
    %270 = arith.cmpi slt, %266, %269 : vector<32x1xi32>
    %271 = arith.andi %268, %270 : vector<32x1xi1>
    %cst_124 = arith.constant 0.000000e+00 : f32
    %272 = vector.shape_cast %271 : vector<32x1xi1> to vector<32x1xi1>
    %273 = vector.broadcast %272 : vector<32x1xi1> to vector<32x32xi1>
    %274 = vector.broadcast %cst_124 : f32 to vector<32x32xf32>
    %275 = arith.select %273, %264, %274 : vector<32x32xi1>, vector<32x32xf32>
    %c31_i32_125 = arith.constant 31 : i32
    %276 = tpu.dynamic_rotate %259 by %c31_i32_125 dim 0 : vector<32x32xf32>, i32 -> vector<32x32xf32>
    %c1_i32_126 = arith.constant 1 : i32
    %277 = vector.broadcast %c1_i32_126 : i32 to vector<32x1xi32>
    %278 = arith.addi %199, %277 : vector<32x1xi32>
    %c0_i32_127 = arith.constant 0 : i32
    %279 = vector.broadcast %c0_i32_127 : i32 to vector<32x1xi32>
    %280 = arith.cmpi sge, %278, %279 : vector<32x1xi32>
    %c16_i32_128 = arith.constant 16 : i32
    %281 = vector.broadcast %c16_i32_128 : i32 to vector<32x1xi32>
    %282 = arith.cmpi slt, %278, %281 : vector<32x1xi32>
    %283 = arith.andi %280, %282 : vector<32x1xi1>
    %cst_129 = arith.constant 0.000000e+00 : f32
    %284 = vector.shape_cast %283 : vector<32x1xi1> to vector<32x1xi1>
    %285 = vector.broadcast %284 : vector<32x1xi1> to vector<32x32xi1>
    %286 = vector.broadcast %cst_129 : f32 to vector<32x32xf32>
    %287 = arith.select %285, %276, %286 : vector<32x32xi1>, vector<32x32xf32>
    %288 = tpu.concatenate %275, %259, %287 in 1 : vector<32x32xf32>, vector<32x32xf32>, vector<32x32xf32> -> vector<32x96xf32>
    %cst_130 = arith.constant dense<0.000000e+00> : vector<32x32xf32>
    %289 = tpu.matmul %288, %261, %cst_130 {dimension_numbers = #tpu.dot_dimension_numbers<[1], [0], [0], [1], [0, 0, 1, 1], [], []>} : vector<32x96xf32>, vector<96x32xf32>, vector<32x32xf32> -> vector<32x32xf32>
    %290 = vector.broadcast %263 : vector<1x32xf32> to vector<32x32xf32>
    %291 = arith.addf %289, %290 : vector<32x32xf32>
    %cst_131 = arith.constant 0.000000e+00 : f32
    %292 = vector.broadcast %cst_131 : f32 to vector<32x32xf32>
    %293 = arith.maximumf %291, %292 : vector<32x32xf32>
    %c1_132 = arith.constant 1 : index
    %c0_133 = arith.constant 0 : index
    %c0_134 = arith.constant 0 : index
    %294 = vector.load %arg14[%c1_132, %c0_133, %c0_134] : memref<3x1x32xf32, #tpu.memory_space<vmem>>, vector<1x1x32xf32>
    %295 = vector.shape_cast %294 : vector<1x1x32xf32> to vector<1x32xf32>
    %c1_135 = arith.constant 1 : index
    %c0_136 = arith.constant 0 : index
    %c0_137 = arith.constant 0 : index
    %296 = vector.load %arg15[%c1_135, %c0_136, %c0_137] : memref<3x1x32xf32, #tpu.memory_space<vmem>>, vector<1x1x32xf32>
    %297 = vector.shape_cast %296 : vector<1x1x32xf32> to vector<1x32xf32>
    %cst_138 = arith.constant dense<0.000000e+00> : vector<32xf32>
    %298 = vector.multi_reduction <add>, %293, %cst_138 [1] : vector<32x32xf32> to vector<32xf32>
    %299 = vector.shape_cast %298 : vector<32xf32> to vector<32x1xf32>
    %cst_139 = arith.constant 3.200000e+01 : f32
    %300 = vector.broadcast %cst_139 : f32 to vector<32x1xf32>
    %301 = arith.divf %299, %300 : vector<32x1xf32>
    %302 = vector.broadcast %301 : vector<32x1xf32> to vector<32x32xf32>
    %303 = arith.subf %293, %302 : vector<32x32xf32>
    %304 = arith.mulf %303, %303 : vector<32x32xf32>
    %cst_140 = arith.constant dense<0.000000e+00> : vector<32xf32>
    %305 = vector.multi_reduction <add>, %304, %cst_140 [1] : vector<32x32xf32> to vector<32xf32>
    %306 = vector.shape_cast %305 : vector<32xf32> to vector<32x1xf32>
    %cst_141 = arith.constant 3.200000e+01 : f32
    %307 = vector.broadcast %cst_141 : f32 to vector<32x1xf32>
    %308 = arith.divf %306, %307 : vector<32x1xf32>
    %309 = vector.broadcast %301 : vector<32x1xf32> to vector<32x32xf32>
    %310 = arith.subf %293, %309 : vector<32x32xf32>
    %cst_142 = arith.constant 9.99999974E-6 : f32
    %311 = vector.broadcast %cst_142 : f32 to vector<32x1xf32>
    %312 = arith.addf %308, %311 : vector<32x1xf32>
    %313 = math.rsqrt %312 : vector<32x1xf32>
    %314 = vector.broadcast %313 : vector<32x1xf32> to vector<32x32xf32>
    %315 = arith.mulf %310, %314 : vector<32x32xf32>
    %316 = vector.broadcast %295 : vector<1x32xf32> to vector<32x32xf32>
    %317 = arith.mulf %315, %316 : vector<32x32xf32>
    %318 = vector.broadcast %297 : vector<1x32xf32> to vector<32x32xf32>
    %319 = arith.addf %317, %318 : vector<32x32xf32>
    %c1_143 = arith.constant 1 : index
    %c0_144 = arith.constant 0 : index
    %c0_145 = arith.constant 0 : index
    %320 = vector.load %arg16[%c1_143, %c0_144, %c0_145] : memref<3x32x1xf32, #tpu.memory_space<vmem>>, vector<1x32x1xf32>
    %321 = vector.shape_cast %320 : vector<1x32x1xf32> to vector<32x1xf32>
    %cst_146 = arith.constant dense<0.000000e+00> : vector<32x1xf32>
    %322 = tpu.matmul %319, %321, %cst_146 {dimension_numbers = #tpu.dot_dimension_numbers<[1], [0], [0], [1], [0, 0, 1, 1], [], []>} : vector<32x32xf32>, vector<32x1xf32>, vector<32x1xf32> -> vector<32x1xf32>
    %c1_147 = arith.constant 1 : index
    %c0_148 = arith.constant 0 : index
    %c0_149 = arith.constant 0 : index
    %323 = vector.load %arg17[%c1_147, %c0_148, %c0_149] : memref<3x1x1xf32, #tpu.memory_space<vmem>>, vector<1x1x1xf32>
    %324 = vector.shape_cast %323 : vector<1x1x1xf32> to vector<1x1xf32>
    %325 = vector.broadcast %324 : vector<1x1xf32> to vector<32x1xf32>
    %326 = arith.addf %322, %325 : vector<32x1xf32>
    %cst_150 = arith.constant 5.000000e-01 : f32
    %327 = vector.broadcast %cst_150 : f32 to vector<32x1xf32>
    %328 = arith.cmpf ogt, %181, %327 : vector<32x1xf32>
    %cst_151 = arith.constant 0.000000e+00 : f32
    %329 = vector.broadcast %cst_151 : f32 to vector<32x1xf32>
    %330 = arith.select %328, %329, %326 : vector<32x1xi1>, vector<32x1xf32>
    %c0_152 = arith.constant 0 : index
    %c0_153 = arith.constant 0 : index
    %331 = vector.load %arg24[%c0_152, %c0_153] : memref<32x1xf32, #tpu.memory_space<vmem>>, vector<32x1xf32>
    tpu.vector_store %arg24[%c0_152, %c0_153], %330 {strides = array<i32>} : memref<32x1xf32, #tpu.memory_space<vmem>>, vector<32x1xf32>,
    %c0_154 = arith.constant 0 : index
    %c0_155 = arith.constant 0 : index
    %332 = vector.load %arg4[%c0_154, %c0_155] : memref<32x1xf32, #tpu.memory_space<vmem>>, vector<32x1xf32>
    %c0_156 = arith.constant 0 : index
    %c0_157 = arith.constant 0 : index
    %333 = vector.load %arg19[%c0_156, %c0_157] : memref<1x7xf32, #tpu.memory_space<vmem>>, vector<1x7xf32>
    %334 = vector.broadcast %332 : vector<32x1xf32> to vector<32x7xf32>
    %335 = vector.broadcast %333 : vector<1x7xf32> to vector<32x7xf32>
    %336 = arith.cmpf oge, %334, %335 : vector<32x7xf32>
    %337 = arith.extui %336 : vector<32x7xi1> to vector<32x7xi32>
    %cst_158 = arith.constant dense<0> : vector<32xi32>
    %338 = vector.multi_reduction <add>, %337, %cst_158 [1] : vector<32x7xi32> to vector<32xi32>
    %339 = vector.shape_cast %338 : vector<32xi32> to vector<32x1xi32>
    %340 = vector.broadcast %339 : vector<32x1xi32> to vector<32x8xi32>
    %341 = arith.cmpi eq, %182, %340 : vector<32x8xi32>
    %342 = arith.extui %341 : vector<32x8xi1> to vector<32x8xi32>
    %343 = arith.sitofp %342 : vector<32x8xi32> to vector<32x8xf32>
    %c0_159 = arith.constant 0 : index
    %c0_160 = arith.constant 0 : index
    %344 = vector.load %arg18[%c0_159, %c0_160] : memref<8x32xf32, #tpu.memory_space<vmem>>, vector<8x32xf32>
    %cst_161 = arith.constant dense<0.000000e+00> : vector<32x32xf32>
    %345 = tpu.matmul %343, %344, %cst_161 {dimension_numbers = #tpu.dot_dimension_numbers<[1], [0], [0], [1], [0, 0, 1, 1], [], []>} : vector<32x8xf32>, vector<8x32xf32>, vector<32x32xf32> -> vector<32x32xf32>
    %346 = arith.addf %180, %345 : vector<32x32xf32>
    %347 = tpu.iota {dimensions = array<i32: 0>} : vector<32x1xi32>
    %c16_i32_162 = arith.constant 16 : i32
    %c0_i32_163 = arith.constant 0 : i32
    %348 = arith.cmpi eq, %c16_i32_162, %c0_i32_163 : i32
    %c1_i32_164 = arith.constant 1 : i32
    %349 = arith.select %348, %c1_i32_164, %c16_i32_162 : i32
    %350 = vector.broadcast %349 : i32 to vector<32x1xi32>
    %351 = arith.remsi %347, %350 : vector<32x1xi32>
    %c0_i32_165 = arith.constant 0 : i32
    %352 = vector.broadcast %c0_i32_165 : i32 to vector<32x1xi32>
    %353 = arith.cmpi ne, %351, %352 : vector<32x1xi32>
    %c0_i32_166 = arith.constant 0 : i32
    %354 = vector.broadcast %c0_i32_166 : i32 to vector<32x1xi32>
    %355 = arith.cmpi slt, %351, %354 : vector<32x1xi32>
    %c0_i32_167 = arith.constant 0 : i32
    %356 = arith.cmpi slt, %349, %c0_i32_167 : i32
    %357 = vector.broadcast %356 : i1 to vector<32x1xi1>
    %358 = vector.broadcast %357 : vector<32x1xi1> to vector<32x1xi1>
    %359 = arith.xori %355, %358 : vector<32x1xi1>
    %360 = arith.andi %359, %353 : vector<32x1xi1>
    %361 = vector.broadcast %349 : i32 to vector<32x1xi32>
    %362 = arith.addi %351, %361 : vector<32x1xi32>
    %363 = arith.select %360, %362, %351 : vector<32x1xi1>, vector<32x1xi32>
    %c2 = arith.constant 2 : index
    %c0_168 = arith.constant 0 : index
    %c0_169 = arith.constant 0 : index
    %364 = vector.load %arg8[%c2, %c0_168, %c0_169] : memref<3x96x32xf32, #tpu.memory_space<vmem>>, vector<1x96x32xf32>
    %365 = vector.shape_cast %364 : vector<1x96x32xf32> to vector<96x32xf32>
    %c2_170 = arith.constant 2 : index
    %c0_171 = arith.constant 0 : index
    %c0_172 = arith.constant 0 : index
    %366 = vector.load %arg9[%c2_170, %c0_171, %c0_172] : memref<3x1x32xf32, #tpu.memory_space<vmem>>, vector<1x1x32xf32>
    %367 = vector.shape_cast %366 : vector<1x1x32xf32> to vector<1x32xf32>
    %c1_i32_173 = arith.constant 1 : i32
    %368 = tpu.dynamic_rotate %346 by %c1_i32_173 dim 0 : vector<32x32xf32>, i32 -> vector<32x32xf32>
    %c-1_i32_174 = arith.constant -1 : i32
    %369 = vector.broadcast %c-1_i32_174 : i32 to vector<32x1xi32>
    %370 = arith.addi %363, %369 : vector<32x1xi32>
    %c0_i32_175 = arith.constant 0 : i32
    %371 = vector.broadcast %c0_i32_175 : i32 to vector<32x1xi32>
    %372 = arith.cmpi sge, %370, %371 : vector<32x1xi32>
    %c16_i32_176 = arith.constant 16 : i32
    %373 = vector.broadcast %c16_i32_176 : i32 to vector<32x1xi32>
    %374 = arith.cmpi slt, %370, %373 : vector<32x1xi32>
    %375 = arith.andi %372, %374 : vector<32x1xi1>
    %cst_177 = arith.constant 0.000000e+00 : f32
    %376 = vector.shape_cast %375 : vector<32x1xi1> to vector<32x1xi1>
    %377 = vector.broadcast %376 : vector<32x1xi1> to vector<32x32xi1>
    %378 = vector.broadcast %cst_177 : f32 to vector<32x32xf32>
    %379 = arith.select %377, %368, %378 : vector<32x32xi1>, vector<32x32xf32>
    %c31_i32_178 = arith.constant 31 : i32
    %380 = tpu.dynamic_rotate %346 by %c31_i32_178 dim 0 : vector<32x32xf32>, i32 -> vector<32x32xf32>
    %c1_i32_179 = arith.constant 1 : i32
    %381 = vector.broadcast %c1_i32_179 : i32 to vector<32x1xi32>
    %382 = arith.addi %363, %381 : vector<32x1xi32>
    %c0_i32_180 = arith.constant 0 : i32
    %383 = vector.broadcast %c0_i32_180 : i32 to vector<32x1xi32>
    %384 = arith.cmpi sge, %382, %383 : vector<32x1xi32>
    %c16_i32_181 = arith.constant 16 : i32
    %385 = vector.broadcast %c16_i32_181 : i32 to vector<32x1xi32>
    %386 = arith.cmpi slt, %382, %385 : vector<32x1xi32>
    %387 = arith.andi %384, %386 : vector<32x1xi1>
    %cst_182 = arith.constant 0.000000e+00 : f32
    %388 = vector.shape_cast %387 : vector<32x1xi1> to vector<32x1xi1>
    %389 = vector.broadcast %388 : vector<32x1xi1> to vector<32x32xi1>
    %390 = vector.broadcast %cst_182 : f32 to vector<32x32xf32>
    %391 = arith.select %389, %380, %390 : vector<32x32xi1>, vector<32x32xf32>
    %392 = tpu.concatenate %379, %346, %391 in 1 : vector<32x32xf32>, vector<32x32xf32>, vector<32x32xf32> -> vector<32x96xf32>
    %cst_183 = arith.constant dense<0.000000e+00> : vector<32x32xf32>
    %393 = tpu.matmul %392, %365, %cst_183 {dimension_numbers = #tpu.dot_dimension_numbers<[1], [0], [0], [1], [0, 0, 1, 1], [], []>} : vector<32x96xf32>, vector<96x32xf32>, vector<32x32xf32> -> vector<32x32xf32>
    %394 = vector.broadcast %367 : vector<1x32xf32> to vector<32x32xf32>
    %395 = arith.addf %393, %394 : vector<32x32xf32>
    %cst_184 = arith.constant 0.000000e+00 : f32
    %396 = vector.broadcast %cst_184 : f32 to vector<32x32xf32>
    %397 = arith.maximumf %395, %396 : vector<32x32xf32>
    %c2_185 = arith.constant 2 : index
    %c0_186 = arith.constant 0 : index
    %c0_187 = arith.constant 0 : index
    %398 = vector.load %arg10[%c2_185, %c0_186, %c0_187] : memref<3x1x32xf32, #tpu.memory_space<vmem>>, vector<1x1x32xf32>
    %399 = vector.shape_cast %398 : vector<1x1x32xf32> to vector<1x32xf32>
    %c2_188 = arith.constant 2 : index
    %c0_189 = arith.constant 0 : index
    %c0_190 = arith.constant 0 : index
    %400 = vector.load %arg11[%c2_188, %c0_189, %c0_190] : memref<3x1x32xf32, #tpu.memory_space<vmem>>, vector<1x1x32xf32>
    %401 = vector.shape_cast %400 : vector<1x1x32xf32> to vector<1x32xf32>
    %cst_191 = arith.constant dense<0.000000e+00> : vector<32xf32>
    %402 = vector.multi_reduction <add>, %397, %cst_191 [1] : vector<32x32xf32> to vector<32xf32>
    %403 = vector.shape_cast %402 : vector<32xf32> to vector<32x1xf32>
    %cst_192 = arith.constant 3.200000e+01 : f32
    %404 = vector.broadcast %cst_192 : f32 to vector<32x1xf32>
    %405 = arith.divf %403, %404 : vector<32x1xf32>
    %406 = vector.broadcast %405 : vector<32x1xf32> to vector<32x32xf32>
    %407 = arith.subf %397, %406 : vector<32x32xf32>
    %408 = arith.mulf %407, %407 : vector<32x32xf32>
    %cst_193 = arith.constant dense<0.000000e+00> : vector<32xf32>
    %409 = vector.multi_reduction <add>, %408, %cst_193 [1] : vector<32x32xf32> to vector<32xf32>
    %410 = vector.shape_cast %409 : vector<32xf32> to vector<32x1xf32>
    %cst_194 = arith.constant 3.200000e+01 : f32
    %411 = vector.broadcast %cst_194 : f32 to vector<32x1xf32>
    %412 = arith.divf %410, %411 : vector<32x1xf32>
    %413 = vector.broadcast %405 : vector<32x1xf32> to vector<32x32xf32>
    %414 = arith.subf %397, %413 : vector<32x32xf32>
    %cst_195 = arith.constant 9.99999974E-6 : f32
    %415 = vector.broadcast %cst_195 : f32 to vector<32x1xf32>
    %416 = arith.addf %412, %415 : vector<32x1xf32>
    %417 = math.rsqrt %416 : vector<32x1xf32>
    %418 = vector.broadcast %417 : vector<32x1xf32> to vector<32x32xf32>
    %419 = arith.mulf %414, %418 : vector<32x32xf32>
    %420 = vector.broadcast %399 : vector<1x32xf32> to vector<32x32xf32>
    %421 = arith.mulf %419, %420 : vector<32x32xf32>
    %422 = vector.broadcast %401 : vector<1x32xf32> to vector<32x32xf32>
    %423 = arith.addf %421, %422 : vector<32x32xf32>
    %c2_196 = arith.constant 2 : index
    %c0_197 = arith.constant 0 : index
    %c0_198 = arith.constant 0 : index
    %424 = vector.load %arg12[%c2_196, %c0_197, %c0_198] : memref<3x96x32xf32, #tpu.memory_space<vmem>>, vector<1x96x32xf32>
    %425 = vector.shape_cast %424 : vector<1x96x32xf32> to vector<96x32xf32>
    %c2_199 = arith.constant 2 : index
    %c0_200 = arith.constant 0 : index
    %c0_201 = arith.constant 0 : index
    %426 = vector.load %arg13[%c2_199, %c0_200, %c0_201] : memref<3x1x32xf32, #tpu.memory_space<vmem>>, vector<1x1x32xf32>
    %427 = vector.shape_cast %426 : vector<1x1x32xf32> to vector<1x32xf32>
    %c1_i32_202 = arith.constant 1 : i32
    %428 = tpu.dynamic_rotate %423 by %c1_i32_202 dim 0 : vector<32x32xf32>, i32 -> vector<32x32xf32>
    %c-1_i32_203 = arith.constant -1 : i32
    %429 = vector.broadcast %c-1_i32_203 : i32 to vector<32x1xi32>
    %430 = arith.addi %363, %429 : vector<32x1xi32>
    %c0_i32_204 = arith.constant 0 : i32
    %431 = vector.broadcast %c0_i32_204 : i32 to vector<32x1xi32>
    %432 = arith.cmpi sge, %430, %431 : vector<32x1xi32>
    %c16_i32_205 = arith.constant 16 : i32
    %433 = vector.broadcast %c16_i32_205 : i32 to vector<32x1xi32>
    %434 = arith.cmpi slt, %430, %433 : vector<32x1xi32>
    %435 = arith.andi %432, %434 : vector<32x1xi1>
    %cst_206 = arith.constant 0.000000e+00 : f32
    %436 = vector.shape_cast %435 : vector<32x1xi1> to vector<32x1xi1>
    %437 = vector.broadcast %436 : vector<32x1xi1> to vector<32x32xi1>
    %438 = vector.broadcast %cst_206 : f32 to vector<32x32xf32>
    %439 = arith.select %437, %428, %438 : vector<32x32xi1>, vector<32x32xf32>
    %c31_i32_207 = arith.constant 31 : i32
    %440 = tpu.dynamic_rotate %423 by %c31_i32_207 dim 0 : vector<32x32xf32>, i32 -> vector<32x32xf32>
    %c1_i32_208 = arith.constant 1 : i32
    %441 = vector.broadcast %c1_i32_208 : i32 to vector<32x1xi32>
    %442 = arith.addi %363, %441 : vector<32x1xi32>
    %c0_i32_209 = arith.constant 0 : i32
    %443 = vector.broadcast %c0_i32_209 : i32 to vector<32x1xi32>
    %444 = arith.cmpi sge, %442, %443 : vector<32x1xi32>
    %c16_i32_210 = arith.constant 16 : i32
    %445 = vector.broadcast %c16_i32_210 : i32 to vector<32x1xi32>
    %446 = arith.cmpi slt, %442, %445 : vector<32x1xi32>
    %447 = arith.andi %444, %446 : vector<32x1xi1>
    %cst_211 = arith.constant 0.000000e+00 : f32
    %448 = vector.shape_cast %447 : vector<32x1xi1> to vector<32x1xi1>
    %449 = vector.broadcast %448 : vector<32x1xi1> to vector<32x32xi1>
    %450 = vector.broadcast %cst_211 : f32 to vector<32x32xf32>
    %451 = arith.select %449, %440, %450 : vector<32x32xi1>, vector<32x32xf32>
    %452 = tpu.concatenate %439, %423, %451 in 1 : vector<32x32xf32>, vector<32x32xf32>, vector<32x32xf32> -> vector<32x96xf32>
    %cst_212 = arith.constant dense<0.000000e+00> : vector<32x32xf32>
    %453 = tpu.matmul %452, %425, %cst_212 {dimension_numbers = #tpu.dot_dimension_numbers<[1], [0], [0], [1], [0, 0, 1, 1], [], []>} : vector<32x96xf32>, vector<96x32xf32>, vector<32x32xf32> -> vector<32x32xf32>
    %454 = vector.broadcast %427 : vector<1x32xf32> to vector<32x32xf32>
    %455 = arith.addf %453, %454 : vector<32x32xf32>
    %cst_213 = arith.constant 0.000000e+00 : f32
    %456 = vector.broadcast %cst_213 : f32 to vector<32x32xf32>
    %457 = arith.maximumf %455, %456 : vector<32x32xf32>
    %c2_214 = arith.constant 2 : index
    %c0_215 = arith.constant 0 : index
    %c0_216 = arith.constant 0 : index
    %458 = vector.load %arg14[%c2_214, %c0_215, %c0_216] : memref<3x1x32xf32, #tpu.memory_space<vmem>>, vector<1x1x32xf32>
    %459 = vector.shape_cast %458 : vector<1x1x32xf32> to vector<1x32xf32>
    %c2_217 = arith.constant 2 : index
    %c0_218 = arith.constant 0 : index
    %c0_219 = arith.constant 0 : index
    %460 = vector.load %arg15[%c2_217, %c0_218, %c0_219] : memref<3x1x32xf32, #tpu.memory_space<vmem>>, vector<1x1x32xf32>
    %461 = vector.shape_cast %460 : vector<1x1x32xf32> to vector<1x32xf32>
    %cst_220 = arith.constant dense<0.000000e+00> : vector<32xf32>
    %462 = vector.multi_reduction <add>, %457, %cst_220 [1] : vector<32x32xf32> to vector<32xf32>
    %463 = vector.shape_cast %462 : vector<32xf32> to vector<32x1xf32>
    %cst_221 = arith.constant 3.200000e+01 : f32
    %464 = vector.broadcast %cst_221 : f32 to vector<32x1xf32>
    %465 = arith.divf %463, %464 : vector<32x1xf32>
    %466 = vector.broadcast %465 : vector<32x1xf32> to vector<32x32xf32>
    %467 = arith.subf %457, %466 : vector<32x32xf32>
    %468 = arith.mulf %467, %467 : vector<32x32xf32>
    %cst_222 = arith.constant dense<0.000000e+00> : vector<32xf32>
    %469 = vector.multi_reduction <add>, %468, %cst_222 [1] : vector<32x32xf32> to vector<32xf32>
    %470 = vector.shape_cast %469 : vector<32xf32> to vector<32x1xf32>
    %cst_223 = arith.constant 3.200000e+01 : f32
    %471 = vector.broadcast %cst_223 : f32 to vector<32x1xf32>
    %472 = arith.divf %470, %471 : vector<32x1xf32>
    %473 = vector.broadcast %465 : vector<32x1xf32> to vector<32x32xf32>
    %474 = arith.subf %457, %473 : vector<32x32xf32>
    %cst_224 = arith.constant 9.99999974E-6 : f32
    %475 = vector.broadcast %cst_224 : f32 to vector<32x1xf32>
    %476 = arith.addf %472, %475 : vector<32x1xf32>
    %477 = math.rsqrt %476 : vector<32x1xf32>
    %478 = vector.broadcast %477 : vector<32x1xf32> to vector<32x32xf32>
    %479 = arith.mulf %474, %478 : vector<32x32xf32>
    %480 = vector.broadcast %459 : vector<1x32xf32> to vector<32x32xf32>
    %481 = arith.mulf %479, %480 : vector<32x32xf32>
    %482 = vector.broadcast %461 : vector<1x32xf32> to vector<32x32xf32>
    %483 = arith.addf %481, %482 : vector<32x32xf32>
    %c2_225 = arith.constant 2 : index
    %c0_226 = arith.constant 0 : index
    %c0_227 = arith.constant 0 : index
    %484 = vector.load %arg16[%c2_225, %c0_226, %c0_227] : memref<3x32x1xf32, #tpu.memory_space<vmem>>, vector<1x32x1xf32>
    %485 = vector.shape_cast %484 : vector<1x32x1xf32> to vector<32x1xf32>
    %cst_228 = arith.constant dense<0.000000e+00> : vector<32x1xf32>
    %486 = tpu.matmul %483, %485, %cst_228 {dimension_numbers = #tpu.dot_dimension_numbers<[1], [0], [0], [1], [0, 0, 1, 1], [], []>} : vector<32x32xf32>, vector<32x1xf32>, vector<32x1xf32> -> vector<32x1xf32>
    %c2_229 = arith.constant 2 : index
    %c0_230 = arith.constant 0 : index
    %c0_231 = arith.constant 0 : index
    %487 = vector.load %arg17[%c2_229, %c0_230, %c0_231] : memref<3x1x1xf32, #tpu.memory_space<vmem>>, vector<1x1x1xf32>
    %488 = vector.shape_cast %487 : vector<1x1x1xf32> to vector<1x1xf32>
    %489 = vector.broadcast %488 : vector<1x1xf32> to vector<32x1xf32>
    %490 = arith.addf %486, %489 : vector<32x1xf32>
    %cst_232 = arith.constant 5.000000e-01 : f32
    %491 = vector.broadcast %cst_232 : f32 to vector<32x1xf32>
    %492 = arith.cmpf ogt, %181, %491 : vector<32x1xf32>
    %cst_233 = arith.constant 0.000000e+00 : f32
    %493 = vector.broadcast %cst_233 : f32 to vector<32x1xf32>
    %494 = arith.select %492, %493, %490 : vector<32x1xi1>, vector<32x1xf32>
    %c0_234 = arith.constant 0 : index
    %c0_235 = arith.constant 0 : index
    %495 = vector.load %arg25[%c0_234, %c0_235] : memref<32x1xf32, #tpu.memory_space<vmem>>, vector<32x1xf32>
    tpu.vector_store %arg25[%c0_234, %c0_235], %494 {strides = array<i32>} : memref<32x1xf32, #tpu.memory_space<vmem>>, vector<32x1xf32>,
    %c0_236 = arith.constant 0 : index
    %c0_237 = arith.constant 0 : index
    %496 = vector.load %arg5[%c0_236, %c0_237] : memref<32x1xf32, #tpu.memory_space<vmem>>, vector<32x1xf32>
    %c0_238 = arith.constant 0 : index
    %c0_239 = arith.constant 0 : index
    %497 = vector.load %arg21[%c0_238, %c0_239] : memref<1x7xf32, #tpu.memory_space<vmem>>, vector<1x7xf32>
    %498 = vector.broadcast %496 : vector<32x1xf32> to vector<32x7xf32>
    %499 = vector.broadcast %497 : vector<1x7xf32> to vector<32x7xf32>
    %500 = arith.cmpf oge, %498, %499 : vector<32x7xf32>
    %501 = arith.extui %500 : vector<32x7xi1> to vector<32x7xi32>
    %cst_240 = arith.constant dense<0> : vector<32xi32>
    %502 = vector.multi_reduction <add>, %501, %cst_240 [1] : vector<32x7xi32> to vector<32xi32>
    %503 = vector.shape_cast %502 : vector<32xi32> to vector<32x1xi32>
    %504 = vector.broadcast %503 : vector<32x1xi32> to vector<32x8xi32>
    %505 = arith.cmpi eq, %182, %504 : vector<32x8xi32>
    %506 = arith.extui %505 : vector<32x8xi1> to vector<32x8xi32>
    %507 = arith.sitofp %506 : vector<32x8xi32> to vector<32x8xf32>
    %c0_241 = arith.constant 0 : index
    %c0_242 = arith.constant 0 : index
    %508 = vector.load %arg20[%c0_241, %c0_242] : memref<8x32xf32, #tpu.memory_space<vmem>>, vector<8x32xf32>
    %cst_243 = arith.constant dense<0.000000e+00> : vector<32x32xf32>
    %509 = tpu.matmul %507, %508, %cst_243 {dimension_numbers = #tpu.dot_dimension_numbers<[1], [0], [0], [1], [0, 0, 1, 1], [], []>} : vector<32x8xf32>, vector<8x32xf32>, vector<32x32xf32> -> vector<32x32xf32>
    %510 = arith.addf %346, %509 : vector<32x32xf32>
    %c0_244 = arith.constant 0 : index
    %c0_245 = arith.constant 0 : index
    %511 = vector.load %arg22[%c0_244, %c0_245] : memref<32x32xf32, #tpu.memory_space<vmem>>, vector<32x32xf32>
    tpu.vector_store %arg22[%c0_244, %c0_245], %510 {strides = array<i32>} : memref<32x32xf32, #tpu.memory_space<vmem>>, vector<32x32xf32>,
    return
  }
}

module attributes {stable_mosaic.version = 11 : i64} {
  func.func @_decoder_kernel(%arg0: memref<32x32xf32, #tpu.memory_space<vmem>>, %arg1: memref<32x32xf32, #tpu.memory_space<vmem>>, %arg2: memref<2x1x16xf32, #tpu.memory_space<vmem>>, %arg3: memref<32x1xf32, #tpu.memory_space<vmem>>, %arg4: memref<2x32x96xf32, #tpu.memory_space<vmem>>, %arg5: memref<2x1x96xf32, #tpu.memory_space<vmem>>, %arg6: memref<2x32x32xf32, #tpu.memory_space<vmem>>, %arg7: memref<2x1x32xf32, #tpu.memory_space<vmem>>, %arg8: memref<2x1x32xf32, #tpu.memory_space<vmem>>, %arg9: memref<2x1x32xf32, #tpu.memory_space<vmem>>, %arg10: memref<2x288x64xf32, #tpu.memory_space<vmem>>, %arg11: memref<2x1x64xf32, #tpu.memory_space<vmem>>, %arg12: memref<2x64x32xf32, #tpu.memory_space<vmem>>, %arg13: memref<2x1x32xf32, #tpu.memory_space<vmem>>, %arg14: memref<2x1x32xf32, #tpu.memory_space<vmem>>, %arg15: memref<2x1x32xf32, #tpu.memory_space<vmem>>, %arg16: memref<32x20xf32, #tpu.memory_space<vmem>>, %arg17: memref<1x20xf32, #tpu.memory_space<vmem>>, %arg18: memref<32x20xf32, #tpu.memory_space<vmem>>) attributes {dimension_semantics = [], scalar_prefetch = 0 : i64, scratch_operands = 0 : i64, tpu.core_type = #tpu.core_type<tc>} {
    %c0 = arith.constant 0 : index
    %c0_0 = arith.constant 0 : index
    %0 = vector.load %arg0[%c0, %c0_0] : memref<32x32xf32, #tpu.memory_space<vmem>>, vector<32x32xf32>
    %c0_1 = arith.constant 0 : index
    %c0_2 = arith.constant 0 : index
    %1 = vector.load %arg1[%c0_1, %c0_2] : memref<32x32xf32, #tpu.memory_space<vmem>>, vector<32x32xf32>
    %2 = arith.addf %0, %1 : vector<32x32xf32>
    %c0_3 = arith.constant 0 : index
    %c0_4 = arith.constant 0 : index
    %3 = vector.load %arg3[%c0_3, %c0_4] : memref<32x1xf32, #tpu.memory_space<vmem>>, vector<32x1xf32>
    %cst = arith.constant 5.000000e-01 : f32
    %4 = vector.broadcast %cst : f32 to vector<32x1xf32>
    %5 = arith.cmpf ogt, %3, %4 : vector<32x1xf32>
    %6 = tpu.iota {dimensions = array<i32: 0>} : vector<32x1xi32>
    %c16_i32 = arith.constant 16 : i32
    %c0_i32 = arith.constant 0 : i32
    %7 = arith.cmpi eq, %c16_i32, %c0_i32 : i32
    %c1_i32 = arith.constant 1 : i32
    %8 = arith.select %7, %c1_i32, %c16_i32 : i32
    %9 = vector.broadcast %8 : i32 to vector<32x1xi32>
    %10 = arith.remsi %6, %9 : vector<32x1xi32>
    %c0_i32_5 = arith.constant 0 : i32
    %11 = vector.broadcast %c0_i32_5 : i32 to vector<32x1xi32>
    %12 = arith.cmpi ne, %10, %11 : vector<32x1xi32>
    %c0_i32_6 = arith.constant 0 : i32
    %13 = vector.broadcast %c0_i32_6 : i32 to vector<32x1xi32>
    %14 = arith.cmpi slt, %10, %13 : vector<32x1xi32>
    %c0_i32_7 = arith.constant 0 : i32
    %15 = arith.cmpi slt, %8, %c0_i32_7 : i32
    %16 = vector.broadcast %15 : i1 to vector<32x1xi1>
    %17 = vector.broadcast %16 : vector<32x1xi1> to vector<32x1xi1>
    %18 = arith.xori %14, %17 : vector<32x1xi1>
    %19 = arith.andi %18, %12 : vector<32x1xi1>
    %20 = vector.broadcast %8 : i32 to vector<32x1xi32>
    %21 = arith.addi %10, %20 : vector<32x1xi32>
    %22 = arith.select %19, %21, %10 : vector<32x1xi1>, vector<32x1xi32>
    %c0_8 = arith.constant 0 : index
    %c0_9 = arith.constant 0 : index
    %c0_10 = arith.constant 0 : index
    %23 = vector.load %arg2[%c0_8, %c0_9, %c0_10] : memref<2x1x16xf32, #tpu.memory_space<vmem>>, vector<1x1x16xf32>
    %24 = vector.shape_cast %23 : vector<1x1x16xf32> to vector<1x16xf32>
    %cst_11 = arith.constant 5.000000e-01 : f32
    %25 = vector.broadcast %cst_11 : f32 to vector<1x16xf32>
    %26 = arith.cmpf ogt, %24, %25 : vector<1x16xf32>
    %c1 = arith.constant 1 : index
    %c0_12 = arith.constant 0 : index
    %c0_13 = arith.constant 0 : index
    %27 = vector.load %arg2[%c1, %c0_12, %c0_13] : memref<2x1x16xf32, #tpu.memory_space<vmem>>, vector<1x1x16xf32>
    %28 = vector.shape_cast %27 : vector<1x1x16xf32> to vector<1x16xf32>
    %cst_14 = arith.constant 5.000000e-01 : f32
    %29 = vector.broadcast %cst_14 : f32 to vector<1x16xf32>
    %30 = arith.cmpf ogt, %28, %29 : vector<1x16xf32>
    %c0_15 = arith.constant 0 : index
    %c0_16 = arith.constant 0 : index
    %c0_17 = arith.constant 0 : index
    %31 = vector.load %arg4[%c0_15, %c0_16, %c0_17] : memref<2x32x96xf32, #tpu.memory_space<vmem>>, vector<1x32x96xf32>
    %32 = vector.shape_cast %31 : vector<1x32x96xf32> to vector<32x96xf32>
    %c0_18 = arith.constant 0 : index
    %c0_19 = arith.constant 0 : index
    %c0_20 = arith.constant 0 : index
    %33 = vector.load %arg5[%c0_18, %c0_19, %c0_20] : memref<2x1x96xf32, #tpu.memory_space<vmem>>, vector<1x1x96xf32>
    %34 = vector.shape_cast %33 : vector<1x1x96xf32> to vector<1x96xf32>
    %c0_21 = arith.constant 0 : index
    %c0_22 = arith.constant 0 : index
    %c0_23 = arith.constant 0 : index
    %35 = vector.load %arg6[%c0_21, %c0_22, %c0_23] : memref<2x32x32xf32, #tpu.memory_space<vmem>>, vector<1x32x32xf32>
    %36 = vector.shape_cast %35 : vector<1x32x32xf32> to vector<32x32xf32>
    %c0_24 = arith.constant 0 : index
    %c0_25 = arith.constant 0 : index
    %c0_26 = arith.constant 0 : index
    %37 = vector.load %arg7[%c0_24, %c0_25, %c0_26] : memref<2x1x32xf32, #tpu.memory_space<vmem>>, vector<1x1x32xf32>
    %38 = vector.shape_cast %37 : vector<1x1x32xf32> to vector<1x32xf32>
    %c0_27 = arith.constant 0 : index
    %c0_28 = arith.constant 0 : index
    %c0_29 = arith.constant 0 : index
    %39 = vector.load %arg8[%c0_27, %c0_28, %c0_29] : memref<2x1x32xf32, #tpu.memory_space<vmem>>, vector<1x1x32xf32>
    %40 = vector.shape_cast %39 : vector<1x1x32xf32> to vector<1x32xf32>
    %c0_30 = arith.constant 0 : index
    %c0_31 = arith.constant 0 : index
    %c0_32 = arith.constant 0 : index
    %41 = vector.load %arg9[%c0_30, %c0_31, %c0_32] : memref<2x1x32xf32, #tpu.memory_space<vmem>>, vector<1x1x32xf32>
    %42 = vector.shape_cast %41 : vector<1x1x32xf32> to vector<1x32xf32>
    %c0_33 = arith.constant 0 : index
    %c0_34 = arith.constant 0 : index
    %c0_35 = arith.constant 0 : index
    %43 = vector.load %arg10[%c0_33, %c0_34, %c0_35] : memref<2x288x64xf32, #tpu.memory_space<vmem>>, vector<1x288x64xf32>
    %44 = vector.shape_cast %43 : vector<1x288x64xf32> to vector<288x64xf32>
    %c0_36 = arith.constant 0 : index
    %c0_37 = arith.constant 0 : index
    %c0_38 = arith.constant 0 : index
    %45 = vector.load %arg11[%c0_36, %c0_37, %c0_38] : memref<2x1x64xf32, #tpu.memory_space<vmem>>, vector<1x1x64xf32>
    %46 = vector.shape_cast %45 : vector<1x1x64xf32> to vector<1x64xf32>
    %c0_39 = arith.constant 0 : index
    %c0_40 = arith.constant 0 : index
    %c0_41 = arith.constant 0 : index
    %47 = vector.load %arg12[%c0_39, %c0_40, %c0_41] : memref<2x64x32xf32, #tpu.memory_space<vmem>>, vector<1x64x32xf32>
    %48 = vector.shape_cast %47 : vector<1x64x32xf32> to vector<64x32xf32>
    %c0_42 = arith.constant 0 : index
    %c0_43 = arith.constant 0 : index
    %c0_44 = arith.constant 0 : index
    %49 = vector.load %arg13[%c0_42, %c0_43, %c0_44] : memref<2x1x32xf32, #tpu.memory_space<vmem>>, vector<1x1x32xf32>
    %50 = vector.shape_cast %49 : vector<1x1x32xf32> to vector<1x32xf32>
    %c0_45 = arith.constant 0 : index
    %c0_46 = arith.constant 0 : index
    %c0_47 = arith.constant 0 : index
    %51 = vector.load %arg14[%c0_45, %c0_46, %c0_47] : memref<2x1x32xf32, #tpu.memory_space<vmem>>, vector<1x1x32xf32>
    %52 = vector.shape_cast %51 : vector<1x1x32xf32> to vector<1x32xf32>
    %c0_48 = arith.constant 0 : index
    %c0_49 = arith.constant 0 : index
    %c0_50 = arith.constant 0 : index
    %53 = vector.load %arg15[%c0_48, %c0_49, %c0_50] : memref<2x1x32xf32, #tpu.memory_space<vmem>>, vector<1x1x32xf32>
    %54 = vector.shape_cast %53 : vector<1x1x32xf32> to vector<1x32xf32>
    %cst_51 = arith.constant dense<0.000000e+00> : vector<32x96xf32>
    %55 = tpu.matmul %2, %32, %cst_51 {dimension_numbers = #tpu.dot_dimension_numbers<[1], [0], [0], [1], [0, 0, 1, 1], [], []>} : vector<32x32xf32>, vector<32x96xf32>, vector<32x96xf32> -> vector<32x96xf32>
    %56 = vector.broadcast %34 : vector<1x96xf32> to vector<32x96xf32>
    %57 = arith.addf %55, %56 : vector<32x96xf32>
    %58 = vector.extract_strided_slice %57 {offsets = [0, 0], sizes = [16, 96], strides = [1, 1]} : vector<32x96xf32> to vector<16x96xf32>
    %59 = vector.extract_strided_slice %58 {offsets = [0, 0], sizes = [16, 16], strides = [1, 1]} : vector<16x96xf32> to vector<16x16xf32>
    %60 = vector.extract_strided_slice %58 {offsets = [0, 32], sizes = [16, 16], strides = [1, 1]} : vector<16x96xf32> to vector<16x16xf32>
    %61 = vector.extract_strided_slice %58 {offsets = [0, 64], sizes = [16, 16], strides = [1, 1]} : vector<16x96xf32> to vector<16x16xf32>
    %cst_52 = arith.constant dense<0.000000e+00> : vector<16x16xf32>
    %62 = tpu.matmul %59, %60, %cst_52 {dimension_numbers = #tpu.dot_dimension_numbers<[1], [1], [0], [0], [0, 0, 1, 0], [], []>} : vector<16x16xf32>, vector<16x16xf32>, vector<16x16xf32> -> vector<16x16xf32>
    %cst_53 = arith.constant 2.500000e-01 : f32
    %63 = vector.broadcast %cst_53 : f32 to vector<16x16xf32>
    %64 = arith.mulf %62, %63 : vector<16x16xf32>
    %cst_54 = arith.constant -1.000000e+09 : f32
    %65 = vector.shape_cast %26 : vector<1x16xi1> to vector<1x16xi1>
    %66 = vector.broadcast %65 : vector<1x16xi1> to vector<16x16xi1>
    %67 = vector.broadcast %cst_54 : f32 to vector<16x16xf32>
    %68 = arith.select %66, %67, %64 : vector<16x16xi1>, vector<16x16xf32>
    %cst_55 = arith.constant dense<0xFF800000> : vector<16xf32>
    %69 = vector.multi_reduction <maximumf>, %68, %cst_55 [1] : vector<16x16xf32> to vector<16xf32>
    %70 = vector.shape_cast %69 : vector<16xf32> to vector<16x1xf32>
    %71 = vector.broadcast %70 : vector<16x1xf32> to vector<16x16xf32>
    %72 = arith.subf %68, %71 : vector<16x16xf32>
    %73 = math.exp %72 : vector<16x16xf32>
    %cst_56 = arith.constant dense<0.000000e+00> : vector<16xf32>
    %74 = vector.multi_reduction <add>, %73, %cst_56 [1] : vector<16x16xf32> to vector<16xf32>
    %75 = vector.shape_cast %74 : vector<16xf32> to vector<16x1xf32>
    %76 = tpu.reciprocal %75 {approx = true} : vector<16x1xf32> -> vector<16x1xf32>
    %77 = vector.broadcast %76 : vector<16x1xf32> to vector<16x16xf32>
    %78 = arith.mulf %73, %77 : vector<16x16xf32>
    %cst_57 = arith.constant dense<0.000000e+00> : vector<16x16xf32>
    %79 = tpu.matmul %78, %61, %cst_57 {dimension_numbers = #tpu.dot_dimension_numbers<[1], [0], [0], [1], [0, 0, 1, 1], [], []>} : vector<16x16xf32>, vector<16x16xf32>, vector<16x16xf32> -> vector<16x16xf32>
    %80 = vector.extract_strided_slice %36 {offsets = [0, 0], sizes = [16, 32], strides = [1, 1]} : vector<32x32xf32> to vector<16x32xf32>
    %cst_58 = arith.constant dense<0.000000e+00> : vector<16x32xf32>
    %81 = tpu.matmul %79, %80, %cst_58 {dimension_numbers = #tpu.dot_dimension_numbers<[1], [0], [0], [1], [0, 0, 1, 1], [], []>} : vector<16x16xf32>, vector<16x32xf32>, vector<16x32xf32> -> vector<16x32xf32>
    %82 = vector.extract_strided_slice %58 {offsets = [0, 16], sizes = [16, 16], strides = [1, 1]} : vector<16x96xf32> to vector<16x16xf32>
    %83 = vector.extract_strided_slice %58 {offsets = [0, 48], sizes = [16, 16], strides = [1, 1]} : vector<16x96xf32> to vector<16x16xf32>
    %84 = vector.extract_strided_slice %58 {offsets = [0, 80], sizes = [16, 16], strides = [1, 1]} : vector<16x96xf32> to vector<16x16xf32>
    %cst_59 = arith.constant dense<0.000000e+00> : vector<16x16xf32>
    %85 = tpu.matmul %82, %83, %cst_59 {dimension_numbers = #tpu.dot_dimension_numbers<[1], [1], [0], [0], [0, 0, 1, 0], [], []>} : vector<16x16xf32>, vector<16x16xf32>, vector<16x16xf32> -> vector<16x16xf32>
    %cst_60 = arith.constant 2.500000e-01 : f32
    %86 = vector.broadcast %cst_60 : f32 to vector<16x16xf32>
    %87 = arith.mulf %85, %86 : vector<16x16xf32>
    %cst_61 = arith.constant -1.000000e+09 : f32
    %88 = vector.shape_cast %26 : vector<1x16xi1> to vector<1x16xi1>
    %89 = vector.broadcast %88 : vector<1x16xi1> to vector<16x16xi1>
    %90 = vector.broadcast %cst_61 : f32 to vector<16x16xf32>
    %91 = arith.select %89, %90, %87 : vector<16x16xi1>, vector<16x16xf32>
    %cst_62 = arith.constant dense<0xFF800000> : vector<16xf32>
    %92 = vector.multi_reduction <maximumf>, %91, %cst_62 [1] : vector<16x16xf32> to vector<16xf32>
    %93 = vector.shape_cast %92 : vector<16xf32> to vector<16x1xf32>
    %94 = vector.broadcast %93 : vector<16x1xf32> to vector<16x16xf32>
    %95 = arith.subf %91, %94 : vector<16x16xf32>
    %96 = math.exp %95 : vector<16x16xf32>
    %cst_63 = arith.constant dense<0.000000e+00> : vector<16xf32>
    %97 = vector.multi_reduction <add>, %96, %cst_63 [1] : vector<16x16xf32> to vector<16xf32>
    %98 = vector.shape_cast %97 : vector<16xf32> to vector<16x1xf32>
    %99 = tpu.reciprocal %98 {approx = true} : vector<16x1xf32> -> vector<16x1xf32>
    %100 = vector.broadcast %99 : vector<16x1xf32> to vector<16x16xf32>
    %101 = arith.mulf %96, %100 : vector<16x16xf32>
    %cst_64 = arith.constant dense<0.000000e+00> : vector<16x16xf32>
    %102 = tpu.matmul %101, %84, %cst_64 {dimension_numbers = #tpu.dot_dimension_numbers<[1], [0], [0], [1], [0, 0, 1, 1], [], []>} : vector<16x16xf32>, vector<16x16xf32>, vector<16x16xf32> -> vector<16x16xf32>
    %103 = vector.extract_strided_slice %36 {offsets = [16, 0], sizes = [16, 32], strides = [1, 1]} : vector<32x32xf32> to vector<16x32xf32>
    %cst_65 = arith.constant dense<0.000000e+00> : vector<16x32xf32>
    %104 = tpu.matmul %102, %103, %cst_65 {dimension_numbers = #tpu.dot_dimension_numbers<[1], [0], [0], [1], [0, 0, 1, 1], [], []>} : vector<16x16xf32>, vector<16x32xf32>, vector<16x32xf32> -> vector<16x32xf32>
    %105 = arith.addf %81, %104 : vector<16x32xf32>
    %106 = vector.extract_strided_slice %57 {offsets = [16, 0], sizes = [16, 96], strides = [1, 1]} : vector<32x96xf32> to vector<16x96xf32>
    %107 = vector.extract_strided_slice %106 {offsets = [0, 0], sizes = [16, 16], strides = [1, 1]} : vector<16x96xf32> to vector<16x16xf32>
    %108 = vector.extract_strided_slice %106 {offsets = [0, 32], sizes = [16, 16], strides = [1, 1]} : vector<16x96xf32> to vector<16x16xf32>
    %109 = vector.extract_strided_slice %106 {offsets = [0, 64], sizes = [16, 16], strides = [1, 1]} : vector<16x96xf32> to vector<16x16xf32>
    %cst_66 = arith.constant dense<0.000000e+00> : vector<16x16xf32>
    %110 = tpu.matmul %107, %108, %cst_66 {dimension_numbers = #tpu.dot_dimension_numbers<[1], [1], [0], [0], [0, 0, 1, 0], [], []>} : vector<16x16xf32>, vector<16x16xf32>, vector<16x16xf32> -> vector<16x16xf32>
    %cst_67 = arith.constant 2.500000e-01 : f32
    %111 = vector.broadcast %cst_67 : f32 to vector<16x16xf32>
    %112 = arith.mulf %110, %111 : vector<16x16xf32>
    %cst_68 = arith.constant -1.000000e+09 : f32
    %113 = vector.shape_cast %30 : vector<1x16xi1> to vector<1x16xi1>
    %114 = vector.broadcast %113 : vector<1x16xi1> to vector<16x16xi1>
    %115 = vector.broadcast %cst_68 : f32 to vector<16x16xf32>
    %116 = arith.select %114, %115, %112 : vector<16x16xi1>, vector<16x16xf32>
    %cst_69 = arith.constant dense<0xFF800000> : vector<16xf32>
    %117 = vector.multi_reduction <maximumf>, %116, %cst_69 [1] : vector<16x16xf32> to vector<16xf32>
    %118 = vector.shape_cast %117 : vector<16xf32> to vector<16x1xf32>
    %119 = vector.broadcast %118 : vector<16x1xf32> to vector<16x16xf32>
    %120 = arith.subf %116, %119 : vector<16x16xf32>
    %121 = math.exp %120 : vector<16x16xf32>
    %cst_70 = arith.constant dense<0.000000e+00> : vector<16xf32>
    %122 = vector.multi_reduction <add>, %121, %cst_70 [1] : vector<16x16xf32> to vector<16xf32>
    %123 = vector.shape_cast %122 : vector<16xf32> to vector<16x1xf32>
    %124 = tpu.reciprocal %123 {approx = true} : vector<16x1xf32> -> vector<16x1xf32>
    %125 = vector.broadcast %124 : vector<16x1xf32> to vector<16x16xf32>
    %126 = arith.mulf %121, %125 : vector<16x16xf32>
    %cst_71 = arith.constant dense<0.000000e+00> : vector<16x16xf32>
    %127 = tpu.matmul %126, %109, %cst_71 {dimension_numbers = #tpu.dot_dimension_numbers<[1], [0], [0], [1], [0, 0, 1, 1], [], []>} : vector<16x16xf32>, vector<16x16xf32>, vector<16x16xf32> -> vector<16x16xf32>
    %128 = vector.extract_strided_slice %36 {offsets = [0, 0], sizes = [16, 32], strides = [1, 1]} : vector<32x32xf32> to vector<16x32xf32>
    %cst_72 = arith.constant dense<0.000000e+00> : vector<16x32xf32>
    %129 = tpu.matmul %127, %128, %cst_72 {dimension_numbers = #tpu.dot_dimension_numbers<[1], [0], [0], [1], [0, 0, 1, 1], [], []>} : vector<16x16xf32>, vector<16x32xf32>, vector<16x32xf32> -> vector<16x32xf32>
    %130 = vector.extract_strided_slice %106 {offsets = [0, 16], sizes = [16, 16], strides = [1, 1]} : vector<16x96xf32> to vector<16x16xf32>
    %131 = vector.extract_strided_slice %106 {offsets = [0, 48], sizes = [16, 16], strides = [1, 1]} : vector<16x96xf32> to vector<16x16xf32>
    %132 = vector.extract_strided_slice %106 {offsets = [0, 80], sizes = [16, 16], strides = [1, 1]} : vector<16x96xf32> to vector<16x16xf32>
    %cst_73 = arith.constant dense<0.000000e+00> : vector<16x16xf32>
    %133 = tpu.matmul %130, %131, %cst_73 {dimension_numbers = #tpu.dot_dimension_numbers<[1], [1], [0], [0], [0, 0, 1, 0], [], []>} : vector<16x16xf32>, vector<16x16xf32>, vector<16x16xf32> -> vector<16x16xf32>
    %cst_74 = arith.constant 2.500000e-01 : f32
    %134 = vector.broadcast %cst_74 : f32 to vector<16x16xf32>
    %135 = arith.mulf %133, %134 : vector<16x16xf32>
    %cst_75 = arith.constant -1.000000e+09 : f32
    %136 = vector.shape_cast %30 : vector<1x16xi1> to vector<1x16xi1>
    %137 = vector.broadcast %136 : vector<1x16xi1> to vector<16x16xi1>
    %138 = vector.broadcast %cst_75 : f32 to vector<16x16xf32>
    %139 = arith.select %137, %138, %135 : vector<16x16xi1>, vector<16x16xf32>
    %cst_76 = arith.constant dense<0xFF800000> : vector<16xf32>
    %140 = vector.multi_reduction <maximumf>, %139, %cst_76 [1] : vector<16x16xf32> to vector<16xf32>
    %141 = vector.shape_cast %140 : vector<16xf32> to vector<16x1xf32>
    %142 = vector.broadcast %141 : vector<16x1xf32> to vector<16x16xf32>
    %143 = arith.subf %139, %142 : vector<16x16xf32>
    %144 = math.exp %143 : vector<16x16xf32>
    %cst_77 = arith.constant dense<0.000000e+00> : vector<16xf32>
    %145 = vector.multi_reduction <add>, %144, %cst_77 [1] : vector<16x16xf32> to vector<16xf32>
    %146 = vector.shape_cast %145 : vector<16xf32> to vector<16x1xf32>
    %147 = tpu.reciprocal %146 {approx = true} : vector<16x1xf32> -> vector<16x1xf32>
    %148 = vector.broadcast %147 : vector<16x1xf32> to vector<16x16xf32>
    %149 = arith.mulf %144, %148 : vector<16x16xf32>
    %cst_78 = arith.constant dense<0.000000e+00> : vector<16x16xf32>
    %150 = tpu.matmul %149, %132, %cst_78 {dimension_numbers = #tpu.dot_dimension_numbers<[1], [0], [0], [1], [0, 0, 1, 1], [], []>} : vector<16x16xf32>, vector<16x16xf32>, vector<16x16xf32> -> vector<16x16xf32>
    %151 = vector.extract_strided_slice %36 {offsets = [16, 0], sizes = [16, 32], strides = [1, 1]} : vector<32x32xf32> to vector<16x32xf32>
    %cst_79 = arith.constant dense<0.000000e+00> : vector<16x32xf32>
    %152 = tpu.matmul %150, %151, %cst_79 {dimension_numbers = #tpu.dot_dimension_numbers<[1], [0], [0], [1], [0, 0, 1, 1], [], []>} : vector<16x16xf32>, vector<16x32xf32>, vector<16x32xf32> -> vector<16x32xf32>
    %153 = arith.addf %129, %152 : vector<16x32xf32>
    %154 = tpu.concatenate %105, %153 in 0 : vector<16x32xf32>, vector<16x32xf32> -> vector<32x32xf32>
    %155 = vector.broadcast %38 : vector<1x32xf32> to vector<32x32xf32>
    %156 = arith.addf %154, %155 : vector<32x32xf32>
    %157 = arith.addf %156, %2 : vector<32x32xf32>
    %cst_80 = arith.constant dense<0.000000e+00> : vector<32xf32>
    %158 = vector.multi_reduction <add>, %157, %cst_80 [1] : vector<32x32xf32> to vector<32xf32>
    %159 = vector.shape_cast %158 : vector<32xf32> to vector<32x1xf32>
    %cst_81 = arith.constant 3.200000e+01 : f32
    %160 = vector.broadcast %cst_81 : f32 to vector<32x1xf32>
    %161 = arith.divf %159, %160 : vector<32x1xf32>
    %162 = vector.broadcast %161 : vector<32x1xf32> to vector<32x32xf32>
    %163 = arith.subf %157, %162 : vector<32x32xf32>
    %164 = arith.mulf %163, %163 : vector<32x32xf32>
    %cst_82 = arith.constant dense<0.000000e+00> : vector<32xf32>
    %165 = vector.multi_reduction <add>, %164, %cst_82 [1] : vector<32x32xf32> to vector<32xf32>
    %166 = vector.shape_cast %165 : vector<32xf32> to vector<32x1xf32>
    %cst_83 = arith.constant 3.200000e+01 : f32
    %167 = vector.broadcast %cst_83 : f32 to vector<32x1xf32>
    %168 = arith.divf %166, %167 : vector<32x1xf32>
    %169 = vector.broadcast %161 : vector<32x1xf32> to vector<32x32xf32>
    %170 = arith.subf %157, %169 : vector<32x32xf32>
    %cst_84 = arith.constant 9.99999974E-6 : f32
    %171 = vector.broadcast %cst_84 : f32 to vector<32x1xf32>
    %172 = arith.addf %168, %171 : vector<32x1xf32>
    %173 = math.rsqrt %172 : vector<32x1xf32>
    %174 = vector.broadcast %173 : vector<32x1xf32> to vector<32x32xf32>
    %175 = arith.mulf %170, %174 : vector<32x32xf32>
    %176 = vector.broadcast %40 : vector<1x32xf32> to vector<32x32xf32>
    %177 = arith.mulf %175, %176 : vector<32x32xf32>
    %178 = vector.broadcast %42 : vector<1x32xf32> to vector<32x32xf32>
    %179 = arith.addf %177, %178 : vector<32x32xf32>
    %cst_85 = arith.constant 0.000000e+00 : f32
    %180 = vector.shape_cast %5 : vector<32x1xi1> to vector<32x1xi1>
    %181 = vector.broadcast %180 : vector<32x1xi1> to vector<32x32xi1>
    %182 = vector.broadcast %cst_85 : f32 to vector<32x32xf32>
    %183 = arith.select %181, %182, %179 : vector<32x32xi1>, vector<32x32xf32>
    %c4_i32 = arith.constant 4 : i32
    %184 = tpu.dynamic_rotate %183 by %c4_i32 dim 0 : vector<32x32xf32>, i32 -> vector<32x32xf32>
    %c-4_i32 = arith.constant -4 : i32
    %185 = vector.broadcast %c-4_i32 : i32 to vector<32x1xi32>
    %186 = arith.addi %22, %185 : vector<32x1xi32>
    %c0_i32_86 = arith.constant 0 : i32
    %187 = vector.broadcast %c0_i32_86 : i32 to vector<32x1xi32>
    %188 = arith.cmpi sge, %186, %187 : vector<32x1xi32>
    %c16_i32_87 = arith.constant 16 : i32
    %189 = vector.broadcast %c16_i32_87 : i32 to vector<32x1xi32>
    %190 = arith.cmpi slt, %186, %189 : vector<32x1xi32>
    %191 = arith.andi %188, %190 : vector<32x1xi1>
    %cst_88 = arith.constant 0.000000e+00 : f32
    %192 = vector.shape_cast %191 : vector<32x1xi1> to vector<32x1xi1>
    %193 = vector.broadcast %192 : vector<32x1xi1> to vector<32x32xi1>
    %194 = vector.broadcast %cst_88 : f32 to vector<32x32xf32>
    %195 = arith.select %193, %184, %194 : vector<32x32xi1>, vector<32x32xf32>
    %c3_i32 = arith.constant 3 : i32
    %196 = tpu.dynamic_rotate %183 by %c3_i32 dim 0 : vector<32x32xf32>, i32 -> vector<32x32xf32>
    %c-3_i32 = arith.constant -3 : i32
    %197 = vector.broadcast %c-3_i32 : i32 to vector<32x1xi32>
    %198 = arith.addi %22, %197 : vector<32x1xi32>
    %c0_i32_89 = arith.constant 0 : i32
    %199 = vector.broadcast %c0_i32_89 : i32 to vector<32x1xi32>
    %200 = arith.cmpi sge, %198, %199 : vector<32x1xi32>
    %c16_i32_90 = arith.constant 16 : i32
    %201 = vector.broadcast %c16_i32_90 : i32 to vector<32x1xi32>
    %202 = arith.cmpi slt, %198, %201 : vector<32x1xi32>
    %203 = arith.andi %200, %202 : vector<32x1xi1>
    %cst_91 = arith.constant 0.000000e+00 : f32
    %204 = vector.shape_cast %203 : vector<32x1xi1> to vector<32x1xi1>
    %205 = vector.broadcast %204 : vector<32x1xi1> to vector<32x32xi1>
    %206 = vector.broadcast %cst_91 : f32 to vector<32x32xf32>
    %207 = arith.select %205, %196, %206 : vector<32x32xi1>, vector<32x32xf32>
    %c2_i32 = arith.constant 2 : i32
    %208 = tpu.dynamic_rotate %183 by %c2_i32 dim 0 : vector<32x32xf32>, i32 -> vector<32x32xf32>
    %c-2_i32 = arith.constant -2 : i32
    %209 = vector.broadcast %c-2_i32 : i32 to vector<32x1xi32>
    %210 = arith.addi %22, %209 : vector<32x1xi32>
    %c0_i32_92 = arith.constant 0 : i32
    %211 = vector.broadcast %c0_i32_92 : i32 to vector<32x1xi32>
    %212 = arith.cmpi sge, %210, %211 : vector<32x1xi32>
    %c16_i32_93 = arith.constant 16 : i32
    %213 = vector.broadcast %c16_i32_93 : i32 to vector<32x1xi32>
    %214 = arith.cmpi slt, %210, %213 : vector<32x1xi32>
    %215 = arith.andi %212, %214 : vector<32x1xi1>
    %cst_94 = arith.constant 0.000000e+00 : f32
    %216 = vector.shape_cast %215 : vector<32x1xi1> to vector<32x1xi1>
    %217 = vector.broadcast %216 : vector<32x1xi1> to vector<32x32xi1>
    %218 = vector.broadcast %cst_94 : f32 to vector<32x32xf32>
    %219 = arith.select %217, %208, %218 : vector<32x32xi1>, vector<32x32xf32>
    %c1_i32_95 = arith.constant 1 : i32
    %220 = tpu.dynamic_rotate %183 by %c1_i32_95 dim 0 : vector<32x32xf32>, i32 -> vector<32x32xf32>
    %c-1_i32 = arith.constant -1 : i32
    %221 = vector.broadcast %c-1_i32 : i32 to vector<32x1xi32>
    %222 = arith.addi %22, %221 : vector<32x1xi32>
    %c0_i32_96 = arith.constant 0 : i32
    %223 = vector.broadcast %c0_i32_96 : i32 to vector<32x1xi32>
    %224 = arith.cmpi sge, %222, %223 : vector<32x1xi32>
    %c16_i32_97 = arith.constant 16 : i32
    %225 = vector.broadcast %c16_i32_97 : i32 to vector<32x1xi32>
    %226 = arith.cmpi slt, %222, %225 : vector<32x1xi32>
    %227 = arith.andi %224, %226 : vector<32x1xi1>
    %cst_98 = arith.constant 0.000000e+00 : f32
    %228 = vector.shape_cast %227 : vector<32x1xi1> to vector<32x1xi1>
    %229 = vector.broadcast %228 : vector<32x1xi1> to vector<32x32xi1>
    %230 = vector.broadcast %cst_98 : f32 to vector<32x32xf32>
    %231 = arith.select %229, %220, %230 : vector<32x32xi1>, vector<32x32xf32>
    %c31_i32 = arith.constant 31 : i32
    %232 = tpu.dynamic_rotate %183 by %c31_i32 dim 0 : vector<32x32xf32>, i32 -> vector<32x32xf32>
    %c1_i32_99 = arith.constant 1 : i32
    %233 = vector.broadcast %c1_i32_99 : i32 to vector<32x1xi32>
    %234 = arith.addi %22, %233 : vector<32x1xi32>
    %c0_i32_100 = arith.constant 0 : i32
    %235 = vector.broadcast %c0_i32_100 : i32 to vector<32x1xi32>
    %236 = arith.cmpi sge, %234, %235 : vector<32x1xi32>
    %c16_i32_101 = arith.constant 16 : i32
    %237 = vector.broadcast %c16_i32_101 : i32 to vector<32x1xi32>
    %238 = arith.cmpi slt, %234, %237 : vector<32x1xi32>
    %239 = arith.andi %236, %238 : vector<32x1xi1>
    %cst_102 = arith.constant 0.000000e+00 : f32
    %240 = vector.shape_cast %239 : vector<32x1xi1> to vector<32x1xi1>
    %241 = vector.broadcast %240 : vector<32x1xi1> to vector<32x32xi1>
    %242 = vector.broadcast %cst_102 : f32 to vector<32x32xf32>
    %243 = arith.select %241, %232, %242 : vector<32x32xi1>, vector<32x32xf32>
    %c30_i32 = arith.constant 30 : i32
    %244 = tpu.dynamic_rotate %183 by %c30_i32 dim 0 : vector<32x32xf32>, i32 -> vector<32x32xf32>
    %c2_i32_103 = arith.constant 2 : i32
    %245 = vector.broadcast %c2_i32_103 : i32 to vector<32x1xi32>
    %246 = arith.addi %22, %245 : vector<32x1xi32>
    %c0_i32_104 = arith.constant 0 : i32
    %247 = vector.broadcast %c0_i32_104 : i32 to vector<32x1xi32>
    %248 = arith.cmpi sge, %246, %247 : vector<32x1xi32>
    %c16_i32_105 = arith.constant 16 : i32
    %249 = vector.broadcast %c16_i32_105 : i32 to vector<32x1xi32>
    %250 = arith.cmpi slt, %246, %249 : vector<32x1xi32>
    %251 = arith.andi %248, %250 : vector<32x1xi1>
    %cst_106 = arith.constant 0.000000e+00 : f32
    %252 = vector.shape_cast %251 : vector<32x1xi1> to vector<32x1xi1>
    %253 = vector.broadcast %252 : vector<32x1xi1> to vector<32x32xi1>
    %254 = vector.broadcast %cst_106 : f32 to vector<32x32xf32>
    %255 = arith.select %253, %244, %254 : vector<32x32xi1>, vector<32x32xf32>
    %c29_i32 = arith.constant 29 : i32
    %256 = tpu.dynamic_rotate %183 by %c29_i32 dim 0 : vector<32x32xf32>, i32 -> vector<32x32xf32>
    %c3_i32_107 = arith.constant 3 : i32
    %257 = vector.broadcast %c3_i32_107 : i32 to vector<32x1xi32>
    %258 = arith.addi %22, %257 : vector<32x1xi32>
    %c0_i32_108 = arith.constant 0 : i32
    %259 = vector.broadcast %c0_i32_108 : i32 to vector<32x1xi32>
    %260 = arith.cmpi sge, %258, %259 : vector<32x1xi32>
    %c16_i32_109 = arith.constant 16 : i32
    %261 = vector.broadcast %c16_i32_109 : i32 to vector<32x1xi32>
    %262 = arith.cmpi slt, %258, %261 : vector<32x1xi32>
    %263 = arith.andi %260, %262 : vector<32x1xi1>
    %cst_110 = arith.constant 0.000000e+00 : f32
    %264 = vector.shape_cast %263 : vector<32x1xi1> to vector<32x1xi1>
    %265 = vector.broadcast %264 : vector<32x1xi1> to vector<32x32xi1>
    %266 = vector.broadcast %cst_110 : f32 to vector<32x32xf32>
    %267 = arith.select %265, %256, %266 : vector<32x32xi1>, vector<32x32xf32>
    %c28_i32 = arith.constant 28 : i32
    %268 = tpu.dynamic_rotate %183 by %c28_i32 dim 0 : vector<32x32xf32>, i32 -> vector<32x32xf32>
    %c4_i32_111 = arith.constant 4 : i32
    %269 = vector.broadcast %c4_i32_111 : i32 to vector<32x1xi32>
    %270 = arith.addi %22, %269 : vector<32x1xi32>
    %c0_i32_112 = arith.constant 0 : i32
    %271 = vector.broadcast %c0_i32_112 : i32 to vector<32x1xi32>
    %272 = arith.cmpi sge, %270, %271 : vector<32x1xi32>
    %c16_i32_113 = arith.constant 16 : i32
    %273 = vector.broadcast %c16_i32_113 : i32 to vector<32x1xi32>
    %274 = arith.cmpi slt, %270, %273 : vector<32x1xi32>
    %275 = arith.andi %272, %274 : vector<32x1xi1>
    %cst_114 = arith.constant 0.000000e+00 : f32
    %276 = vector.shape_cast %275 : vector<32x1xi1> to vector<32x1xi1>
    %277 = vector.broadcast %276 : vector<32x1xi1> to vector<32x32xi1>
    %278 = vector.broadcast %cst_114 : f32 to vector<32x32xf32>
    %279 = arith.select %277, %268, %278 : vector<32x32xi1>, vector<32x32xf32>
    %280 = tpu.concatenate %195, %207, %219, %231, %183, %243, %255, %267, %279 in 1 : vector<32x32xf32>, vector<32x32xf32>, vector<32x32xf32>, vector<32x32xf32>, vector<32x32xf32>, vector<32x32xf32>, vector<32x32xf32>, vector<32x32xf32>, vector<32x32xf32> -> vector<32x288xf32>
    %cst_115 = arith.constant dense<0.000000e+00> : vector<32x64xf32>
    %281 = tpu.matmul %280, %44, %cst_115 {dimension_numbers = #tpu.dot_dimension_numbers<[1], [0], [0], [1], [0, 0, 1, 1], [], []>} : vector<32x288xf32>, vector<288x64xf32>, vector<32x64xf32> -> vector<32x64xf32>
    %282 = vector.broadcast %46 : vector<1x64xf32> to vector<32x64xf32>
    %283 = arith.addf %281, %282 : vector<32x64xf32>
    %cst_116 = arith.constant 0.000000e+00 : f32
    %284 = vector.broadcast %cst_116 : f32 to vector<32x64xf32>
    %285 = arith.maximumf %283, %284 : vector<32x64xf32>
    %cst_117 = arith.constant dense<0.000000e+00> : vector<32x32xf32>
    %286 = tpu.matmul %285, %48, %cst_117 {dimension_numbers = #tpu.dot_dimension_numbers<[1], [0], [0], [1], [0, 0, 1, 1], [], []>} : vector<32x64xf32>, vector<64x32xf32>, vector<32x32xf32> -> vector<32x32xf32>
    %287 = vector.broadcast %50 : vector<1x32xf32> to vector<32x32xf32>
    %288 = arith.addf %286, %287 : vector<32x32xf32>
    %289 = arith.addf %288, %183 : vector<32x32xf32>
    %cst_118 = arith.constant dense<0.000000e+00> : vector<32xf32>
    %290 = vector.multi_reduction <add>, %289, %cst_118 [1] : vector<32x32xf32> to vector<32xf32>
    %291 = vector.shape_cast %290 : vector<32xf32> to vector<32x1xf32>
    %cst_119 = arith.constant 3.200000e+01 : f32
    %292 = vector.broadcast %cst_119 : f32 to vector<32x1xf32>
    %293 = arith.divf %291, %292 : vector<32x1xf32>
    %294 = vector.broadcast %293 : vector<32x1xf32> to vector<32x32xf32>
    %295 = arith.subf %289, %294 : vector<32x32xf32>
    %296 = arith.mulf %295, %295 : vector<32x32xf32>
    %cst_120 = arith.constant dense<0.000000e+00> : vector<32xf32>
    %297 = vector.multi_reduction <add>, %296, %cst_120 [1] : vector<32x32xf32> to vector<32xf32>
    %298 = vector.shape_cast %297 : vector<32xf32> to vector<32x1xf32>
    %cst_121 = arith.constant 3.200000e+01 : f32
    %299 = vector.broadcast %cst_121 : f32 to vector<32x1xf32>
    %300 = arith.divf %298, %299 : vector<32x1xf32>
    %301 = vector.broadcast %293 : vector<32x1xf32> to vector<32x32xf32>
    %302 = arith.subf %289, %301 : vector<32x32xf32>
    %cst_122 = arith.constant 9.99999974E-6 : f32
    %303 = vector.broadcast %cst_122 : f32 to vector<32x1xf32>
    %304 = arith.addf %300, %303 : vector<32x1xf32>
    %305 = math.rsqrt %304 : vector<32x1xf32>
    %306 = vector.broadcast %305 : vector<32x1xf32> to vector<32x32xf32>
    %307 = arith.mulf %302, %306 : vector<32x32xf32>
    %308 = vector.broadcast %52 : vector<1x32xf32> to vector<32x32xf32>
    %309 = arith.mulf %307, %308 : vector<32x32xf32>
    %310 = vector.broadcast %54 : vector<1x32xf32> to vector<32x32xf32>
    %311 = arith.addf %309, %310 : vector<32x32xf32>
    %cst_123 = arith.constant 0.000000e+00 : f32
    %312 = vector.shape_cast %5 : vector<32x1xi1> to vector<32x1xi1>
    %313 = vector.broadcast %312 : vector<32x1xi1> to vector<32x32xi1>
    %314 = vector.broadcast %cst_123 : f32 to vector<32x32xf32>
    %315 = arith.select %313, %314, %311 : vector<32x32xi1>, vector<32x32xf32>
    %c1_124 = arith.constant 1 : index
    %c0_125 = arith.constant 0 : index
    %c0_126 = arith.constant 0 : index
    %316 = vector.load %arg4[%c1_124, %c0_125, %c0_126] : memref<2x32x96xf32, #tpu.memory_space<vmem>>, vector<1x32x96xf32>
    %317 = vector.shape_cast %316 : vector<1x32x96xf32> to vector<32x96xf32>
    %c1_127 = arith.constant 1 : index
    %c0_128 = arith.constant 0 : index
    %c0_129 = arith.constant 0 : index
    %318 = vector.load %arg5[%c1_127, %c0_128, %c0_129] : memref<2x1x96xf32, #tpu.memory_space<vmem>>, vector<1x1x96xf32>
    %319 = vector.shape_cast %318 : vector<1x1x96xf32> to vector<1x96xf32>
    %c1_130 = arith.constant 1 : index
    %c0_131 = arith.constant 0 : index
    %c0_132 = arith.constant 0 : index
    %320 = vector.load %arg6[%c1_130, %c0_131, %c0_132] : memref<2x32x32xf32, #tpu.memory_space<vmem>>, vector<1x32x32xf32>
    %321 = vector.shape_cast %320 : vector<1x32x32xf32> to vector<32x32xf32>
    %c1_133 = arith.constant 1 : index
    %c0_134 = arith.constant 0 : index
    %c0_135 = arith.constant 0 : index
    %322 = vector.load %arg7[%c1_133, %c0_134, %c0_135] : memref<2x1x32xf32, #tpu.memory_space<vmem>>, vector<1x1x32xf32>
    %323 = vector.shape_cast %322 : vector<1x1x32xf32> to vector<1x32xf32>
    %c1_136 = arith.constant 1 : index
    %c0_137 = arith.constant 0 : index
    %c0_138 = arith.constant 0 : index
    %324 = vector.load %arg8[%c1_136, %c0_137, %c0_138] : memref<2x1x32xf32, #tpu.memory_space<vmem>>, vector<1x1x32xf32>
    %325 = vector.shape_cast %324 : vector<1x1x32xf32> to vector<1x32xf32>
    %c1_139 = arith.constant 1 : index
    %c0_140 = arith.constant 0 : index
    %c0_141 = arith.constant 0 : index
    %326 = vector.load %arg9[%c1_139, %c0_140, %c0_141] : memref<2x1x32xf32, #tpu.memory_space<vmem>>, vector<1x1x32xf32>
    %327 = vector.shape_cast %326 : vector<1x1x32xf32> to vector<1x32xf32>
    %c1_142 = arith.constant 1 : index
    %c0_143 = arith.constant 0 : index
    %c0_144 = arith.constant 0 : index
    %328 = vector.load %arg10[%c1_142, %c0_143, %c0_144] : memref<2x288x64xf32, #tpu.memory_space<vmem>>, vector<1x288x64xf32>
    %329 = vector.shape_cast %328 : vector<1x288x64xf32> to vector<288x64xf32>
    %c1_145 = arith.constant 1 : index
    %c0_146 = arith.constant 0 : index
    %c0_147 = arith.constant 0 : index
    %330 = vector.load %arg11[%c1_145, %c0_146, %c0_147] : memref<2x1x64xf32, #tpu.memory_space<vmem>>, vector<1x1x64xf32>
    %331 = vector.shape_cast %330 : vector<1x1x64xf32> to vector<1x64xf32>
    %c1_148 = arith.constant 1 : index
    %c0_149 = arith.constant 0 : index
    %c0_150 = arith.constant 0 : index
    %332 = vector.load %arg12[%c1_148, %c0_149, %c0_150] : memref<2x64x32xf32, #tpu.memory_space<vmem>>, vector<1x64x32xf32>
    %333 = vector.shape_cast %332 : vector<1x64x32xf32> to vector<64x32xf32>
    %c1_151 = arith.constant 1 : index
    %c0_152 = arith.constant 0 : index
    %c0_153 = arith.constant 0 : index
    %334 = vector.load %arg13[%c1_151, %c0_152, %c0_153] : memref<2x1x32xf32, #tpu.memory_space<vmem>>, vector<1x1x32xf32>
    %335 = vector.shape_cast %334 : vector<1x1x32xf32> to vector<1x32xf32>
    %c1_154 = arith.constant 1 : index
    %c0_155 = arith.constant 0 : index
    %c0_156 = arith.constant 0 : index
    %336 = vector.load %arg14[%c1_154, %c0_155, %c0_156] : memref<2x1x32xf32, #tpu.memory_space<vmem>>, vector<1x1x32xf32>
    %337 = vector.shape_cast %336 : vector<1x1x32xf32> to vector<1x32xf32>
    %c1_157 = arith.constant 1 : index
    %c0_158 = arith.constant 0 : index
    %c0_159 = arith.constant 0 : index
    %338 = vector.load %arg15[%c1_157, %c0_158, %c0_159] : memref<2x1x32xf32, #tpu.memory_space<vmem>>, vector<1x1x32xf32>
    %339 = vector.shape_cast %338 : vector<1x1x32xf32> to vector<1x32xf32>
    %cst_160 = arith.constant dense<0.000000e+00> : vector<32x96xf32>
    %340 = tpu.matmul %315, %317, %cst_160 {dimension_numbers = #tpu.dot_dimension_numbers<[1], [0], [0], [1], [0, 0, 1, 1], [], []>} : vector<32x32xf32>, vector<32x96xf32>, vector<32x96xf32> -> vector<32x96xf32>
    %341 = vector.broadcast %319 : vector<1x96xf32> to vector<32x96xf32>
    %342 = arith.addf %340, %341 : vector<32x96xf32>
    %343 = vector.extract_strided_slice %342 {offsets = [0, 0], sizes = [16, 96], strides = [1, 1]} : vector<32x96xf32> to vector<16x96xf32>
    %344 = vector.extract_strided_slice %343 {offsets = [0, 0], sizes = [16, 16], strides = [1, 1]} : vector<16x96xf32> to vector<16x16xf32>
    %345 = vector.extract_strided_slice %343 {offsets = [0, 32], sizes = [16, 16], strides = [1, 1]} : vector<16x96xf32> to vector<16x16xf32>
    %346 = vector.extract_strided_slice %343 {offsets = [0, 64], sizes = [16, 16], strides = [1, 1]} : vector<16x96xf32> to vector<16x16xf32>
    %cst_161 = arith.constant dense<0.000000e+00> : vector<16x16xf32>
    %347 = tpu.matmul %344, %345, %cst_161 {dimension_numbers = #tpu.dot_dimension_numbers<[1], [1], [0], [0], [0, 0, 1, 0], [], []>} : vector<16x16xf32>, vector<16x16xf32>, vector<16x16xf32> -> vector<16x16xf32>
    %cst_162 = arith.constant 2.500000e-01 : f32
    %348 = vector.broadcast %cst_162 : f32 to vector<16x16xf32>
    %349 = arith.mulf %347, %348 : vector<16x16xf32>
    %cst_163 = arith.constant -1.000000e+09 : f32
    %350 = vector.shape_cast %26 : vector<1x16xi1> to vector<1x16xi1>
    %351 = vector.broadcast %350 : vector<1x16xi1> to vector<16x16xi1>
    %352 = vector.broadcast %cst_163 : f32 to vector<16x16xf32>
    %353 = arith.select %351, %352, %349 : vector<16x16xi1>, vector<16x16xf32>
    %cst_164 = arith.constant dense<0xFF800000> : vector<16xf32>
    %354 = vector.multi_reduction <maximumf>, %353, %cst_164 [1] : vector<16x16xf32> to vector<16xf32>
    %355 = vector.shape_cast %354 : vector<16xf32> to vector<16x1xf32>
    %356 = vector.broadcast %355 : vector<16x1xf32> to vector<16x16xf32>
    %357 = arith.subf %353, %356 : vector<16x16xf32>
    %358 = math.exp %357 : vector<16x16xf32>
    %cst_165 = arith.constant dense<0.000000e+00> : vector<16xf32>
    %359 = vector.multi_reduction <add>, %358, %cst_165 [1] : vector<16x16xf32> to vector<16xf32>
    %360 = vector.shape_cast %359 : vector<16xf32> to vector<16x1xf32>
    %361 = tpu.reciprocal %360 {approx = true} : vector<16x1xf32> -> vector<16x1xf32>
    %362 = vector.broadcast %361 : vector<16x1xf32> to vector<16x16xf32>
    %363 = arith.mulf %358, %362 : vector<16x16xf32>
    %cst_166 = arith.constant dense<0.000000e+00> : vector<16x16xf32>
    %364 = tpu.matmul %363, %346, %cst_166 {dimension_numbers = #tpu.dot_dimension_numbers<[1], [0], [0], [1], [0, 0, 1, 1], [], []>} : vector<16x16xf32>, vector<16x16xf32>, vector<16x16xf32> -> vector<16x16xf32>
    %365 = vector.extract_strided_slice %321 {offsets = [0, 0], sizes = [16, 32], strides = [1, 1]} : vector<32x32xf32> to vector<16x32xf32>
    %cst_167 = arith.constant dense<0.000000e+00> : vector<16x32xf32>
    %366 = tpu.matmul %364, %365, %cst_167 {dimension_numbers = #tpu.dot_dimension_numbers<[1], [0], [0], [1], [0, 0, 1, 1], [], []>} : vector<16x16xf32>, vector<16x32xf32>, vector<16x32xf32> -> vector<16x32xf32>
    %367 = vector.extract_strided_slice %343 {offsets = [0, 16], sizes = [16, 16], strides = [1, 1]} : vector<16x96xf32> to vector<16x16xf32>
    %368 = vector.extract_strided_slice %343 {offsets = [0, 48], sizes = [16, 16], strides = [1, 1]} : vector<16x96xf32> to vector<16x16xf32>
    %369 = vector.extract_strided_slice %343 {offsets = [0, 80], sizes = [16, 16], strides = [1, 1]} : vector<16x96xf32> to vector<16x16xf32>
    %cst_168 = arith.constant dense<0.000000e+00> : vector<16x16xf32>
    %370 = tpu.matmul %367, %368, %cst_168 {dimension_numbers = #tpu.dot_dimension_numbers<[1], [1], [0], [0], [0, 0, 1, 0], [], []>} : vector<16x16xf32>, vector<16x16xf32>, vector<16x16xf32> -> vector<16x16xf32>
    %cst_169 = arith.constant 2.500000e-01 : f32
    %371 = vector.broadcast %cst_169 : f32 to vector<16x16xf32>
    %372 = arith.mulf %370, %371 : vector<16x16xf32>
    %cst_170 = arith.constant -1.000000e+09 : f32
    %373 = vector.shape_cast %26 : vector<1x16xi1> to vector<1x16xi1>
    %374 = vector.broadcast %373 : vector<1x16xi1> to vector<16x16xi1>
    %375 = vector.broadcast %cst_170 : f32 to vector<16x16xf32>
    %376 = arith.select %374, %375, %372 : vector<16x16xi1>, vector<16x16xf32>
    %cst_171 = arith.constant dense<0xFF800000> : vector<16xf32>
    %377 = vector.multi_reduction <maximumf>, %376, %cst_171 [1] : vector<16x16xf32> to vector<16xf32>
    %378 = vector.shape_cast %377 : vector<16xf32> to vector<16x1xf32>
    %379 = vector.broadcast %378 : vector<16x1xf32> to vector<16x16xf32>
    %380 = arith.subf %376, %379 : vector<16x16xf32>
    %381 = math.exp %380 : vector<16x16xf32>
    %cst_172 = arith.constant dense<0.000000e+00> : vector<16xf32>
    %382 = vector.multi_reduction <add>, %381, %cst_172 [1] : vector<16x16xf32> to vector<16xf32>
    %383 = vector.shape_cast %382 : vector<16xf32> to vector<16x1xf32>
    %384 = tpu.reciprocal %383 {approx = true} : vector<16x1xf32> -> vector<16x1xf32>
    %385 = vector.broadcast %384 : vector<16x1xf32> to vector<16x16xf32>
    %386 = arith.mulf %381, %385 : vector<16x16xf32>
    %cst_173 = arith.constant dense<0.000000e+00> : vector<16x16xf32>
    %387 = tpu.matmul %386, %369, %cst_173 {dimension_numbers = #tpu.dot_dimension_numbers<[1], [0], [0], [1], [0, 0, 1, 1], [], []>} : vector<16x16xf32>, vector<16x16xf32>, vector<16x16xf32> -> vector<16x16xf32>
    %388 = vector.extract_strided_slice %321 {offsets = [16, 0], sizes = [16, 32], strides = [1, 1]} : vector<32x32xf32> to vector<16x32xf32>
    %cst_174 = arith.constant dense<0.000000e+00> : vector<16x32xf32>
    %389 = tpu.matmul %387, %388, %cst_174 {dimension_numbers = #tpu.dot_dimension_numbers<[1], [0], [0], [1], [0, 0, 1, 1], [], []>} : vector<16x16xf32>, vector<16x32xf32>, vector<16x32xf32> -> vector<16x32xf32>
    %390 = arith.addf %366, %389 : vector<16x32xf32>
    %391 = vector.extract_strided_slice %342 {offsets = [16, 0], sizes = [16, 96], strides = [1, 1]} : vector<32x96xf32> to vector<16x96xf32>
    %392 = vector.extract_strided_slice %391 {offsets = [0, 0], sizes = [16, 16], strides = [1, 1]} : vector<16x96xf32> to vector<16x16xf32>
    %393 = vector.extract_strided_slice %391 {offsets = [0, 32], sizes = [16, 16], strides = [1, 1]} : vector<16x96xf32> to vector<16x16xf32>
    %394 = vector.extract_strided_slice %391 {offsets = [0, 64], sizes = [16, 16], strides = [1, 1]} : vector<16x96xf32> to vector<16x16xf32>
    %cst_175 = arith.constant dense<0.000000e+00> : vector<16x16xf32>
    %395 = tpu.matmul %392, %393, %cst_175 {dimension_numbers = #tpu.dot_dimension_numbers<[1], [1], [0], [0], [0, 0, 1, 0], [], []>} : vector<16x16xf32>, vector<16x16xf32>, vector<16x16xf32> -> vector<16x16xf32>
    %cst_176 = arith.constant 2.500000e-01 : f32
    %396 = vector.broadcast %cst_176 : f32 to vector<16x16xf32>
    %397 = arith.mulf %395, %396 : vector<16x16xf32>
    %cst_177 = arith.constant -1.000000e+09 : f32
    %398 = vector.shape_cast %30 : vector<1x16xi1> to vector<1x16xi1>
    %399 = vector.broadcast %398 : vector<1x16xi1> to vector<16x16xi1>
    %400 = vector.broadcast %cst_177 : f32 to vector<16x16xf32>
    %401 = arith.select %399, %400, %397 : vector<16x16xi1>, vector<16x16xf32>
    %cst_178 = arith.constant dense<0xFF800000> : vector<16xf32>
    %402 = vector.multi_reduction <maximumf>, %401, %cst_178 [1] : vector<16x16xf32> to vector<16xf32>
    %403 = vector.shape_cast %402 : vector<16xf32> to vector<16x1xf32>
    %404 = vector.broadcast %403 : vector<16x1xf32> to vector<16x16xf32>
    %405 = arith.subf %401, %404 : vector<16x16xf32>
    %406 = math.exp %405 : vector<16x16xf32>
    %cst_179 = arith.constant dense<0.000000e+00> : vector<16xf32>
    %407 = vector.multi_reduction <add>, %406, %cst_179 [1] : vector<16x16xf32> to vector<16xf32>
    %408 = vector.shape_cast %407 : vector<16xf32> to vector<16x1xf32>
    %409 = tpu.reciprocal %408 {approx = true} : vector<16x1xf32> -> vector<16x1xf32>
    %410 = vector.broadcast %409 : vector<16x1xf32> to vector<16x16xf32>
    %411 = arith.mulf %406, %410 : vector<16x16xf32>
    %cst_180 = arith.constant dense<0.000000e+00> : vector<16x16xf32>
    %412 = tpu.matmul %411, %394, %cst_180 {dimension_numbers = #tpu.dot_dimension_numbers<[1], [0], [0], [1], [0, 0, 1, 1], [], []>} : vector<16x16xf32>, vector<16x16xf32>, vector<16x16xf32> -> vector<16x16xf32>
    %413 = vector.extract_strided_slice %321 {offsets = [0, 0], sizes = [16, 32], strides = [1, 1]} : vector<32x32xf32> to vector<16x32xf32>
    %cst_181 = arith.constant dense<0.000000e+00> : vector<16x32xf32>
    %414 = tpu.matmul %412, %413, %cst_181 {dimension_numbers = #tpu.dot_dimension_numbers<[1], [0], [0], [1], [0, 0, 1, 1], [], []>} : vector<16x16xf32>, vector<16x32xf32>, vector<16x32xf32> -> vector<16x32xf32>
    %415 = vector.extract_strided_slice %391 {offsets = [0, 16], sizes = [16, 16], strides = [1, 1]} : vector<16x96xf32> to vector<16x16xf32>
    %416 = vector.extract_strided_slice %391 {offsets = [0, 48], sizes = [16, 16], strides = [1, 1]} : vector<16x96xf32> to vector<16x16xf32>
    %417 = vector.extract_strided_slice %391 {offsets = [0, 80], sizes = [16, 16], strides = [1, 1]} : vector<16x96xf32> to vector<16x16xf32>
    %cst_182 = arith.constant dense<0.000000e+00> : vector<16x16xf32>
    %418 = tpu.matmul %415, %416, %cst_182 {dimension_numbers = #tpu.dot_dimension_numbers<[1], [1], [0], [0], [0, 0, 1, 0], [], []>} : vector<16x16xf32>, vector<16x16xf32>, vector<16x16xf32> -> vector<16x16xf32>
    %cst_183 = arith.constant 2.500000e-01 : f32
    %419 = vector.broadcast %cst_183 : f32 to vector<16x16xf32>
    %420 = arith.mulf %418, %419 : vector<16x16xf32>
    %cst_184 = arith.constant -1.000000e+09 : f32
    %421 = vector.shape_cast %30 : vector<1x16xi1> to vector<1x16xi1>
    %422 = vector.broadcast %421 : vector<1x16xi1> to vector<16x16xi1>
    %423 = vector.broadcast %cst_184 : f32 to vector<16x16xf32>
    %424 = arith.select %422, %423, %420 : vector<16x16xi1>, vector<16x16xf32>
    %cst_185 = arith.constant dense<0xFF800000> : vector<16xf32>
    %425 = vector.multi_reduction <maximumf>, %424, %cst_185 [1] : vector<16x16xf32> to vector<16xf32>
    %426 = vector.shape_cast %425 : vector<16xf32> to vector<16x1xf32>
    %427 = vector.broadcast %426 : vector<16x1xf32> to vector<16x16xf32>
    %428 = arith.subf %424, %427 : vector<16x16xf32>
    %429 = math.exp %428 : vector<16x16xf32>
    %cst_186 = arith.constant dense<0.000000e+00> : vector<16xf32>
    %430 = vector.multi_reduction <add>, %429, %cst_186 [1] : vector<16x16xf32> to vector<16xf32>
    %431 = vector.shape_cast %430 : vector<16xf32> to vector<16x1xf32>
    %432 = tpu.reciprocal %431 {approx = true} : vector<16x1xf32> -> vector<16x1xf32>
    %433 = vector.broadcast %432 : vector<16x1xf32> to vector<16x16xf32>
    %434 = arith.mulf %429, %433 : vector<16x16xf32>
    %cst_187 = arith.constant dense<0.000000e+00> : vector<16x16xf32>
    %435 = tpu.matmul %434, %417, %cst_187 {dimension_numbers = #tpu.dot_dimension_numbers<[1], [0], [0], [1], [0, 0, 1, 1], [], []>} : vector<16x16xf32>, vector<16x16xf32>, vector<16x16xf32> -> vector<16x16xf32>
    %436 = vector.extract_strided_slice %321 {offsets = [16, 0], sizes = [16, 32], strides = [1, 1]} : vector<32x32xf32> to vector<16x32xf32>
    %cst_188 = arith.constant dense<0.000000e+00> : vector<16x32xf32>
    %437 = tpu.matmul %435, %436, %cst_188 {dimension_numbers = #tpu.dot_dimension_numbers<[1], [0], [0], [1], [0, 0, 1, 1], [], []>} : vector<16x16xf32>, vector<16x32xf32>, vector<16x32xf32> -> vector<16x32xf32>
    %438 = arith.addf %414, %437 : vector<16x32xf32>
    %439 = tpu.concatenate %390, %438 in 0 : vector<16x32xf32>, vector<16x32xf32> -> vector<32x32xf32>
    %440 = vector.broadcast %323 : vector<1x32xf32> to vector<32x32xf32>
    %441 = arith.addf %439, %440 : vector<32x32xf32>
    %442 = arith.addf %441, %315 : vector<32x32xf32>
    %cst_189 = arith.constant dense<0.000000e+00> : vector<32xf32>
    %443 = vector.multi_reduction <add>, %442, %cst_189 [1] : vector<32x32xf32> to vector<32xf32>
    %444 = vector.shape_cast %443 : vector<32xf32> to vector<32x1xf32>
    %cst_190 = arith.constant 3.200000e+01 : f32
    %445 = vector.broadcast %cst_190 : f32 to vector<32x1xf32>
    %446 = arith.divf %444, %445 : vector<32x1xf32>
    %447 = vector.broadcast %446 : vector<32x1xf32> to vector<32x32xf32>
    %448 = arith.subf %442, %447 : vector<32x32xf32>
    %449 = arith.mulf %448, %448 : vector<32x32xf32>
    %cst_191 = arith.constant dense<0.000000e+00> : vector<32xf32>
    %450 = vector.multi_reduction <add>, %449, %cst_191 [1] : vector<32x32xf32> to vector<32xf32>
    %451 = vector.shape_cast %450 : vector<32xf32> to vector<32x1xf32>
    %cst_192 = arith.constant 3.200000e+01 : f32
    %452 = vector.broadcast %cst_192 : f32 to vector<32x1xf32>
    %453 = arith.divf %451, %452 : vector<32x1xf32>
    %454 = vector.broadcast %446 : vector<32x1xf32> to vector<32x32xf32>
    %455 = arith.subf %442, %454 : vector<32x32xf32>
    %cst_193 = arith.constant 9.99999974E-6 : f32
    %456 = vector.broadcast %cst_193 : f32 to vector<32x1xf32>
    %457 = arith.addf %453, %456 : vector<32x1xf32>
    %458 = math.rsqrt %457 : vector<32x1xf32>
    %459 = vector.broadcast %458 : vector<32x1xf32> to vector<32x32xf32>
    %460 = arith.mulf %455, %459 : vector<32x32xf32>
    %461 = vector.broadcast %325 : vector<1x32xf32> to vector<32x32xf32>
    %462 = arith.mulf %460, %461 : vector<32x32xf32>
    %463 = vector.broadcast %327 : vector<1x32xf32> to vector<32x32xf32>
    %464 = arith.addf %462, %463 : vector<32x32xf32>
    %cst_194 = arith.constant 0.000000e+00 : f32
    %465 = vector.shape_cast %5 : vector<32x1xi1> to vector<32x1xi1>
    %466 = vector.broadcast %465 : vector<32x1xi1> to vector<32x32xi1>
    %467 = vector.broadcast %cst_194 : f32 to vector<32x32xf32>
    %468 = arith.select %466, %467, %464 : vector<32x32xi1>, vector<32x32xf32>
    %c4_i32_195 = arith.constant 4 : i32
    %469 = tpu.dynamic_rotate %468 by %c4_i32_195 dim 0 : vector<32x32xf32>, i32 -> vector<32x32xf32>
    %c-4_i32_196 = arith.constant -4 : i32
    %470 = vector.broadcast %c-4_i32_196 : i32 to vector<32x1xi32>
    %471 = arith.addi %22, %470 : vector<32x1xi32>
    %c0_i32_197 = arith.constant 0 : i32
    %472 = vector.broadcast %c0_i32_197 : i32 to vector<32x1xi32>
    %473 = arith.cmpi sge, %471, %472 : vector<32x1xi32>
    %c16_i32_198 = arith.constant 16 : i32
    %474 = vector.broadcast %c16_i32_198 : i32 to vector<32x1xi32>
    %475 = arith.cmpi slt, %471, %474 : vector<32x1xi32>
    %476 = arith.andi %473, %475 : vector<32x1xi1>
    %cst_199 = arith.constant 0.000000e+00 : f32
    %477 = vector.shape_cast %476 : vector<32x1xi1> to vector<32x1xi1>
    %478 = vector.broadcast %477 : vector<32x1xi1> to vector<32x32xi1>
    %479 = vector.broadcast %cst_199 : f32 to vector<32x32xf32>
    %480 = arith.select %478, %469, %479 : vector<32x32xi1>, vector<32x32xf32>
    %c3_i32_200 = arith.constant 3 : i32
    %481 = tpu.dynamic_rotate %468 by %c3_i32_200 dim 0 : vector<32x32xf32>, i32 -> vector<32x32xf32>
    %c-3_i32_201 = arith.constant -3 : i32
    %482 = vector.broadcast %c-3_i32_201 : i32 to vector<32x1xi32>
    %483 = arith.addi %22, %482 : vector<32x1xi32>
    %c0_i32_202 = arith.constant 0 : i32
    %484 = vector.broadcast %c0_i32_202 : i32 to vector<32x1xi32>
    %485 = arith.cmpi sge, %483, %484 : vector<32x1xi32>
    %c16_i32_203 = arith.constant 16 : i32
    %486 = vector.broadcast %c16_i32_203 : i32 to vector<32x1xi32>
    %487 = arith.cmpi slt, %483, %486 : vector<32x1xi32>
    %488 = arith.andi %485, %487 : vector<32x1xi1>
    %cst_204 = arith.constant 0.000000e+00 : f32
    %489 = vector.shape_cast %488 : vector<32x1xi1> to vector<32x1xi1>
    %490 = vector.broadcast %489 : vector<32x1xi1> to vector<32x32xi1>
    %491 = vector.broadcast %cst_204 : f32 to vector<32x32xf32>
    %492 = arith.select %490, %481, %491 : vector<32x32xi1>, vector<32x32xf32>
    %c2_i32_205 = arith.constant 2 : i32
    %493 = tpu.dynamic_rotate %468 by %c2_i32_205 dim 0 : vector<32x32xf32>, i32 -> vector<32x32xf32>
    %c-2_i32_206 = arith.constant -2 : i32
    %494 = vector.broadcast %c-2_i32_206 : i32 to vector<32x1xi32>
    %495 = arith.addi %22, %494 : vector<32x1xi32>
    %c0_i32_207 = arith.constant 0 : i32
    %496 = vector.broadcast %c0_i32_207 : i32 to vector<32x1xi32>
    %497 = arith.cmpi sge, %495, %496 : vector<32x1xi32>
    %c16_i32_208 = arith.constant 16 : i32
    %498 = vector.broadcast %c16_i32_208 : i32 to vector<32x1xi32>
    %499 = arith.cmpi slt, %495, %498 : vector<32x1xi32>
    %500 = arith.andi %497, %499 : vector<32x1xi1>
    %cst_209 = arith.constant 0.000000e+00 : f32
    %501 = vector.shape_cast %500 : vector<32x1xi1> to vector<32x1xi1>
    %502 = vector.broadcast %501 : vector<32x1xi1> to vector<32x32xi1>
    %503 = vector.broadcast %cst_209 : f32 to vector<32x32xf32>
    %504 = arith.select %502, %493, %503 : vector<32x32xi1>, vector<32x32xf32>
    %c1_i32_210 = arith.constant 1 : i32
    %505 = tpu.dynamic_rotate %468 by %c1_i32_210 dim 0 : vector<32x32xf32>, i32 -> vector<32x32xf32>
    %c-1_i32_211 = arith.constant -1 : i32
    %506 = vector.broadcast %c-1_i32_211 : i32 to vector<32x1xi32>
    %507 = arith.addi %22, %506 : vector<32x1xi32>
    %c0_i32_212 = arith.constant 0 : i32
    %508 = vector.broadcast %c0_i32_212 : i32 to vector<32x1xi32>
    %509 = arith.cmpi sge, %507, %508 : vector<32x1xi32>
    %c16_i32_213 = arith.constant 16 : i32
    %510 = vector.broadcast %c16_i32_213 : i32 to vector<32x1xi32>
    %511 = arith.cmpi slt, %507, %510 : vector<32x1xi32>
    %512 = arith.andi %509, %511 : vector<32x1xi1>
    %cst_214 = arith.constant 0.000000e+00 : f32
    %513 = vector.shape_cast %512 : vector<32x1xi1> to vector<32x1xi1>
    %514 = vector.broadcast %513 : vector<32x1xi1> to vector<32x32xi1>
    %515 = vector.broadcast %cst_214 : f32 to vector<32x32xf32>
    %516 = arith.select %514, %505, %515 : vector<32x32xi1>, vector<32x32xf32>
    %c31_i32_215 = arith.constant 31 : i32
    %517 = tpu.dynamic_rotate %468 by %c31_i32_215 dim 0 : vector<32x32xf32>, i32 -> vector<32x32xf32>
    %c1_i32_216 = arith.constant 1 : i32
    %518 = vector.broadcast %c1_i32_216 : i32 to vector<32x1xi32>
    %519 = arith.addi %22, %518 : vector<32x1xi32>
    %c0_i32_217 = arith.constant 0 : i32
    %520 = vector.broadcast %c0_i32_217 : i32 to vector<32x1xi32>
    %521 = arith.cmpi sge, %519, %520 : vector<32x1xi32>
    %c16_i32_218 = arith.constant 16 : i32
    %522 = vector.broadcast %c16_i32_218 : i32 to vector<32x1xi32>
    %523 = arith.cmpi slt, %519, %522 : vector<32x1xi32>
    %524 = arith.andi %521, %523 : vector<32x1xi1>
    %cst_219 = arith.constant 0.000000e+00 : f32
    %525 = vector.shape_cast %524 : vector<32x1xi1> to vector<32x1xi1>
    %526 = vector.broadcast %525 : vector<32x1xi1> to vector<32x32xi1>
    %527 = vector.broadcast %cst_219 : f32 to vector<32x32xf32>
    %528 = arith.select %526, %517, %527 : vector<32x32xi1>, vector<32x32xf32>
    %c30_i32_220 = arith.constant 30 : i32
    %529 = tpu.dynamic_rotate %468 by %c30_i32_220 dim 0 : vector<32x32xf32>, i32 -> vector<32x32xf32>
    %c2_i32_221 = arith.constant 2 : i32
    %530 = vector.broadcast %c2_i32_221 : i32 to vector<32x1xi32>
    %531 = arith.addi %22, %530 : vector<32x1xi32>
    %c0_i32_222 = arith.constant 0 : i32
    %532 = vector.broadcast %c0_i32_222 : i32 to vector<32x1xi32>
    %533 = arith.cmpi sge, %531, %532 : vector<32x1xi32>
    %c16_i32_223 = arith.constant 16 : i32
    %534 = vector.broadcast %c16_i32_223 : i32 to vector<32x1xi32>
    %535 = arith.cmpi slt, %531, %534 : vector<32x1xi32>
    %536 = arith.andi %533, %535 : vector<32x1xi1>
    %cst_224 = arith.constant 0.000000e+00 : f32
    %537 = vector.shape_cast %536 : vector<32x1xi1> to vector<32x1xi1>
    %538 = vector.broadcast %537 : vector<32x1xi1> to vector<32x32xi1>
    %539 = vector.broadcast %cst_224 : f32 to vector<32x32xf32>
    %540 = arith.select %538, %529, %539 : vector<32x32xi1>, vector<32x32xf32>
    %c29_i32_225 = arith.constant 29 : i32
    %541 = tpu.dynamic_rotate %468 by %c29_i32_225 dim 0 : vector<32x32xf32>, i32 -> vector<32x32xf32>
    %c3_i32_226 = arith.constant 3 : i32
    %542 = vector.broadcast %c3_i32_226 : i32 to vector<32x1xi32>
    %543 = arith.addi %22, %542 : vector<32x1xi32>
    %c0_i32_227 = arith.constant 0 : i32
    %544 = vector.broadcast %c0_i32_227 : i32 to vector<32x1xi32>
    %545 = arith.cmpi sge, %543, %544 : vector<32x1xi32>
    %c16_i32_228 = arith.constant 16 : i32
    %546 = vector.broadcast %c16_i32_228 : i32 to vector<32x1xi32>
    %547 = arith.cmpi slt, %543, %546 : vector<32x1xi32>
    %548 = arith.andi %545, %547 : vector<32x1xi1>
    %cst_229 = arith.constant 0.000000e+00 : f32
    %549 = vector.shape_cast %548 : vector<32x1xi1> to vector<32x1xi1>
    %550 = vector.broadcast %549 : vector<32x1xi1> to vector<32x32xi1>
    %551 = vector.broadcast %cst_229 : f32 to vector<32x32xf32>
    %552 = arith.select %550, %541, %551 : vector<32x32xi1>, vector<32x32xf32>
    %c28_i32_230 = arith.constant 28 : i32
    %553 = tpu.dynamic_rotate %468 by %c28_i32_230 dim 0 : vector<32x32xf32>, i32 -> vector<32x32xf32>
    %c4_i32_231 = arith.constant 4 : i32
    %554 = vector.broadcast %c4_i32_231 : i32 to vector<32x1xi32>
    %555 = arith.addi %22, %554 : vector<32x1xi32>
    %c0_i32_232 = arith.constant 0 : i32
    %556 = vector.broadcast %c0_i32_232 : i32 to vector<32x1xi32>
    %557 = arith.cmpi sge, %555, %556 : vector<32x1xi32>
    %c16_i32_233 = arith.constant 16 : i32
    %558 = vector.broadcast %c16_i32_233 : i32 to vector<32x1xi32>
    %559 = arith.cmpi slt, %555, %558 : vector<32x1xi32>
    %560 = arith.andi %557, %559 : vector<32x1xi1>
    %cst_234 = arith.constant 0.000000e+00 : f32
    %561 = vector.shape_cast %560 : vector<32x1xi1> to vector<32x1xi1>
    %562 = vector.broadcast %561 : vector<32x1xi1> to vector<32x32xi1>
    %563 = vector.broadcast %cst_234 : f32 to vector<32x32xf32>
    %564 = arith.select %562, %553, %563 : vector<32x32xi1>, vector<32x32xf32>
    %565 = tpu.concatenate %480, %492, %504, %516, %468, %528, %540, %552, %564 in 1 : vector<32x32xf32>, vector<32x32xf32>, vector<32x32xf32>, vector<32x32xf32>, vector<32x32xf32>, vector<32x32xf32>, vector<32x32xf32>, vector<32x32xf32>, vector<32x32xf32> -> vector<32x288xf32>
    %cst_235 = arith.constant dense<0.000000e+00> : vector<32x64xf32>
    %566 = tpu.matmul %565, %329, %cst_235 {dimension_numbers = #tpu.dot_dimension_numbers<[1], [0], [0], [1], [0, 0, 1, 1], [], []>} : vector<32x288xf32>, vector<288x64xf32>, vector<32x64xf32> -> vector<32x64xf32>
    %567 = vector.broadcast %331 : vector<1x64xf32> to vector<32x64xf32>
    %568 = arith.addf %566, %567 : vector<32x64xf32>
    %cst_236 = arith.constant 0.000000e+00 : f32
    %569 = vector.broadcast %cst_236 : f32 to vector<32x64xf32>
    %570 = arith.maximumf %568, %569 : vector<32x64xf32>
    %cst_237 = arith.constant dense<0.000000e+00> : vector<32x32xf32>
    %571 = tpu.matmul %570, %333, %cst_237 {dimension_numbers = #tpu.dot_dimension_numbers<[1], [0], [0], [1], [0, 0, 1, 1], [], []>} : vector<32x64xf32>, vector<64x32xf32>, vector<32x32xf32> -> vector<32x32xf32>
    %572 = vector.broadcast %335 : vector<1x32xf32> to vector<32x32xf32>
    %573 = arith.addf %571, %572 : vector<32x32xf32>
    %574 = arith.addf %573, %468 : vector<32x32xf32>
    %cst_238 = arith.constant dense<0.000000e+00> : vector<32xf32>
    %575 = vector.multi_reduction <add>, %574, %cst_238 [1] : vector<32x32xf32> to vector<32xf32>
    %576 = vector.shape_cast %575 : vector<32xf32> to vector<32x1xf32>
    %cst_239 = arith.constant 3.200000e+01 : f32
    %577 = vector.broadcast %cst_239 : f32 to vector<32x1xf32>
    %578 = arith.divf %576, %577 : vector<32x1xf32>
    %579 = vector.broadcast %578 : vector<32x1xf32> to vector<32x32xf32>
    %580 = arith.subf %574, %579 : vector<32x32xf32>
    %581 = arith.mulf %580, %580 : vector<32x32xf32>
    %cst_240 = arith.constant dense<0.000000e+00> : vector<32xf32>
    %582 = vector.multi_reduction <add>, %581, %cst_240 [1] : vector<32x32xf32> to vector<32xf32>
    %583 = vector.shape_cast %582 : vector<32xf32> to vector<32x1xf32>
    %cst_241 = arith.constant 3.200000e+01 : f32
    %584 = vector.broadcast %cst_241 : f32 to vector<32x1xf32>
    %585 = arith.divf %583, %584 : vector<32x1xf32>
    %586 = vector.broadcast %578 : vector<32x1xf32> to vector<32x32xf32>
    %587 = arith.subf %574, %586 : vector<32x32xf32>
    %cst_242 = arith.constant 9.99999974E-6 : f32
    %588 = vector.broadcast %cst_242 : f32 to vector<32x1xf32>
    %589 = arith.addf %585, %588 : vector<32x1xf32>
    %590 = math.rsqrt %589 : vector<32x1xf32>
    %591 = vector.broadcast %590 : vector<32x1xf32> to vector<32x32xf32>
    %592 = arith.mulf %587, %591 : vector<32x32xf32>
    %593 = vector.broadcast %337 : vector<1x32xf32> to vector<32x32xf32>
    %594 = arith.mulf %592, %593 : vector<32x32xf32>
    %595 = vector.broadcast %339 : vector<1x32xf32> to vector<32x32xf32>
    %596 = arith.addf %594, %595 : vector<32x32xf32>
    %cst_243 = arith.constant 0.000000e+00 : f32
    %597 = vector.shape_cast %5 : vector<32x1xi1> to vector<32x1xi1>
    %598 = vector.broadcast %597 : vector<32x1xi1> to vector<32x32xi1>
    %599 = vector.broadcast %cst_243 : f32 to vector<32x32xf32>
    %600 = arith.select %598, %599, %596 : vector<32x32xi1>, vector<32x32xf32>
    %c0_244 = arith.constant 0 : index
    %c0_245 = arith.constant 0 : index
    %601 = vector.load %arg16[%c0_244, %c0_245] : memref<32x20xf32, #tpu.memory_space<vmem>>, vector<32x20xf32>
    %cst_246 = arith.constant dense<0.000000e+00> : vector<32x20xf32>
    %602 = tpu.matmul %600, %601, %cst_246 {dimension_numbers = #tpu.dot_dimension_numbers<[1], [0], [0], [1], [0, 0, 1, 1], [], []>} : vector<32x32xf32>, vector<32x20xf32>, vector<32x20xf32> -> vector<32x20xf32>
    %c0_247 = arith.constant 0 : index
    %c0_248 = arith.constant 0 : index
    %603 = vector.load %arg17[%c0_247, %c0_248] : memref<1x20xf32, #tpu.memory_space<vmem>>, vector<1x20xf32>
    %604 = vector.broadcast %603 : vector<1x20xf32> to vector<32x20xf32>
    %605 = arith.addf %602, %604 : vector<32x20xf32>
    %c0_249 = arith.constant 0 : index
    %c0_250 = arith.constant 0 : index
    %606 = vector.load %arg18[%c0_249, %c0_250] : memref<32x20xf32, #tpu.memory_space<vmem>>, vector<32x20xf32>
    tpu.vector_store %arg18[%c0_249, %c0_250], %605 {strides = array<i32>} : memref<32x20xf32, #tpu.memory_space<vmem>>, vector<32x20xf32>,
    return
  }
}

</mosaic_0001>

<bundles_post_ra>
// kernel: diffsinger_forward.3
= control target key start
LH: loop header
LB: loop body
LE: loop exit
PB: predicated region body
PF: predicated region fallthrough
CT: control target
= control target key end

     0   :  { %v2098_v0 = vmov 0   ;;  %v58_v9 = vlaneseq  ;;  %vm78_vm0 = vcmask 261120   ;;  %v2099_v12 = vmov 0.0   ;;  %s2100_s22 = smov 80   ;;  %s2101_s23 = smov 96   ;;  %s3106_s0 = inlined_call_operand.vmem [shape: s32[16,1], index: 0, kind: input, shape index: {}]   ;;  %s3107_s2 = inlined_call_operand.vmem [shape: f32[32,32], index: 2, kind: input, shape index: {}]   ;;  %s3108_s5 = inlined_call_operand.vmem [shape: f32[2,32,96], index: 5, kind: input, shape index: {}]   ;;  %s3109_s6 = inlined_call_operand.vmem [shape: f32[2,1,96], index: 6, kind: input, shape index: {}]   ;;  %s3110_s1 = inlined_call_operand.vmem [shape: f32[16,32], index: 1, kind: input, shape index: {}]   ;;  %s3111_s3 = inlined_call_operand.vmem [shape: f32[2,1,8], index: 3, kind: input, shape index: {}]   ;;  %s3112_s7 = inlined_call_operand.vmem [shape: f32[2,32,32], index: 7, kind: input, shape index: {}]   ;;  %s3113_s8 = inlined_call_operand.vmem [shape: f32[2,1,32], index: 8, kind: input, shape index: {}]   ;;  %s3114_s4 = inlined_call_operand.vmem [shape: f32[16,1], index: 4, kind: input, shape index: {}]   ;;  %s3115_s9 = inlined_call_operand.vmem [shape: f32[2,1,32], index: 9, kind: input, shape index: {}]   ;;  %s3116_s10 = inlined_call_operand.vmem [shape: f32[2,1,32], index: 10, kind: input, shape index: {}]   ;;  %s3117_s11 = inlined_call_operand.vmem [shape: f32[2,288,64], index: 11, kind: input, shape index: {}]   ;;  %s3118_s12 = inlined_call_operand.vmem [shape: f32[2,1,64], index: 12, kind: input, shape index: {}]   ;;  %s3119_s13 = inlined_call_operand.vmem [shape: f32[2,64,32], index: 13, kind: input, shape index: {}]   ;;  %s3120_s14 = inlined_call_operand.vmem [shape: f32[2,1,32], index: 14, kind: input, shape index: {}]   ;;  %s3121_s15 = inlined_call_operand.vmem [shape: f32[2,1,32], index: 15, kind: input, shape index: {}]   ;;  %s3122_s16 = inlined_call_operand.vmem [shape: f32[2,1,32], index: 16, kind: input, shape index: {}]   ;;  %s3123_s17 = inlined_call_operand.vmem [shape: f32[16,32], index: 17, kind: output, shape index: {}]  }
   0x1   :  { %3146 = sst [smem:[#allocation2_spill]] %s3106_s0  ;;  %1984 = vset.pattern.permute.xlu0 %v2098_v0  ;;  %1985 = vset.pattern.permute.xlu1 %v2098_v0  ;;  %v147_v7 = vld [vmem:[%s3108_s5 + $0x18] sm:$0xff]  ;;  %v146_v8 = vld [vmem:[%s3108_s5 + $0x10] sm:$0xff]  ;;  %v145_v16 = vld [vmem:[%s3108_s5 + $0x8] sm:$0xff]  ;;  %s2102_s24 = smov 112   ;;  %vm239_vm3 = vcmask 130048  }
   0x2   :  { %3147 = sst [smem:[#allocation3_spill]] %s3107_s2  ;;  %1986 = vset.pattern.permute.xlu2 %v2098_v0  ;;  %225 = vmatpush.msra.mxu1 %v147_v7  ;;  %v59_v10 = vand.u32 127, %v58_v9  ;;  %v144_v17 = vld [vmem:[%s3108_s5] sm:$0xff]  ;;  %v77_v21 = vld [vmem:[%s3110_s1 + $0x8] sm:$0xff]  ;;  %vm3126_vm6 = vcmask 64512   ;;  %s2103_s27 = smov 48  }
   0x3   :  { %s3148_s26 = sld [smem:[#allocation2_spill]]  ;;  %v76_v18 = vld [vmem:[%s3110_s1] sm:$0xff] }
   0x4   :  { %s3149_s29 = sld [smem:[#allocation3_spill]]  ;;  %226 = vmatpush.msra.mxu1 %v146_v8  ;;  %v2032_v24 = vld [vmem:[%s3109_s6] ss:$0 sm:$0xff]  ;;  %v1870_v56 = vld [vmem:[%s3111_s3 + $0x1] sm:$0x1] }
   0x5   :  { %v139_v28 = vld [vmem:[%s3111_s3] sm:$0x1]  ;;  %vm143_vm7 = vcmp.gt.f32.partialorder %v1870_v56, 0.5 }
   0x6   :  { %227 = vmatpush.msra.mxu1 %v145_v16  ;;  %vm140_vm4 = vcmp.gt.f32.partialorder %v139_v28, 0.5  ;;  %v448_v57 = vsel %vm143_vm7, 1, %v2098_v0 }
   0x7   :  { %v265_v29 = vsel %vm140_vm4, 1, %v2098_v0  ;;  %v449_v59 = vperm.slane %v448_v57, 0 }
   0x8   :  { %228 = vmatpush.msra.mxu1 %v144_v17  ;;  %v266_v30 = vperm.slane %v265_v29, 0 }
   0x9   :  { %v56_v1 = vld [vmem:[%s3148_s26] sm:$0xff]  ;;  %v57_v5 = vld [vmem:[%s3148_s26 + $0x8] sm:$0xff]  ;;  %s2104_s26 = smov 64   ;;  %vm2288_vm8 = vcmp.eq.s32.totalorder %v449_v59, 1 }
   0xa   :  { %v75_v2 = vld [vmem:[%s3149_s29 + $0x18] sm:$0xff]  ;;  %61 = vperm.xlu0 %1984, %v56_v1   ;;  %v74_v3 = vld [vmem:[%s3149_s29 + $0x10] sm:$0xff]  ;;  %v73_v4 = vld [vmem:[%s3149_s29 + $0x8] sm:$0xff]  ;;  %vm2259_vm5 = vcmp.eq.s32.totalorder %v266_v30, 1 }
   0xb   :  { %97 = vmatpush.msra.mxu0 %v75_v2  ;;  %v72_v6 = vld [vmem:[%s3149_s29] sm:$0xff]  ;;  %s2106_s29 = smov 32  }
   0xd   :  { %98 = vmatpush.msra.mxu0 %v74_v3 }
   0xf   :  { %99 = vmatpush.msra.mxu0 %v73_v4 }
  0x11   :  { %100 = vmatpush.msra.mxu0 %v72_v6 }
  0x12   :  { %64 = vperm.xlu0 %1984, %v57_v5  }
  0x7c   :  { %v62_v11 = vpop.permute.xlu0 %61 }
  0x7d   :  { %vm66_vm1 = vcmp.eq.s32.totalorder %v59_v10, %v62_v11  ;;  %v151_v11 = vld [vmem:[%s3112_s7 + $0x10] sm:$0xff] }
  0x7e   :  { %v1866_v13 = vsel %vm66_vm1, 1.0, %v2099_v12 }
  0x7f   :  { %1868 = vmatmul.msk.f32.vlgmr.msra.gmra.mxu0 %vm78_vm0, %v1866_v13  ;;  %v149_v13 = vld [vmem:[%s3112_s7] sm:$0xff] }
  0x84   :  { %v65_v14 = vpop.permute.xlu0 %64 }
  0x85   :  { %vm67_vm2 = vcmp.eq.s32.totalorder %v59_v10, %v65_v14  ;;  %v152_v10 = vld [vmem:[%s3112_s7 + $0x18] sm:$0xff] }
  0x86   :  { %v1867_v15 = vsel %vm67_vm2, 1.0, %v2099_v12  ;;  %v150_v12 = vld [vmem:[%s3112_s7 + $0x8] sm:$0xff] }
  0x87   :  { %1869 = vmatmul.msk.f32.gmra.mxu0 %vm78_vm0, %v1867_v15 }
  0xfc   :  { %v102_v19 = vpop.f32.mrf.mxu0 }
  0xfd   :  { %v2236_v20 = vadd.f32 %v102_v19, %v76_v18 }
  0xff   :  { %1871 = vmatmul.msk.f32.vlgmr.msra.gmra.mxu1 %vm78_vm0, %v2236_v20 }
 0x104   :  { %v105_v22 = vpop.f32.mrf.mxu0 }
 0x105   :  { %v2243_v23 = vadd.f32 %v105_v22, %v77_v21 }
 0x107   :  { %1872 = vmatmul.msk.f32.gmra.mxu1 %vm78_vm0, %v2243_v23 }
 0x17c   :  { %v230_v25 = vpop.f32.mrf.mxu1 }
 0x17d   :  { %v231_v26 = vadd.f32 %v2032_v24, %v230_v25 }
 0x17f   :  { %309 = vrot.lane.b32.xlu0 %v231_v26, %s2100_s22  ;;  %237 = vrot.lane.b32.xlu1 %v231_v26, %s2101_s23 }
 0x184   :  { %v233_v36 = vpop.f32.mrf.mxu1 }
 0x185   :  { %v2267_v37 = vadd.f32 %v2032_v24, %v233_v36  ;;  %v2033_v36 = vld [vmem:[%s3113_s8] ss:$0 sm:$0xff] }
 0x187   :  { %307 = vrot.lane.b32.xlu0 %v231_v26, %s2102_s24 }
 0x1f1   :  { %v238_v27 = vpop.permute.xlu1 %237  ;;  %v310_v47 = vpop.permute.xlu0 %309 }
 0x1f2   :  { %1873 = vmatpush.xpose.msk.msrb.mxu0 %vm239_vm3, %v238_v27 }
 0x1f5   :  { %1874 = vmatmul.msk.f32.vlgmr.msrb.gmra.mxu0 %vm239_vm3, %v231_v26 }
 0x1f9   :  { %v308_v50 = vpop.permute.xlu0 %307 }
 0x272   :  { %v261_v31 = vpop.f32.mrf.mxu0 }
 0x273   :  { %v264_v33 = vmul.f32 0.25, %v261_v31 }
 0x275   :  { %v268_v34 = vsel %vm2259_vm5, -1e+09, %v264_v33 }
 0x276   :  { %v270_v35 = vsel %vm3126_vm6, %v268_v34, -inf }
 0x277   :  { %271 = vmax.xlane.f32.xlu1 %v270_v35 }
 0x290   :  { %348 = vrot.lane.b32.xlu1 %v231_v26, %s2103_s27 }
 0x298   :  { %421 = vrot.lane.b32.xlu1 %v2267_v37, %s2101_s23 }
 0x2ea   :  { %v272_v38 = vpop.xlane.xlu1 %271 }
 0x2eb   :  { %v273_v39 = vsub.f32 %v268_v34, %v272_v38 }
 0x2ed   :  { %v274_v40 = vmul.f32 1.442695, %v273_v39 }
 0x2ef   :  { %2048 = vpow2.f32 %v274_v40 }
 0x2f5   :  { %v2049_v41 = vpop.eup %2048 }
 0x2f6   :  { %v276_v42 = vsel %vm3126_vm6, %v2049_v41, 0.0 }
 0x2f7   :  { %277 = vadd.xlane.f32.xlu2 %v276_v42 }
 0x302   :  { %v349_v43 = vpop.permute.xlu1 %348 }
 0x303   :  { %369 = vmatpush.msra.mxu2 %v349_v43 }
 0x305   :  { %414 = vmatpush.msrb.mxu2 %v150_v12 }
 0x307   :  { %415 = vmatpush.msrb.mxu2 %v149_v13 }
 0x30a   :  { %v422_v44 = vpop.permute.xlu1 %421 }
 0x30b   :  { %1881 = vmatpush.xpose.msk.msra.mxu0 %vm239_vm3, %v422_v44 }
 0x30e   :  { %1882 = vmatmul.msk.f32.vlgmr.msra.gmra.mxu0 %vm239_vm3, %v2267_v37 }
 0x30f   :  { %281 = vrot.lane.b32.xlu2 %v231_v26, %s2104_s26  ;;  %573 = vmatpush.msrb.mxu0 %v152_v10 }
 0x311   :  { %574 = vmatpush.msrb.mxu0 %v151_v11 }
 0x36a   :  { %v278_v45 = vpop.xlane.xlu2 %277 }
 0x36b   :  { %2050 = vrcp.f32 %v278_v45 }
 0x371   :  { %v2051_v46 = vpop.eup %2050 }
 0x372   :  { %v282_v48 = vpop.permute.xlu2 %281  ;;  %v280_v49 = vmul.f32 %v2051_v46, %v2049_v41 }
 0x373   :  { %302 = vmatpush.msra.mxu3 %v282_v48 }
 0x374   :  { %1875 = vmatmul.msk.f32.vlgmr.msra.gmra.mxu3 %vm3126_vm6, %v280_v49 }
 0x375   :  { %1876 = vmatpush.xpose.msk.msrb.mxu3 %vm239_vm3, %v310_v47 }
 0x379   :  { %391 = vmatpush.msra.mxu3 %v152_v10 }
 0x37b   :  { %392 = vmatpush.msra.mxu3 %v151_v11 }
 0x37c   :  { %1877 = vmatmul.msk.f32.vlgmr.msrb.gmra.mxu3 %vm239_vm3, %v308_v50 }
 0x38b   :  { %v444_v58 = vpop.f32.mrf.mxu0 }
 0x38c   :  { %v447_v60 = vmul.f32 0.25, %v444_v58 }
 0x38e   :  { %v451_v62 = vsel %vm2288_vm8, -1e+09, %v447_v60 }
 0x38f   :  { %v452_v63 = vsel %vm3126_vm6, %v451_v62, -inf }
 0x3f7   :  { %v304_v51 = vpop.f32.mrf.mxu3 }
 0x3ff   :  { %v332_v52 = vpop.f32.mrf.mxu3 }
 0x400   :  { %v335_v53 = vmul.f32 0.25, %v332_v52 }
 0x402   :  { %v336_v54 = vsel %vm2259_vm5, -1e+09, %v335_v53  ;;  %v108_v53 = vld [vmem:[%s3114_s4] sm:$0xff] }
 0x403   :  { %v337_v55 = vsel %vm3126_vm6, %v336_v54, -inf  ;;  %vm110_vm9 = vcmp.gt.f32.partialorder %v108_v53, 0.5 }
 0x404   :  { %338 = vmax.xlane.f32.xlu0 %v337_v55 }
 0x418   :  { %489 = vrot.lane.b32.xlu0 %v2267_v37, %s2102_s24 }
 0x442   :  { %453 = vmax.xlane.f32.xlu0 %v452_v63 }
 0x456   :  { %463 = vrot.lane.b32.xlu0 %v2267_v37, %s2104_s26 }
 0x477   :  { %v339_v1 = vpop.xlane.xlu0 %338 }
 0x478   :  { %v340_v2 = vsub.f32 %v336_v54, %v339_v1  ;;  %v670_v54 = vsel %vm110_vm9, 1, %v2098_v0 }
 0x47a   :  { %v341_v3 = vmul.f32 1.442695, %v340_v2 }
 0x47c   :  { %2052 = vpow2.f32 %v341_v3 }
 0x482   :  { %v2053_v4 = vpop.eup %2052 }
 0x483   :  { %v343_v5 = vsel %vm3126_vm6, %v2053_v4, 0.0 }
 0x484   :  { %344 = vadd.xlane.f32.xlu2 %v343_v5 }
 0x48a   :  { %v490_v6 = vpop.permute.xlu0 %489 }
 0x49c   :  { %491 = vrot.lane.b32.xlu2 %v2267_v37, %s2100_s22 }
 0x4b5   :  { %v454_v7 = vpop.xlane.xlu0 %453 }
 0x4b6   :  { %v455_v21 = vsub.f32 %v451_v62, %v454_v7 }
 0x4b8   :  { %v456_v22 = vmul.f32 1.442695, %v455_v21 }
 0x4c8   :  { %v464_v8 = vpop.permute.xlu0 %463 }
 0x4c9   :  { %484 = vmatpush.msrb.mxu1 %v464_v8 }
 0x4cb   :  { %596 = vmatpush.msra.mxu1 %v150_v12 }
 0x4cd   :  { %597 = vmatpush.msra.mxu1 %v149_v13  ;;  %v109_v13 = vld [vmem:[%s3114_s4 + $0x8] sm:$0xff] }
 0x4ce   :  { %vm111_vm11 = vcmp.gt.f32.partialorder %v109_v13, 0.5 }
 0x4f7   :  { %v345_v14 = vpop.xlane.xlu2 %344 }
 0x4f8   :  { %2054 = vrcp.f32 %v345_v14  ;;  %v671_v14 = vsel %vm111_vm11, 1, %v2098_v0  ;;  %v190_v0 = vld [vmem:[%s3117_s11 + $0x110] sm:$0xff] }
 0x4f9   :  { %2056 = vpow2.f32 %v456_v22  ;;  %v191_v22 = vld [vmem:[%s3117_s11 + $0x118] sm:$0xff] }
 0x4fe   :  { %v2055_v15 = vpop.eup %2054 }
 0x4ff   :  { %v492_v16 = vpop.permute.xlu2 %491  ;;  %v347_v17 = vmul.f32 %v2055_v15, %v2053_v4  ;;  %v2057_v28 = vpop.eup %2056 }
 0x500   :  { %1884 = vmatpush.xpose.msk.msrb.mxu3 %vm239_vm3, %v492_v16  ;;  %v458_v29 = vsel %vm3126_vm6, %v2057_v28, 0.0 }
 0x501   :  { %1878 = vmatmul.msk.f32.vlgmr.msra.gmra.mxu2 %vm3126_vm6, %v347_v17 }
 0x509   :  { %1880 = vmatmul.msk.f32.vlgmr.msrb.gmra.mxu2 %vm239_vm3, %v304_v51 }
 0x584   :  { %v371_v18 = vpop.f32.mrf.mxu2 }
 0x585   :  { %1879 = vmatmul.msk.f32.vlgmr.msra.gmra.mxu3 %vm239_vm3, %v371_v18 }
 0x58c   :  { %v417_v34 = vpop.f32.mrf.mxu2 }
 0x58d   :  { %1885 = vmatmul.msk.f32.vlgmr.msrb.gmra.mxu3 %vm239_vm3, %v490_v6 }
 0x608   :  { %v394_v19 = vpop.f32.mrf.mxu3 }
 0x609   :  { %v418_v35 = vadd.f32 %v417_v34, %v394_v19 }
 0x60b   :  { %v605_v40 = vadd.f32 %v2033_v36, %v418_v35  ;;  %v2034_v35 = vld [vmem:[%s3115_s9] ss:$0 sm:$0xff] }
 0x610   :  { %v514_v24 = vpop.f32.mrf.mxu3 }
 0x611   :  { %v517_v25 = vmul.f32 0.25, %v514_v24 }
 0x613   :  { %v518_v26 = vsel %vm2288_vm8, -1e+09, %v517_v25  ;;  %v189_v25 = vld [vmem:[%s3117_s11 + $0x108] sm:$0xff] }
 0x614   :  { %v519_v27 = vsel %vm3126_vm6, %v518_v26, -inf }
 0x615   :  { %520 = vmax.xlane.f32.xlu1 %v519_v27  ;;  %v188_v27 = vld [vmem:[%s3117_s11 + $0x100] sm:$0xff] }
 0x61d   :  { %459 = vadd.xlane.f32.xlu1 %v458_v29 }
 0x636   :  { %530 = vrot.lane.b32.xlu1 %v2267_v37, %s2103_s27  ;;  %v607_v37 = vadd.f32 %v605_v40, %v2236_v20  ;;  %v2105_v20 = vmov 32.0   ;;  %v2035_v40 = vld [vmem:[%s3116_s10] ss:$0 sm:$0xff] }
 0x638   :  { %v609_v44 = vsel %vm78_vm0, %v607_v37, 0.0 }
 0x63e   :  { %673 = vperm.xlu1 %1985, %v670_v54  }
 0x688   :  { %v521_v30 = vpop.xlane.xlu1 %520 }
 0x689   :  { %v522_v31 = vsub.f32 %v518_v26, %v521_v30 }
 0x68b   :  { %v523_v33 = vmul.f32 1.442695, %v522_v31 }
 0x68d   :  { %2058 = vpow2.f32 %v523_v33 }
 0x690   :  { %v460_v38 = vpop.xlane.xlu1 %459 }
 0x691   :  { %2060 = vrcp.f32 %v460_v38  ;;  %v2367_v38 = vshrl.u32 %v58_v9, 7 }
 0x693   :  { %v2059_v39 = vpop.eup %2058  ;;  %v2377_v9 = vand.u32 7, %v2367_v38  ;;  %vm684_vm9 = vcmp.lt.s32.totalorder %v2367_v38, 4  ;;  %vm3132_vm11 = vcmp.lt.s32.totalorder %v2367_v38, 3 }
 0x694   :  { %v525_v41 = vsel %vm3126_vm6, %v2059_v39, 0.0 }
 0x695   :  { %526 = vadd.xlane.f32.xlu2 %v525_v41 }
 0x697   :  { %v2061_v42 = vpop.eup %2060 }
 0x698   :  { %v462_v43 = vmul.f32 %v2061_v42, %v2057_v28 }
 0x69a   :  { %1883 = vmatmul.msk.f32.vlgmr.msrb.gmra.mxu1 %vm3126_vm6, %v462_v43 }
 0x69b   :  { %958 = vmatpush.msrb.mxu1 %v191_v22 }
 0x69d   :  { %610 = vadd.xlane.f32.xlu2 %v609_v44  ;;  %959 = vmatpush.msrb.mxu1 %v190_v0  ;;  %v114_v44 = vadd.s32 8, %v2367_v38 }
 0x69f   :  { %960 = vmatpush.msrb.mxu1 %v189_v25 }
 0x6a1   :  { %961 = vmatpush.msrb.mxu1 %v188_v27 }
 0x6a8   :  { %v531_v45 = vpop.permute.xlu1 %530 }
 0x6a9   :  { %551 = vmatpush.msra.mxu2 %v531_v45 }
 0x6b0   :  { %v2372_v43 = vpop.permute.xlu1 %673 }
 0x6b1   :  { %vm678_vm1 = vcmp.eq.s32.totalorder %v2372_v43, 1 }
 0x708   :  { %v527_v46 = vpop.xlane.xlu2 %526 }
 0x709   :  { %2062 = vrcp.f32 %v527_v46 }
 0x70a   :  { %2064 = vrcp.f32 %v2105_v20  ;;  %v171_v20 = vld [vmem:[%s3117_s11 + $0x78] sm:$0xff] }
 0x70b   :  { %900 = vmatpush.msra.mxu3 %v171_v20 }
 0x70f   :  { %v2063_v47 = vpop.eup %2062 }
 0x710   :  { %v529_v48 = vmul.f32 %v2063_v47, %v2059_v39  ;;  %v2065_v51 = vpop.eup %2064  ;;  %v611_v58 = vpop.xlane.xlu2 %610 }
 0x711   :  { %v616_v52 = vmul.f32 32.0, %v2065_v51  ;;  %vm620_vm10 = vweird.f32 %v2065_v51 }
 0x712   :  { %1886 = vmatmul.msk.f32.vlgmr.msra.gmra.mxu2 %vm3126_vm6, %v529_v48  ;;  %v2379_v48 = vand.u32 7, %v114_v44  ;;  %vm779_vm6 = vcmp.lt.s32.totalorder %v2367_v38, 6 }
 0x713   :  { %v617_v55 = vsub.f32 1.0, %v616_v52  ;;  %v170_v52 = vld [vmem:[%s3117_s11 + $0x70] sm:$0xff] }
 0x714   :  { %901 = vmatpush.msra.mxu3 %v170_v52  ;;  %v2472_v0 = vadd.s32 4294967294, %v2379_v48 }
 0x715   :  { %v618_v56 = vmul.f32 %v2065_v51, %v617_v55  ;;  %v2397_v55 = vadd.s32 4, %v2377_v9 }
 0x717   :  { %v486_v49 = vpop.f32.mrf.mxu1  ;;  %v619_v57 = vadd.f32 %v2065_v51, %v618_v56  ;;  %v186_v56 = vld [vmem:[%s3117_s11 + $0xf0] sm:$0xff] }
 0x718   :  { %1888 = vmatmul.msk.f32.vlgmr.msra.gmra.mxu1 %vm239_vm3, %v486_v49 }
 0x719   :  { %v2337_v59 = vsel %vm620_vm10, %v2065_v51, %v619_v57  ;;  %v187_v51 = vld [vmem:[%s3117_s11 + $0xf8] sm:$0xff]  ;;  %v2403_v57 = vadd.s32 4294967293, %v2377_v9  ;;  %vm3137_vm10 = vcmp.lt.s32.totalorder %v2397_v55, 8 }
 0x71a   :  { %v622_v1 = vmul.f32 %v2337_v59, %v611_v58  ;;  %923 = vmatpush.msrb.mxu2 %v187_v51  ;;  %v2406_v58 = vadd.s32 1, %v2377_v9  ;;  %v2531_v51 = vadd.s32 4294967295, %v2377_v9 }
 0x71c   :  { %v624_v4 = vsub.f32 %v607_v37, %v622_v1  ;;  %v185_v1 = vld [vmem:[%s3117_s11 + $0xe8] sm:$0xff]  ;;  %924 = vmatpush.msrb.mxu2 %v186_v56  ;;  %v2537_v56 = vadd.s32 3, %v2377_v9 }
 0x71e   :  { %v626_v6 = vmul.f32 %v624_v4, %v624_v4  ;;  %925 = vmatpush.msrb.mxu2 %v185_v1 }
 0x720   :  { %v628_v7 = vsel %vm78_vm0, %v626_v6, 0.0 }
 0x795   :  { %v553_v50 = vpop.f32.mrf.mxu2  ;;  %v599_v60 = vpop.f32.mrf.mxu1 }
 0x796   :  { %1887 = vmatmul.msk.f32.vlgmr.msrb.gmra.mxu0 %vm239_vm3, %v553_v50 }
 0x813   :  { %v576_v62 = vpop.f32.mrf.mxu0 }
 0x814   :  { %v600_v63 = vadd.f32 %v599_v60, %v576_v62  ;;  %v2409_v60 = vadd.s32 4294967293, %v2379_v48  ;;  %v2412_v62 = vadd.s32 1, %v2379_v48 }
 0x816   :  { %v606_v2 = vadd.f32 %v2033_v36, %v600_v63  ;;  %v169_v63 = vld [vmem:[%s3117_s11 + $0x68] sm:$0xff] }
 0x817   :  { %902 = vmatpush.msra.mxu3 %v169_v63 }
 0x818   :  { %v608_v3 = vadd.f32 %v606_v2, %v2243_v23 }
 0x81a   :  { %v612_v5 = vsel %vm78_vm0, %v608_v3, 0.0 }
 0x81b   :  { %613 = vadd.xlane.f32.xlu2 %v612_v5 }
 0x823   :  { %629 = vadd.xlane.f32.xlu2 %v628_v7  ;;  %v168_v7 = vld [vmem:[%s3117_s11 + $0x60] sm:$0xff] }
 0x824   :  { %903 = vmatpush.msra.mxu3 %v168_v7 }
 0x83b   :  { %676 = vperm.xlu2 %1986, %v671_v14   ;;  %v2454_v14 = vadd.s32 4294967294, %v2377_v9 }
 0x88e   :  { %v614_v8 = vpop.xlane.xlu2 %613 }
 0x88f   :  { %v623_v10 = vmul.f32 %v2337_v59, %v614_v8  ;;  %v184_v8 = vld [vmem:[%s3117_s11 + $0xe0] sm:$0xff] }
 0x890   :  { %926 = vmatpush.msrb.mxu2 %v184_v8 }
 0x891   :  { %v625_v11 = vsub.f32 %v608_v3, %v623_v10 }
 0x893   :  { %v627_v12 = vmul.f32 %v625_v11, %v625_v11 }
 0x895   :  { %v631_v23 = vsel %vm78_vm0, %v627_v12, 0.0  ;;  %v183_v12 = vld [vmem:[%s3117_s11 + $0xd8] sm:$0xff] }
 0x896   :  { %632 = vadd.xlane.f32.xlu0 %v631_v23  ;;  %v630_v15 = vpop.xlane.xlu2 %629  ;;  %v2450_v23 = vadd.s32 4, %v2379_v48  ;;  %927 = vmatpush.msrb.mxu2 %v183_v12 }
 0x897   :  { %v634_v16 = vmul.f32 %v630_v15, %v2337_v59 }
 0x899   :  { %v636_v17 = vadd.f32 1e-05, %v634_v16 }
 0x89b   :  { %2066 = vrsqrt.f32 %v636_v17  ;;  %vm644_vm13 = vweird.f32 %v636_v17 }
 0x89e   :  { %v2394_v54 = vpop.permute.xlu2 %676 }
 0x89f   :  { %vm679_vm7 = vcmp.eq.s32.totalorder %v2394_v54, 1 }
 0x8a1   :  { %v2067_v18 = vpop.eup %2066 }
 0x8a2   :  { %v639_v19 = vmul.f32 %v2067_v18, %v636_v17  ;;  %vm645_vm12 = vweird.f32 %v2067_v18 }
 0x8a3   :  { %vm646_vm14 = vmor %vm644_vm13, %vm645_vm12  ;;  %vm3128_vm12 = vcmp.lt.s32.totalorder %v2367_v38, 7  ;;  %vm3130_vm13 = vcmp.ge.s32.totalorder %v2403_v57, 0 }
 0x8a4   :  { %v640_v21 = vmul.f32 %v2067_v18, %v639_v19  ;;  %v182_v19 = vld [vmem:[%s3117_s11 + $0xd0] sm:$0xff] }
 0x8a5   :  { %928 = vmatpush.msrb.mxu2 %v182_v19 }
 0x8a6   :  { %v641_v24 = vmul.f32 0.5, %v640_v21 }
 0x8a8   :  { %v642_v26 = vsub.f32 1.5, %v641_v24  ;;  %v2469_v24 = vadd.s32 2, %v2377_v9 }
 0x8aa   :  { %v643_v30 = vmul.f32 %v2067_v18, %v642_v26 }
 0x8ac   :  { %v647_v33 = vsel %vm646_vm14, %v2067_v18, %v643_v30  ;;  %vm3127_vm14 = vcmp.lt.s32.totalorder %v2406_v58, 8  ;;  %v166_v18 = vld [vmem:[%s3117_s11 + $0x50] sm:$0xff] }
 0x8ad   :  { %v658_v34 = vmul.f32 %v647_v33, %v624_v4 }
 0x8af   :  { %v663_v41 = vmul.f32 %v2034_v35, %v658_v34 }
 0x8b1   :  { %v668_v45 = vadd.f32 %v2035_v40, %v663_v41 }
 0x8b3   :  { %v2383_v49 = vsel %vm678_vm1, 0.0, %v668_v45 }
 0x8b4   :  { %v682_v3 = vrot.slane %v2383_v49, 4  ;;  %v701_v4 = vrot.slane %v2383_v49, 5  ;;  %v758_v5 = vrot.slane %v2383_v49, 1  ;;  %v720_v6 = vrot.slane %v2383_v49, 6 }
 0x8b5   :  { %v739_v20 = vrot.slane %v2383_v49, 7 }
 0x909   :  { %v633_v28 = vpop.xlane.xlu0 %632 }
 0x90a   :  { %v635_v29 = vmul.f32 %v633_v28, %v2337_v59 }
 0x90c   :  { %v637_v31 = vadd.f32 1e-05, %v635_v29 }
 0x90e   :  { %2068 = vrsqrt.f32 %v637_v31  ;;  %vm654_vm2 = vweird.f32 %v637_v31 }
 0x914   :  { %v2069_v36 = vpop.eup %2068 }
 0x915   :  { %v649_v39 = vmul.f32 %v2069_v36, %v637_v31  ;;  %vm655_vm15 = vweird.f32 %v2069_v36 }
 0x916   :  { %vm656_vm4 = vmor %vm654_vm2, %vm655_vm15  ;;  %vm3129_vm15 = vcmp.ge.s32.totalorder %v2409_v60, 0  ;;  %vm3131_vm2 = vcmp.lt.s32.totalorder %v2412_v62, 8 }
 0x917   :  { %v650_v42 = vmul.f32 %v2069_v36, %v649_v39  ;;  %v2500_v39 = vadd.s32 2, %v2379_v48 }
 0x919   :  { %v651_v37 = vmul.f32 0.5, %v650_v42 }
 0x91b   :  { %v652_v46 = vsub.f32 1.5, %v651_v37 }
 0x91d   :  { %v653_v47 = vmul.f32 %v2069_v36, %v652_v46 }
 0x91f   :  { %v657_v50 = vsel %vm656_vm4, %v2069_v36, %v653_v47  ;;  %vm722_vm4 = vcmp.lt.s32.totalorder %v2367_v38, 2  ;;  %v777_v36 = vrot.slane %v2383_v49, 2 }
 0x920   :  { %v659_v53 = vmul.f32 %v657_v50, %v625_v11  ;;  %v167_v11 = vld [vmem:[%s3117_s11 + $0x58] sm:$0xff] }
 0x921   :  { %904 = vmatpush.msra.mxu3 %v167_v11 }
 0x922   :  { %v664_v2 = vmul.f32 %v2034_v35, %v659_v53 }
 0x923   :  { %905 = vmatpush.msra.mxu3 %v166_v18 }
 0x924   :  { %v669_v10 = vadd.f32 %v2035_v40, %v664_v2 }
 0x926   :  { %v2447_v13 = vsel %vm679_vm7, 0.0, %v669_v10 }
 0x927   :  { %v683_v15 = vrot.slane %v2447_v13, 4  ;;  %v702_v16 = vrot.slane %v2447_v13, 5  ;;  %v759_v17 = vrot.slane %v2447_v13, 1  ;;  %v721_v21 = vrot.slane %v2447_v13, 6 }
 0x928   :  { %v778_v22 = vrot.slane %v2447_v13, 2  ;;  %v740_v52 = vrot.slane %v2447_v13, 7  ;;  %v797_v53 = vrot.slane %v2447_v13, 3 }
 0x929   :  { %v2478_v25 = vsel %vm684_vm9, %v682_v3, %v683_v15  ;;  %v705_v26 = vsel %vm3132_vm11, %v702_v16, %v701_v4  ;;  %v761_v27 = vsel %vm3128_vm12, %v758_v5, %v759_v17  ;;  %v704_v28 = vsel %vm3132_vm11, %v701_v4, %v702_v16 }
 0x92a   :  { %v827_v29 = vsel %vm3137_vm10, %v2478_v25, 0.0  ;;  %v718_v30 = vsel %vm3130_vm13, %v705_v26, 0.0  ;;  %v775_v31 = vsel %vm3127_vm14, %v761_v27, 0.0  ;;  %v719_v33 = vsel %vm3129_vm15, %v704_v28, 0.0  ;;  %v181_v26 = vld [vmem:[%s3117_s11 + $0xc8] sm:$0xff]  ;;  %v164_v27 = vld [vmem:[%s3117_s11 + $0x40] sm:$0xff] }
 0x92b   :  { %1889 = vmatmul.msk.f32.vlgmr.msrb.gmra.mxu1 %vm78_vm0, %v827_v29  ;;  %v1987_v34 = vpack.i.bf16 %v775_v31, %v718_v30  ;;  %v762_v35 = vsel %vm3128_vm12, %v759_v17, %v758_v5  ;;  %vm3136_vm14 = vcmp.ge.s32.totalorder %v2454_v14, 0  ;;  %v724_v42 = vsel %vm722_vm4, %v721_v21, %v720_v6  ;;  %929 = vmatpush.msrb.mxu2 %v181_v26  ;;  %v180_v28 = vld [vmem:[%s3117_s11 + $0xc0] sm:$0xff]  ;;  %v163_v29 = vld [vmem:[%s3117_s11 + $0x38] sm:$0xff]  ;;  %v162_v31 = vld [vmem:[%s3117_s11 + $0x30] sm:$0xff] }
 0x92c   :  { %v776_v40 = vsel %vm3131_vm2, %v762_v35, 0.0  ;;  %v780_v37 = vsel %vm779_vm6, %v777_v36, %v778_v22  ;;  %vm3133_vm12 = vcmp.lt.s32.totalorder %v2469_v24, 8  ;;  %vm3134_vm15 = vcmp.lt.s32.totalorder %v2450_v23, 8  ;;  %v179_v30 = vld [vmem:[%s3117_s11 + $0xb8] sm:$0xff]  ;;  %v177_v35 = vld [vmem:[%s3117_s11 + $0xa8] sm:$0xff] }
 0x92d   :  { %1988 = vrot.lane.b32.xlu1 %v1987_v34, %s2106_s29  ;;  %v2002_v41 = vpack.i.bf16 %v776_v40, %v719_v33  ;;  %vm3135_vm13 = vcmp.ge.s32.totalorder %v2472_v0, 0  ;;  %v2518_v44 = vsel %vm684_vm9, %v683_v15, %v682_v3  ;;  %v723_v45 = vsel %vm722_vm4, %v720_v6, %v721_v21  ;;  %930 = vmatpush.msrb.mxu2 %v180_v28  ;;  %v178_v33 = vld [vmem:[%s3117_s11 + $0xb0] sm:$0xff]  ;;  %v161_v34 = vld [vmem:[%s3117_s11 + $0x28] sm:$0xff]  ;;  %v176_v40 = vld [vmem:[%s3117_s11 + $0xa0] sm:$0xff] }
 0x92e   :  { %v781_v46 = vsel %vm779_vm6, %v778_v22, %v777_v36  ;;  %vm787_vm2 = vcmp.lt.s32.totalorder %v2500_v39, 8  ;;  %v737_v47 = vsel %vm3136_vm14, %v724_v42, 0.0  ;;  %v794_v50 = vsel %vm3133_vm12, %v780_v37, 0.0  ;;  %v165_v22 = vld [vmem:[%s3117_s11 + $0x48] sm:$0xff]  ;;  %v160_v36 = vld [vmem:[%s3117_s11 + $0x20] sm:$0xff]  ;;  %v175_v42 = vld [vmem:[%s3117_s11 + $0x98] sm:$0xff] }
 0x92f   :  { %2003 = vrot.lane.b32.xlu0 %v2002_v41, %s2106_s29  ;;  %vm741_vm11 = vcmp.lt.s32.totalorder %v2367_v38, 1  ;;  %v828_v63 = vsel %vm3134_vm15, %v2518_v44, 0.0  ;;  %v738_v1 = vsel %vm3135_vm13, %v723_v45, 0.0  ;;  %v795_v2 = vsel %vm787_vm2, %v781_v46, 0.0  ;;  %906 = vmatpush.msra.mxu3 %v165_v22  ;;  %v159_v41 = vld [vmem:[%s3117_s11 + $0x18] sm:$0xff]  ;;  %v158_v37 = vld [vmem:[%s3117_s11 + $0x10] sm:$0xff] }
 0x930   :  { %vm3145_vm12 = vcmp.lt.s32.totalorder %v2367_v38, 5  ;;  %v1992_v3 = vpack.i.bf16 %v794_v50, %v737_v47  ;;  %v796_v4 = vrot.slane %v2383_v49, 3  ;;  %v2550_v5 = vadd.s32 4294967295, %v2379_v48  ;;  %931 = vmatpush.msrb.mxu2 %v179_v30  ;;  %v174_v45 = vld [vmem:[%s3117_s11 + $0x90] sm:$0xff]  ;;  %v157_v46 = vld [vmem:[%s3117_s11 + $0x8] sm:$0xff]  ;;  %v156_v50 = vld [vmem:[%s3117_s11] sm:$0xff] }
 0x931   :  { %v2553_v6 = vadd.s32 3, %v2379_v48  ;;  %vm746_vm15 = vcmp.ge.s32.totalorder %v2531_v51, 0  ;;  %v2007_v7 = vpack.i.bf16 %v795_v2, %v738_v1  ;;  %v743_v8 = vsel %vm741_vm11, %v740_v52, %v739_v20  ;;  %907 = vmatpush.msra.mxu3 %v164_v27  ;;  %v173_v47 = vld [vmem:[%s3117_s11 + $0x88] sm:$0xff] }
 0x932   :  { %v799_v10 = vsel %vm3145_vm12, %v796_v4, %v797_v53  ;;  %vm3139_vm13 = vcmp.lt.s32.totalorder %v2537_v56, 8  ;;  %v742_v11 = vsel %vm741_vm11, %v739_v20, %v740_v52  ;;  %vm3140_vm14 = vcmp.ge.s32.totalorder %v2550_v5, 0  ;;  %932 = vmatpush.msrb.mxu2 %v178_v33  ;;  %v172_v20 = vld [vmem:[%s3117_s11 + $0x80] sm:$0xff]  ;;  %v200_v52 = vld [vmem:[%s3119_s13 + $0x38] sm:$0xff] }
 0x933   :  { %1890 = vmatmul.msk.f32.gmra.mxu1 %vm78_vm0, %v828_v63  ;;  %v800_v12 = vsel %vm3145_vm12, %v797_v53, %v796_v4  ;;  %vm3138_vm10 = vcmp.lt.s32.totalorder %v2553_v6, 8  ;;  %v756_v15 = vsel %vm746_vm15, %v743_v8, 0.0  ;;  %v813_v16 = vsel %vm3139_vm13, %v799_v10, 0.0  ;;  %908 = vmatpush.msra.mxu3 %v163_v29  ;;  %v199_v53 = vld [vmem:[%s3119_s13 + $0x30] sm:$0xff]  ;;  %v198_v63 = vld [vmem:[%s3119_s13 + $0x28] sm:$0xff] }
 0x934   :  { %v757_v17 = vsel %vm3140_vm14, %v742_v11, 0.0  ;;  %v814_v18 = vsel %vm3138_vm10, %v800_v12, 0.0  ;;  %v1997_v19 = vpack.i.bf16 %v813_v16, %v756_v15  ;;  %933 = vmatpush.msrb.mxu2 %v177_v35  ;;  %988 = vmatpush.msra.mxu1 %v200_v52  ;;  %v2649_v4 = vadd.s32 4294967292, %v2377_v9  ;;  %v2038_v52 = vld [vmem:[%s3118_s12] ss:$0 sm:$0xff] }
 0x935   :  { %1993 = vrot.lane.b32.xlu1 %v1992_v3, %s2104_s26  ;;  %v2012_v21 = vpack.i.bf16 %v814_v18, %v757_v17  ;;  %909 = vmatpush.msra.mxu3 %v162_v31  ;;  %vm3144_vm13 = vcmask 523264   ;;  %vm3143_vm14 = vcmask 785408   ;;  %v2656_v17 = vadd.s32 4294967292, %v2379_v48 }
 0x936   :  { %934 = vmatpush.msrb.mxu2 %v176_v40  ;;  %989 = vmatpush.msra.mxu1 %v199_v53  ;;  %vm3141_vm10 = vcmp.ge.s32.totalorder %v2649_v4, 0 }
 0x937   :  { %2008 = vrot.lane.b32.xlu0 %v2007_v7, %s2104_s26  ;;  %910 = vmatpush.msra.mxu3 %v161_v34  ;;  %v699_v15 = vsel %vm3141_vm10, %v2518_v44, 0.0  ;;  %vm3142_vm10 = vcmp.ge.s32.totalorder %v2656_v17, 0 }
 0x938   :  { %935 = vmatpush.msrb.mxu2 %v175_v42  ;;  %990 = vmatpush.msra.mxu1 %v198_v63  ;;  %v700_v35 = vsel %vm3142_vm10, %v2478_v25, 0.0  ;;  %v196_v25 = vld [vmem:[%s3119_s13 + $0x18] sm:$0xff] }
 0x939   :  { %911 = vmatpush.msra.mxu3 %v160_v36 }
 0x93a   :  { %936 = vmatpush.msrb.mxu2 %v174_v45 }
 0x93b   :  { %912 = vmatpush.msra.mxu3 %v159_v41 }
 0x93c   :  { %937 = vmatpush.msrb.mxu2 %v173_v47  ;;  %v195_v47 = vld [vmem:[%s3119_s13 + $0x10] sm:$0xff] }
 0x93d   :  { %1998 = vrot.lane.b32.xlu1 %v1997_v19, %s2101_s23  ;;  %913 = vmatpush.msra.mxu3 %v158_v37 }
 0x93e   :  { %938 = vmatpush.msrb.mxu2 %v172_v20  ;;  %v193_v20 = vld [vmem:[%s3119_s13] sm:$0xff] }
 0x93f   :  { %2013 = vrot.lane.b32.xlu0 %v2012_v21, %s2101_s23  ;;  %914 = vmatpush.msra.mxu3 %v157_v46  ;;  %v197_v46 = vld [vmem:[%s3119_s13 + $0x20] sm:$0xff] }
 0x940   :  { %991 = vmatpush.msra.mxu1 %v197_v46 }
 0x941   :  { %915 = vmatpush.msra.mxu3 %v156_v50  ;;  %v194_v50 = vld [vmem:[%s3119_s13 + $0x8] sm:$0xff] }
 0x942   :  { %992 = vmatpush.msra.mxu1 %v196_v25 }
 0x944   :  { %993 = vmatpush.msra.mxu1 %v195_v47  ;;  %v2040_v47 = vld [vmem:[%s3121_s15] ss:$0 sm:$0xff] }
 0x946   :  { %994 = vmatpush.msra.mxu1 %v194_v50 }
 0x948   :  { %995 = vmatpush.msra.mxu1 %v193_v20 }
 0x99f   :  { %v1989_v1 = vpop.permute.xlu1 %1988 }
 0x9a0   :  { %v1991_v8 = vunpack.i.h.bf16 %v1989_v1  ;;  %v1990_v10 = vunpack.i.l.bf16 %v1989_v1 }
 0x9a1   :  { %v2004_v2 = vpop.permute.xlu0 %2003 }
 0x9a2   :  { %v885_v9 = vsel %vm78_vm0, %v2383_v49, %v1991_v8  ;;  %v877_v18 = vsel %vm78_vm0, %v699_v15, %v1990_v10  ;;  %v2006_v48 = vunpack.i.h.bf16 %v2004_v2  ;;  %v2005_v29 = vunpack.i.l.bf16 %v2004_v2 }
 0x9a4   :  { %v878_v36 = vsel %vm78_vm0, %v700_v35, %v2005_v29  ;;  %v886_v40 = vsel %vm78_vm0, %v2447_v13, %v2006_v48 }
 0x9a7   :  { %v1994_v3 = vpop.permute.xlu1 %1993 }
 0x9a8   :  { %v1996_v11 = vunpack.i.h.bf16 %v1994_v3  ;;  %v1995_v12 = vunpack.i.l.bf16 %v1994_v3  ;;  %v963_v2 = vpop.f32.mrf.mxu1 }
 0x9a9   :  { %v2009_v7 = vpop.permute.xlu0 %2008 }
 0x9aa   :  { %v880_v22 = vsel %vm3144_vm13, %v877_v18, %v1995_v12  ;;  %v887_v26 = vsel %vm3144_vm13, %v885_v9, %v1996_v11  ;;  %v2011_v30 = vunpack.i.h.bf16 %v2009_v7  ;;  %v2010_v31 = vunpack.i.l.bf16 %v2009_v7 }
 0x9ac   :  { %v881_v41 = vsel %vm3144_vm13, %v878_v36, %v2010_v31  ;;  %v888_v42 = vsel %vm3144_vm13, %v886_v40, %v2011_v30  ;;  %v1896_v31 = vld [vmem:[%s3108_s5 + $0x38] sm:$0xff] }
 0x9ad   :  { %1154 = vmatpush.msra.mxu0 %v1896_v31 }
 0x9af   :  { %v1999_v16 = vpop.permute.xlu1 %1998 }
 0x9b0   :  { %v2001_v19 = vunpack.i.h.bf16 %v1999_v16  ;;  %v2000_v21 = vunpack.i.l.bf16 %v1999_v16  ;;  %v966_v16 = vpop.f32.mrf.mxu1 }
 0x9b1   :  { %v2014_v28 = vpop.permute.xlu0 %2013 }
 0x9b2   :  { %v883_v27 = vsel %vm3143_vm14, %v880_v22, %v2000_v21  ;;  %v889_v44 = vsel %vm3143_vm14, %v887_v26, %v2001_v19  ;;  %v2016_v33 = vunpack.i.h.bf16 %v2014_v28  ;;  %v2015_v34 = vunpack.i.l.bf16 %v2014_v28  ;;  %v2039_v19 = vld [vmem:[%s3120_s14] ss:$0 sm:$0xff] }
 0x9b3   :  { %916 = vmatmul.f32.vlgmr.msra.gmra.mxu3 %v883_v27  ;;  %939 = vmatmul.f32.vlgmr.msrb.gmra.mxu2 %v889_v44 }
 0x9b4   :  { %v884_v37 = vsel %vm3143_vm14, %v881_v41, %v2015_v34  ;;  %v890_v45 = vsel %vm3143_vm14, %v888_v42, %v2016_v33  ;;  %v1895_v33 = vld [vmem:[%s3108_s5 + $0x30] sm:$0xff]  ;;  %v1893_v34 = vld [vmem:[%s3108_s5 + $0x20] sm:$0xff] }
 0x9b5   :  { %1155 = vmatpush.msra.mxu0 %v1895_v33 }
 0x9bb   :  { %919 = vmatmul.f32.gmra.mxu3 %v884_v37  ;;  %942 = vmatmul.f32.gmra.mxu2 %v890_v45 }
 0xa36   :  { %v917_v53 = vpop.f32.mrf.mxu3  ;;  %v940_v63 = vpop.f32.mrf.mxu2 }
 0xa37   :  { %v918_v1 = vadd.f32 %v2038_v52, %v917_v53 }
 0xa39   :  { %v941_v3 = vadd.f32 %v940_v63, %v918_v1 }
 0xa3b   :  { %v964_v7 = vadd.f32 %v963_v2, %v941_v3  ;;  %v2043_v2 = vld [vmem:[%s3109_s6 + $0x1] ss:$0 sm:$0xff] }
 0xa3d   :  { %v969_v8 = vmax.f32 %v964_v7, 0.0 }
 0xa3e   :  { %v920_v10 = vpop.f32.mrf.mxu3  ;;  %v943_v12 = vpop.f32.mrf.mxu2 }
 0xa3f   :  { %v921_v11 = vadd.f32 %v2038_v52, %v920_v10  ;;  %1891 = vmatmul.msk.f32.vlgmr.msra.gmra.mxu1 %vm3144_vm13, %v969_v8  ;;  %v2041_v52 = vld [vmem:[%s3122_s16] ss:$0 sm:$0xff] }
 0xa41   :  { %v944_v15 = vadd.f32 %v943_v12, %v921_v11 }
 0xa43   :  { %v967_v9 = vadd.f32 %v966_v16, %v944_v15 }
 0xa45   :  { %v970_v18 = vmax.f32 %v967_v9, 0.0 }
 0xa47   :  { %1892 = vmatmul.msk.f32.gmra.mxu1 %vm3144_vm13, %v970_v18 }
 0xabc   :  { %v997_v21 = vpop.f32.mrf.mxu1 }
 0xabd   :  { %v998_v22 = vadd.f32 %v2039_v19, %v997_v21 }
 0xabf   :  { %v1003_v26 = vadd.f32 %v998_v22, %v2383_v49  ;;  %v1894_v49 = vld [vmem:[%s3108_s5 + $0x28] sm:$0xff] }
 0xac0   :  { %1156 = vmatpush.msra.mxu0 %v1894_v49 }
 0xac1   :  { %v1005_v27 = vsel %vm78_vm0, %v1003_v26, 0.0 }
 0xac2   :  { %1006 = vadd.xlane.f32.xlu2 %v1005_v27  ;;  %1157 = vmatpush.msra.mxu0 %v1893_v34 }
 0xac4   :  { %v1000_v8 = vpop.f32.mrf.mxu1 }
 0xac5   :  { %v1001_v10 = vadd.f32 %v2039_v19, %v1000_v8 }
 0xac7   :  { %v1004_v11 = vadd.f32 %v1001_v10, %v2447_v13 }
 0xac9   :  { %v1008_v12 = vsel %vm78_vm0, %v1004_v11, 0.0 }
 0xb35   :  { %v1007_v44 = vpop.xlane.xlu2 %1006 }
 0xb36   :  { %v1011_v28 = vmul.f32 %v1007_v44, %v2337_v59 }
 0xb38   :  { %v1013_v48 = vsub.f32 %v1003_v26, %v1011_v28 }
 0xb3a   :  { %v1015_v29 = vmul.f32 %v1013_v48, %v1013_v48 }
 0xb3c   :  { %v1017_v30 = vsel %vm78_vm0, %v1015_v29, 0.0 }
 0xb3d   :  { %1018 = vadd.xlane.f32.xlu1 %v1017_v30 }
 0xbb0   :  { %v1019_v35 = vpop.xlane.xlu1 %1018 }
 0xbb1   :  { %v1023_v36 = vmul.f32 %v1019_v35, %v2337_v59 }
 0xbb3   :  { %v1025_v40 = vadd.f32 1e-05, %v1023_v36 }
 0xbb5   :  { %2070 = vrsqrt.f32 %v1025_v40  ;;  %vm1033_vm14 = vweird.f32 %v1025_v40 }
 0xbbb   :  { %v2071_v41 = vpop.eup %2070 }
 0xbbc   :  { %v1028_v42 = vmul.f32 %v2071_v41, %v1025_v40  ;;  %vm1034_vm10 = vweird.f32 %v2071_v41 }
 0xbbd   :  { %vm1035_vm13 = vmor %vm1033_vm14, %vm1034_vm10  ;;  %vm3154_vm10 = vcmask 64512  }
 0xbbe   :  { %v1029_v37 = vmul.f32 %v2071_v41, %v1028_v42 }
 0xbc0   :  { %v1030_v45 = vmul.f32 0.5, %v1029_v37 }
 0xbc2   :  { %v1031_v46 = vsub.f32 1.5, %v1030_v45 }
 0xbc4   :  { %v1032_v25 = vmul.f32 %v2071_v41, %v1031_v46 }
 0xbc6   :  { %v1036_v50 = vsel %vm1035_vm13, %v2071_v41, %v1032_v25 }
 0xbc7   :  { %v1047_v20 = vmul.f32 %v1036_v50, %v1013_v48 }
 0xbc9   :  { %v1052_v53 = vmul.f32 %v2040_v47, %v1047_v20 }
 0xbcb   :  { %v1057_v63 = vadd.f32 %v2041_v52, %v1052_v53 }
 0xbcd   :  { %v2724_v1 = vsel %vm678_vm1, 0.0, %v1057_v63 }
 0xbce   :  { %1953 = vmatmul.msk.f32.vlgmr.msra.gmra.mxu0 %vm78_vm0, %v2724_v1 }
 0xc4b   :  { %v1159_v3 = vpop.f32.mrf.mxu0 }
 0xc4c   :  { %v1160_v7 = vadd.f32 %v2043_v2, %v1159_v3 }
 0xc4e   :  { %1231 = vrot.lane.b32.xlu0 %v1160_v7, %s2102_s24  ;;  %1233 = vrot.lane.b32.xlu1 %v1160_v7, %s2100_s22 }
 0xc4f   :  { %1166 = vrot.lane.b32.xlu2 %v1160_v7, %s2101_s23 }
 0xc78   :  { %1009 = vadd.xlane.f32.xlu0 %v1008_v12  ;;  %v1900_v12 = vld [vmem:[%s3112_s7 + $0x30] sm:$0xff] }
 0xca9   :  { %v1167_v15 = vpop.permute.xlu2 %1166 }
 0xcaa   :  { %1955 = vmatpush.xpose.msk.msrb.mxu1 %vm239_vm3, %v1167_v15 }
 0xcad   :  { %1956 = vmatmul.msk.f32.vlgmr.msrb.gmra.mxu1 %vm239_vm3, %v1160_v7 }
 0xcc0   :  { %v1234_v16 = vpop.permute.xlu1 %1233  ;;  %v1232_v9 = vpop.permute.xlu0 %1231 }
 0xcc1   :  { %1958 = vmatpush.xpose.msk.msra.mxu1 %vm239_vm3, %v1234_v16 }
 0xcc4   :  { %1959 = vmatmul.msk.f32.vlgmr.msra.gmra.mxu1 %vm239_vm3, %v1232_v9 }
 0xceb   :  { %v1010_v18 = vpop.xlane.xlu0 %1009 }
 0xcec   :  { %v1012_v21 = vmul.f32 %v1010_v18, %v2337_v59 }
 0xcee   :  { %v1014_v19 = vsub.f32 %v1004_v11, %v1012_v21  ;;  %v1901_v11 = vld [vmem:[%s3112_s7 + $0x38] sm:$0xff] }
 0xcef   :  { %1315 = vmatpush.msra.mxu2 %v1901_v11 }
 0xcf0   :  { %v1016_v22 = vmul.f32 %v1014_v19, %v1014_v19 }
 0xcf1   :  { %1316 = vmatpush.msra.mxu2 %v1900_v12 }
 0xcf2   :  { %v1020_v13 = vsel %vm78_vm0, %v1016_v22, 0.0 }
 0xcf3   :  { %1021 = vadd.xlane.f32.xlu2 %v1020_v13 }
 0xd2a   :  { %v1189_v26 = vpop.f32.mrf.mxu1 }
 0xd41   :  { %v1256_v27 = vpop.f32.mrf.mxu1 }
 0xd42   :  { %v1259_v44 = vmul.f32 0.25, %v1256_v27 }
 0xd44   :  { %v1260_v28 = vsel %vm2259_vm5, -1e+09, %v1259_v44 }
 0xd45   :  { %v1261_v48 = vsel %vm3154_vm10, %v1260_v28, -inf }
 0xd46   :  { %1262 = vmax.xlane.f32.xlu1 %v1261_v48 }
 0xd66   :  { %v1022_v29 = vpop.xlane.xlu2 %1021 }
 0xd67   :  { %v1024_v30 = vmul.f32 %v1022_v29, %v2337_v59 }
 0xd69   :  { %v1026_v31 = vadd.f32 1e-05, %v1024_v30 }
 0xd6b   :  { %2072 = vrsqrt.f32 %v1026_v31  ;;  %vm1043_vm14 = vweird.f32 %v1026_v31 }
 0xd71   :  { %v2073_v33 = vpop.eup %2072 }
 0xd72   :  { %v1038_v49 = vmul.f32 %v2073_v33, %v1026_v31  ;;  %vm1044_vm13 = vweird.f32 %v2073_v33 }
 0xd73   :  { %vm1045_vm12 = vmor %vm1043_vm14, %vm1044_vm13 }
 0xd74   :  { %v1039_v34 = vmul.f32 %v2073_v33, %v1038_v49 }
 0xd76   :  { %v1040_v35 = vmul.f32 0.5, %v1039_v34  ;;  %v1899_v34 = vld [vmem:[%s3112_s7 + $0x28] sm:$0xff] }
 0xd78   :  { %v1041_v36 = vsub.f32 1.5, %v1040_v35  ;;  %v1898_v35 = vld [vmem:[%s3112_s7 + $0x20] sm:$0xff] }
 0xd7a   :  { %v1042_v40 = vmul.f32 %v2073_v33, %v1041_v36 }
 0xd7c   :  { %v1046_v41 = vsel %vm1045_vm12, %v2073_v33, %v1042_v40  ;;  %vm3155_vm12 = vmmov %vm3154_vm10 }
 0xd7d   :  { %v1048_v42 = vmul.f32 %v1046_v41, %v1014_v19 }
 0xd7f   :  { %v1053_v37 = vmul.f32 %v2040_v47, %v1048_v42 }
 0xd81   :  { %v1058_v45 = vadd.f32 %v2041_v52, %v1053_v37  ;;  %v1192_v52 = vmul.f32 0.25, %v1189_v26 }
 0xd83   :  { %v2748_v46 = vsel %vm679_vm7, 0.0, %v1058_v45  ;;  %v1193_v8 = vsel %vm2259_vm5, -1e+09, %v1192_v52  ;;  %vm3156_vm5 = vmmov %vm3154_vm10 }
 0xd84   :  { %1954 = vmatmul.msk.f32.gmra.mxu0 %vm78_vm0, %v2748_v46  ;;  %v1194_v10 = vsel %vm3155_vm12, %v1193_v8, -inf  ;;  %vm3157_vm13 = vmmov %vm3156_vm5 }
 0xd85   :  { %vm3158_vm14 = vmmov %vm3156_vm5 }
 0xd86   :  { %vm3160_vm12 = vmmov %vm3156_vm5 }
 0xdb9   :  { %v1263_v25 = vpop.xlane.xlu1 %1262 }
 0xdba   :  { %v1264_v50 = vsub.f32 %v1260_v28, %v1263_v25 }
 0xdbc   :  { %v1265_v20 = vmul.f32 1.442695, %v1264_v50 }
 0xdbe   :  { %2074 = vpow2.f32 %v1265_v20 }
 0xdc4   :  { %v2075_v53 = vpop.eup %2074 }
 0xdc5   :  { %v1267_v63 = vsel %vm3154_vm10, %v2075_v53, 0.0  ;;  %vm3159_vm10 = vmmov %vm3156_vm5 }
 0xdc6   :  { %1268 = vadd.xlane.f32.xlu0 %v1267_v63 }
 0xdda   :  { %1272 = vrot.lane.b32.xlu0 %v1160_v7, %s2103_s27 }
 0xe01   :  { %v1162_v3 = vpop.f32.mrf.mxu0 }
 0xe02   :  { %v2754_v47 = vadd.f32 %v2043_v2, %v1162_v3 }
 0xe04   :  { %1410 = vrot.lane.b32.xlu0 %v2754_v47, %s2102_s24  ;;  %1412 = vrot.lane.b32.xlu1 %v2754_v47, %s2100_s22 }
 0xe05   :  { %1345 = vrot.lane.b32.xlu2 %v2754_v47, %s2101_s23 }
 0xe0c   :  { %1205 = vrot.lane.b32.xlu1 %v1160_v7, %s2104_s26 }
 0xe2e   :  { %1195 = vmax.xlane.f32.xlu2 %v1194_v10 }
 0xe39   :  { %v1269_v2 = vpop.xlane.xlu0 %1268 }
 0xe3a   :  { %2076 = vrcp.f32 %v1269_v2 }
 0xe40   :  { %v2077_v7 = vpop.eup %2076 }
 0xe41   :  { %v1271_v15 = vmul.f32 %v2077_v7, %v2075_v53 }
 0xe4c   :  { %v1273_v16 = vpop.permute.xlu0 %1272 }
 0xe4d   :  { %1293 = vmatpush.msrb.mxu3 %v1273_v16 }
 0xe4e   :  { %1960 = vmatmul.msk.f32.vlgmr.msrb.gmra.mxu3 %vm3156_vm5, %v1271_v15 }
 0xe5f   :  { %v1346_v32 = vpop.permute.xlu2 %1345 }
 0xe60   :  { %1963 = vmatpush.xpose.msk.msrb.mxu1 %vm239_vm3, %v1346_v32 }
 0xe63   :  { %1964 = vmatmul.msk.f32.vlgmr.msrb.gmra.mxu1 %vm239_vm3, %v2754_v47 }
 0xe64   :  { %1494 = vmatpush.msra.mxu1 %v1901_v11 }
 0xe66   :  { %1495 = vmatpush.msra.mxu1 %v1900_v12 }
 0xe76   :  { %v1413_v9 = vpop.permute.xlu1 %1412  ;;  %v1411_v44 = vpop.permute.xlu0 %1410 }
 0xe77   :  { %1966 = vmatpush.xpose.msk.msrb.mxu2 %vm239_vm3, %v1413_v9 }
 0xe7e   :  { %v1206_v18 = vpop.permute.xlu1 %1205 }
 0xe7f   :  { %1226 = vmatpush.msrb.mxu0 %v1206_v18 }
 0xe81   :  { %1338 = vmatpush.msra.mxu0 %v1899_v34 }
 0xe83   :  { %1339 = vmatpush.msra.mxu0 %v1898_v35 }
 0xea1   :  { %v1196_v21 = vpop.xlane.xlu2 %1195 }
 0xea2   :  { %v1197_v19 = vsub.f32 %v1193_v8, %v1196_v21 }
 0xea4   :  { %v1198_v22 = vmul.f32 1.442695, %v1197_v19 }
 0xea6   :  { %2078 = vpow2.f32 %v1198_v22 }
 0xeac   :  { %v2079_v13 = vpop.eup %2078 }
 0xead   :  { %v1200_v26 = vsel %vm3157_vm13, %v2079_v13, 0.0  ;;  %vm3162_vm13 = vmmov %vm3156_vm5 }
 0xeae   :  { %1201 = vadd.xlane.f32.xlu0 %v1200_v26 }
 0xed1   :  { %v1295_v27 = vpop.f32.mrf.mxu3 }
 0xed2   :  { %1961 = vmatmul.msk.f32.vlgmr.msra.gmra.mxu2 %vm239_vm3, %v1295_v27 }
 0xeda   :  { %1967 = vmatmul.msk.f32.vlgmr.msrb.gmra.mxu2 %vm239_vm3, %v1411_v44 }
 0xee0   :  { %v1368_v28 = vpop.f32.mrf.mxu1 }
 0xee1   :  { %v1371_v48 = vmul.f32 0.25, %v1368_v28 }
 0xee3   :  { %v1372_v29 = vsel %vm2288_vm8, -1e+09, %v1371_v48 }
 0xee4   :  { %v1373_v30 = vsel %vm3158_vm14, %v1372_v29, -inf  ;;  %vm3163_vm14 = vmmov %vm3156_vm5 }
 0xee5   :  { %1374 = vmax.xlane.f32.xlu1 %v1373_v30 }
 0xefe   :  { %1451 = vrot.lane.b32.xlu1 %v2754_v47, %s2103_s27 }
 0xf21   :  { %v1202_v31 = vpop.xlane.xlu0 %1201 }
 0xf22   :  { %2080 = vrcp.f32 %v1202_v31 }
 0xf28   :  { %v2081_v33 = vpop.eup %2080 }
 0xf29   :  { %v1204_v49 = vmul.f32 %v2081_v33, %v2079_v13 }
 0xf2b   :  { %1957 = vmatmul.msk.f32.vlgmr.msrb.gmra.mxu0 %vm3159_vm10, %v1204_v49 }
 0xf55   :  { %v1318_v36 = vpop.f32.mrf.mxu2 }
 0xf58   :  { %v1375_v40 = vpop.xlane.xlu1 %1374 }
 0xf59   :  { %v1376_v41 = vsub.f32 %v1372_v29, %v1375_v40 }
 0xf5b   :  { %v1377_v42 = vmul.f32 1.442695, %v1376_v41 }
 0xf5d   :  { %2082 = vpow2.f32 %v1377_v42  ;;  %v1435_v37 = vpop.f32.mrf.mxu2 }
 0xf5e   :  { %v1438_v45 = vmul.f32 0.25, %v1435_v37 }
 0xf60   :  { %v1439_v25 = vsel %vm2288_vm8, -1e+09, %v1438_v45  ;;  %vm3161_vm8 = vmmov %vm3156_vm5 }
 0xf61   :  { %v1440_v50 = vsel %vm3160_vm12, %v1439_v25, -inf }
 0xf62   :  { %1441 = vmax.xlane.f32.xlu2 %v1440_v50 }
 0xf63   :  { %v2083_v20 = vpop.eup %2082 }
 0xf64   :  { %v1379_v53 = vsel %vm3156_vm5, %v2083_v20, 0.0 }
 0xf65   :  { %1380 = vadd.xlane.f32.xlu0 %v1379_v53 }
 0xf70   :  { %v1452_v63 = vpop.permute.xlu1 %1451 }
 0xf71   :  { %1472 = vmatpush.msrb.mxu0 %v1452_v63 }
 0xf7a   :  { %1384 = vrot.lane.b32.xlu2 %v2754_v47, %s2104_s26  ;;  %v2044_v47 = vld [vmem:[%s3113_s8 + $0x1] ss:$0 sm:$0xff] }
 0xfa8   :  { %v1228_v3 = vpop.f32.mrf.mxu0 }
 0xfa9   :  { %1962 = vmatmul.msk.f32.vlgmr.msra.gmra.mxu0 %vm239_vm3, %v1228_v3  ;;  %v1939_v3 = vld [vmem:[%s3117_s11 + $0x230] sm:$0xff] }
 0xfd5   :  { %v1442_v52 = vpop.xlane.xlu2 %1441 }
 0xfd6   :  { %v1443_v8 = vsub.f32 %v1439_v25, %v1442_v52 }
 0xfd8   :  { %v1444_v10 = vmul.f32 1.442695, %v1443_v8  ;;  %v1381_v61 = vpop.xlane.xlu0 %1380  ;;  %v1938_v8 = vld [vmem:[%s3117_s11 + $0x228] sm:$0xff] }
 0xfd9   :  { %2084 = vrcp.f32 %v1381_v61 }
 0xfda   :  { %2086 = vpow2.f32 %v1444_v10 }
 0xfdd   :  { %v1385_v2 = vpop.permute.xlu2 %1384 }
 0xfde   :  { %1405 = vmatpush.msra.mxu3 %v1385_v2  ;;  %v1937_v2 = vld [vmem:[%s3117_s11 + $0x220] sm:$0xff] }
 0xfdf   :  { %v2085_v11 = vpop.eup %2084 }
 0xfe0   :  { %1517 = vmatpush.msrb.mxu3 %v1899_v34  ;;  %v2087_v12 = vpop.eup %2086  ;;  %v1383_v7 = vmul.f32 %v2085_v11, %v2083_v20 }
 0xfe1   :  { %v1446_v15 = vsel %vm3161_vm8, %v2087_v12, 0.0 }
 0xfe2   :  { %1518 = vmatpush.msrb.mxu3 %v1898_v35  ;;  %1447 = vadd.xlane.f32.xlu0 %v1446_v15 }
 0xfe3   :  { %1965 = vmatmul.msk.f32.vlgmr.msra.gmra.mxu3 %vm3162_vm13, %v1383_v7 }
0x1026   :  { %v1341_v16 = vpop.f32.mrf.mxu0 }
0x1027   :  { %v1342_v32 = vadd.f32 %v1341_v16, %v1318_v36 }
0x1029   :  { %v1526_v9 = vadd.f32 %v2044_v47, %v1342_v32  ;;  %v2036_v32 = vld [vmem:[%s3115_s9 + $0x1] ss:$0 sm:$0xff] }
0x102b   :  { %v1528_v18 = vadd.f32 %v1526_v9, %v2724_v1 }
0x102d   :  { %v1530_v21 = vsel %vm78_vm0, %v1528_v18, 0.0 }
0x102e   :  { %1531 = vadd.xlane.f32.xlu0 %v1530_v21 }
0x1055   :  { %v1448_v19 = vpop.xlane.xlu0 %1447 }
0x1056   :  { %2088 = vrcp.f32 %v1448_v19  ;;  %v2037_v19 = vld [vmem:[%s3116_s10 + $0x1] ss:$0 sm:$0xff] }
0x105c   :  { %v2089_v22 = vpop.eup %2088 }
0x105d   :  { %v1450_v13 = vmul.f32 %v2089_v22, %v2087_v12 }
0x105f   :  { %1968 = vmatmul.msk.f32.vlgmr.msrb.gmra.mxu0 %vm3163_vm14, %v1450_v13  ;;  %vm3164_vm14 = vcmp.lt.s32.totalorder %v2397_v55, 8 }
0x1066   :  { %v1407_v26 = vpop.f32.mrf.mxu3 }
0x1067   :  { %1970 = vmatmul.msk.f32.vlgmr.msrb.gmra.mxu3 %vm239_vm3, %v1407_v26 }
0x10a1   :  { %v1532_v27 = vpop.xlane.xlu0 %1531 }
0x10a2   :  { %v1536_v44 = vmul.f32 %v1532_v27, %v2337_v59 }
0x10a4   :  { %v1538_v28 = vsub.f32 %v1528_v18, %v1536_v44 }
0x10a6   :  { %v1540_v48 = vmul.f32 %v1538_v28, %v1538_v28 }
0x10a8   :  { %v1542_v29 = vsel %vm78_vm0, %v1540_v48, 0.0 }
0x10a9   :  { %1543 = vadd.xlane.f32.xlu2 %v1542_v29 }
0x10dc   :  { %v1474_v1 = vpop.f32.mrf.mxu0 }
0x10dd   :  { %1969 = vmatmul.msk.f32.vlgmr.msra.gmra.mxu1 %vm239_vm3, %v1474_v1 }
0x10ea   :  { %v1520_v30 = vpop.f32.mrf.mxu3 }
0x111c   :  { %v1544_v45 = vpop.xlane.xlu2 %1543 }
0x111d   :  { %v1548_v25 = vmul.f32 %v1544_v45, %v2337_v59 }
0x111f   :  { %v1550_v50 = vadd.f32 1e-05, %v1548_v25 }
0x1121   :  { %2090 = vrsqrt.f32 %v1550_v50  ;;  %vm1558_vm10 = vweird.f32 %v1550_v50 }
0x1127   :  { %v2091_v20 = vpop.eup %2090 }
0x1128   :  { %v1553_v53 = vmul.f32 %v2091_v20, %v1550_v50  ;;  %vm1559_vm3 = vweird.f32 %v2091_v20 }
0x1129   :  { %vm1560_vm12 = vmor %vm1558_vm10, %vm1559_vm3  ;;  %vm3165_vm3 = vcmp.ge.s32.totalorder %v2454_v14, 0  ;;  %vm3166_vm10 = vcmp.ge.s32.totalorder %v2472_v0, 0 }
0x112a   :  { %v1554_v63 = vmul.f32 %v2091_v20, %v1553_v53 }
0x112c   :  { %v1555_v52 = vmul.f32 0.5, %v1554_v63 }
0x112e   :  { %v1556_v11 = vsub.f32 1.5, %v1555_v52 }
0x1130   :  { %v1557_v7 = vmul.f32 %v2091_v20, %v1556_v11 }
0x115a   :  { %v1497_v31 = vpop.f32.mrf.mxu1 }
0x115b   :  { %v1521_v33 = vadd.f32 %v1520_v30, %v1497_v31 }
0x115d   :  { %v1527_v49 = vadd.f32 %v2044_v47, %v1521_v33  ;;  %v1561_v47 = vsel %vm1560_vm12, %v2091_v20, %v1557_v7  ;;  %vm3169_vm12 = vcmp.ge.s32.totalorder %v2403_v57, 0 }
0x115e   :  { %v1572_v9 = vmul.f32 %v1561_v47, %v1538_v28 }
0x115f   :  { %v1529_v34 = vadd.f32 %v1527_v49, %v2748_v46  ;;  %v1940_v46 = vld [vmem:[%s3117_s11 + $0x238] sm:$0xff] }
0x1160   :  { %1757 = vmatpush.msrb.mxu1 %v1940_v46  ;;  %v1577_v22 = vmul.f32 %v2036_v32, %v1572_v9 }
0x1161   :  { %v1533_v35 = vsel %vm78_vm0, %v1529_v34, 0.0 }
0x1162   :  { %1534 = vadd.xlane.f32.xlu0 %v1533_v35  ;;  %1758 = vmatpush.msrb.mxu1 %v1939_v3  ;;  %v1582_v27 = vadd.f32 %v2037_v19, %v1577_v22  ;;  %v1920_v22 = vld [vmem:[%s3117_s11 + $0x198] sm:$0xff] }
0x1163   :  { %1699 = vmatpush.msra.mxu2 %v1920_v22 }
0x1164   :  { %1759 = vmatpush.msrb.mxu1 %v1938_v8  ;;  %v2837_v1 = vsel %vm678_vm1, 0.0, %v1582_v27  ;;  %v1915_v27 = vld [vmem:[%s3117_s11 + $0x170] sm:$0xff] }
0x1165   :  { %v1616_v31 = vrot.slane %v2837_v1, 2  ;;  %v1586_v33 = vrot.slane %v2837_v1, 4  ;;  %v1598_v49 = vrot.slane %v2837_v1, 6  ;;  %v1604_v57 = vrot.slane %v2837_v1, 7 }
0x1166   :  { %1760 = vmatpush.msrb.mxu1 %v1937_v2  ;;  %v1622_v51 = vrot.slane %v2837_v1, 3 }
0x11d5   :  { %v1535_v36 = vpop.xlane.xlu0 %1534 }
0x11d6   :  { %v1537_v40 = vmul.f32 %v1535_v36, %v2337_v59 }
0x11d8   :  { %v1539_v41 = vsub.f32 %v1529_v34, %v1537_v40 }
0x11da   :  { %v1541_v42 = vmul.f32 %v1539_v41, %v1539_v41 }
0x11dc   :  { %v1545_v37 = vsel %vm78_vm0, %v1541_v42, 0.0 }
0x11dd   :  { %1546 = vadd.xlane.f32.xlu0 %v1545_v37 }
0x1250   :  { %v1547_v10 = vpop.xlane.xlu0 %1546 }
0x1251   :  { %v1549_v61 = vmul.f32 %v1547_v10, %v2337_v59 }
0x1253   :  { %v1551_v12 = vadd.f32 1e-05, %v1549_v61 }
0x1255   :  { %2092 = vrsqrt.f32 %v1551_v12  ;;  %vm1568_vm8 = vweird.f32 %v1551_v12 }
0x125b   :  { %v2093_v15 = vpop.eup %2092 }
0x125c   :  { %v1563_v16 = vmul.f32 %v2093_v15, %v1551_v12  ;;  %vm1569_vm5 = vweird.f32 %v2093_v15 }
0x125d   :  { %vm1570_vm13 = vmor %vm1568_vm8, %vm1569_vm5  ;;  %vm3170_vm5 = vcmp.ge.s32.totalorder %v2409_v60, 0  ;;  %vm3171_vm8 = vcmp.lt.s32.totalorder %v2450_v23, 8  ;;  %v1610_v23 = vrot.slane %v2837_v1, 1 }
0x125e   :  { %v1564_v18 = vmul.f32 %v2093_v15, %v1563_v16 }
0x1260   :  { %v1565_v21 = vmul.f32 0.5, %v1564_v18 }
0x1262   :  { %v1566_v13 = vsub.f32 1.5, %v1565_v21 }
0x1264   :  { %v1567_v26 = vmul.f32 %v2093_v15, %v1566_v13  ;;  %v1935_v13 = vld [vmem:[%s3117_s11 + $0x210] sm:$0xff] }
0x1266   :  { %v1571_v44 = vsel %vm1570_vm13, %v2093_v15, %v1567_v26  ;;  %vm3172_vm13 = vcmp.lt.s32.totalorder %v2469_v24, 8  ;;  %v1916_v26 = vld [vmem:[%s3117_s11 + $0x178] sm:$0xff] }
0x1267   :  { %v1573_v48 = vmul.f32 %v1571_v44, %v1539_v41  ;;  %v1592_v41 = vrot.slane %v2837_v1, 5  ;;  %v1914_v44 = vld [vmem:[%s3117_s11 + $0x168] sm:$0xff] }
0x1269   :  { %v1578_v29 = vmul.f32 %v2036_v32, %v1573_v48  ;;  %v1913_v48 = vld [vmem:[%s3117_s11 + $0x160] sm:$0xff] }
0x126b   :  { %v1583_v28 = vadd.f32 %v2037_v19, %v1578_v29  ;;  %v1912_v29 = vld [vmem:[%s3117_s11 + $0x158] sm:$0xff] }
0x126d   :  { %v2841_v30 = vsel %vm679_vm7, 0.0, %v1583_v28  ;;  %v1911_v28 = vld [vmem:[%s3117_s11 + $0x150] sm:$0xff] }
0x126e   :  { %v1617_v34 = vrot.slane %v2841_v30, 2  ;;  %v1587_v35 = vrot.slane %v2841_v30, 4  ;;  %v1599_v36 = vrot.slane %v2841_v30, 6  ;;  %v1593_v40 = vrot.slane %v2841_v30, 5 }
0x126f   :  { %v1605_v8 = vrot.slane %v2841_v30, 7  ;;  %v1611_v11 = vrot.slane %v2841_v30, 1  ;;  %v1623_v24 = vrot.slane %v2841_v30, 3 }
0x1270   :  { %v1619_v42 = vsel %vm779_vm6, %v1617_v34, %v1616_v31  ;;  %v2855_v37 = vsel %vm684_vm9, %v1586_v33, %v1587_v35  ;;  %v1600_v45 = vsel %vm722_vm4, %v1598_v49, %v1599_v36  ;;  %v1601_v25 = vsel %vm722_vm4, %v1599_v36, %v1598_v49  ;;  %v1934_v49 = vld [vmem:[%s3117_s11 + $0x208] sm:$0xff]  ;;  %v1907_v36 = vld [vmem:[%s3117_s11 + $0x130] sm:$0xff] }
0x1271   :  { %v1621_v50 = vsel %vm787_vm2, %v1619_v42, 0.0  ;;  %v1628_v20 = vsel %vm3164_vm14, %v2855_v37, 0.0  ;;  %v1602_v53 = vsel %vm3165_vm3, %v1601_v25, 0.0  ;;  %v1603_v63 = vsel %vm3166_vm10, %v1600_v45, 0.0  ;;  %v1931_v42 = vld [vmem:[%s3117_s11 + $0x1f0] sm:$0xff]  ;;  %v1905_v45 = vld [vmem:[%s3117_s11 + $0x120] sm:$0xff] }
0x1272   :  { %1666 = vrot.lane.b32.xlu2 %v1621_v50, %s2104_s26  ;;  %1971 = vmatmul.msk.f32.vlgmr.msrb.gmra.mxu1 %vm78_vm0, %v1628_v20  ;;  %v2022_v46 = vpack.i.bf16 %v1603_v63, %v1602_v53  ;;  %vm3167_vm4 = vcmp.lt.s32.totalorder %v2367_v38, 3  ;;  %v2884_v52 = vsel %vm684_vm9, %v1587_v35, %v1586_v33  ;;  %v1618_v10 = vsel %vm779_vm6, %v1616_v31, %v1617_v34  ;;  %v1910_v31 = vld [vmem:[%s3117_s11 + $0x148] sm:$0xff]  ;;  %v1909_v33 = vld [vmem:[%s3117_s11 + $0x140] sm:$0xff]  ;;  %v1908_v34 = vld [vmem:[%s3117_s11 + $0x138] sm:$0xff] }
0x1273   :  { %v1594_v3 = vsel %vm3167_vm4, %v1592_v41, %v1593_v40  ;;  %vm3168_vm2 = vmmov %vm3167_vm4  ;;  %v1629_v60 = vsel %vm3171_vm8, %v2884_v52, 0.0  ;;  %v1607_v61 = vsel %vm741_vm11, %v1605_v8, %v1604_v57  ;;  %v1620_v2 = vsel %vm3172_vm13, %v1618_v10, 0.0  ;;  %v1933_v35 = vld [vmem:[%s3117_s11 + $0x200] sm:$0xff]  ;;  %v1930_v25 = vld [vmem:[%s3117_s11 + $0x1e8] sm:$0xff] }
0x1274   :  { %v1595_v39 = vsel %vm3168_vm2, %v1593_v40, %v1592_v41  ;;  %v1597_v14 = vsel %vm3170_vm5, %v1594_v3, 0.0  ;;  %2023 = vrot.lane.b32.xlu0 %v2022_v46, %s2104_s26  ;;  %v1608_v12 = vsel %vm746_vm15, %v1607_v61, 0.0  ;;  %vm3173_vm6 = vcmp.lt.s32.totalorder %v2367_v38, 7  ;;  %v1932_v40 = vld [vmem:[%s3117_s11 + $0x1f8] sm:$0xff]  ;;  %v1906_v41 = vld [vmem:[%s3117_s11 + $0x128] sm:$0xff]  ;;  %v1929_v50 = vld [vmem:[%s3117_s11 + $0x1e0] sm:$0xff] }
0x1275   :  { %v1596_v55 = vsel %vm3169_vm12, %v1595_v39, 0.0  ;;  %v1613_v7 = vsel %vm3173_vm6, %v1611_v11, %v1610_v23  ;;  %vm3174_vm9 = vmmov %vm3173_vm6  ;;  %vm3175_vm14 = vcmp.lt.s32.totalorder %v2412_v62, 8  ;;  %vm3176_vm15 = vcmp.lt.s32.totalorder %v2406_v58, 8  ;;  %v1928_v20 = vld [vmem:[%s3117_s11 + $0x1d8] sm:$0xff]  ;;  %v1927_v53 = vld [vmem:[%s3117_s11 + $0x1d0] sm:$0xff] }
0x1276   :  { %v2017_v0 = vpack.i.bf16 %v1597_v14, %v1596_v55  ;;  %v1612_v15 = vsel %vm3174_vm9, %v1610_v23, %v1611_v11  ;;  %v1615_v47 = vsel %vm3175_vm14, %v1613_v7, 0.0  ;;  %v1606_v32 = vsel %vm741_vm11, %v1604_v57, %v1605_v8  ;;  %v1926_v63 = vld [vmem:[%s3117_s11 + $0x1c8] sm:$0xff]  ;;  %v1925_v46 = vld [vmem:[%s3117_s11 + $0x1c0] sm:$0xff]  ;;  %v1924_v3 = vld [vmem:[%s3117_s11 + $0x1b8] sm:$0xff] }
0x1277   :  { %v1614_v16 = vsel %vm3176_vm15, %v1612_v15, 0.0  ;;  %vm3177_vm3 = vcmp.lt.s32.totalorder %v2367_v38, 5  ;;  %vm3178_vm10 = vcmp.ge.s32.totalorder %v2550_v5, 0  ;;  %vm3179_vm4 = vcmp.lt.s32.totalorder %v2537_v56, 8  ;;  %v1919_v56 = vld [vmem:[%s3117_s11 + $0x190] sm:$0xff]  ;;  %v1918_v5 = vld [vmem:[%s3117_s11 + $0x188] sm:$0xff] }
0x1278   :  { %2018 = vrot.lane.b32.xlu1 %v2017_v0, %s2106_s29  ;;  %v1624_v9 = vsel %vm3177_vm3, %v1622_v51, %v1623_v24  ;;  %v1609_v18 = vsel %vm3178_vm10, %v1606_v32, 0.0  ;;  %vm3180_vm2 = vmmov %vm3177_vm3  ;;  %vm3181_vm12 = vcmp.lt.s32.totalorder %v2553_v6, 8  ;;  %1700 = vmatpush.msra.mxu2 %v1919_v56  ;;  %v1936_v38 = vld [vmem:[%s3117_s11 + $0x218] sm:$0xff]  ;;  %v1917_v6 = vld [vmem:[%s3117_s11 + $0x180] sm:$0xff]  ;;  %vm3182_vm11 = vcmp.ge.s32.totalorder %v2649_v4, 0 }
0x1279   :  { %v1626_v62 = vsel %vm3179_vm4, %v1624_v9, 0.0  ;;  %v1625_v58 = vsel %vm3180_vm2, %v1623_v24, %v1622_v51  ;;  %1722 = vmatpush.msra.mxu0 %v1936_v38  ;;  %v1923_v39 = vld [vmem:[%s3117_s11 + $0x1b0] sm:$0xff]  ;;  %v1922_v55 = vld [vmem:[%s3117_s11 + $0x1a8] sm:$0xff]  ;;  %v1921_v14 = vld [vmem:[%s3117_s11 + $0x1a0] sm:$0xff]  ;;  %v1590_v57 = vsel %vm3182_vm11, %v2884_v52, 0.0  ;;  %vm3183_vm5 = vcmask 523264  }
0x127a   :  { %1972 = vmatmul.msk.f32.gmra.mxu1 %vm78_vm0, %v1629_v60  ;;  %v2027_v21 = vpack.i.bf16 %v1626_v62, %v1609_v18  ;;  %v1627_v19 = vsel %vm3181_vm12, %v1625_v58, 0.0  ;;  %1701 = vmatpush.msra.mxu2 %v1918_v5  ;;  %vm3184_vm8 = vcmask 785408   ;;  %vm3185_vm13 = vcmp.ge.s32.totalorder %v2656_v17, 0  ;;  %vm3186_vm6 = vmmov %vm3183_vm5  ;;  %v1949_v5 = vld [vmem:[%s3119_s13 + $0x78] sm:$0xff]  ;;  %v1948_v38 = vld [vmem:[%s3119_s13 + $0x70] sm:$0xff] }
0x127b   :  { %1723 = vmatpush.msra.mxu0 %v1935_v13  ;;  %vm3187_vm9 = vmmov %vm3183_vm5  ;;  %1787 = vmatpush.msra.mxu3 %v1949_v5  ;;  %v1946_v13 = vld [vmem:[%s3119_s13 + $0x60] sm:$0xff] }
0x127c   :  { %1664 = vrot.lane.b32.xlu0 %v1620_v2, %s2104_s26  ;;  %1702 = vmatpush.msra.mxu2 %v1917_v6  ;;  %vm3188_vm14 = vmmov %vm3184_vm8  ;;  %v1947_v6 = vld [vmem:[%s3119_s13 + $0x68] sm:$0xff] }
0x127d   :  { %1724 = vmatpush.msra.mxu0 %v1934_v49  ;;  %vm3189_vm15 = vmmov %vm3184_vm8  ;;  %1788 = vmatpush.msra.mxu3 %v1948_v38 }
0x127e   :  { %1703 = vmatpush.msra.mxu2 %v1916_v26  ;;  %vm3190_vm3 = vmmov %vm3183_vm5  ;;  %v1945_v26 = vld [vmem:[%s3119_s13 + $0x58] sm:$0xff] }
0x127f   :  { %1725 = vmatpush.msra.mxu0 %v1933_v35  ;;  %vm3191_vm10 = vmmov %vm3184_vm8  ;;  %1789 = vmatpush.msra.mxu3 %v1947_v6 }
0x1280   :  { %1648 = vrot.lane.b32.xlu1 %v1608_v12, %s2101_s23  ;;  %1704 = vmatpush.msra.mxu2 %v1915_v27  ;;  %v1944_v27 = vld [vmem:[%s3119_s13 + $0x50] sm:$0xff]  ;;  %vm3192_vm4 = vmmov %vm3190_vm3 }
0x1281   :  { %1726 = vmatpush.msra.mxu0 %v1932_v40  ;;  %1790 = vmatpush.msra.mxu3 %v1946_v13  ;;  %vm3193_vm2 = vmmov %vm3190_vm3 }
0x1282   :  { %1705 = vmatpush.msra.mxu2 %v1914_v44  ;;  %v1943_v44 = vld [vmem:[%s3119_s13 + $0x48] sm:$0xff] }
0x1283   :  { %1727 = vmatpush.msra.mxu0 %v1931_v42  ;;  %1791 = vmatpush.msra.mxu3 %v1945_v26 }
0x1284   :  { %1658 = vrot.lane.b32.xlu0 %v1615_v47, %s2106_s29  ;;  %1706 = vmatpush.msra.mxu2 %v1913_v48  ;;  %v1591_v47 = vsel %vm3185_vm13, %v2855_v37, 0.0  ;;  %v1942_v48 = vld [vmem:[%s3119_s13 + $0x40] sm:$0xff] }
0x1285   :  { %1728 = vmatpush.msra.mxu0 %v1930_v25  ;;  %1792 = vmatpush.msra.mxu3 %v1944_v27 }
0x1286   :  { %1707 = vmatpush.msra.mxu2 %v1912_v29  ;;  %v2045_v29 = vld [vmem:[%s3118_s12 + $0x1] ss:$0 sm:$0xff] }
0x1287   :  { %1729 = vmatpush.msra.mxu0 %v1929_v50  ;;  %1793 = vmatpush.msra.mxu3 %v1943_v44 }
0x1288   :  { %1656 = vrot.lane.b32.xlu1 %v1614_v16, %s2106_s29  ;;  %1708 = vmatpush.msra.mxu2 %v1911_v28 }
0x1289   :  { %1730 = vmatpush.msra.mxu0 %v1928_v20  ;;  %1794 = vmatpush.msra.mxu3 %v1942_v48 }
0x128a   :  { %1709 = vmatpush.msra.mxu2 %v1910_v31 }
0x128b   :  { %1731 = vmatpush.msra.mxu0 %v1927_v53  ;;  %v2046_v53 = vld [vmem:[%s3120_s14 + $0x1] ss:$0 sm:$0xff] }
0x128c   :  { %1710 = vmatpush.msra.mxu2 %v1909_v33 }
0x128d   :  { %1732 = vmatpush.msra.mxu0 %v1926_v63 }
0x128e   :  { %1711 = vmatpush.msra.mxu2 %v1908_v34 }
0x128f   :  { %1733 = vmatpush.msra.mxu0 %v1925_v46 }
0x1290   :  { %2028 = vrot.lane.b32.xlu1 %v2027_v21, %s2101_s23  ;;  %1712 = vmatpush.msra.mxu2 %v1907_v36 }
0x1291   :  { %1734 = vmatpush.msra.mxu0 %v1924_v3 }
0x1292   :  { %1713 = vmatpush.msra.mxu2 %v1906_v41 }
0x1293   :  { %1735 = vmatpush.msra.mxu0 %v1923_v39 }
0x1294   :  { %1714 = vmatpush.msra.mxu2 %v1905_v45 }
0x1295   :  { %1736 = vmatpush.msra.mxu0 %v1922_v55 }
0x1297   :  { %1737 = vmatpush.msra.mxu0 %v1921_v14 }
0x1298   :  { %1674 = vrot.lane.b32.xlu1 %v1627_v19, %s2101_s23 }
0x12cc   :  { %v1667_v19 = vpop.permute.xlu2 %1666 }
0x12e6   :  { %v2024_v8 = vpop.permute.xlu0 %2023 }
0x12e7   :  { %v2025_v60 = vunpack.i.l.bf16 %v2024_v8  ;;  %v2026_v24 = vunpack.i.h.bf16 %v2024_v8 }
0x12ea   :  { %v2019_v0 = vpop.permute.xlu1 %2018 }
0x12eb   :  { %v2020_v10 = vunpack.i.l.bf16 %v2019_v0  ;;  %v2021_v15 = vunpack.i.h.bf16 %v2019_v0 }
0x12ed   :  { %v1678_v61 = vsel %vm78_vm0, %v1590_v57, %v2020_v10  ;;  %v1679_v52 = vsel %vm78_vm0, %v1591_v47, %v2021_v15 }
0x12ee   :  { %v1680_v11 = vsel %vm3183_vm5, %v1678_v61, %v2025_v60  ;;  %v1665_v7 = vpop.permute.xlu0 %1664  ;;  %v1681_v18 = vsel %vm3187_vm9, %v1679_v52, %v2026_v24 }
0x12ef   :  { %v1762_v33 = vpop.f32.mrf.mxu1 }
0x12f2   :  { %v1649_v2 = vpop.permute.xlu1 %1648 }
0x12f3   :  { %v1682_v12 = vsel %vm3184_vm8, %v1680_v11, %v1649_v2 }
0x12f4   :  { %1715 = vmatmul.f32.vlgmr.msra.gmra.mxu2 %v1682_v12 }
0x12f6   :  { %v1659_v58 = vpop.permute.xlu0 %1658 }
0x12f7   :  { %v1685_v17 = vsel %vm78_vm0, %v2841_v30, %v1659_v58  ;;  %v1765_v25 = vpop.f32.mrf.mxu1 }
0x12f8   :  { %v1687_v22 = vsel %vm3190_vm3, %v1685_v17, %v1667_v19  ;;  %v2047_v17 = vld [vmem:[%s3121_s15 + $0x1] ss:$0 sm:$0xff] }
0x12fa   :  { %v1657_v23 = vpop.permute.xlu1 %1656 }
0x12fb   :  { %v1684_v4 = vsel %vm78_vm0, %v2837_v1, %v1657_v23 }
0x12fc   :  { %v1686_v9 = vsel %vm3186_vm6, %v1684_v4, %v1665_v7 }
0x1302   :  { %v2029_v51 = vpop.permute.xlu1 %2028 }
0x1303   :  { %v2031_v16 = vunpack.i.h.bf16 %v2029_v51  ;;  %v2030_v32 = vunpack.i.l.bf16 %v2029_v51 }
0x1305   :  { %v1683_v62 = vsel %vm3188_vm14, %v1681_v18, %v2030_v32  ;;  %v1688_v21 = vsel %vm3189_vm15, %v1686_v9, %v2031_v16 }
0x1306   :  { %1718 = vmatmul.f32.gmra.mxu2 %v1683_v62  ;;  %1738 = vmatmul.f32.vlgmr.msra.gmra.mxu0 %v1688_v21 }
0x130a   :  { %v1675_v37 = vpop.permute.xlu1 %1674 }
0x130b   :  { %v1689_v56 = vsel %vm3191_vm10, %v1687_v22, %v1675_v37 }
0x130e   :  { %1741 = vmatmul.f32.gmra.mxu0 %v1689_v56 }
0x1377   :  { %v1716_v28 = vpop.f32.mrf.mxu2 }
0x1378   :  { %v1717_v31 = vadd.f32 %v2045_v29, %v1716_v28 }
0x1383   :  { %v1739_v49 = vpop.f32.mrf.mxu0 }
0x1384   :  { %v1740_v34 = vadd.f32 %v1739_v49, %v1717_v31 }
0x1386   :  { %v1763_v35 = vadd.f32 %v1762_v33, %v1740_v34 }
0x1388   :  { %v1768_v36 = vmax.f32 %v1763_v35, 0.0 }
0x1389   :  { %v1719_v40 = vpop.f32.mrf.mxu2 }
0x138a   :  { %v1720_v41 = vadd.f32 %v2045_v29, %v1719_v40  ;;  %1973 = vmatmul.msk.f32.vlgmr.msra.gmra.mxu3 %vm3192_vm4, %v1768_v36 }
0x138b   :  { %v1742_v42 = vpop.f32.mrf.mxu0 }
0x138c   :  { %v1743_v45 = vadd.f32 %v1742_v42, %v1720_v41 }
0x138e   :  { %v1766_v50 = vadd.f32 %v1765_v25, %v1743_v45 }
0x1390   :  { %v1769_v20 = vmax.f32 %v1766_v50, 0.0 }
0x1392   :  { %1974 = vmatmul.msk.f32.gmra.mxu3 %vm3193_vm2, %v1769_v20 }
0x140d   :  { %v1796_v63 = vpop.f32.mrf.mxu3 }
0x140e   :  { %v1797_v46 = vadd.f32 %v2046_v53, %v1796_v63 }
0x1410   :  { %v1802_v3 = vadd.f32 %v1797_v46, %v2837_v1 }
0x1412   :  { %v1804_v39 = vsel %vm78_vm0, %v1802_v3, 0.0 }
0x1413   :  { %1805 = vadd.xlane.f32.xlu0 %v1804_v39 }
0x1415   :  { %v1799_v55 = vpop.f32.mrf.mxu3 }
0x1416   :  { %v1800_v14 = vadd.f32 %v2046_v53, %v1799_v55 }
0x1418   :  { %v1803_v0 = vadd.f32 %v1800_v14, %v2841_v30 }
0x141a   :  { %v1807_v8 = vsel %vm78_vm0, %v1803_v0, 0.0 }
0x141b   :  { %1808 = vadd.xlane.f32.xlu1 %v1807_v8 }
0x1486   :  { %v1806_v10 = vpop.xlane.xlu0 %1805 }
0x1487   :  { %v1810_v57 = vmul.f32 %v1806_v10, %v2337_v59 }
0x1489   :  { %v1812_v60 = vsub.f32 %v1802_v3, %v1810_v57 }
0x148b   :  { %v1814_v61 = vmul.f32 %v1812_v60, %v1812_v60 }
0x148d   :  { %v1816_v2 = vsel %vm78_vm0, %v1814_v61, 0.0 }
0x148e   :  { %1817 = vadd.xlane.f32.xlu2 %v1816_v2  ;;  %v1809_v11 = vpop.xlane.xlu1 %1808 }
0x148f   :  { %v1811_v1 = vmul.f32 %v1809_v11, %v2337_v59 }
0x1491   :  { %v1813_v12 = vsub.f32 %v1803_v0, %v1811_v1 }
0x1493   :  { %v1815_v23 = vmul.f32 %v1813_v12, %v1813_v12 }
0x1495   :  { %v1819_v7 = vsel %vm78_vm0, %v1815_v23, 0.0 }
0x1496   :  { %1820 = vadd.xlane.f32.xlu0 %v1819_v7 }
0x1501   :  { %v1818_v30 = vpop.xlane.xlu2 %1817 }
0x1502   :  { %v1822_v15 = vmul.f32 %v1818_v30, %v2337_v59 }
0x1504   :  { %v1824_v24 = vadd.f32 1e-05, %v1822_v15 }
0x1506   :  { %2094 = vrsqrt.f32 %v1824_v24  ;;  %vm1832_vm11 = vweird.f32 %v1824_v24 }
0x1509   :  { %v1821_v47 = vpop.xlane.xlu0 %1820 }
0x150a   :  { %v1823_v4 = vmul.f32 %v1821_v47, %v2337_v59  ;;  %v2042_v59 = vld [vmem:[%s3122_s16 + $0x1] ss:$0 sm:$0xff] }
0x150c   :  { %v2095_v52 = vpop.eup %2094  ;;  %v1825_v51 = vadd.f32 1e-05, %v1823_v4 }
0x150d   :  { %v1827_v16 = vmul.f32 %v2095_v52, %v1824_v24  ;;  %vm1833_vm12 = vweird.f32 %v2095_v52 }
0x150e   :  { %2096 = vrsqrt.f32 %v1825_v51  ;;  %vm1834_vm5 = vmor %vm1832_vm11, %vm1833_vm12  ;;  %vm1842_vm13 = vweird.f32 %v1825_v51 }
0x150f   :  { %v1828_v32 = vmul.f32 %v2095_v52, %v1827_v16 }
0x1511   :  { %v1829_v9 = vmul.f32 0.5, %v1828_v32 }
0x1513   :  { %v1830_v18 = vsub.f32 1.5, %v1829_v9 }
0x1514   :  { %v2097_v62 = vpop.eup %2096 }
0x1515   :  { %v1831_v21 = vmul.f32 %v2095_v52, %v1830_v18  ;;  %v1837_v58 = vmul.f32 %v2097_v62, %v1825_v51  ;;  %vm1843_vm8 = vweird.f32 %v2097_v62 }
0x1516   :  { %vm1844_vm6 = vmor %vm1842_vm13, %vm1843_vm8 }
0x1517   :  { %v1835_v37 = vsel %vm1834_vm5, %v2095_v52, %v1831_v21  ;;  %v1838_v19 = vmul.f32 %v2097_v62, %v1837_v58 }
0x1518   :  { %v1846_v22 = vmul.f32 %v1835_v37, %v1812_v60 }
0x1519   :  { %v1839_v56 = vmul.f32 0.5, %v1838_v19 }
0x151a   :  { %v1851_v5 = vmul.f32 %v2047_v17, %v1846_v22 }
0x151b   :  { %v1840_v38 = vsub.f32 1.5, %v1839_v56 }
0x151c   :  { %v1856_v6 = vadd.f32 %v2042_v59, %v1851_v5 }
0x151d   :  { %v1841_v13 = vmul.f32 %v2097_v62, %v1840_v38 }
0x151e   :  { %v1858_v26 = vsel %vm678_vm1, 0.0, %v1856_v6 }
0x151f   :  { %1860 = vst.msk [vmem:[%s3123_s17] sm:$0xff] %vm78_vm0, %v1858_v26  ;;  %v1845_v27 = vsel %vm1844_vm6, %v2097_v62, %v1841_v13 }
0x1520   :  { %v1847_v44 = vmul.f32 %v1845_v27, %v1813_v12 }
0x1522   :  { %v1852_v48 = vmul.f32 %v2047_v17, %v1847_v44 }
0x1524   :  { %v1857_v29 = vadd.f32 %v2042_v59, %v1852_v48 }
0x1526   :  { %v1859_v28 = vsel %vm679_vm7, 0.0, %v1857_v29 }
0x1527   :  { %1861 = vst.msk [vmem:[%s3123_s17 + $0x8] sm:$0xff] %vm78_vm0, %v1859_v28 }

// kernel: diffsinger_forward.4
= control target key start
LH: loop header
LB: loop body
LE: loop exit
PB: predicated region body
PF: predicated region fallthrough
CT: control target
= control target key end

     0   :  { %v83_v0 = vlaneseq  ;;  %vm177_vm5 = vcmask 261120   ;;  %vm180_vm6 = vcmask 523264   ;;  %vm186_vm7 = vcmask 785408   ;;  %s3554_s0 = inlined_call_operand.vmem [shape: f32[16,32], index: 0, kind: input, shape index: {}]   ;;  %s3555_s6 = inlined_call_operand.<no memory space> [shape: f32[1,1], index: 6, kind: input, shape index: {}]   ;;  %s3556_s7 = inlined_call_operand.<no memory space> [shape: f32[1,1], index: 7, kind: input, shape index: {}]   ;;  %s3557_s8 = inlined_call_operand.vmem [shape: f32[3,96,32], index: 8, kind: input, shape index: {}]   ;;  %s3558_s9 = inlined_call_operand.vmem [shape: f32[3,1,32], index: 9, kind: input, shape index: {}]   ;;  %s3559_s10 = inlined_call_operand.vmem [shape: f32[3,1,32], index: 10, kind: input, shape index: {}]   ;;  %s3560_s11 = inlined_call_operand.vmem [shape: f32[3,1,32], index: 11, kind: input, shape index: {}]   ;;  %s3561_s3 = inlined_call_operand.vmem [shape: s32[32,1], index: 3, kind: input, shape index: {}]   ;;  %s3562_s12 = inlined_call_operand.vmem [shape: f32[3,96,32], index: 12, kind: input, shape index: {}]   ;;  %s3563_s13 = inlined_call_operand.vmem [shape: f32[3,1,32], index: 13, kind: input, shape index: {}]   ;;  %s3564_s19 = inlined_call_operand.vmem [shape: f32[1,7], index: 19, kind: input, shape index: {}]   ;;  %s3565_s4 = inlined_call_operand.vmem [shape: f32[32,1], index: 4, kind: input, shape index: {}]   ;;  %s3566_s14 = inlined_call_operand.vmem [shape: f32[3,1,32], index: 14, kind: input, shape index: {}]   ;;  %s3567_s15 = inlined_call_operand.vmem [shape: f32[3,1,32], index: 15, kind: input, shape index: {}]   ;;  %s3568_s16 = inlined_call_operand.vmem [shape: f32[3,32,1], index: 16, kind: input, shape index: {}]   ;;  %s3569_s17 = inlined_call_operand.vmem [shape: f32[3,1,1], index: 17, kind: input, shape index: {}]   ;;  %s3570_s18 = inlined_call_operand.vmem [shape: f32[8,32], index: 18, kind: input, shape index: {}]   ;;  %s3571_s1 = inlined_call_operand.vmem [shape: f32[16,1], index: 1, kind: input, shape index: {}]   ;;  %s3572_s23 = inlined_call_operand.vmem [shape: f32[16,1], index: 23, kind: output, shape index: {1}]   ;;  %s3573_s21 = inlined_call_operand.vmem [shape: f32[1,7], index: 21, kind: input, shape index: {}]   ;;  %s3574_s5 = inlined_call_operand.vmem [shape: f32[32,1], index: 5, kind: input, shape index: {}]   ;;  %s3575_s2 = inlined_call_operand.vmem [shape: f32[32,1], index: 2, kind: input, shape index: {}]   ;;  %s3576_s24 = inlined_call_operand.vmem [shape: f32[32,1], index: 24, kind: output, shape index: {2}]   ;;  %s3577_s20 = inlined_call_operand.vmem [shape: f32[8,32], index: 20, kind: input, shape index: {}]   ;;  %s3578_s25 = inlined_call_operand.vmem [shape: f32[32,1], index: 25, kind: output, shape index: {3}]   ;;  %s3579_s22 = inlined_call_operand.vmem [shape: f32[32,32], index: 22, kind: output, shape index: {0}]  }
   0x1   :  { %3595 = sst [smem:[#allocation4_spill]] %s3554_s0  ;;  %v2253_v52 = vmov 32.0   ;;  %s3612_s0 = smov 32  }
   0x2   :  { %3596 = sst [smem:[#allocation5_spill]] %s3557_s8  ;;  %s3588_s8 = smov 32   ;;  %v2395_v3 = vshrl.u32 %v83_v0, 7  ;;  %2209 = vrcp.f32 %v2253_v52 }
   0x3   :  { %3597 = sst [smem:[#allocation6_spill]] %s3558_s9 }
   0x4   :  { %3598 = sst [smem:[#allocation7_spill]] %s3559_s10  ;;  %v90_v8 = vand.u32 7, %v2395_v3  ;;  %vm144_vm0 = vcmp.lt.s32.totalorder %v2395_v3, 7  ;;  %v2406_v9 = vadd.s32 8, %v2395_v3  ;;  %vm125_vm3 = vcmp.lt.s32.totalorder %v2395_v3, 1 }
   0x5   :  { %3599 = sst [smem:[#allocation8_spill]] %s3560_s11 }
   0x6   :  { %3600 = sst [smem:[#allocation9_spill]] %s3561_s3  ;;  %v2413_v12 = vadd.s32 1, %v90_v8  ;;  %v97_v13 = vand.u32 7, %v2406_v9  ;;  %v2460_v31 = vadd.s32 4294967295, %v90_v8 }
   0x7   :  { %3601 = sst [smem:[#allocation10_spill]] %s3562_s12 }
   0x8   :  { %3602 = sst [smem:[#allocation11_spill]] %s3563_s13  ;;  %vm151_vm1 = vcmp.lt.s32.totalorder %v2413_v12, 8  ;;  %v2422_v16 = vadd.s32 1, %v97_v13  ;;  %vm130_vm4 = vcmp.ge.s32.totalorder %v2460_v31, 0  ;;  %v2463_v33 = vadd.s32 4294967295, %v97_v13  ;;  %v2210_v53 = vpop.eup %2209 }
   0x9   :  { %3603 = sst [smem:[#allocation12_spill]] %s3579_s22  ;;  %v227_v54 = vmul.f32 32.0, %v2210_v53  ;;  %vm231_vm9 = vweird.f32 %v2210_v53 }
   0xa   :  { %s3604_s11 = sld [smem:[#allocation4_spill]]  ;;  %vm152_vm2 = vcmp.lt.s32.totalorder %v2422_v16, 8  ;;  %vm131_vm8 = vcmp.ge.s32.totalorder %v2463_v33, 0 }
   0xb   :  { %s3605_s12 = sld [smem:[#allocation5_spill]]  ;;  %v228_v55 = vsub.f32 1.0, %v227_v54 }
   0xc   :  { %s3606_s27 = sld [smem:[#allocation6_spill]] }
   0xd   :  { %v229_v56 = vmul.f32 %v2210_v53, %v228_v55  ;;  %s3607_s13 = sld [smem:[#allocation9_spill]] }
   0xe   :  { %s3608_s30 = sld [smem:[#allocation7_spill]] }
   0xf   :  { %v230_v57 = vadd.f32 %v2210_v53, %v229_v56  ;;  %s3609_s6 = sld [smem:[#allocation8_spill]] }
  0x10   :  { %v79_v1 = vld [vmem:[%s3604_s11] sm:$0xff]  ;;  %v80_v2 = vld [vmem:[%s3604_s11 + $0x8] sm:$0xff]  ;;  %s3590_s11 = smov 64   ;;  %s3610_s29 = sld [smem:[#allocation10_spill]] }
  0x11   :  { %163 = vrot.lane.b32.xlu0 %v79_v1, %s3588_s8  ;;  %165 = vrot.lane.b32.xlu1 %v80_v2, %s3588_s8  ;;  %v142_v4 = vrot.slane %v79_v1, 1  ;;  %v143_v5 = vrot.slane %v80_v2, 1  ;;  %v121_v6 = vld [vmem:[%s3605_s12 + $0x58] sm:$0xff]  ;;  %v120_v7 = vld [vmem:[%s3605_s12 + $0x50] sm:$0xff]  ;;  %v123_v22 = vrot.slane %v79_v1, 7  ;;  %v124_v23 = vrot.slane %v80_v2, 7 }
  0x12   :  { %516 = vmatpush.msra.mxu3 %v79_v1  ;;  %197 = vmatpush.msra.mxu0 %v121_v6  ;;  %v119_v10 = vld [vmem:[%s3605_s12 + $0x48] sm:$0xff]  ;;  %v118_v14 = vld [vmem:[%s3605_s12 + $0x40] sm:$0xff]  ;;  %v117_v18 = vld [vmem:[%s3605_s12 + $0x38] sm:$0xff]  ;;  %v2481_v58 = vsel %vm231_vm9, %v2210_v53, %v230_v57  ;;  %s3611_s10 = sld [smem:[#allocation11_spill]] }
  0x13   :  { %v145_v11 = vsel %vm144_vm0, %v142_v4, %v143_v5  ;;  %v146_v15 = vsel %vm144_vm0, %v143_v5, %v142_v4  ;;  %v116_v20 = vld [vmem:[%s3605_s12 + $0x30] sm:$0xff]  ;;  %v115_v21 = vld [vmem:[%s3605_s12 + $0x28] sm:$0xff]  ;;  %v127_v24 = vsel %vm125_vm3, %v124_v23, %v123_v22  ;;  %v114_v25 = vld [vmem:[%s3605_s12 + $0x20] sm:$0xff]  ;;  %v126_v26 = vsel %vm125_vm3, %v123_v22, %v124_v23 }
  0x14   :  { %573 = vmatpush.msrb.mxu3 %v80_v2  ;;  %198 = vmatpush.msra.mxu0 %v120_v7  ;;  %v159_v17 = vsel %vm151_vm1, %v145_v11, 0.0  ;;  %v160_v19 = vsel %vm152_vm2, %v146_v15, 0.0  ;;  %v113_v27 = vld [vmem:[%s3605_s12 + $0x18] sm:$0xff]  ;;  %v112_v28 = vld [vmem:[%s3605_s12 + $0x10] sm:$0xff]  ;;  %v111_v29 = vld [vmem:[%s3605_s12 + $0x8] sm:$0xff]  ;;  %v140_v35 = vsel %vm130_vm4, %v127_v24, 0.0 }
  0x15   :  { %v110_v30 = vld [vmem:[%s3605_s12] sm:$0xff]  ;;  %v141_v39 = vsel %vm131_vm8, %v126_v26, 0.0  ;;  %v462_v22 = vld [vmem:[%s3607_s13 + $0x10] sm:$0xff]  ;;  %v461_v12 = vld [vmem:[%s3607_s13 + $0x8] sm:$0xff] }
  0x16   :  { %199 = vmatpush.msra.mxu0 %v119_v10  ;;  %v2186_v43 = vld [vmem:[%s3606_s27] ss:$0 sm:$0xff]  ;;  %v2254_v10 = vmov 0   ;;  %vm534_vm11 = vcmp.gt.s32.totalorder %v462_v22, 0  ;;  %v290_v16 = vld [vmem:[%s3610_s29 + $0x48] sm:$0xff] }
  0x17   :  { %v460_v7 = vld [vmem:[%s3607_s13] sm:$0xff]  ;;  %2184 = vset.pattern.permute.xlu1 %v2254_v10  ;;  %2183 = vset.pattern.permute.xlu0 %v2254_v10  ;;  %v536_v24 = vsel %vm534_vm11, 1, %v2254_v10 }
  0x18   :  { %200 = vmatpush.msra.mxu0 %v118_v14  ;;  %v2056_v11 = vadd.s32 4294967295, %v460_v7  ;;  %vm476_vm10 = vcmp.gt.s32.totalorder %v460_v7, 0  ;;  %2185 = vset.pattern.permute.xlu2 %v2254_v10  ;;  %v285_v7 = vld [vmem:[%s3610_s29 + $0x20] sm:$0xff] }
  0x19   :  { %171 = vrot.lane.b32.xlu0 %v159_v17, %s3590_s11  ;;  %173 = vrot.lane.b32.xlu1 %v160_v19, %s3590_s11  ;;  %v478_v14 = vsel %vm476_vm10, 1, %v2254_v10 }
  0x1a   :  { %201 = vmatpush.msra.mxu0 %v117_v18 }
  0x1c   :  { %202 = vmatpush.msra.mxu0 %v116_v20 }
  0x1e   :  { %203 = vmatpush.msra.mxu0 %v115_v21 }
  0x20   :  { %204 = vmatpush.msra.mxu0 %v114_v25 }
  0x22   :  { %205 = vmatpush.msra.mxu0 %v113_v27 }
  0x24   :  { %206 = vmatpush.msra.mxu0 %v112_v28 }
  0x26   :  { %207 = vmatpush.msra.mxu0 %v111_v29 }
  0x28   :  { %208 = vmatpush.msra.mxu0 %v110_v30  ;;  %v2189_v30 = vld [vmem:[%s3608_s30] ss:$0 sm:$0xff] }
  0x83   :  { %v164_v32 = vpop.permute.xlu0 %163  ;;  %v166_v34 = vpop.permute.xlu1 %165 }
  0x84   :  { %v178_v36 = vsel %vm177_vm5, %v140_v35, %v164_v32  ;;  %v179_v40 = vsel %vm177_vm5, %v141_v39, %v166_v34 }
  0x8b   :  { %v172_v37 = vpop.permute.xlu0 %171  ;;  %v174_v41 = vpop.permute.xlu1 %173 }
  0x8c   :  { %v181_v38 = vsel %vm180_vm6, %v178_v36, %v172_v37  ;;  %v182_v42 = vsel %vm180_vm6, %v179_v40, %v174_v41  ;;  %v2190_v36 = vld [vmem:[%s3609_s6] ss:$0 sm:$0xff]  ;;  %v463_v41 = vld [vmem:[%s3607_s13 + $0x18] sm:$0xff]  ;;  %s3613_s13 = smov 64  }
  0x8d   :  { %2050 = vmatmul.msk.f32.vlgmr.msra.gmra.mxu0 %vm186_vm7, %v181_v38  ;;  %vm535_vm10 = vcmp.gt.s32.totalorder %v463_v41, 0 }
  0x95   :  { %2051 = vmatmul.msk.f32.gmra.mxu0 %vm186_vm7, %v182_v42 }
 0x10a   :  { %v210_v44 = vpop.f32.mrf.mxu0 }
 0x10b   :  { %v211_v45 = vadd.f32 %v2186_v43, %v210_v44 }
 0x10d   :  { %v216_v46 = vmax.f32 %v211_v45, 0.0 }
 0x10f   :  { %v220_v47 = vsel %vm177_vm5, %v216_v46, 0.0 }
 0x110   :  { %221 = vadd.xlane.f32.xlu2 %v220_v47 }
 0x112   :  { %v213_v48 = vpop.f32.mrf.mxu0 }
 0x113   :  { %v214_v49 = vadd.f32 %v2186_v43, %v213_v48  ;;  %v537_v43 = vsel %vm535_vm10, 1, %v2254_v10 }
 0x115   :  { %v217_v50 = vmax.f32 %v214_v49, 0.0 }
 0x117   :  { %v223_v51 = vsel %vm177_vm5, %v217_v50, 0.0 }
 0x118   :  { %224 = vadd.xlane.f32.xlu2 %v223_v51 }
 0x183   :  { %v222_v59 = vpop.xlane.xlu2 %221 }
 0x184   :  { %v233_v60 = vmul.f32 %v2481_v58, %v222_v59  ;;  %v292_v59 = vld [vmem:[%s3610_s29 + $0x58] sm:$0xff] }
 0x185   :  { %339 = vmatpush.msra.mxu1 %v292_v59 }
 0x186   :  { %v235_v61 = vsub.f32 %v216_v46, %v233_v60  ;;  %v291_v60 = vld [vmem:[%s3610_s29 + $0x50] sm:$0xff] }
 0x187   :  { %340 = vmatpush.msra.mxu1 %v291_v60  ;;  %v1212_v60 = vld [vmem:[%s3565_s4] sm:$0xff] }
 0x188   :  { %v237_v62 = vmul.f32 %v235_v61, %v235_v61 }
 0x189   :  { %341 = vmatpush.msra.mxu1 %v290_v16 }
 0x18a   :  { %v239_v63 = vsel %vm177_vm5, %v237_v62, 0.0 }
 0x18b   :  { %240 = vadd.xlane.f32.xlu0 %v239_v63  ;;  %v225_v1 = vpop.xlane.xlu2 %224  ;;  %v2062_v63 = vadd.s32 4294967295, %v462_v22 }
 0x18c   :  { %v234_v2 = vmul.f32 %v2481_v58, %v225_v1  ;;  %v2063_v1 = vadd.s32 4294967295, %v463_v41 }
 0x18e   :  { %v236_v4 = vsub.f32 %v217_v50, %v234_v2  ;;  %v289_v2 = vld [vmem:[%s3610_s29 + $0x40] sm:$0xff] }
 0x18f   :  { %342 = vmatpush.msra.mxu1 %v289_v2 }
 0x190   :  { %v238_v5 = vmul.f32 %v236_v4, %v236_v4 }
 0x192   :  { %v242_v6 = vsel %vm177_vm5, %v238_v5, 0.0  ;;  %v287_v5 = vld [vmem:[%s3610_s29 + $0x30] sm:$0xff] }
 0x193   :  { %243 = vadd.xlane.f32.xlu1 %v242_v6  ;;  %v286_v6 = vld [vmem:[%s3610_s29 + $0x28] sm:$0xff] }
 0x19f   :  { %469 = vperm.xlu0 %2183, %v2056_v11   ;;  %v283_v11 = vld [vmem:[%s3610_s29 + $0x10] sm:$0xff] }
 0x1ac   :  { %481 = vperm.xlu1 %2184, %v478_v14   ;;  %v281_v14 = vld [vmem:[%s3610_s29] sm:$0xff] }
 0x1b4   :  { %539 = vperm.xlu1 %2184, %v536_v24  }
 0x1bc   :  { %542 = vperm.xlu1 %2184, %v537_v43  }
 0x1fe   :  { %v241_v8 = vpop.xlane.xlu0 %240 }
 0x1ff   :  { %v245_v13 = vmul.f32 %v241_v8, %v2481_v58  ;;  %v284_v8 = vld [vmem:[%s3610_s29 + $0x18] sm:$0xff] }
 0x201   :  { %v247_v15 = vadd.f32 1e-05, %v245_v13  ;;  %v282_v13 = vld [vmem:[%s3610_s29 + $0x8] sm:$0xff] }
 0x203   :  { %2211 = vrsqrt.f32 %v247_v15  ;;  %vm255_vm13 = vweird.f32 %v247_v15 }
 0x206   :  { %v244_v17 = vpop.xlane.xlu1 %243 }
 0x207   :  { %v246_v18 = vmul.f32 %v244_v17, %v2481_v58 }
 0x209   :  { %v2212_v19 = vpop.eup %2211  ;;  %v248_v20 = vadd.f32 1e-05, %v246_v18 }
 0x20a   :  { %v250_v21 = vmul.f32 %v2212_v19, %v247_v15  ;;  %vm256_vm12 = vweird.f32 %v2212_v19  ;;  %v2567_v15 = vand.u32 127, %v83_v0 }
 0x20b   :  { %2213 = vrsqrt.f32 %v248_v20  ;;  %vm257_vm14 = vmor %vm255_vm13, %vm256_vm12  ;;  %vm265_vm9 = vweird.f32 %v248_v20 }
 0x20c   :  { %v251_v23 = vmul.f32 %v2212_v19, %v250_v21 }
 0x20e   :  { %v252_v25 = vmul.f32 0.5, %v251_v23 }
 0x210   :  { %v253_v26 = vsub.f32 1.5, %v252_v25 }
 0x211   :  { %v2214_v27 = vpop.eup %2213  ;;  %v470_v17 = vpop.permute.xlu0 %469 }
 0x212   :  { %v254_v28 = vmul.f32 %v2212_v19, %v253_v26  ;;  %v260_v29 = vmul.f32 %v2214_v27, %v248_v20  ;;  %vm266_vm15 = vweird.f32 %v2214_v27  ;;  %v2255_v20 = vmov 0.0  }
 0x213   :  { %vm267_vm11 = vmor %vm265_vm9, %vm266_vm15 }
 0x214   :  { %v258_v32 = vsel %vm257_vm14, %v2212_v19, %v254_v28  ;;  %v261_v34 = vmul.f32 %v2214_v27, %v260_v29  ;;  %vm3593_vm14 = vcmask 64512  }
 0x215   :  { %v269_v35 = vmul.f32 %v258_v32, %v235_v61  ;;  %v2057_v61 = vadd.s32 4294967295, %v461_v12 }
 0x216   :  { %v262_v37 = vmul.f32 0.5, %v261_v34 }
 0x217   :  { %v274_v38 = vmul.f32 %v2189_v30, %v269_v35 }
 0x218   :  { %v263_v39 = vsub.f32 1.5, %v262_v37 }
 0x219   :  { %v279_v40 = vadd.f32 %v2190_v36, %v274_v38 }
 0x21a   :  { %v264_v42 = vmul.f32 %v2214_v27, %v263_v39  ;;  %v2195_v39 = vld [vmem:[%s3611_s10] ss:$0 sm:$0xff] }
 0x21b   :  { %308 = vrot.lane.b32.xlu2 %v279_v40, %s3588_s8  ;;  %v294_v48 = vrot.slane %v279_v40, 7  ;;  %v300_v51 = vrot.slane %v279_v40, 1 }
 0x21c   :  { %v268_v44 = vsel %vm267_vm11, %v2214_v27, %v264_v42 }
 0x21d   :  { %v270_v45 = vmul.f32 %v268_v44, %v236_v4  ;;  %v288_v4 = vld [vmem:[%s3610_s29 + $0x38] sm:$0xff] }
 0x21e   :  { %343 = vmatpush.msra.mxu1 %v288_v4  ;;  %v482_v18 = vpop.permute.xlu1 %481 }
 0x21f   :  { %v275_v46 = vmul.f32 %v2189_v30, %v270_v45  ;;  %vm486_vm12 = vcmp.eq.s32.totalorder %v482_v18, 1 }
 0x220   :  { %344 = vmatpush.msra.mxu1 %v287_v5 }
 0x221   :  { %v280_v47 = vadd.f32 %v2190_v36, %v275_v46 }
 0x222   :  { %345 = vmatpush.msra.mxu1 %v286_v6 }
 0x223   :  { %310 = vrot.lane.b32.xlu2 %v280_v47, %s3588_s8  ;;  %v295_v49 = vrot.slane %v280_v47, 7  ;;  %v301_v50 = vrot.slane %v280_v47, 1 }
 0x224   :  { %346 = vmatpush.msra.mxu1 %v285_v7 }
 0x225   :  { %v297_v52 = vsel %vm125_vm3, %v295_v49, %v294_v48  ;;  %v296_v53 = vsel %vm125_vm3, %v294_v48, %v295_v49  ;;  %v302_v54 = vsel %vm144_vm0, %v300_v51, %v301_v50  ;;  %v303_v56 = vsel %vm144_vm0, %v301_v50, %v300_v51 }
 0x226   :  { %v304_v55 = vsel %vm151_vm1, %v302_v54, 0.0  ;;  %v305_v57 = vsel %vm152_vm2, %v303_v56, 0.0  ;;  %vm477_vm1 = vcmp.gt.s32.totalorder %v461_v12, 0  ;;  %347 = vmatpush.msra.mxu1 %v284_v8  ;;  %vm474_vm2 = vcmp.eq.s32.totalorder %v2567_v15, %v470_v17  ;;  %v540_v32 = vpop.permute.xlu1 %539  ;;  %v1215_v12 = vld [vmem:[%s3565_s4 + $0x18] sm:$0xff] }
 0x227   :  { %v479_v62 = vsel %vm477_vm1, 1, %v2254_v10  ;;  %vm488_vm13 = vmand %vm474_vm2, %vm486_vm12  ;;  %v298_v23 = vsel %vm130_vm4, %v297_v52, 0.0  ;;  %v299_v26 = vsel %vm131_vm8, %v296_v53, 0.0  ;;  %vm544_vm10 = vcmp.eq.s32.totalorder %v540_v32, 1 }
 0x228   :  { %348 = vmatpush.msra.mxu1 %v283_v11  ;;  %v2058_v21 = vsel %vm488_vm13, 1.0, %v2255_v20  ;;  %v598_v50 = vand.u32 15, %v2406_v9 }
 0x229   :  { %2060 = vmatmul.msk.f32.vlgmr.msra.gmra.mxu3 %vm3593_vm14, %v2058_v21 }
 0x22a   :  { %349 = vmatpush.msra.mxu1 %v282_v13  ;;  %v2603_v51 = vadd.s32 1, %v598_v50  ;;  %v586_v13 = vadd.s32 24, %v2395_v3  ;;  %v2071_v50 = vld [vmem:[%s3605_s12 + $0x78] sm:$0xff] }
 0x22b   :  { %316 = vrot.lane.b32.xlu2 %v304_v55, %s3590_s11 }
 0x22c   :  { %350 = vmatpush.msra.mxu1 %v281_v14  ;;  %vm703_vm13 = vcmp.lt.s32.totalorder %v2603_v51, 16  ;;  %v612_v14 = vand.u32 15, %v586_v13  ;;  %v2106_v51 = vld [vmem:[%s3568_s16 + $0x20] sm:$0xff] }
 0x22e   :  { %v543_v36 = vpop.permute.xlu1 %542  ;;  %v2648_v17 = vadd.s32 1, %v612_v14  ;;  %v2200_v14 = vld [vmem:[%s3567_s15] ss:$0 sm:$0xff] }
 0x22f   :  { %vm545_vm1 = vcmp.eq.s32.totalorder %v543_v36, 1  ;;  %v416_v36 = vld [vmem:[%s3568_s16] sm:$0xff] }
 0x233   :  { %318 = vrot.lane.b32.xlu2 %v305_v57, %s3590_s11 }
 0x23b   :  { %472 = vperm.xlu2 %2185, %v2057_v61  }
 0x243   :  { %484 = vperm.xlu2 %2185, %v479_v62  }
 0x24b   :  { %527 = vperm.xlu2 %2185, %v2062_v63  }
 0x253   :  { %530 = vperm.xlu2 %2185, %v2063_v1  }
 0x275   :  { %v309_v19 = vpop.permute.xlu2 %308 }
 0x276   :  { %v322_v0 = vsel %vm177_vm5, %v298_v23, %v309_v19  ;;  %v1214_v23 = vld [vmem:[%s3565_s4 + $0x10] sm:$0xff] }
 0x27d   :  { %v311_v22 = vpop.permute.xlu2 %310 }
 0x27e   :  { %v323_v27 = vsel %vm177_vm5, %v299_v26, %v311_v22  ;;  %v1213_v22 = vld [vmem:[%s3565_s4 + $0x8] sm:$0xff] }
 0x285   :  { %v317_v24 = vpop.permute.xlu2 %316 }
 0x286   :  { %v324_v25 = vsel %vm180_vm6, %v322_v0, %v317_v24 }
 0x287   :  { %2052 = vmatmul.msk.f32.vlgmr.msra.gmra.mxu1 %vm186_vm7, %v324_v25  ;;  %v2673_v25 = vld [vmem:[%s3564_s19] ss:$0 sm:$0xff] }
 0x28d   :  { %v319_v28 = vpop.permute.xlu2 %318 }
 0x28e   :  { %v325_v29 = vsel %vm180_vm6, %v323_v27, %v319_v28 }
 0x28f   :  { %2053 = vmatmul.msk.f32.gmra.mxu1 %vm186_vm7, %v325_v29 }
 0x295   :  { %v473_v30 = vpop.permute.xlu2 %472 }
 0x296   :  { %vm475_vm4 = vcmp.eq.s32.totalorder %v2567_v15, %v473_v30 }
 0x29d   :  { %v485_v31 = vpop.permute.xlu2 %484 }
 0x29e   :  { %vm487_vm15 = vcmp.eq.s32.totalorder %v485_v31, 1 }
 0x29f   :  { %vm489_vm9 = vmand %vm475_vm4, %vm487_vm15  ;;  %vm705_vm4 = vcmp.lt.s32.totalorder %v2648_v17, 16 }
 0x2a0   :  { %v2059_v34 = vsel %vm489_vm9, 1.0, %v2255_v20  ;;  %vm3594_vm9 = vcmask 56320  }
 0x2a1   :  { %2061 = vmatmul.msk.f32.gmra.mxu3 %vm3593_vm14, %v2059_v34  ;;  %v419_v34 = vld [vmem:[%s3568_s16 + $0x18] sm:$0xff] }
 0x2a2   :  { %442 = vmatpush.msra.mxu2 %v419_v34 }
 0x2a5   :  { %v528_v33 = vpop.permute.xlu2 %527 }
 0x2a6   :  { %vm532_vm8 = vcmp.eq.s32.totalorder %v2567_v15, %v528_v33  ;;  %v418_v33 = vld [vmem:[%s3568_s16 + $0x10] sm:$0xff] }
 0x2a7   :  { %vm546_vm11 = vmand %vm532_vm8, %vm544_vm10  ;;  %443 = vmatpush.msra.mxu2 %v418_v33 }
 0x2a8   :  { %v2064_v35 = vsel %vm546_vm11, 1.0, %v2255_v20 }
 0x2a9   :  { %2066 = vmatmul.msk.f32.vlgmr.msrb.gmra.mxu3 %vm3593_vm14, %v2064_v35  ;;  %v417_v35 = vld [vmem:[%s3568_s16 + $0x8] sm:$0xff] }
 0x2aa   :  { %444 = vmatpush.msra.mxu2 %v417_v35 }
 0x2ac   :  { %v2596_v48 = vpop.f32.mrf.mxu3  ;;  %445 = vmatpush.msra.mxu2 %v416_v36 }
 0x2ad   :  { %v531_v37 = vpop.permute.xlu2 %530  ;;  %v686_v8 = vrot.slane %v2596_v48, 1 }
 0x2ae   :  { %vm533_vm2 = vcmp.eq.s32.totalorder %v2567_v15, %v531_v37  ;;  %v2079_v37 = vld [vmem:[%s3605_s12 + $0xb8] sm:$0xff] }
 0x2af   :  { %vm547_vm12 = vmand %vm533_vm2, %vm545_vm1  ;;  %781 = vmatpush.msrb.mxu2 %v2079_v37 }
 0x2b0   :  { %v2065_v38 = vsel %vm547_vm12, 1.0, %v2255_v20 }
 0x2b1   :  { %2067 = vmatmul.msk.f32.gmra.mxu3 %vm3593_vm14, %v2065_v38  ;;  %v2078_v38 = vld [vmem:[%s3605_s12 + $0xb0] sm:$0xff] }
 0x2b2   :  { %782 = vmatpush.msrb.mxu2 %v2078_v38 }
 0x304   :  { %v352_v40 = vpop.f32.mrf.mxu1 }
 0x305   :  { %v353_v41 = vadd.f32 %v2195_v39, %v352_v40  ;;  %v2076_v40 = vld [vmem:[%s3605_s12 + $0xa0] sm:$0xff] }
 0x307   :  { %v358_v42 = vmax.f32 %v353_v41, 0.0  ;;  %v2075_v41 = vld [vmem:[%s3605_s12 + $0x98] sm:$0xff] }
 0x309   :  { %v362_v43 = vsel %vm177_vm5, %v358_v42, 0.0 }
 0x30a   :  { %363 = vadd.xlane.f32.xlu2 %v362_v43 }
 0x30c   :  { %v355_v44 = vpop.f32.mrf.mxu1 }
 0x30d   :  { %v356_v45 = vadd.f32 %v2195_v39, %v355_v44  ;;  %v2077_v39 = vld [vmem:[%s3605_s12 + $0xa8] sm:$0xff] }
 0x30e   :  { %783 = vmatpush.msrb.mxu2 %v2077_v39 }
 0x30f   :  { %v359_v46 = vmax.f32 %v356_v45, 0.0  ;;  %v2073_v45 = vld [vmem:[%s3605_s12 + $0x88] sm:$0xff] }
 0x310   :  { %784 = vmatpush.msrb.mxu2 %v2076_v40 }
 0x311   :  { %v365_v47 = vsel %vm177_vm5, %v359_v46, 0.0 }
 0x312   :  { %366 = vadd.xlane.f32.xlu0 %v365_v47  ;;  %785 = vmatpush.msrb.mxu2 %v2075_v41  ;;  %v2072_v47 = vld [vmem:[%s3605_s12 + $0x80] sm:$0xff] }
 0x324   :  { %v2598_v49 = vpop.f32.mrf.mxu3 }
 0x325   :  { %v687_v52 = vrot.slane %v2598_v49, 1 }
 0x326   :  { %726 = vrot.lane.b32.xlu0 %v2596_v48, %s3612_s0 }
 0x327   :  { %v692_v11 = vsel %vm144_vm0, %v686_v8, %v687_v52 }
 0x32c   :  { %v2606_v53 = vpop.f32.mrf.mxu3 }
 0x32d   :  { %v688_v54 = vrot.slane %v2606_v53, 1 }
 0x32f   :  { %v691_v55 = vsel %vm144_vm0, %v687_v52, %v688_v54  ;;  %v2070_v52 = vld [vmem:[%s3605_s12 + $0x70] sm:$0xff] }
 0x330   :  { %v719_v56 = vsel %vm703_vm13, %v691_v55, 0.0  ;;  %v2069_v55 = vld [vmem:[%s3605_s12 + $0x68] sm:$0xff] }
 0x331   :  { %744 = vrot.lane.b32.xlu0 %v719_v56, %s3613_s13 }
 0x334   :  { %v2615_v9 = vpop.f32.mrf.mxu3 }
 0x335   :  { %v689_v57 = vrot.slane %v2615_v9, 1  ;;  %v653_v34 = vrot.slane %v2615_v9, 7 }
 0x337   :  { %v690_v59 = vsel %vm144_vm0, %v688_v54, %v689_v57  ;;  %v693_v18 = vsel %vm144_vm0, %v689_v57, %v686_v8  ;;  %v2068_v57 = vld [vmem:[%s3605_s12 + $0x60] sm:$0xff] }
 0x338   :  { %v721_v19 = vsel %vm705_vm4, %v693_v18, 0.0 }
 0x339   :  { %746 = vrot.lane.b32.xlu0 %v690_v59, %s3613_s13 }
 0x341   :  { %1219 = vperm.xlu0 %2183, %v1212_v60  }
 0x349   :  { %1234 = vperm.xlu0 %2183, %v1215_v12  }
 0x37d   :  { %v364_v16 = vpop.xlane.xlu2 %363 }
 0x37e   :  { %v368_v61 = vmul.f32 %v364_v16, %v2481_v58 }
 0x380   :  { %v2628_v62 = vsub.f32 %v358_v42, %v368_v61  ;;  %v2074_v42 = vld [vmem:[%s3605_s12 + $0x90] sm:$0xff] }
 0x381   :  { %786 = vmatpush.msrb.mxu2 %v2074_v42 }
 0x382   :  { %v372_v63 = vmul.f32 %v2628_v62, %v2628_v62 }
 0x383   :  { %787 = vmatpush.msrb.mxu2 %v2073_v45 }
 0x384   :  { %v374_v1 = vsel %vm177_vm5, %v372_v63, 0.0 }
 0x385   :  { %v367_v2 = vpop.xlane.xlu0 %366  ;;  %375 = vadd.xlane.f32.xlu1 %v374_v1  ;;  %788 = vmatpush.msrb.mxu2 %v2072_v47 }
 0x386   :  { %v369_v4 = vmul.f32 %v367_v2, %v2481_v58 }
 0x387   :  { %789 = vmatpush.msrb.mxu2 %v2071_v50 }
 0x388   :  { %v2634_v5 = vsub.f32 %v359_v46, %v369_v4 }
 0x389   :  { %790 = vmatpush.msrb.mxu2 %v2070_v52  ;;  %v585_v52 = vadd.s32 16, %v2395_v3 }
 0x38a   :  { %v373_v6 = vmul.f32 %v2634_v5, %v2634_v5 }
 0x38b   :  { %791 = vmatpush.msrb.mxu2 %v2069_v55 }
 0x38c   :  { %v377_v7 = vsel %vm177_vm5, %v373_v6, 0.0 }
 0x38d   :  { %378 = vadd.xlane.f32.xlu2 %v377_v7  ;;  %792 = vmatpush.msrb.mxu2 %v2068_v57  ;;  %v2199_v7 = vld [vmem:[%s3566_s14] ss:$0 sm:$0xff] }
 0x398   :  { %v2657_v21 = vpop.permute.xlu0 %726 }
 0x39e   :  { %742 = vrot.lane.b32.xlu1 %v692_v11, %s3613_s13 }
 0x3a3   :  { %v2666_v0 = vpop.permute.xlu0 %744 }
 0x3a5   :  { %728 = vrot.lane.b32.xlu2 %v2598_v49, %s3612_s0 }
 0x3a6   :  { %730 = vrot.lane.b32.xlu1 %v2606_v53, %s3612_s0 }
 0x3ab   :  { %v2668_v24 = vpop.permute.xlu0 %746 }
 0x3ad   :  { %732 = vrot.lane.b32.xlu2 %v2615_v9, %s3612_s0 }
 0x3ae   :  { %748 = vrot.lane.b32.xlu1 %v721_v19, %s3613_s13 }
 0x3b3   :  { %v1220_v26 = vpop.permute.xlu0 %1219 }
 0x3b4   :  { %vm1240_vm15 = vcmp.ge.f32.partialorder %v1220_v26, %v2673_v25 }
 0x3b5   :  { %1224 = vperm.xlu2 %2185, %v1213_v22   ;;  %v1244_v27 = vsel %vm1240_vm15, 1, %v2254_v10 }
 0x3b6   :  { %1229 = vperm.xlu1 %2184, %v1214_v23   ;;  %v1249_v28 = vsel %vm3594_vm9, %v1244_v27, 0 }
 0x3b7   :  { %v1251_v29 = vshrl.u32 %v1249_v28, 16  ;;  %v1250_v30 = vand.u32 65535, %v1249_v28 }
 0x3b9   :  { %v1253_v31 = vcvt.s32.f32 %v1251_v29  ;;  %v1252_v32 = vcvt.s32.f32 %v1250_v30  ;;  %v591_v29 = vand.u32 15, %v2395_v3 }
 0x3bb   :  { %v2744_v36 = vadd.s32 4294967295, %v591_v29 }
 0x3de   :  { %1256 = vadd.xlane.f32.xlu2 %v1253_v31 }
 0x3e0   :  { %1254 = vadd.xlane.f32.xlu1 %v1252_v32  ;;  %v650_v32 = vrot.slane %v2596_v48, 7 }
 0x3f8   :  { %v376_v43 = vpop.xlane.xlu1 %375 }
 0x3f9   :  { %v380_v44 = vmul.f32 %v376_v43, %v2481_v58  ;;  %v657_v43 = vsel %vm125_vm3, %v653_v34, %v650_v32 }
 0x3fb   :  { %v382_v46 = vadd.f32 1e-05, %v380_v44 }
 0x3fd   :  { %2215 = vrsqrt.f32 %v382_v46  ;;  %vm390_vm8 = vweird.f32 %v382_v46 }
 0x400   :  { %v379_v54 = vpop.xlane.xlu2 %378 }
 0x401   :  { %v381_v56 = vmul.f32 %v379_v54, %v2481_v58 }
 0x403   :  { %v2216_v59 = vpop.eup %2215  ;;  %v383_v60 = vadd.f32 1e-05, %v381_v56  ;;  %v651_v56 = vrot.slane %v2598_v49, 7 }
 0x404   :  { %v385_v12 = vmul.f32 %v2216_v59, %v382_v46  ;;  %vm391_vm10 = vweird.f32 %v2216_v59 }
 0x405   :  { %2217 = vrsqrt.f32 %v383_v60  ;;  %vm392_vm11 = vmor %vm390_vm8, %vm391_vm10  ;;  %vm400_vm2 = vweird.f32 %v383_v60  ;;  %vm662_vm8 = vcmp.ge.s32.totalorder %v2744_v36, 0 }
 0x406   :  { %v386_v16 = vmul.f32 %v2216_v59, %v385_v12  ;;  %v682_v47 = vsel %vm662_vm8, %v657_v43, 0.0  ;;  %v656_v12 = vsel %vm125_vm3, %v650_v32, %v651_v56 }
 0x407   :  { %v754_v55 = vsel %vm177_vm5, %v682_v47, %v2657_v21 }
 0x408   :  { %v387_v61 = vmul.f32 0.5, %v386_v16  ;;  %v2728_v63 = vpop.permute.xlu2 %728 }
 0x40a   :  { %v388_v1 = vsub.f32 1.5, %v387_v61  ;;  %v652_v61 = vrot.slane %v2606_v53, 7 }
 0x40b   :  { %v2218_v2 = vpop.eup %2217 }
 0x40c   :  { %v389_v4 = vmul.f32 %v2216_v59, %v388_v1  ;;  %v395_v6 = vmul.f32 %v2218_v2, %v383_v60  ;;  %vm401_vm1 = vweird.f32 %v2218_v2  ;;  %v755_v1 = vsel %vm177_vm5, %v656_v12, %v2728_v63 }
 0x40d   :  { %vm402_vm12 = vmor %vm400_vm2, %vm401_vm1 }
 0x40e   :  { %v393_v8 = vsel %vm392_vm11, %v2216_v59, %v389_v4  ;;  %v396_v11 = vmul.f32 %v2218_v2, %v395_v6  ;;  %v605_v59 = vand.u32 15, %v585_v52  ;;  %v759_v6 = vsel %vm180_vm6, %v755_v1, %v2666_v0 }
 0x40f   :  { %v404_v13 = vmul.f32 %v393_v8, %v2628_v62  ;;  %v1235_v62 = vpop.permute.xlu0 %1234 }
 0x410   :  { %v397_v18 = vmul.f32 0.5, %v396_v11  ;;  %v743_v19 = vpop.permute.xlu1 %742  ;;  %v2737_v22 = vpop.permute.xlu2 %732  ;;  %vm1243_vm15 = vcmp.ge.f32.partialorder %v1235_v62, %v2673_v25  ;;  %v655_v11 = vsel %vm125_vm3, %v651_v56, %v652_v61  ;;  %v2187_v56 = vld [vmem:[%s3606_s27 + $0x1] ss:$0 sm:$0xff] }
 0x411   :  { %v409_v23 = vmul.f32 %v2199_v7, %v404_v13  ;;  %v758_v57 = vsel %vm180_vm6, %v754_v55, %v743_v19 }
 0x412   :  { %v398_v26 = vsub.f32 1.5, %v397_v18 }
 0x413   :  { %v414_v27 = vadd.f32 %v2200_v14, %v409_v23  ;;  %v1313_v23 = vld [vmem:[%s3570_s18] sm:$0xff] }
 0x414   :  { %v399_v28 = vmul.f32 %v2218_v2, %v398_v26  ;;  %1341 = vmatpush.msrb.mxu1 %v1313_v23  ;;  %v654_v26 = vsel %vm125_vm3, %v652_v61, %v653_v34 }
 0x415   :  { %2054 = vmatmul.msk.f32.vlgmr.msra.gmra.mxu2 %vm177_vm5, %v414_v27  ;;  %v757_v27 = vsel %vm177_vm5, %v654_v26, %v2737_v22  ;;  %v81_v22 = vld [vmem:[%s3571_s1] sm:$0xff] }
 0x416   :  { %v403_v30 = vsel %vm402_vm12, %v2218_v2, %v399_v28  ;;  %v2769_v2 = vadd.s32 4294967295, %v605_v59  ;;  %vm453_vm12 = vcmp.gt.f32.partialorder %v81_v22, 0.5 }
 0x417   :  { %v405_v31 = vmul.f32 %v403_v30, %v2634_v5  ;;  %v1247_v5 = vsel %vm1243_vm15, 1, %v2254_v10  ;;  %vm457_vm15 = vcmask 7168  }
 0x418   :  { %v731_v33 = vpop.permute.xlu1 %730  ;;  %v1225_v35 = vpop.permute.xlu2 %1224  ;;  %v1288_v46 = vsel %vm3594_vm9, %v1247_v5, 0  ;;  %vm664_vm1 = vcmp.ge.s32.totalorder %v2769_v2, 0  ;;  %v2206_v2 = vld [vmem:[%s3569_s17 + $0x1] ss:$0 sm:$0xff] }
 0x419   :  { %vm1241_vm10 = vcmp.ge.f32.partialorder %v1225_v35, %v2673_v25  ;;  %v410_v37 = vmul.f32 %v2199_v7, %v405_v31  ;;  %v1290_v54 = vshrl.u32 %v1288_v46, 16  ;;  %v1289_v18 = vand.u32 65535, %v1288_v46 }
 0x41a   :  { %v1245_v38 = vsel %vm1241_vm10, 1, %v2254_v10 }
 0x41b   :  { %v1262_v39 = vsel %vm3594_vm9, %v1245_v38, 0  ;;  %v415_v40 = vadd.f32 %v2200_v14, %v410_v37  ;;  %v1292_v60 = vcvt.s32.f32 %v1290_v54  ;;  %v1291_v19 = vcvt.s32.f32 %v1289_v18  ;;  %v2205_v38 = vld [vmem:[%s3569_s17] ss:$0 sm:$0xff] }
 0x41c   :  { %v1264_v41 = vshrl.u32 %v1262_v39, 16  ;;  %v1263_v42 = vand.u32 65535, %v1262_v39 }
 0x41d   :  { %2055 = vmatmul.msk.f32.gmra.mxu2 %vm177_vm5, %v415_v40 }
 0x41e   :  { %v1266_v44 = vcvt.s32.f32 %v1264_v41  ;;  %v1265_v45 = vcvt.s32.f32 %v1263_v42 }
 0x420   :  { %v749_v50 = vpop.permute.xlu1 %748  ;;  %1269 = vadd.xlane.f32.xlu0 %v1266_v44  ;;  %1267 = vadd.xlane.f32.xlu2 %v1265_v45  ;;  %v82_v45 = vld [vmem:[%s3571_s1 + $0x8] sm:$0xff] }
 0x421   :  { %v761_v28 = vsel %vm180_vm6, %v757_v27, %v749_v50 }
 0x425   :  { %2081 = vmatmul.msk.f32.vlgmr.msrb.gmra.mxu2 %vm186_vm7, %v758_v57 }
 0x428   :  { %v1230_v16 = vpop.permute.xlu1 %1229  ;;  %1295 = vadd.xlane.f32.xlu2 %v1292_v60 }
 0x429   :  { %vm1242_vm11 = vcmp.ge.f32.partialorder %v1230_v16, %v2673_v25  ;;  %v684_v25 = vsel %vm664_vm1, %v655_v11, 0.0 }
 0x42a   :  { %v1246_v21 = vsel %vm1242_vm11, 1, %v2254_v10  ;;  %v756_v14 = vsel %vm177_vm5, %v684_v25, %v731_v33  ;;  %vm454_vm11 = vcmp.gt.f32.partialorder %v82_v45, 0.5 }
 0x42b   :  { %v1275_v4 = vsel %vm3594_vm9, %v1246_v21, 0  ;;  %v760_v0 = vsel %vm180_vm6, %v756_v14, %v2668_v24 }
 0x42c   :  { %v1277_v7 = vshrl.u32 %v1275_v4, 16  ;;  %v1276_v8 = vand.u32 65535, %v1275_v4 }
 0x42d   :  { %2082 = vmatmul.msk.f32.gmra.mxu2 %vm186_vm7, %v759_v6 }
 0x42e   :  { %v1279_v63 = vcvt.s32.f32 %v1277_v7  ;;  %v1278_v13 = vcvt.s32.f32 %v1276_v8 }
 0x430   :  { %1282 = vadd.xlane.f32.xlu1 %v1279_v63  ;;  %1280 = vadd.xlane.f32.xlu0 %v1278_v13 }
 0x435   :  { %2083 = vmatmul.msk.f32.gmra.mxu2 %vm186_vm7, %v760_v0 }
 0x438   :  { %1293 = vadd.xlane.f32.xlu1 %v1291_v19 }
 0x43d   :  { %2084 = vmatmul.msk.f32.gmra.mxu2 %vm186_vm7, %v761_v28 }
 0x451   :  { %v1257_v24 = vpop.xlane.xlu2 %1256 }
 0x452   :  { %v1259_v29 = vcvt.f32.s32 %v1257_v24 }
 0x453   :  { %v1255_v62 = vpop.xlane.xlu1 %1254 }
 0x454   :  { %v1260_v30 = vshll.u32 %v1259_v29, 16  ;;  %v1258_v31 = vcvt.f32.s32 %v1255_v62 }
 0x456   :  { %v1261_v32 = vadd.s32 %v1260_v30, %v1258_v31 }
 0x458   :  { %vm1301_vm2 = vcmp.eq.s32.totalorder %v2567_v15, %v1261_v32 }
 0x459   :  { %v2115_v33 = vsel %vm1301_vm2, 1.0, %v2255_v20 }
 0x45a   :  { %2119 = vmatmul.msk.f32.vlgmr.msrb.gmra.mxu1 %vm3593_vm14, %v2115_v33 }
 0x493   :  { %v1270_v34 = vpop.xlane.xlu0 %1269  ;;  %v1268_v35 = vpop.xlane.xlu2 %1267 }
 0x494   :  { %v1272_v37 = vcvt.f32.s32 %v1270_v34  ;;  %v1271_v40 = vcvt.f32.s32 %v1268_v35 }
 0x496   :  { %v1273_v39 = vshll.u32 %v1272_v37, 16 }
 0x498   :  { %v1274_v5 = vadd.s32 %v1273_v39, %v1271_v40  ;;  %v447_v41 = vpop.f32.mrf.mxu2 }
 0x499   :  { %v448_v42 = vadd.f32 %v2205_v38, %v447_v41 }
 0x49a   :  { %vm1302_vm10 = vcmp.eq.s32.totalorder %v2567_v15, %v1274_v5 }
 0x49b   :  { %v455_v43 = vsel %vm453_vm12, 0.0, %v448_v42  ;;  %v2116_v44 = vsel %vm1302_vm10, 1.0, %v2255_v20  ;;  %v1296_v57 = vpop.xlane.xlu2 %1295 }
 0x49c   :  { %458 = vst.msk [vmem:[%s3572_s23] sm:$0xff] %vm457_vm15, %v455_v43  ;;  %2120 = vmatmul.msk.f32.gmra.mxu1 %vm3593_vm14, %v2116_v44  ;;  %v1298_v12 = vcvt.f32.s32 %v1296_v57 }
 0x49e   :  { %v1299_v7 = vshll.u32 %v1298_v12, 16 }
 0x4a0   :  { %v450_v46 = vpop.f32.mrf.mxu2 }
 0x4a1   :  { %v451_v47 = vadd.f32 %v2205_v38, %v450_v46 }
 0x4a3   :  { %v456_v50 = vsel %vm454_vm11, 0.0, %v451_v47  ;;  %v1283_v52 = vpop.xlane.xlu1 %1282  ;;  %v1281_v54 = vpop.xlane.xlu0 %1280 }
 0x4a4   :  { %459 = vst.msk [vmem:[%s3572_s23 + $0x8] sm:$0xff] %vm457_vm15, %v456_v50  ;;  %v1285_v55 = vcvt.f32.s32 %v1283_v52  ;;  %v1284_v60 = vcvt.f32.s32 %v1281_v54 }
 0x4a6   :  { %v1286_v59 = vshll.u32 %v1285_v55, 16 }
 0x4a8   :  { %v1287_v16 = vadd.s32 %v1286_v59, %v1284_v60  ;;  %v794_v61 = vpop.f32.mrf.mxu2 }
 0x4a9   :  { %v795_v1 = vadd.f32 %v2187_v56, %v794_v61 }
 0x4aa   :  { %vm1303_vm2 = vcmp.eq.s32.totalorder %v2567_v15, %v1287_v16 }
 0x4ab   :  { %v806_v21 = vmax.f32 %v795_v1, 0.0  ;;  %v1294_v4 = vpop.xlane.xlu1 %1293  ;;  %v2117_v6 = vsel %vm1303_vm2, 1.0, %v2255_v20 }
 0x4ac   :  { %v1297_v8 = vcvt.f32.s32 %v1294_v4  ;;  %2121 = vmatmul.msk.f32.gmra.mxu1 %vm3593_vm14, %v2117_v6 }
 0x4ad   :  { %v814_v11 = vsel %vm177_vm5, %v806_v21, 0.0 }
 0x4ae   :  { %v1300_v63 = vadd.s32 %v1299_v7, %v1297_v8  ;;  %815 = vadd.xlane.f32.xlu0 %v814_v11  ;;  %v2134_v11 = vld [vmem:[%s3605_s12 + $0x118] sm:$0xff] }
 0x4af   :  { %1457 = vmatpush.msra.mxu2 %v2134_v11  ;;  %v2096_v11 = vld [vmem:[%s3610_s29 + $0xa8] sm:$0xff] }
 0x4b0   :  { %v797_v13 = vpop.f32.mrf.mxu2  ;;  %vm1304_vm12 = vcmp.eq.s32.totalorder %v2567_v15, %v1300_v63  ;;  %v2133_v63 = vld [vmem:[%s3605_s12 + $0x110] sm:$0xff] }
 0x4b1   :  { %v798_v25 = vadd.f32 %v2187_v56, %v797_v13  ;;  %v2118_v18 = vsel %vm1304_vm12, 1.0, %v2255_v20  ;;  %1458 = vmatpush.msra.mxu2 %v2133_v63  ;;  %v2132_v13 = vld [vmem:[%s3605_s12 + $0x108] sm:$0xff] }
 0x4b3   :  { %v807_v14 = vmax.f32 %v798_v25, 0.0  ;;  %1459 = vmatpush.msra.mxu2 %v2132_v13  ;;  %v2131_v25 = vld [vmem:[%s3605_s12 + $0x100] sm:$0xff] }
 0x4b4   :  { %2122 = vmatmul.msk.f32.gmra.mxu1 %vm3593_vm14, %v2118_v18  ;;  %v2129_v18 = vld [vmem:[%s3605_s12 + $0xf0] sm:$0xff] }
 0x4b5   :  { %v817_v0 = vsel %vm177_vm5, %v807_v14, 0.0  ;;  %1460 = vmatpush.msra.mxu2 %v2131_v25 }
 0x4b6   :  { %818 = vadd.xlane.f32.xlu2 %v817_v0  ;;  %v2128_v0 = vld [vmem:[%s3605_s12 + $0xe8] sm:$0xff] }
 0x4b8   :  { %v800_v19 = vpop.f32.mrf.mxu2 }
 0x4b9   :  { %v801_v23 = vadd.f32 %v2187_v56, %v800_v19  ;;  %v2127_v19 = vld [vmem:[%s3605_s12 + $0xe0] sm:$0xff] }
 0x4bb   :  { %v808_v26 = vmax.f32 %v801_v23, 0.0  ;;  %v2126_v23 = vld [vmem:[%s3605_s12 + $0xd8] sm:$0xff] }
 0x4bd   :  { %v820_v27 = vsel %vm177_vm5, %v808_v26, 0.0 }
 0x4be   :  { %821 = vadd.xlane.f32.xlu1 %v820_v27 }
 0x4c0   :  { %v803_v28 = vpop.f32.mrf.mxu2 }
 0x4c1   :  { %v804_v24 = vadd.f32 %v2187_v56, %v803_v28 }
 0x4c3   :  { %v809_v29 = vmax.f32 %v804_v24, 0.0  ;;  %v2124_v24 = vld [vmem:[%s3605_s12 + $0xc8] sm:$0xff] }
 0x4c5   :  { %v823_v62 = vsel %vm177_vm5, %v809_v29, 0.0 }
 0x4c6   :  { %824 = vadd.xlane.f32.xlu0 %v823_v62  ;;  %v2123_v62 = vld [vmem:[%s3605_s12 + $0xc0] sm:$0xff] }
 0x4d7   :  { %v1343_v30 = vpop.f32.mrf.mxu1 }
 0x4d8   :  { %v2843_v41 = vadd.f32 %v1343_v30, %v2596_v48 }
 0x4da   :  { %v1386_v48 = vrot.slane %v2843_v41, 1  ;;  %v1374_v25 = vrot.slane %v2843_v41, 7 }
 0x519   :  { %v1346_v31 = vpop.f32.mrf.mxu1 }
 0x51a   :  { %v2881_v1 = vadd.f32 %v1346_v31, %v2598_v49 }
 0x521   :  { %v816_v32 = vpop.xlane.xlu0 %815 }
 0x522   :  { %v826_v33 = vmul.f32 %v816_v32, %v2481_v58 }
 0x524   :  { %v2832_v34 = vsub.f32 %v806_v21, %v826_v33  ;;  %v1387_v21 = vrot.slane %v2881_v1, 1 }
 0x526   :  { %v834_v35 = vmul.f32 %v2832_v34, %v2832_v34  ;;  %v1392_v4 = vsel %vm144_vm0, %v1386_v48, %v1387_v21 }
 0x528   :  { %v838_v37 = vsel %vm177_vm5, %v834_v35, 0.0 }
 0x529   :  { %839 = vadd.xlane.f32.xlu2 %v838_v37  ;;  %v1349_v22 = vpop.f32.mrf.mxu1  ;;  %v819_v38 = vpop.xlane.xlu2 %818 }
 0x52a   :  { %v827_v39 = vmul.f32 %v819_v38, %v2481_v58  ;;  %v2847_v43 = vadd.f32 %v1349_v22, %v2606_v53 }
 0x52c   :  { %v2838_v40 = vsub.f32 %v807_v14, %v827_v39  ;;  %v1376_v55 = vrot.slane %v2847_v43, 7  ;;  %v1388_v6 = vrot.slane %v2847_v43, 1  ;;  %v2130_v14 = vld [vmem:[%s3605_s12 + $0xf8] sm:$0xff] }
 0x52d   :  { %1461 = vmatpush.msra.mxu2 %v2130_v14  ;;  %v2095_v14 = vld [vmem:[%s3610_s29 + $0xa0] sm:$0xff] }
 0x52e   :  { %v835_v5 = vmul.f32 %v2838_v40, %v2838_v40  ;;  %v1391_v7 = vsel %vm144_vm0, %v1387_v21, %v1388_v6 }
 0x52f   :  { %v1395_v49 = vsel %vm703_vm13, %v1391_v7, 0.0  ;;  %1462 = vmatpush.msra.mxu2 %v2129_v18 }
 0x530   :  { %v841_v42 = vsel %vm177_vm5, %v835_v5, 0.0 }
 0x531   :  { %v822_v44 = vpop.xlane.xlu1 %821  ;;  %v1352_v45 = vpop.f32.mrf.mxu1  ;;  %842 = vadd.xlane.f32.xlu1 %v841_v42  ;;  %1463 = vmatpush.msra.mxu2 %v2128_v0 }
 0x532   :  { %v828_v46 = vmul.f32 %v822_v44, %v2481_v58  ;;  %v2851_v47 = vadd.f32 %v1352_v45, %v2615_v9 }
 0x533   :  { %1464 = vmatpush.msra.mxu2 %v2127_v19 }
 0x534   :  { %v2853_v50 = vsub.f32 %v808_v26, %v828_v46  ;;  %v1377_v52 = vrot.slane %v2851_v47, 7  ;;  %v1389_v54 = vrot.slane %v2851_v47, 1  ;;  %v2125_v26 = vld [vmem:[%s3605_s12 + $0xd0] sm:$0xff] }
 0x535   :  { %1465 = vmatpush.msra.mxu2 %v2126_v23 }
 0x536   :  { %v836_v53 = vmul.f32 %v2853_v50, %v2853_v50  ;;  %v2863_v56 = vsel %vm144_vm0, %v1389_v54, %v1386_v48  ;;  %v2871_v9 = vsel %vm125_vm3, %v1376_v55, %v1377_v52  ;;  %v1390_v8 = vsel %vm144_vm0, %v1388_v6, %v1389_v54  ;;  %v2946_v48 = vld [vmem:[%s3608_s30 + $0x1] ss:$0 sm:$0xff]  ;;  %v2097_v6 = vld [vmem:[%s3610_s29 + $0xb0] sm:$0xff] }
 0x537   :  { %1466 = vmatpush.msra.mxu2 %v2125_v26  ;;  %v1381_v23 = vsel %vm125_vm3, %v1377_v52, %v1374_v25 }
 0x538   :  { %v844_v57 = vsel %vm177_vm5, %v836_v53, 0.0 }
 0x539   :  { %845 = vadd.xlane.f32.xlu0 %v844_v57  ;;  %v825_v59 = vpop.xlane.xlu0 %824  ;;  %1467 = vmatpush.msra.mxu2 %v2124_v24  ;;  %v2951_v57 = vld [vmem:[%s3609_s6 + $0x1] ss:$0 sm:$0xff] }
 0x53a   :  { %v829_v60 = vmul.f32 %v825_v59, %v2481_v58 }
 0x53b   :  { %1468 = vmatpush.msra.mxu2 %v2123_v62 }
 0x53c   :  { %v2875_v12 = vsub.f32 %v809_v29, %v829_v60 }
 0x53e   :  { %v837_v16 = vmul.f32 %v2875_v12, %v2875_v12 }
 0x540   :  { %v847_v61 = vsel %vm177_vm5, %v837_v16, 0.0 }
 0x541   :  { %848 = vadd.xlane.f32.xlu2 %v847_v61 }
 0x54a   :  { %1402 = vrot.lane.b32.xlu1 %v2843_v41, %s3612_s0 }
 0x54d   :  { %1418 = vrot.lane.b32.xlu0 %v1392_v4, %s3613_s13  ;;  %v2098_v4 = vld [vmem:[%s3610_s29 + $0xb8] sm:$0xff] }
 0x54e   :  { %1014 = vmatpush.msra.mxu3 %v2098_v4 }
 0x550   :  { %1015 = vmatpush.msra.mxu3 %v2097_v6 }
 0x552   :  { %1406 = vrot.lane.b32.xlu1 %v2847_v43, %s3612_s0  ;;  %1016 = vmatpush.msra.mxu3 %v2096_v11 }
 0x554   :  { %1017 = vmatpush.msra.mxu3 %v2095_v14 }
 0x555   :  { %1420 = vrot.lane.b32.xlu0 %v1395_v49, %s3613_s13 }
 0x559   :  { %1404 = vrot.lane.b32.xlu2 %v2881_v1, %s3612_s0 }
 0x561   :  { %1422 = vrot.lane.b32.xlu2 %v1390_v8, %s3613_s13 }
 0x569   :  { %1408 = vrot.lane.b32.xlu2 %v2851_v47, %s3612_s0 }
 0x59c   :  { %v840_v27 = vpop.xlane.xlu2 %839 }
 0x59d   :  { %v850_v28 = vmul.f32 %v840_v27, %v2481_v58 }
 0x59f   :  { %v854_v29 = vadd.f32 1e-05, %v850_v28 }
 0x5a1   :  { %2219 = vrsqrt.f32 %v854_v29  ;;  %vm864_vm11 = vweird.f32 %v854_v29 }
 0x5a4   :  { %v843_v30 = vpop.xlane.xlu1 %842 }
 0x5a5   :  { %v851_v31 = vmul.f32 %v843_v30, %v2481_v58 }
 0x5a7   :  { %v2220_v32 = vpop.eup %2219  ;;  %v855_v33 = vadd.f32 1e-05, %v851_v31 }
 0x5a8   :  { %v859_v35 = vmul.f32 %v2220_v32, %v854_v29  ;;  %vm865_vm10 = vweird.f32 %v2220_v32  ;;  %v1382_v29 = vsel %vm662_vm8, %v1381_v23, 0.0 }
 0x5a9   :  { %2221 = vrsqrt.f32 %v855_v33  ;;  %vm866_vm2 = vmor %vm864_vm11, %vm865_vm10  ;;  %vm874_vm10 = vweird.f32 %v855_v33 }
 0x5aa   :  { %v860_v37 = vmul.f32 %v2220_v32, %v859_v35 }
 0x5ac   :  { %v861_v22 = vmul.f32 0.5, %v860_v37  ;;  %v846_v38 = vpop.xlane.xlu0 %845 }
 0x5ad   :  { %v852_v39 = vmul.f32 %v846_v38, %v2481_v58 }
 0x5ae   :  { %v862_v5 = vsub.f32 1.5, %v861_v22 }
 0x5af   :  { %v2222_v42 = vpop.eup %2221  ;;  %v856_v44 = vadd.f32 1e-05, %v852_v39 }
 0x5b0   :  { %v863_v45 = vmul.f32 %v2220_v32, %v862_v5  ;;  %v869_v46 = vmul.f32 %v2222_v42, %v855_v33  ;;  %vm875_vm12 = vweird.f32 %v2222_v42 }
 0x5b1   :  { %2223 = vrsqrt.f32 %v856_v44  ;;  %vm876_vm11 = vmor %vm874_vm10, %vm875_vm12  ;;  %vm884_vm12 = vweird.f32 %v856_v44 }
 0x5b2   :  { %v867_v54 = vsel %vm866_vm2, %v2220_v32, %v863_v45  ;;  %v870_v53 = vmul.f32 %v2222_v42, %v869_v46 }
 0x5b3   :  { %v898_v59 = vmul.f32 %v867_v54, %v2832_v34 }
 0x5b4   :  { %v871_v60 = vmul.f32 0.5, %v870_v53  ;;  %v849_v16 = vpop.xlane.xlu2 %848 }
 0x5b5   :  { %v853_v61 = vmul.f32 %v849_v16, %v2481_v58  ;;  %v905_v21 = vmul.f32 %v2946_v48, %v898_v59 }
 0x5b6   :  { %v872_v7 = vsub.f32 1.5, %v871_v60 }
 0x5b7   :  { %v2224_v49 = vpop.eup %2223  ;;  %v857_v8 = vadd.f32 1e-05, %v853_v61  ;;  %v2963_v34 = vadd.f32 %v2951_v57, %v905_v21 }
 0x5b8   :  { %v873_v63 = vmul.f32 %v2222_v42, %v872_v7  ;;  %v879_v13 = vmul.f32 %v2224_v49, %v856_v44  ;;  %vm885_vm2 = vweird.f32 %v2224_v49 }
 0x5b9   :  { %2225 = vrsqrt.f32 %v857_v8  ;;  %959 = vrot.lane.b32.xlu0 %v2963_v34, %s3612_s0  ;;  %vm886_vm10 = vmor %vm884_vm12, %vm885_vm2  ;;  %v931_v37 = vrot.slane %v2963_v34, 7  ;;  %v943_v22 = vrot.slane %v2963_v34, 1  ;;  %vm894_vm2 = vweird.f32 %v857_v8 }
 0x5ba   :  { %v877_v18 = vsel %vm876_vm11, %v2222_v42, %v873_v63  ;;  %v880_v0 = vmul.f32 %v2224_v49, %v879_v13  ;;  %v1375_v42 = vrot.slane %v2881_v1, 7 }
 0x5bb   :  { %v899_v19 = vmul.f32 %v877_v18, %v2838_v40  ;;  %v1397_v40 = vsel %vm705_vm4, %v2863_v56, 0.0 }
 0x5bc   :  { %v881_v26 = vmul.f32 0.5, %v880_v0  ;;  %v1403_v27 = vpop.permute.xlu1 %1402  ;;  %v1405_v45 = vpop.permute.xlu2 %1404  ;;  %v1380_v16 = vsel %vm125_vm3, %v1374_v25, %v1375_v42  ;;  %v1379_v7 = vsel %vm125_vm3, %v1375_v42, %v1376_v55 }
 0x5bd   :  { %v906_v28 = vmul.f32 %v2946_v48, %v899_v19  ;;  %v1430_v30 = vsel %vm177_vm5, %v1382_v29, %v1403_v27  ;;  %v1431_v61 = vsel %vm177_vm5, %v1380_v16, %v1405_v45  ;;  %v1384_v14 = vsel %vm664_vm1, %v1379_v7, 0.0 }
 0x5be   :  { %v882_v24 = vsub.f32 1.5, %v881_v26 }
 0x5bf   :  { %v2226_v62 = vpop.eup %2225  ;;  %v1419_v31 = vpop.permute.xlu0 %1418  ;;  %v913_v52 = vadd.f32 %v2951_v57, %v906_v28 }
 0x5c0   :  { %v883_v32 = vmul.f32 %v2224_v49, %v882_v24  ;;  %v889_v33 = vmul.f32 %v2226_v62, %v857_v8  ;;  %v1434_v35 = vsel %vm180_vm6, %v1430_v30, %v1419_v31  ;;  %vm895_vm11 = vweird.f32 %v2226_v62  ;;  %v2093_v30 = vld [vmem:[%s3610_s29 + $0x90] sm:$0xff]  ;;  %v2092_v31 = vld [vmem:[%s3610_s29 + $0x88] sm:$0xff] }
 0x5c1   :  { %2136 = vmatmul.msk.f32.vlgmr.msra.gmra.mxu2 %vm186_vm7, %v1434_v35  ;;  %1424 = vrot.lane.b32.xlu0 %v1397_v40, %s3613_s13  ;;  %v944_v38 = vrot.slane %v913_v52, 1  ;;  %v932_v39 = vrot.slane %v913_v52, 7  ;;  %vm896_vm12 = vmor %vm894_vm2, %vm895_vm11  ;;  %v2091_v40 = vld [vmem:[%s3610_s29 + $0x80] sm:$0xff] }
 0x5c2   :  { %v887_v5 = vsel %vm886_vm10, %v2224_v49, %v883_v32  ;;  %v890_v56 = vmul.f32 %v2226_v62, %v889_v33  ;;  %v2089_v32 = vld [vmem:[%s3610_s29 + $0x70] sm:$0xff]  ;;  %v2088_v33 = vld [vmem:[%s3610_s29 + $0x68] sm:$0xff]  ;;  %v2087_v35 = vld [vmem:[%s3610_s29 + $0x60] sm:$0xff] }
 0x5c3   :  { %v949_v44 = vsel %vm144_vm0, %v943_v22, %v944_v38  ;;  %v900_v46 = vmul.f32 %v887_v5, %v2853_v50  ;;  %v2998_v54 = vsel %vm125_vm3, %v931_v37, %v932_v39 }
 0x5c4   :  { %v891_v53 = vmul.f32 0.5, %v890_v56  ;;  %975 = vrot.lane.b32.xlu1 %v949_v44, %s3613_s13  ;;  %v1407_v63 = vpop.permute.xlu1 %1406  ;;  %v1423_v19 = vpop.permute.xlu2 %1422 }
 0x5c5   :  { %v907_v59 = vmul.f32 %v2946_v48, %v900_v46  ;;  %v1432_v0 = vsel %vm177_vm5, %v1384_v14, %v1407_v63 }
 0x5c6   :  { %v892_v60 = vsub.f32 1.5, %v891_v53  ;;  %v1436_v23 = vsel %vm180_vm6, %v1432_v0, %v1423_v19 }
 0x5c7   :  { %v1421_v21 = vpop.permute.xlu0 %1420  ;;  %v914_v4 = vadd.f32 %v2951_v57, %v907_v59 }
 0x5c8   :  { %v893_v50 = vmul.f32 %v2226_v62, %v892_v60  ;;  %v1435_v6 = vsel %vm180_vm6, %v1431_v61, %v1421_v21  ;;  %v2188_v60 = vld [vmem:[%s3606_s27 + $0x2] ss:$0 sm:$0xff] }
 0x5c9   :  { %963 = vrot.lane.b32.xlu0 %v914_v4, %s3612_s0  ;;  %2137 = vmatmul.msk.f32.gmra.mxu2 %vm186_vm7, %v1435_v6  ;;  %v945_v49 = vrot.slane %v914_v4, 1  ;;  %v933_v34 = vrot.slane %v914_v4, 7 }
 0x5ca   :  { %v897_v11 = vsel %vm896_vm12, %v2226_v62, %v893_v50  ;;  %v2094_v62 = vld [vmem:[%s3610_s29 + $0x98] sm:$0xff] }
 0x5cb   :  { %v901_v13 = vmul.f32 %v897_v11, %v2875_v12  ;;  %v948_v8 = vsel %vm144_vm0, %v944_v38, %v945_v49  ;;  %v936_v25 = vsel %vm125_vm3, %v932_v39, %v933_v34  ;;  %1018 = vmatpush.msra.mxu3 %v2094_v62 }
 0x5cc   :  { %961 = vrot.lane.b32.xlu1 %v913_v52, %s3612_s0  ;;  %v952_v55 = vsel %vm703_vm13, %v948_v8, 0.0  ;;  %v2090_v52 = vld [vmem:[%s3610_s29 + $0x78] sm:$0xff]  ;;  %v941_v21 = vsel %vm664_vm1, %v936_v25, 0.0 }
 0x5cd   :  { %v908_v18 = vmul.f32 %v2946_v48, %v901_v13  ;;  %977 = vrot.lane.b32.xlu2 %v952_v55, %s3613_s13  ;;  %1019 = vmatpush.msra.mxu3 %v2093_v30 }
 0x5cf   :  { %v915_v12 = vadd.f32 %v2951_v57, %v908_v18  ;;  %1020 = vmatpush.msra.mxu3 %v2092_v31 }
 0x5d1   :  { %2138 = vmatmul.msk.f32.gmra.mxu2 %vm186_vm7, %v1436_v23  ;;  %v946_v26 = vrot.slane %v915_v12, 1  ;;  %v934_v27 = vrot.slane %v915_v12, 7  ;;  %1021 = vmatpush.msra.mxu3 %v2091_v40  ;;  %v2196_v23 = vld [vmem:[%s3611_s10 + $0x1] ss:$0 sm:$0xff] }
 0x5d3   :  { %v947_v28 = vsel %vm144_vm0, %v945_v49, %v946_v26  ;;  %v950_v24 = vsel %vm144_vm0, %v946_v26, %v943_v22  ;;  %v938_v48 = vsel %vm125_vm3, %v934_v27, %v931_v37  ;;  %v935_v29 = vsel %vm125_vm3, %v933_v34, %v934_v27  ;;  %1022 = vmatpush.msra.mxu3 %v2090_v52  ;;  %v1409_v22 = vpop.permute.xlu2 %1408 }
 0x5d4   :  { %979 = vrot.lane.b32.xlu1 %v947_v28, %s3613_s13  ;;  %v954_v57 = vsel %vm705_vm4, %v950_v24, 0.0  ;;  %v1433_v38 = vsel %vm177_vm5, %v2871_v9, %v1409_v22  ;;  %v939_v56 = vsel %vm662_vm8, %v938_v48, 0.0 }
 0x5d5   :  { %965 = vrot.lane.b32.xlu2 %v915_v12, %s3612_s0  ;;  %981 = vrot.lane.b32.xlu0 %v954_v57, %s3613_s13 }
 0x5d6   :  { %1023 = vmatpush.msra.mxu3 %v2089_v32 }
 0x5d8   :  { %1024 = vmatpush.msra.mxu3 %v2088_v33 }
 0x5da   :  { %1025 = vmatpush.msra.mxu3 %v2087_v35 }
 0x627   :  { %v978_v53 = vpop.permute.xlu2 %977 }
 0x62b   :  { %v960_v37 = vpop.permute.xlu0 %959 }
 0x62c   :  { %v987_v42 = vsel %vm177_vm5, %v939_v56, %v960_v37 }
 0x62f   :  { %v966_v34 = vpop.permute.xlu2 %965 }
 0x630   :  { %v990_v8 = vsel %vm177_vm5, %v935_v29, %v966_v34 }
 0x633   :  { %v1425_v39 = vpop.permute.xlu0 %1424 }
 0x634   :  { %v1437_v5 = vsel %vm180_vm6, %v1433_v38, %v1425_v39 }
 0x635   :  { %2139 = vmatmul.msk.f32.gmra.mxu2 %vm186_vm7, %v1437_v5 }
 0x636   :  { %v976_v45 = vpop.permute.xlu1 %975 }
 0x637   :  { %v991_v44 = vsel %vm180_vm6, %v987_v42, %v976_v45 }
 0x638   :  { %2100 = vmatmul.msk.f32.vlgmr.msra.gmra.mxu3 %vm186_vm7, %v991_v44 }
 0x63b   :  { %v964_v16 = vpop.permute.xlu0 %963 }
 0x63c   :  { %v989_v50 = vsel %vm177_vm5, %v941_v21, %v964_v16 }
 0x63e   :  { %v962_v46 = vpop.permute.xlu1 %961 }
 0x63f   :  { %v988_v9 = vsel %vm177_vm5, %v2998_v54, %v962_v46 }
 0x640   :  { %v992_v59 = vsel %vm180_vm6, %v988_v9, %v978_v53 }
 0x641   :  { %2101 = vmatmul.msk.f32.gmra.mxu3 %vm186_vm7, %v992_v59 }
 0x644   :  { %v1470_v61 = vpop.f32.mrf.mxu2 }
 0x645   :  { %v1471_v4 = vadd.f32 %v2188_v60, %v1470_v61 }
 0x646   :  { %v980_v6 = vpop.permute.xlu1 %979 }
 0x647   :  { %v1482_v7 = vmax.f32 %v1471_v4, 0.0  ;;  %v993_v54 = vsel %vm180_vm6, %v989_v50, %v980_v6  ;;  %v982_v63 = vpop.permute.xlu0 %981 }
 0x648   :  { %v994_v25 = vsel %vm180_vm6, %v990_v8, %v982_v63 }
 0x649   :  { %2102 = vmatmul.msk.f32.gmra.mxu3 %vm186_vm7, %v993_v54  ;;  %v1490_v49 = vsel %vm177_vm5, %v1482_v7, 0.0 }
 0x64a   :  { %1491 = vadd.xlane.f32.xlu1 %v1490_v49 }
 0x64c   :  { %v1473_v11 = vpop.f32.mrf.mxu2 }
 0x64d   :  { %v1474_v13 = vadd.f32 %v2188_v60, %v1473_v11 }
 0x64f   :  { %v1483_v14 = vmax.f32 %v1474_v13, 0.0 }
 0x651   :  { %2103 = vmatmul.msk.f32.gmra.mxu3 %vm186_vm7, %v994_v25  ;;  %v1493_v55 = vsel %vm177_vm5, %v1483_v14, 0.0 }
 0x652   :  { %1494 = vadd.xlane.f32.xlu2 %v1493_v55 }
 0x654   :  { %v1476_v18 = vpop.f32.mrf.mxu2 }
 0x655   :  { %v1477_v0 = vadd.f32 %v2188_v60, %v1476_v18 }
 0x657   :  { %v1484_v19 = vmax.f32 %v1477_v0, 0.0 }
 0x659   :  { %v1496_v12 = vsel %vm177_vm5, %v1484_v19, 0.0 }
 0x65a   :  { %1497 = vadd.xlane.f32.xlu0 %v1496_v12 }
 0x6b8   :  { %v1479_v26 = vpop.f32.mrf.mxu2 }
 0x6b9   :  { %v1480_v27 = vadd.f32 %v2188_v60, %v1479_v26 }
 0x6bb   :  { %v1485_v28 = vmax.f32 %v1480_v27, 0.0  ;;  %v1027_v24 = vpop.f32.mrf.mxu3 }
 0x6bc   :  { %v1028_v48 = vadd.f32 %v2196_v23, %v1027_v24 }
 0x6bd   :  { %v1499_v29 = vsel %vm177_vm5, %v1485_v28, 0.0  ;;  %v1492_v30 = vpop.xlane.xlu1 %1491 }
 0x6be   :  { %v1039_v57 = vmax.f32 %v1028_v48, 0.0  ;;  %1500 = vadd.xlane.f32.xlu2 %v1499_v29  ;;  %v1502_v40 = vmul.f32 %v1492_v30, %v2481_v58 }
 0x6c0   :  { %v1047_v62 = vsel %vm177_vm5, %v1039_v57, 0.0  ;;  %v3099_v33 = vsub.f32 %v1482_v7, %v1502_v40 }
 0x6c1   :  { %1048 = vadd.xlane.f32.xlu1 %v1047_v62 }
 0x6c2   :  { %v1510_v5 = vmul.f32 %v3099_v33, %v3099_v33 }
 0x6c4   :  { %v1030_v31 = vpop.f32.mrf.mxu3  ;;  %v1514_v44 = vsel %vm177_vm5, %v1510_v5, 0.0 }
 0x6c5   :  { %v1031_v52 = vadd.f32 %v2196_v23, %v1030_v31  ;;  %v1495_v37 = vpop.xlane.xlu2 %1494 }
 0x6c6   :  { %v1503_v38 = vmul.f32 %v1495_v37, %v2481_v58 }
 0x6c7   :  { %v1040_v32 = vmax.f32 %v1031_v52, 0.0 }
 0x6c8   :  { %v3105_v42 = vsub.f32 %v1483_v14, %v1503_v38 }
 0x6c9   :  { %v1050_v35 = vsel %vm177_vm5, %v1040_v32, 0.0 }
 0x6ca   :  { %1051 = vadd.xlane.f32.xlu0 %v1050_v35  ;;  %v1511_v60 = vmul.f32 %v3105_v42, %v3105_v42 }
 0x6cc   :  { %v1033_v22 = vpop.f32.mrf.mxu3  ;;  %v1517_v4 = vsel %vm177_vm5, %v1511_v60, 0.0  ;;  %v3155_v60 = vld [vmem:[%s3608_s30 + $0x2] ss:$0 sm:$0xff] }
 0x6cd   :  { %v1034_v39 = vadd.f32 %v2196_v23, %v1033_v22  ;;  %v1498_v46 = vpop.xlane.xlu0 %1497 }
 0x6ce   :  { %v1504_v9 = vmul.f32 %v1498_v46, %v2481_v58 }
 0x6cf   :  { %v1041_v56 = vmax.f32 %v1034_v39, 0.0 }
 0x6d0   :  { %v3112_v61 = vsub.f32 %v1484_v19, %v1504_v9 }
 0x6d1   :  { %v1053_v45 = vsel %vm177_vm5, %v1041_v56, 0.0 }
 0x6d2   :  { %1054 = vadd.xlane.f32.xlu1 %v1053_v45  ;;  %1515 = vadd.xlane.f32.xlu0 %v1514_v44  ;;  %v1512_v50 = vmul.f32 %v3112_v61, %v3112_v61 }
 0x6d4   :  { %v1036_v53 = vpop.f32.mrf.mxu3  ;;  %v1520_v6 = vsel %vm177_vm5, %v1512_v50, 0.0 }
 0x6d5   :  { %v1037_v59 = vadd.f32 %v2196_v23, %v1036_v53 }
 0x6d7   :  { %v1042_v16 = vmax.f32 %v1037_v59, 0.0 }
 0x6d9   :  { %v1056_v21 = vsel %vm177_vm5, %v1042_v16, 0.0 }
 0x6da   :  { %1057 = vadd.xlane.f32.xlu2 %v1056_v21  ;;  %1518 = vadd.xlane.f32.xlu1 %v1517_v4  ;;  %v3160_v4 = vld [vmem:[%s3609_s6 + $0x2] ss:$0 sm:$0xff] }
 0x6e2   :  { %1521 = vadd.xlane.f32.xlu2 %v1520_v6 }
 0x731   :  { %v1501_v7 = vpop.xlane.xlu2 %1500 }
 0x732   :  { %v1505_v54 = vmul.f32 %v1501_v7, %v2481_v58 }
 0x734   :  { %v3120_v49 = vsub.f32 %v1485_v28, %v1505_v54  ;;  %v1049_v34 = vpop.xlane.xlu1 %1048 }
 0x735   :  { %v1059_v11 = vmul.f32 %v1049_v34, %v2481_v58 }
 0x736   :  { %v1513_v63 = vmul.f32 %v3120_v49, %v3120_v49 }
 0x737   :  { %v3125_v13 = vsub.f32 %v1039_v57, %v1059_v11 }
 0x738   :  { %v1523_v8 = vsel %vm177_vm5, %v1513_v63, 0.0 }
 0x739   :  { %1524 = vadd.xlane.f32.xlu1 %v1523_v8  ;;  %v1067_v14 = vmul.f32 %v3125_v13, %v3125_v13 }
 0x73b   :  { %v1071_v25 = vsel %vm177_vm5, %v1067_v14, 0.0 }
 0x73c   :  { %1072 = vadd.xlane.f32.xlu0 %v1071_v25 }
 0x73d   :  { %v1052_v55 = vpop.xlane.xlu0 %1051 }
 0x73e   :  { %v1060_v18 = vmul.f32 %v1052_v55, %v2481_v58 }
 0x740   :  { %v3132_v0 = vsub.f32 %v1040_v32, %v1060_v18 }
 0x742   :  { %v1068_v19 = vmul.f32 %v3132_v0, %v3132_v0 }
 0x744   :  { %v1074_v12 = vsel %vm177_vm5, %v1068_v19, 0.0 }
 0x745   :  { %v1055_v23 = vpop.xlane.xlu1 %1054  ;;  %v1516_v26 = vpop.xlane.xlu0 %1515  ;;  %1075 = vadd.xlane.f32.xlu2 %v1074_v12 }
 0x746   :  { %v1061_v27 = vmul.f32 %v1055_v23, %v2481_v58  ;;  %v1526_v28 = vmul.f32 %v1516_v26, %v2481_v58 }
 0x748   :  { %v3139_v24 = vsub.f32 %v1041_v56, %v1061_v27  ;;  %v1530_v48 = vadd.f32 1e-05, %v1526_v28 }
 0x74a   :  { %2227 = vrsqrt.f32 %v1530_v48  ;;  %v1069_v29 = vmul.f32 %v3139_v24, %v3139_v24  ;;  %vm1540_vm11 = vweird.f32 %v1530_v48 }
 0x74c   :  { %v1077_v57 = vsel %vm177_vm5, %v1069_v29, 0.0 }
 0x74d   :  { %1078 = vadd.xlane.f32.xlu0 %v1077_v57  ;;  %v1519_v62 = vpop.xlane.xlu1 %1518  ;;  %v1058_v30 = vpop.xlane.xlu2 %1057 }
 0x74e   :  { %v1527_v31 = vmul.f32 %v1519_v62, %v2481_v58  ;;  %v1062_v40 = vmul.f32 %v1058_v30, %v2481_v58 }
 0x750   :  { %v2228_v52 = vpop.eup %2227  ;;  %v1531_v32 = vadd.f32 1e-05, %v1527_v31  ;;  %v3146_v35 = vsub.f32 %v1042_v16, %v1062_v40 }
 0x751   :  { %v1535_v37 = vmul.f32 %v2228_v52, %v1530_v48  ;;  %vm1541_vm10 = vweird.f32 %v2228_v52 }
 0x752   :  { %2229 = vrsqrt.f32 %v1531_v32  ;;  %v1070_v22 = vmul.f32 %v3146_v35, %v3146_v35  ;;  %vm1542_vm2 = vmor %vm1540_vm11, %vm1541_vm10  ;;  %vm1550_vm10 = vweird.f32 %v1531_v32 }
 0x753   :  { %v1536_v38 = vmul.f32 %v2228_v52, %v1535_v37 }
 0x754   :  { %v1080_v39 = vsel %vm177_vm5, %v1070_v22, 0.0  ;;  %v2109_v22 = vld [vmem:[%s3568_s16 + $0x38] sm:$0xff] }
 0x755   :  { %v1537_v5 = vmul.f32 0.5, %v1536_v38  ;;  %1081 = vadd.xlane.f32.xlu1 %v1080_v39  ;;  %v1522_v56 = vpop.xlane.xlu2 %1521  ;;  %1183 = vmatpush.msrb.mxu0 %v2109_v22  ;;  %v2108_v38 = vld [vmem:[%s3568_s16 + $0x30] sm:$0xff]  ;;  %v2107_v39 = vld [vmem:[%s3568_s16 + $0x28] sm:$0xff] }
 0x756   :  { %v1528_v45 = vmul.f32 %v1522_v56, %v2481_v58 }
 0x757   :  { %v1538_v44 = vsub.f32 1.5, %v1537_v5  ;;  %1184 = vmatpush.msrb.mxu0 %v2108_v38 }
 0x758   :  { %v2230_v46 = vpop.eup %2229  ;;  %v1532_v53 = vadd.f32 1e-05, %v1528_v45 }
 0x759   :  { %v1539_v9 = vmul.f32 %v2228_v52, %v1538_v44  ;;  %v1545_v59 = vmul.f32 %v2230_v46, %v1531_v32  ;;  %vm1551_vm12 = vweird.f32 %v2230_v46  ;;  %1185 = vmatpush.msrb.mxu0 %v2107_v39  ;;  %v3255_v39 = vld [vmem:[%s3566_s14 + $0x1] ss:$0 sm:$0xff] }
 0x75a   :  { %2231 = vrsqrt.f32 %v1532_v53  ;;  %vm1552_vm11 = vmor %vm1550_vm10, %vm1551_vm12  ;;  %vm1560_vm14 = vweird.f32 %v1532_v53 }
 0x75b   :  { %v1543_v16 = vsel %vm1542_vm2, %v2228_v52, %v1539_v9  ;;  %v1546_v21 = vmul.f32 %v2230_v46, %v1545_v59  ;;  %1186 = vmatpush.msrb.mxu0 %v2106_v51  ;;  %v2153_v9 = vld [vmem:[%s3610_s29 + $0x118] sm:$0xff] }
 0x75c   :  { %v1574_v50 = vmul.f32 %v1543_v16, %v3099_v33 }
 0x75d   :  { %v1547_v6 = vmul.f32 0.5, %v1546_v21  ;;  %1690 = vmatpush.msra.mxu0 %v2153_v9 }
 0x75e   :  { %v1581_v7 = vmul.f32 %v3155_v60, %v1574_v50  ;;  %v2152_v50 = vld [vmem:[%s3610_s29 + $0x110] sm:$0xff] }
 0x75f   :  { %v1548_v54 = vsub.f32 1.5, %v1547_v6  ;;  %1691 = vmatpush.msra.mxu0 %v2152_v50 }
 0x760   :  { %v2232_v34 = vpop.eup %2231  ;;  %v3165_v11 = vadd.f32 %v3160_v4, %v1581_v7 }
 0x761   :  { %v1549_v63 = vmul.f32 %v2230_v46, %v1548_v54  ;;  %v1555_v8 = vmul.f32 %v2232_v34, %v1532_v53  ;;  %vm1561_vm2 = vweird.f32 %v2232_v34 }
 0x762   :  { %1635 = vrot.lane.b32.xlu2 %v3165_v11, %s3612_s0  ;;  %vm1562_vm9 = vmor %vm1560_vm14, %vm1561_vm2  ;;  %v1607_v26 = vrot.slane %v3165_v11, 7  ;;  %v1619_v27 = vrot.slane %v3165_v11, 1 }
 0x763   :  { %v1553_v14 = vsel %vm1552_vm11, %v2230_v46, %v1549_v63  ;;  %v1556_v25 = vmul.f32 %v2232_v34, %v1555_v8 }
 0x764   :  { %v1575_v33 = vmul.f32 %v1553_v14, %v3105_v42 }
 0x765   :  { %v1557_v55 = vmul.f32 0.5, %v1556_v25  ;;  %v2150_v25 = vld [vmem:[%s3610_s29 + $0x100] sm:$0xff] }
 0x766   :  { %v1582_v18 = vmul.f32 %v3155_v60, %v1575_v33 }
 0x767   :  { %v1558_v19 = vsub.f32 1.5, %v1557_v55 }
 0x768   :  { %v1589_v12 = vadd.f32 %v3160_v4, %v1582_v18  ;;  %v2149_v18 = vld [vmem:[%s3610_s29 + $0xf8] sm:$0xff] }
 0x769   :  { %v1559_v23 = vmul.f32 %v2232_v34, %v1558_v19 }
 0x76a   :  { %v1620_v28 = vrot.slane %v1589_v12, 1  ;;  %v1608_v48 = vrot.slane %v1589_v12, 7 }
 0x76b   :  { %v1563_v29 = vsel %vm1562_vm9, %v2232_v34, %v1559_v23  ;;  %v2151_v34 = vld [vmem:[%s3610_s29 + $0x108] sm:$0xff] }
 0x76c   :  { %v1625_v42 = vsel %vm144_vm0, %v1619_v27, %v1620_v28  ;;  %v1576_v57 = vmul.f32 %v1563_v29, %v3112_v61  ;;  %v3183_v62 = vsel %vm125_vm3, %v1607_v26, %v1608_v48  ;;  %1692 = vmatpush.msra.mxu0 %v2151_v34 }
 0x76d   :  { %1651 = vrot.lane.b32.xlu0 %v1625_v42, %s3613_s13  ;;  %v2147_v42 = vld [vmem:[%s3610_s29 + $0xe8] sm:$0xff] }
 0x76e   :  { %1637 = vrot.lane.b32.xlu1 %v1589_v12, %s3612_s0  ;;  %v1583_v30 = vmul.f32 %v3155_v60, %v1576_v57  ;;  %1693 = vmatpush.msra.mxu0 %v2150_v25 }
 0x770   :  { %v3189_v31 = vadd.f32 %v3160_v4, %v1583_v30  ;;  %1694 = vmatpush.msra.mxu0 %v2149_v18  ;;  %v2146_v30 = vld [vmem:[%s3610_s29 + $0xe0] sm:$0xff] }
 0x772   :  { %v1609_v40 = vrot.slane %v3189_v31, 7  ;;  %v1621_v52 = vrot.slane %v3189_v31, 1 }
 0x774   :  { %v1624_v61 = vsel %vm144_vm0, %v1620_v28, %v1621_v52  ;;  %v3201_v32 = vsel %vm125_vm3, %v1608_v48, %v1609_v40  ;;  %v2148_v28 = vld [vmem:[%s3610_s29 + $0xf0] sm:$0xff] }
 0x775   :  { %1639 = vrot.lane.b32.xlu0 %v3189_v31, %s3612_s0  ;;  %v1628_v37 = vsel %vm703_vm13, %v1624_v61, 0.0  ;;  %1695 = vmatpush.msra.mxu0 %v2148_v28  ;;  %v1617_v36 = vsel %vm664_vm1, %v3201_v32, 0.0  ;;  %v3348_v32 = vld [vmem:[%s3575_s2] sm:$0xff] }
 0x776   :  { %1653 = vrot.lane.b32.xlu2 %v1628_v37, %s3613_s13 }
 0x777   :  { %1696 = vmatpush.msra.mxu0 %v2147_v42 }
 0x779   :  { %1697 = vmatpush.msra.mxu0 %v2146_v30 }
 0x7ac   :  { %v1525_v5 = vpop.xlane.xlu1 %1524 }
 0x7ad   :  { %v1529_v56 = vmul.f32 %v1525_v5, %v2481_v58 }
 0x7af   :  { %v1533_v45 = vadd.f32 1e-05, %v1529_v56  ;;  %v1073_v44 = vpop.xlane.xlu0 %1072 }
 0x7b0   :  { %v1083_v46 = vmul.f32 %v1073_v44, %v2481_v58 }
 0x7b1   :  { %2233 = vrsqrt.f32 %v1533_v45  ;;  %vm1570_vm13 = vweird.f32 %v1533_v45 }
 0x7b2   :  { %v1087_v53 = vadd.f32 1e-05, %v1083_v46 }
 0x7b4   :  { %2235 = vrsqrt.f32 %v1087_v53  ;;  %vm1097_vm10 = vweird.f32 %v1087_v53 }
 0x7b7   :  { %v2234_v59 = vpop.eup %2233 }
 0x7b8   :  { %v1565_v16 = vmul.f32 %v2234_v59, %v1533_v45  ;;  %v1076_v21 = vpop.xlane.xlu2 %1075  ;;  %vm1571_vm14 = vweird.f32 %v2234_v59  ;;  %v3265_v45 = vld [vmem:[%s3567_s15 + $0x1] ss:$0 sm:$0xff] }
 0x7b9   :  { %v1084_v6 = vmul.f32 %v1076_v21, %v2481_v58  ;;  %vm1572_vm9 = vmor %vm1570_vm13, %vm1571_vm14  ;;  %v2143_v21 = vld [vmem:[%s3610_s29 + $0xc8] sm:$0xff] }
 0x7ba   :  { %v2236_v7 = vpop.eup %2235  ;;  %v1566_v54 = vmul.f32 %v2234_v59, %v1565_v16  ;;  %v2144_v16 = vld [vmem:[%s3610_s29 + $0xd0] sm:$0xff] }
 0x7bb   :  { %v1092_v63 = vmul.f32 %v2236_v7, %v1087_v53  ;;  %v3232_v8 = vadd.f32 1e-05, %v1084_v6  ;;  %vm1098_vm12 = vweird.f32 %v2236_v7 }
 0x7bc   :  { %v1567_v14 = vmul.f32 0.5, %v1566_v54  ;;  %vm1099_vm11 = vmor %vm1097_vm10, %vm1098_vm12  ;;  %v2142_v54 = vld [vmem:[%s3610_s29 + $0xc0] sm:$0xff] }
 0x7bd   :  { %v1093_v33 = vmul.f32 %v2236_v7, %v1092_v63  ;;  %2237 = vrsqrt.f32 %v3232_v8  ;;  %vm1107_vm14 = vweird.f32 %v3232_v8 }
 0x7be   :  { %v1568_v55 = vsub.f32 1.5, %v1567_v14 }
 0x7bf   :  { %v1094_v19 = vmul.f32 0.5, %v1093_v33 }
 0x7c0   :  { %v1569_v12 = vmul.f32 %v2234_v59, %v1568_v55  ;;  %v1079_v23 = vpop.xlane.xlu0 %1078 }
 0x7c1   :  { %v1095_v48 = vsub.f32 1.5, %v1094_v19  ;;  %v1085_v29 = vmul.f32 %v1079_v23, %v2481_v58  ;;  %v1884_v23 = vld [vmem:[%s3574_s5] sm:$0xff] }
 0x7c2   :  { %v1573_v57 = vsel %vm1572_vm9, %v2234_v59, %v1569_v12 }
 0x7c3   :  { %v2238_v61 = vpop.eup %2237  ;;  %v1577_v37 = vmul.f32 %v1573_v57, %v3120_v49  ;;  %v1096_v22 = vmul.f32 %v2236_v7, %v1095_v48  ;;  %v1089_v38 = vadd.f32 1e-05, %v1085_v29  ;;  %v2145_v49 = vld [vmem:[%s3610_s29 + $0xd8] sm:$0xff] }
 0x7c4   :  { %v1102_v51 = vmul.f32 %v2238_v61, %v3232_v8  ;;  %1698 = vmatpush.msra.mxu0 %v2145_v49  ;;  %vm1108_vm2 = vweird.f32 %v2238_v61 }
 0x7c5   :  { %v1584_v5 = vmul.f32 %v3155_v60, %v1577_v37  ;;  %v1100_v56 = vsel %vm1099_vm11, %v2236_v7, %v1096_v22  ;;  %2239 = vrsqrt.f32 %v1089_v38  ;;  %vm1109_vm13 = vmor %vm1107_vm14, %vm1108_vm2  ;;  %vm3614_vm2 = vcmask 56320  }
 0x7c6   :  { %v1131_v44 = vmul.f32 %v1100_v56, %v3125_v13  ;;  %v1103_v46 = vmul.f32 %v2238_v61, %v1102_v51  ;;  %1699 = vmatpush.msra.mxu0 %v2144_v16 }
 0x7c7   :  { %v3269_v53 = vadd.f32 %v3160_v4, %v1584_v5 }
 0x7c8   :  { %v1104_v60 = vmul.f32 0.5, %v1103_v46  ;;  %v1082_v9 = vpop.xlane.xlu1 %1081  ;;  %v1138_v59 = vmul.f32 %v3255_v39, %v1131_v44  ;;  %1700 = vmatpush.msra.mxu0 %v2143_v21 }
 0x7c9   :  { %v1086_v50 = vmul.f32 %v1082_v9, %v2481_v58  ;;  %1641 = vrot.lane.b32.xlu0 %v3269_v53, %s3612_s0  ;;  %v1622_v13 = vrot.slane %v3269_v53, 1  ;;  %v1610_v6 = vrot.slane %v3269_v53, 7  ;;  %v1636_v53 = vpop.permute.xlu2 %1635  ;;  %s3622_s0 = sld [smem:[#allocation12_spill]] }
 0x7ca   :  { %v1105_v4 = vsub.f32 1.5, %v1104_v60  ;;  %v1145_v7 = vadd.f32 %v3265_v45, %v1138_v59  ;;  %1701 = vmatpush.msra.mxu0 %v2142_v54  ;;  %v3360_v54 = vld [vmem:[%s3575_s2 + $0x8] sm:$0xff] }
 0x7cb   :  { %v2240_v34 = vpop.eup %2239  ;;  %v1090_v63 = vadd.f32 1e-05, %v1086_v50  ;;  %v1623_v14 = vsel %vm144_vm0, %v1621_v52, %v1622_v13  ;;  %v1626_v25 = vsel %vm144_vm0, %v1622_v13, %v1619_v27  ;;  %v1611_v27 = vsel %vm125_vm3, %v1609_v40, %v1610_v6 }
 0x7cc   :  { %v1106_v33 = vmul.f32 %v2238_v61, %v1105_v4  ;;  %v1112_v55 = vmul.f32 %v2240_v34, %v1089_v38  ;;  %2111 = vmatmul.msk.f32.vlgmr.msrb.gmra.mxu0 %vm177_vm5, %v1145_v7  ;;  %1655 = vrot.lane.b32.xlu2 %v1623_v14, %s3613_s13  ;;  %v1630_v18 = vsel %vm705_vm4, %v1626_v25, 0.0  ;;  %vm1118_vm0 = vweird.f32 %v2240_v34  ;;  %v3372_v25 = vld [vmem:[%s3575_s2 + $0x10] sm:$0xff] }
 0x7cd   :  { %2241 = vrsqrt.f32 %v1090_v63  ;;  %1657 = vrot.lane.b32.xlu1 %v1630_v18, %s3613_s13  ;;  %vm1117_vm4 = vweird.f32 %v1089_v38  ;;  %vm1127_vm10 = vweird.f32 %v1090_v63 }
 0x7ce   :  { %v1110_v52 = vsel %vm1109_vm13, %v2238_v61, %v1106_v33  ;;  %v1113_v19 = vmul.f32 %v2240_v34, %v1112_v55  ;;  %vm1119_vm9 = vmor %vm1117_vm4, %vm1118_vm0 }
 0x7cf   :  { %v1132_v8 = vmul.f32 %v1110_v52, %v3132_v0  ;;  %v3384_v52 = vld [vmem:[%s3575_s2 + $0x18] sm:$0xff]  ;;  %vm3615_vm0 = vmmov %vm3614_vm2 }
 0x7d0   :  { %v1114_v12 = vmul.f32 0.5, %v1113_v19  ;;  %vm3616_vm4 = vmmov %vm3615_vm0 }
 0x7d1   :  { %v1139_v17 = vmul.f32 %v3255_v39, %v1132_v8 }
 0x7d2   :  { %v1115_v28 = vsub.f32 1.5, %v1114_v12  ;;  %v2197_v12 = vld [vmem:[%s3611_s10 + $0x2] ss:$0 sm:$0xff] }
 0x7d3   :  { %v2242_v48 = vpop.eup %2241  ;;  %v1146_v29 = vadd.f32 %v3265_v45, %v1139_v17 }
 0x7d4   :  { %v1116_v42 = vmul.f32 %v2240_v34, %v1115_v28  ;;  %v1122_v31 = vmul.f32 %v2242_v48, %v1090_v63  ;;  %1891 = vperm.xlu2 %2185, %v1884_v23   ;;  %vm1128_vm12 = vweird.f32 %v2242_v48 }
 0x7d5   :  { %2112 = vmatmul.msk.f32.gmra.mxu0 %vm177_vm5, %v1146_v29  ;;  %vm1129_vm11 = vmor %vm1127_vm10, %vm1128_vm12 }
 0x7d6   :  { %v1120_v0 = vsel %vm1119_vm9, %v2240_v34, %v1116_v42  ;;  %v1123_v40 = vmul.f32 %v2242_v48, %v1122_v31  ;;  %vm3617_vm12 = vmmov %vm3615_vm0 }
 0x7d7   :  { %v1133_v57 = vmul.f32 %v1120_v0, %v3139_v24  ;;  %v1614_v24 = vsel %vm125_vm3, %v1610_v6, %v1607_v26  ;;  %vm1200_vm3 = vcmp.gt.f32.partialorder %v3348_v32, 0.5 }
 0x7d8   :  { %v1124_v30 = vmul.f32 0.5, %v1123_v40  ;;  %v1615_v44 = vsel %vm662_vm8, %v1614_v24, 0.0  ;;  %vm1203_vm8 = vcmp.gt.f32.partialorder %v3384_v52, 0.5  ;;  %v1887_v40 = vld [vmem:[%s3574_s5 + $0x18] sm:$0xff] }
 0x7d9   :  { %v1140_v61 = vmul.f32 %v3255_v39, %v1133_v57  ;;  %v1663_v60 = vsel %vm177_vm5, %v1615_v44, %v1636_v53  ;;  %v3404_v57 = vld [vmem:[%s3573_s21] ss:$0 sm:$0xff] }
 0x7da   :  { %v1125_v37 = vsub.f32 1.5, %v1124_v30 }
 0x7db   :  { %v1147_v22 = vadd.f32 %v3265_v45, %v1140_v61 }
 0x7dc   :  { %v1126_v51 = vmul.f32 %v2242_v48, %v1125_v37 }
 0x7dd   :  { %2113 = vmatmul.msk.f32.gmra.mxu0 %vm177_vm5, %v1147_v22 }
 0x7de   :  { %v1130_v38 = vsel %vm1129_vm11, %v2242_v48, %v1126_v51 }
 0x7df   :  { %v1134_v5 = vmul.f32 %v1130_v38, %v3146_v35  ;;  %v1652_v46 = vpop.permute.xlu0 %1651 }
 0x7e0   :  { %v1667_v35 = vsel %vm180_vm6, %v1663_v60, %v1652_v46  ;;  %v1885_v46 = vld [vmem:[%s3574_s5 + $0x8] sm:$0xff] }
 0x7e1   :  { %v1141_v56 = vmul.f32 %v3255_v39, %v1134_v5  ;;  %v1638_v39 = vpop.permute.xlu1 %1637 }
 0x7e2   :  { %v1664_v11 = vsel %vm177_vm5, %v3183_v62, %v1638_v39 }
 0x7e3   :  { %v1148_v49 = vadd.f32 %v3265_v45, %v1141_v56  ;;  %v1654_v45 = vpop.permute.xlu2 %1653 }
 0x7e4   :  { %v1668_v3 = vsel %vm180_vm6, %v1664_v11, %v1654_v45 }
 0x7e5   :  { %2114 = vmatmul.msk.f32.gmra.mxu0 %vm177_vm5, %v1148_v49 }
 0x7e7   :  { %v1640_v26 = vpop.permute.xlu0 %1639 }
 0x7e8   :  { %v1665_v9 = vsel %vm177_vm5, %v1617_v36, %v1640_v26 }
 0x7ed   :  { %2155 = vmatmul.msk.f32.vlgmr.msra.gmra.mxu0 %vm186_vm7, %v1667_v35  ;;  %v1886_v35 = vld [vmem:[%s3574_s5 + $0x10] sm:$0xff] }
 0x7f5   :  { %2156 = vmatmul.msk.f32.gmra.mxu0 %vm186_vm7, %v1668_v3 }
 0x826   :  { %v1656_v59 = vpop.permute.xlu2 %1655 }
 0x827   :  { %v1669_v16 = vsel %vm180_vm6, %v1665_v9, %v1656_v59 }
 0x828   :  { %2157 = vmatmul.msk.f32.gmra.mxu0 %vm186_vm7, %v1669_v16 }
 0x82e   :  { %v1892_v30 = vpop.permute.xlu2 %1891 }
 0x82f   :  { %vm1912_vm1 = vcmp.ge.f32.partialorder %v1892_v30, %v3404_v57 }
 0x830   :  { %v1916_v61 = vsel %vm1912_vm1, 1, %v2254_v10 }
 0x831   :  { %v1920_v51 = vsel %vm3614_vm2, %v1916_v61, 0 }
 0x832   :  { %v1922_v56 = vshrl.u32 %v1920_v51, 16 }
 0x834   :  { %v1924_v49 = vcvt.s32.f32 %v1922_v56  ;;  %v2164_v56 = vld [vmem:[%s3568_s16 + $0x58] sm:$0xff] }
 0x835   :  { %1859 = vmatpush.msra.mxu1 %v2164_v56 }
 0x83b   :  { %v1642_v21 = vpop.permute.xlu0 %1641 }
 0x83c   :  { %v1666_v62 = vsel %vm177_vm5, %v1611_v27, %v1642_v21 }
 0x83f   :  { %v1658_v50 = vpop.permute.xlu1 %1657 }
 0x840   :  { %v1670_v13 = vsel %vm180_vm6, %v1666_v62, %v1658_v50  ;;  %vm1201_vm6 = vcmp.gt.f32.partialorder %v3360_v54, 0.5  ;;  %v1921_v62 = vand.u32 65535, %v1920_v51 }
 0x841   :  { %2158 = vmatmul.msk.f32.gmra.mxu0 %vm186_vm7, %v1670_v13  ;;  %vm1202_vm7 = vcmp.gt.f32.partialorder %v3372_v25, 0.5 }
 0x842   :  { %v1923_v50 = vcvt.s32.f32 %v1921_v62  ;;  %v3475_v62 = vld [vmem:[%s3567_s15 + $0x2] ss:$0 sm:$0xff] }
 0x849   :  { %v1188_v4 = vpop.f32.mrf.mxu0 }
 0x84a   :  { %v1189_v6 = vadd.f32 %v2206_v2, %v1188_v4 }
 0x84c   :  { %v1204_v7 = vsel %vm1200_vm3, 0.0, %v1189_v6 }
 0x84d   :  { %1208 = vst.msk [vmem:[%s3576_s24] sm:$0xff] %vm457_vm15, %v1204_v7 }
 0x852   :  { %v1191_v34 = vpop.f32.mrf.mxu0 }
 0x853   :  { %v1192_v63 = vadd.f32 %v2206_v2, %v1191_v34 }
 0x855   :  { %v1205_v14 = vsel %vm1201_vm6, 0.0, %v1192_v63 }
 0x856   :  { %1209 = vst.msk [vmem:[%s3576_s24 + $0x8] sm:$0xff] %vm457_vm15, %v1205_v14 }
 0x85a   :  { %v1194_v33 = vpop.f32.mrf.mxu0 }
 0x85b   :  { %v1195_v55 = vadd.f32 %v2206_v2, %v1194_v33 }
 0x85d   :  { %v1206_v18 = vsel %vm1202_vm7, 0.0, %v1195_v55 }
 0x85e   :  { %1210 = vst.msk [vmem:[%s3576_s24 + $0x10] sm:$0xff] %vm457_vm15, %v1206_v18 }
 0x862   :  { %v1197_v19 = vpop.f32.mrf.mxu0 }
 0x863   :  { %v1198_v27 = vadd.f32 %v2206_v2, %v1197_v19 }
 0x865   :  { %v1207_v8 = vsel %vm1203_vm8, 0.0, %v1198_v27 }
 0x866   :  { %1211 = vst.msk [vmem:[%s3576_s24 + $0x18] sm:$0xff] %vm457_vm15, %v1207_v8 }
 0x86a   :  { %v1703_v23 = vpop.f32.mrf.mxu0 }
 0x86b   :  { %v1704_v17 = vadd.f32 %v2197_v12, %v1703_v23 }
 0x86d   :  { %v1715_v28 = vmax.f32 %v1704_v17, 0.0 }
 0x86f   :  { %v1723_v48 = vsel %vm177_vm5, %v1715_v28, 0.0 }
 0x870   :  { %1724 = vadd.xlane.f32.xlu2 %v1723_v48 }
 0x872   :  { %v1706_v29 = vpop.f32.mrf.mxu0 }
 0x873   :  { %v1707_v42 = vadd.f32 %v2197_v12, %v1706_v29 }
 0x875   :  { %v1716_v31 = vmax.f32 %v1707_v42, 0.0 }
 0x877   :  { %v1726_v0 = vsel %vm177_vm5, %v1716_v31, 0.0 }
 0x878   :  { %1727 = vadd.xlane.f32.xlu0 %v1726_v0 }
 0x888   :  { %1906 = vperm.xlu2 %2185, %v1887_v40  }
 0x8a5   :  { %v1709_v37 = vpop.f32.mrf.mxu0 }
 0x8a6   :  { %v1710_v22 = vadd.f32 %v2197_v12, %v1709_v37 }
 0x8a8   :  { %v1717_v38 = vmax.f32 %v1710_v22, 0.0 }
 0x8aa   :  { %v1729_v5 = vsel %vm177_vm5, %v1717_v38, 0.0 }
 0x8ab   :  { %1730 = vadd.xlane.f32.xlu1 %v1729_v5 }
 0x8b1   :  { %1927 = vadd.xlane.f32.xlu2 %v1924_v49  ;;  %v2161_v49 = vld [vmem:[%s3568_s16 + $0x40] sm:$0xff] }
 0x8be   :  { %v1712_v24 = vpop.f32.mrf.mxu0 }
 0x8bf   :  { %v1713_v44 = vadd.f32 %v2197_v12, %v1712_v24 }
 0x8c1   :  { %v1718_v53 = vmax.f32 %v1713_v44, 0.0 }
 0x8c3   :  { %v1732_v60 = vsel %vm177_vm5, %v1718_v53, 0.0 }
 0x8c4   :  { %1896 = vperm.xlu1 %2184, %v1885_v46   ;;  %1733 = vadd.xlane.f32.xlu0 %v1732_v60 }
 0x8d8   :  { %1901 = vperm.xlu0 %2183, %v1886_v35  }
 0x8e3   :  { %v1725_v39 = vpop.xlane.xlu2 %1724 }
 0x8e4   :  { %v1735_v11 = vmul.f32 %v1725_v39, %v2481_v58 }
 0x8e6   :  { %v3418_v45 = vsub.f32 %v1715_v28, %v1735_v11 }
 0x8e8   :  { %v1743_v3 = vmul.f32 %v3418_v45, %v3418_v45 }
 0x8ea   :  { %v1747_v26 = vsel %vm177_vm5, %v1743_v3, 0.0 }
 0x8eb   :  { %v1728_v36 = vpop.xlane.xlu0 %1727  ;;  %v1907_v34 = vpop.permute.xlu2 %1906 }
 0x8ec   :  { %v1736_v9 = vmul.f32 %v1728_v36, %v2481_v58  ;;  %vm1915_vm14 = vcmp.ge.f32.partialorder %v1907_v34, %v3404_v57  ;;  %v3469_v36 = vld [vmem:[%s3566_s14 + $0x2] ss:$0 sm:$0xff] }
 0x8ed   :  { %v1919_v19 = vsel %vm1915_vm14, 1, %v2254_v10  ;;  %vm3618_vm14 = vcmask 64512  }
 0x8ee   :  { %1748 = vadd.xlane.f32.xlu1 %v1747_v26  ;;  %v3424_v59 = vsub.f32 %v1716_v31, %v1736_v9  ;;  %v1959_v28 = vsel %vm3616_vm4, %v1919_v19, 0 }
 0x8ef   :  { %v1961_v42 = vshrl.u32 %v1959_v28, 16 }
 0x8f0   :  { %v1744_v16 = vmul.f32 %v3424_v59, %v3424_v59 }
 0x8f1   :  { %v1963_v31 = vcvt.s32.f32 %v1961_v42 }
 0x8f2   :  { %v1750_v21 = vsel %vm177_vm5, %v1744_v16, 0.0 }
 0x902   :  { %1751 = vadd.xlane.f32.xlu0 %v1750_v21 }
 0x90a   :  { %1925 = vadd.xlane.f32.xlu0 %v1923_v50 }
 0x91e   :  { %v1731_v13 = vpop.xlane.xlu1 %1730 }
 0x91f   :  { %v1737_v2 = vmul.f32 %v1731_v13, %v2481_v58 }
 0x921   :  { %v3430_v4 = vsub.f32 %v1717_v38, %v1737_v2  ;;  %v1960_v38 = vand.u32 65535, %v1959_v28 }
 0x923   :  { %v1745_v6 = vmul.f32 %v3430_v4, %v3430_v4  ;;  %v1962_v5 = vcvt.s32.f32 %v1960_v38 }
 0x924   :  { %v1928_v50 = vpop.xlane.xlu2 %1927 }
 0x925   :  { %v1753_v7 = vsel %vm177_vm5, %v1745_v6, 0.0 }
 0x926   :  { %1754 = vadd.xlane.f32.xlu1 %v1753_v7  ;;  %v1930_v7 = vcvt.f32.s32 %v1928_v50 }
 0x936   :  { %v1897_v63 = vpop.permute.xlu1 %1896 }
 0x937   :  { %vm1913_vm13 = vcmp.ge.f32.partialorder %v1897_v63, %v3404_v57  ;;  %v1734_v33 = vpop.xlane.xlu0 %1733 }
 0x938   :  { %v1917_v14 = vsel %vm1913_vm13, 1, %v2254_v10  ;;  %v1738_v18 = vmul.f32 %v1734_v33, %v2481_v58 }
 0x939   :  { %v1933_v55 = vsel %vm3615_vm0, %v1917_v14, 0  ;;  %v1931_v14 = vshll.u32 %v1930_v7, 16 }
 0x93a   :  { %v1935_v27 = vshrl.u32 %v1933_v55, 16  ;;  %v1934_v8 = vand.u32 65535, %v1933_v55  ;;  %v3441_v12 = vsub.f32 %v1718_v53, %v1738_v18  ;;  %v1984_v53 = vld [vmem:[%s3577_s20] sm:$0xff] }
 0x93b   :  { %2012 = vmatpush.msrb.mxu3 %v1984_v53 }
 0x93c   :  { %v1937_v23 = vcvt.s32.f32 %v1935_v27  ;;  %v1936_v17 = vcvt.s32.f32 %v1934_v8  ;;  %v1746_v48 = vmul.f32 %v3441_v12, %v3441_v12 }
 0x93e   :  { %1940 = vadd.xlane.f32.xlu2 %v1937_v23  ;;  %1938 = vadd.xlane.f32.xlu0 %v1936_v17  ;;  %v1756_v29 = vsel %vm177_vm5, %v1746_v48, 0.0 }
 0x93f   :  { %1757 = vadd.xlane.f32.xlu1 %v1756_v29 }
 0x946   :  { %1966 = vadd.xlane.f32.xlu0 %v1963_v31 }
 0x94a   :  { %v1902_v0 = vpop.permute.xlu0 %1901 }
 0x94b   :  { %vm1914_vm9 = vcmp.ge.f32.partialorder %v1902_v0, %v3404_v57  ;;  %v2162_v57 = vld [vmem:[%s3568_s16 + $0x48] sm:$0xff] }
 0x94c   :  { %v1918_v40 = vsel %vm1914_vm9, 1, %v2254_v10  ;;  %v2163_v10 = vld [vmem:[%s3568_s16 + $0x50] sm:$0xff] }
 0x94d   :  { %v1946_v30 = vsel %vm3617_vm12, %v1918_v40, 0  ;;  %1860 = vmatpush.msra.mxu1 %v2163_v10 }
 0x94e   :  { %v1948_v61 = vshrl.u32 %v1946_v30, 16  ;;  %v1947_v37 = vand.u32 65535, %v1946_v30 }
 0x94f   :  { %1861 = vmatpush.msra.mxu1 %v2162_v57 }
 0x950   :  { %v1950_v22 = vcvt.s32.f32 %v1948_v61  ;;  %v1949_v51 = vcvt.s32.f32 %v1947_v37 }
 0x951   :  { %1862 = vmatpush.msra.mxu1 %v2161_v49 }
 0x952   :  { %1953 = vadd.xlane.f32.xlu2 %v1950_v22  ;;  %1951 = vadd.xlane.f32.xlu1 %v1949_v51 }
 0x95a   :  { %1964 = vadd.xlane.f32.xlu2 %v1962_v5 }
 0x961   :  { %v1749_v24 = vpop.xlane.xlu1 %1748 }
 0x962   :  { %v1759_v44 = vmul.f32 %v1749_v24, %v2481_v58 }
 0x964   :  { %v1763_v46 = vadd.f32 1e-05, %v1759_v44 }
 0x966   :  { %2243 = vrsqrt.f32 %v1763_v46  ;;  %vm1773_vm11 = vweird.f32 %v1763_v46 }
 0x96c   :  { %v2244_v60 = vpop.eup %2243 }
 0x96d   :  { %v1768_v35 = vmul.f32 %v2244_v60, %v1763_v46  ;;  %vm1774_vm10 = vweird.f32 %v2244_v60 }
 0x96e   :  { %vm1775_vm1 = vmor %vm1773_vm11, %vm1774_vm10 }
 0x96f   :  { %v1769_v39 = vmul.f32 %v2244_v60, %v1768_v35 }
 0x971   :  { %v1770_v11 = vmul.f32 0.5, %v1769_v39 }
 0x973   :  { %v1771_v3 = vsub.f32 1.5, %v1770_v11 }
 0x975   :  { %v1772_v26 = vmul.f32 %v2244_v60, %v1771_v3  ;;  %v1752_v9 = vpop.xlane.xlu0 %1751 }
 0x976   :  { %v1760_v21 = vmul.f32 %v1752_v9, %v2481_v58 }
 0x977   :  { %v1776_v16 = vsel %vm1775_vm1, %v2244_v60, %v1772_v26  ;;  %vm3619_vm1 = vmmov %vm3618_vm14 }
 0x978   :  { %v1807_v13 = vmul.f32 %v1776_v16, %v3418_v45  ;;  %v1764_v2 = vadd.f32 1e-05, %v1760_v21 }
 0x97a   :  { %v1814_v6 = vmul.f32 %v3469_v36, %v1807_v13  ;;  %2245 = vrsqrt.f32 %v1764_v2  ;;  %vm1783_vm0 = vweird.f32 %v1764_v2 }
 0x97c   :  { %v1821_v34 = vadd.f32 %v3475_v62, %v1814_v6 }
 0x97d   :  { %v1926_v63 = vpop.xlane.xlu0 %1925 }
 0x97e   :  { %2166 = vmatmul.msk.f32.vlgmr.msra.gmra.mxu1 %vm177_vm5, %v1821_v34  ;;  %v1929_v33 = vcvt.f32.s32 %v1926_v63 }
 0x980   :  { %v2246_v55 = vpop.eup %2245  ;;  %v1932_v18 = vadd.s32 %v1931_v14, %v1929_v33 }
 0x981   :  { %v1778_v19 = vmul.f32 %v2246_v55, %v1764_v2  ;;  %vm1784_vm13 = vweird.f32 %v2246_v55 }
 0x982   :  { %vm1972_vm2 = vcmp.eq.s32.totalorder %v2567_v15, %v1932_v18  ;;  %vm1785_vm4 = vmor %vm1783_vm0, %vm1784_vm13 }
 0x983   :  { %v1779_v27 = vmul.f32 %v2246_v55, %v1778_v19  ;;  %v2170_v45 = vsel %vm1972_vm2, 1.0, %v2255_v20 }
 0x984   :  { %2174 = vmatmul.msk.f32.vlgmr.msrb.gmra.mxu3 %vm3618_vm14, %v2170_v45 }
 0x985   :  { %v1780_v8 = vmul.f32 0.5, %v1779_v27 }
 0x987   :  { %v1781_v23 = vsub.f32 1.5, %v1780_v8 }
 0x989   :  { %v1782_v17 = vmul.f32 %v2246_v55, %v1781_v23 }
 0x98b   :  { %v1786_v28 = vsel %vm1785_vm4, %v2246_v55, %v1782_v17  ;;  %vm3620_vm4 = vmmov %vm3619_vm1 }
 0x98c   :  { %v1808_v48 = vmul.f32 %v1786_v28, %v3424_v59 }
 0x98e   :  { %v1815_v29 = vmul.f32 %v3469_v36, %v1808_v48 }
 0x990   :  { %v1822_v42 = vadd.f32 %v3475_v62, %v1815_v29 }
 0x992   :  { %2167 = vmatmul.msk.f32.gmra.mxu1 %vm177_vm5, %v1822_v42 }
 0x999   :  { %v1755_v31 = vpop.xlane.xlu1 %1754 }
 0x99a   :  { %v1761_v0 = vmul.f32 %v1755_v31, %v2481_v58 }
 0x99c   :  { %v1765_v40 = vadd.f32 1e-05, %v1761_v0 }
 0x99e   :  { %2247 = vrsqrt.f32 %v1765_v40  ;;  %vm1793_vm12 = vweird.f32 %v1765_v40 }
 0x9a4   :  { %v2248_v30 = vpop.eup %2247 }
 0x9a5   :  { %v1788_v61 = vmul.f32 %v2248_v30, %v1765_v40  ;;  %vm1794_vm9 = vweird.f32 %v2248_v30 }
 0x9a6   :  { %vm1795_vm10 = vmor %vm1793_vm12, %vm1794_vm9 }
 0x9a7   :  { %v1789_v37 = vmul.f32 %v2248_v30, %v1788_v61  ;;  %vm3621_vm12 = vmmov %vm3619_vm1 }
 0x9a9   :  { %v1790_v22 = vmul.f32 0.5, %v1789_v37 }
 0x9ab   :  { %v1791_v51 = vsub.f32 1.5, %v1790_v22 }
 0x9ad   :  { %v1792_v38 = vmul.f32 %v2248_v30, %v1791_v51 }
 0x9af   :  { %v1796_v59 = vsel %vm1795_vm10, %v2248_v30, %v1792_v38 }
 0x9b0   :  { %v1809_v5 = vmul.f32 %v1796_v59, %v3430_v4 }
 0x9b1   :  { %v1939_v56 = vpop.xlane.xlu0 %1938  ;;  %v1941_v10 = vpop.xlane.xlu2 %1940 }
 0x9b2   :  { %v1943_v57 = vcvt.f32.s32 %v1941_v10  ;;  %v1816_v49 = vmul.f32 %v3469_v36, %v1809_v5  ;;  %v1758_v24 = vpop.xlane.xlu1 %1757  ;;  %v1942_v44 = vcvt.f32.s32 %v1939_v56 }
 0x9b3   :  { %v1762_v53 = vmul.f32 %v1758_v24, %v2481_v58 }
 0x9b4   :  { %v1944_v46 = vshll.u32 %v1943_v57, 16  ;;  %v1823_v60 = vadd.f32 %v3475_v62, %v1816_v49 }
 0x9b5   :  { %v1766_v39 = vadd.f32 1e-05, %v1762_v53 }
 0x9b6   :  { %v1945_v35 = vadd.s32 %v1944_v46, %v1942_v44  ;;  %2168 = vmatmul.msk.f32.gmra.mxu1 %vm177_vm5, %v1823_v60 }
 0x9b7   :  { %2249 = vrsqrt.f32 %v1766_v39  ;;  %vm1803_vm14 = vweird.f32 %v1766_v39 }
 0x9b8   :  { %vm1973_vm11 = vcmp.eq.s32.totalorder %v2567_v15, %v1945_v35 }
 0x9b9   :  { %v2171_v4 = vsel %vm1973_vm11, 1.0, %v2255_v20  ;;  %v1967_v2 = vpop.xlane.xlu0 %1966 }
 0x9ba   :  { %2175 = vmatmul.msk.f32.gmra.mxu3 %vm3619_vm1, %v2171_v4  ;;  %v1969_v14 = vcvt.f32.s32 %v1967_v2 }
 0x9bc   :  { %v1970_v45 = vshll.u32 %v1969_v14, 16 }
 0x9bd   :  { %v2250_v11 = vpop.eup %2249 }
 0x9be   :  { %v1798_v3 = vmul.f32 %v2250_v11, %v1766_v39  ;;  %vm1804_vm2 = vweird.f32 %v2250_v11 }
 0x9bf   :  { %vm1805_vm13 = vmor %vm1803_vm14, %vm1804_vm2 }
 0x9c0   :  { %v1799_v26 = vmul.f32 %v2250_v11, %v1798_v3 }
 0x9c2   :  { %v1800_v9 = vmul.f32 0.5, %v1799_v26 }
 0x9c4   :  { %v1801_v16 = vsub.f32 1.5, %v1800_v9 }
 0x9c5   :  { %v1952_v58 = vpop.xlane.xlu1 %1951  ;;  %v1954_v21 = vpop.xlane.xlu2 %1953 }
 0x9c6   :  { %v1802_v50 = vmul.f32 %v2250_v11, %v1801_v16  ;;  %v1956_v13 = vcvt.f32.s32 %v1954_v21  ;;  %v1955_v7 = vcvt.f32.s32 %v1952_v58 }
 0x9c8   :  { %v1806_v6 = vsel %vm1805_vm13, %v2250_v11, %v1802_v50  ;;  %v1957_v34 = vshll.u32 %v1956_v13, 16 }
 0x9c9   :  { %v1810_v63 = vmul.f32 %v1806_v6, %v3441_v12 }
 0x9ca   :  { %v1958_v33 = vadd.s32 %v1957_v34, %v1955_v7 }
 0x9cb   :  { %v1817_v55 = vmul.f32 %v3469_v36, %v1810_v63  ;;  %v2207_v36 = vld [vmem:[%s3569_s17 + $0x2] ss:$0 sm:$0xff] }
 0x9cc   :  { %vm1974_vm0 = vcmp.eq.s32.totalorder %v2567_v15, %v1958_v33 }
 0x9cd   :  { %v1965_v18 = vpop.xlane.xlu2 %1964  ;;  %v2172_v19 = vsel %vm1974_vm0, 1.0, %v2255_v20  ;;  %v1824_v27 = vadd.f32 %v3475_v62, %v1817_v55 }
 0x9ce   :  { %v1968_v8 = vcvt.f32.s32 %v1965_v18  ;;  %2176 = vmatmul.msk.f32.gmra.mxu3 %vm3620_vm4, %v2172_v19 }
 0x9cf   :  { %2169 = vmatmul.msk.f32.gmra.mxu1 %vm177_vm5, %v1824_v27 }
 0x9d0   :  { %v1971_v23 = vadd.s32 %v1970_v45, %v1968_v8 }
 0x9d2   :  { %vm1975_vm9 = vcmp.eq.s32.totalorder %v2567_v15, %v1971_v23 }
 0x9d3   :  { %v2173_v12 = vsel %vm1975_vm9, 1.0, %v2255_v20 }
 0x9d6   :  { %2177 = vmatmul.msk.f32.gmra.mxu3 %vm3621_vm12, %v2173_v12 }
 0x9fb   :  { %v1864_v17 = vpop.f32.mrf.mxu1 }
 0x9fc   :  { %v1865_v28 = vadd.f32 %v2207_v36, %v1864_v17 }
 0x9fe   :  { %v1876_v62 = vsel %vm1200_vm3, 0.0, %v1865_v28 }
 0x9ff   :  { %1880 = vst.msk [vmem:[%s3578_s25] sm:$0xff] %vm457_vm15, %v1876_v62 }
 0xa07   :  { %v2014_v48 = vpop.f32.mrf.mxu3 }
 0xa08   :  { %v2026_v15 = vadd.f32 %v2014_v48, %v2843_v41 }
 0xa0a   :  { %2030 = vst.msk [vmem:[%s3622_s0] sm:$0xff] %vm177_vm5, %v2026_v15 }
 0xa0f   :  { %v1867_v20 = vpop.f32.mrf.mxu1 }
 0xa10   :  { %v1868_v29 = vadd.f32 %v2207_v36, %v1867_v20 }
 0xa12   :  { %v1877_v42 = vsel %vm1201_vm6, 0.0, %v1868_v29 }
 0xa13   :  { %1881 = vst.msk [vmem:[%s3578_s25 + $0x8] sm:$0xff] %vm457_vm15, %v1877_v42 }
 0xa33   :  { %v1870_v32 = vpop.f32.mrf.mxu1 }
 0xa34   :  { %v1871_v31 = vadd.f32 %v2207_v36, %v1870_v32 }
 0xa36   :  { %v1878_v41 = vsel %vm1202_vm7, 0.0, %v1871_v31 }
 0xa37   :  { %1882 = vst.msk [vmem:[%s3578_s25 + $0x10] sm:$0xff] %vm457_vm15, %v1878_v41 }
 0xa3d   :  { %v2017_v0 = vpop.f32.mrf.mxu3 }
 0xa3e   :  { %v2027_v40 = vadd.f32 %v2017_v0, %v2881_v1 }
 0xa40   :  { %2031 = vst.msk [vmem:[%s3622_s0 + $0x8] sm:$0xff] %vm177_vm5, %v2027_v40 }
 0xa4c   :  { %v1873_v54 = vpop.f32.mrf.mxu1 }
 0xa4d   :  { %v1874_v30 = vadd.f32 %v2207_v36, %v1873_v54 }
 0xa4f   :  { %v1879_v61 = vsel %vm1203_vm8, 0.0, %v1874_v30 }
 0xa50   :  { %1883 = vst.msk [vmem:[%s3578_s25 + $0x18] sm:$0xff] %vm457_vm15, %v1879_v61 }
 0xa51   :  { %v2020_v25 = vpop.f32.mrf.mxu3 }
 0xa52   :  { %v2028_v37 = vadd.f32 %v2020_v25, %v2847_v43 }
 0xa54   :  { %2032 = vst.msk [vmem:[%s3622_s0 + $0x10] sm:$0xff] %vm177_vm5, %v2028_v37 }
 0xa59   :  { %v2023_v1 = vpop.f32.mrf.mxu3 }
 0xa5a   :  { %v2029_v22 = vadd.f32 %v2023_v1, %v2851_v47 }
 0xa5c   :  { %2033 = vst.msk [vmem:[%s3622_s0 + $0x18] sm:$0xff] %vm177_vm5, %v2029_v22 }

// kernel: diffsinger_forward.5
= control target key start
LH: loop header
LB: loop body
LE: loop exit
PB: predicated region body
PF: predicated region fallthrough
CT: control target
= control target key end

     0   :  { %s4982_s0 = inlined_call_operand.vmem [shape: f32[32,32], index: 0, kind: input, shape index: {}]   ;;  %s4983_s1 = inlined_call_operand.vmem [shape: f32[32,32], index: 1, kind: input, shape index: {}]   ;;  %s4984_s2 = inlined_call_operand.vmem [shape: f32[2,1,16], index: 2, kind: input, shape index: {}]   ;;  %s4985_s3 = inlined_call_operand.vmem [shape: f32[32,1], index: 3, kind: input, shape index: {}]   ;;  %s4986_s4 = inlined_call_operand.vmem [shape: f32[2,32,96], index: 4, kind: input, shape index: {}]   ;;  %s4987_s5 = inlined_call_operand.vmem [shape: f32[2,1,96], index: 5, kind: input, shape index: {}]   ;;  %s4988_s6 = inlined_call_operand.vmem [shape: f32[2,32,32], index: 6, kind: input, shape index: {}]   ;;  %s4989_s7 = inlined_call_operand.vmem [shape: f32[2,1,32], index: 7, kind: input, shape index: {}]   ;;  %s4990_s8 = inlined_call_operand.vmem [shape: f32[2,1,32], index: 8, kind: input, shape index: {}]   ;;  %s4991_s9 = inlined_call_operand.vmem [shape: f32[2,1,32], index: 9, kind: input, shape index: {}]   ;;  %s4992_s10 = inlined_call_operand.vmem [shape: f32[2,288,64], index: 10, kind: input, shape index: {}]   ;;  %s4993_s11 = inlined_call_operand.vmem [shape: f32[2,1,64], index: 11, kind: input, shape index: {}]   ;;  %s4994_s12 = inlined_call_operand.vmem [shape: f32[2,64,32], index: 12, kind: input, shape index: {}]   ;;  %s4995_s13 = inlined_call_operand.vmem [shape: f32[2,1,32], index: 13, kind: input, shape index: {}]   ;;  %s4996_s14 = inlined_call_operand.vmem [shape: f32[2,1,32], index: 14, kind: input, shape index: {}]   ;;  %s4997_s15 = inlined_call_operand.vmem [shape: f32[2,1,32], index: 15, kind: input, shape index: {}]   ;;  %s4998_s16 = inlined_call_operand.vmem [shape: f32[32,20], index: 16, kind: input, shape index: {}]   ;;  %s4999_s17 = inlined_call_operand.vmem [shape: f32[1,20], index: 17, kind: input, shape index: {}]   ;;  %s5000_s18 = inlined_call_operand.hbm [shape: f32[32,20], index: 18, kind: output, shape index: {}]  }
   0x1   :  { %5028 = sst [smem:[#allocation5_spill]] %s4982_s0 }
   0x2   :  { %5029 = sst [smem:[#allocation6_spill]] %s4983_s1 }
   0x3   :  { %5030 = sst [smem:[#allocation7_spill]] %s4984_s2 }
   0x4   :  { %v141_v0 = vld [vmem:[%s4986_s4 + $0x18] sm:$0xff]  ;;  %v140_v1 = vld [vmem:[%s4986_s4 + $0x10] sm:$0xff]  ;;  %s5031_s1 = sld [smem:[#allocation5_spill]]  ;;  %v139_v4 = vld [vmem:[%s4986_s4 + $0x8] sm:$0xff]  ;;  %vm201_vm0 = vcmask 261120  }
   0x5   :  { %226 = vmatpush.msra.mxu0 %v141_v0  ;;  %s5032_s22 = sld [smem:[#allocation6_spill]]  ;;  %3013 = vmatpush.msra.mxu1 %v141_v0  ;;  %v138_v5 = vld [vmem:[%s4986_s4] sm:$0xff] }
   0x7   :  { %227 = vmatpush.msra.mxu0 %v140_v1  ;;  %3014 = vmatpush.msra.mxu1 %v140_v1 }
   0x9   :  { %228 = vmatpush.msra.mxu0 %v139_v4  ;;  %3015 = vmatpush.msra.mxu1 %v139_v4 }
   0xa   :  { %v60_v2 = vld [vmem:[%s5031_s1] sm:$0xff]  ;;  %v61_v7 = vld [vmem:[%s5031_s1 + $0x8] sm:$0xff] }
   0xb   :  { %v64_v3 = vld [vmem:[%s5032_s22] sm:$0xff]  ;;  %229 = vmatpush.msra.mxu0 %v138_v5  ;;  %3016 = vmatpush.msra.mxu1 %v138_v5  ;;  %v65_v8 = vld [vmem:[%s5032_s22 + $0x8] sm:$0xff] }
   0xc   :  { %v3443_v6 = vadd.f32 %v64_v3, %v60_v2 }
   0xe   :  { %2861 = vmatmul.msk.f32.vlgmr.msra.gmra.mxu0 %vm201_vm0, %v3443_v6 }
   0xf   :  { %23 = vsyncpa [#allocation3], 0  ;;  %v3453_v9 = vadd.f32 %v65_v8, %v61_v7  ;;  %v3460_v10 = vld [vmem:[%s4987_s5] ss:$0 sm:$0xff]  ;;  %s3319_s19 = smov 112   ;;  %s3320_s20 = smov 80  }
  0x10   :  { %s3321_s21 = smov 48   ;;  %s3322_s2 = smov 96   ;;  %vm5005_vm1 = vcmask 130048   ;;  %v63_v24 = vld [vmem:[%s5031_s1 + $0x18] sm:$0xff]  ;;  %v3323_v26 = vmov 0   ;;  %v62_v28 = vld [vmem:[%s5031_s1 + $0x10] sm:$0xff] }
  0x11   :  { %v67_v25 = vld [vmem:[%s5032_s22 + $0x18] sm:$0xff]  ;;  %3050 = vset.pattern.permute.xlu1 %v3323_v26  ;;  %3052 = vset.pattern.permute.xlu0 %v3323_v26  ;;  %v66_v29 = vld [vmem:[%s5032_s22 + $0x10] sm:$0xff]  ;;  %s5033_s24 = sld [smem:[#allocation7_spill]]  ;;  %s3324_s27 = smov 64  }
  0x12   :  { %v3497_v27 = vadd.f32 %v67_v25, %v63_v24  ;;  %3051 = vset.pattern.permute.xlu2 %v3323_v26  ;;  %v3508_v30 = vadd.f32 %v66_v29, %v62_v28  ;;  %v146_v1 = vld [vmem:[%s4988_s6 + $0x18] sm:$0xff]  ;;  %v145_v5 = vld [vmem:[%s4988_s6 + $0x10] sm:$0xff]  ;;  %s3326_s23 = smov 32   ;;  %s3327_s1 = smov [#allocation2]  }
  0x13   :  { %s2846_s22 = sshll.u32 %s3327_s1, 4  ;;  %s2847_s22 = int_to_ptr.vmem [resolvable:$true] %s2846_s22 }
  0x14   :  { %2864 = vmatmul.msk.f32.vlgmr.msra.gmra.mxu1 %vm201_vm0, %v3497_v27 }
  0x16   :  { %2862 = vmatmul.msk.f32.gmra.mxu0 %vm201_vm0, %v3453_v9 }
  0x17   :  { %v133_v31 = vld [vmem:[%s5033_s24] sm:$0x1]  ;;  %v2860_v25 = vld [vmem:[%s5033_s24 + $0x1] sm:$0x1] }
  0x18   :  { %vm134_vm2 = vcmp.gt.f32.partialorder %v133_v31, 0.5  ;;  %vm137_vm4 = vcmp.gt.f32.partialorder %v2860_v25, 0.5 }
  0x19   :  { %v283_v32 = vsel %vm134_vm2, 1, %v3323_v26 }
  0x1a   :  { %v284_v33 = vperm.slane %v283_v32, 0 }
  0x1c   :  { %vm3516_vm3 = vcmp.eq.s32.totalorder %v284_v33, 1 }
  0x1e   :  { %2863 = vmatmul.msk.f32.gmra.mxu0 %vm201_vm0, %v3508_v30 }
  0x8b   :  { %v231_v11 = vpop.f32.mrf.mxu0 }
  0x8c   :  { %v3463_v12 = vadd.f32 %v3460_v10, %v231_v11 }
  0x8e   :  { %345 = vrot.lane.b32.xlu1 %v3463_v12, %s3319_s19 }
  0x91   :  { %v240_v43 = vpop.f32.mrf.mxu1 }
  0x92   :  { %v3527_v44 = vadd.f32 %v3460_v10, %v240_v43 }
  0x93   :  { %v234_v13 = vpop.f32.mrf.mxu0 }
  0x94   :  { %v3468_v14 = vadd.f32 %v3460_v10, %v234_v13 }
  0x96   :  { %351 = vrot.lane.b32.xlu0 %v3468_v14, %s3320_s20  ;;  %347 = vrot.lane.b32.xlu1 %v3468_v14, %s3319_s19  ;;  %v3476_v15 = vpack.i.bf16 %v3463_v12, %v3468_v14 }
  0x9b   :  { %v237_v45 = vpop.f32.mrf.mxu0 }
  0x9c   :  { %v3532_v46 = vadd.f32 %v3460_v10, %v237_v45 }
  0x9e   :  { %3031 = vrot.lane.b32.xlu1 %v3476_v15, %s3321_s21  ;;  %349 = vrot.lane.b32.xlu0 %v3463_v12, %s3320_s20 }
  0xa6   :  { %247 = vrot.lane.b32.xlu1 %v3468_v14, %s3322_s2 }
  0xae   :  { %610 = vrot.lane.b32.xlu1 %v3527_v44, %s3320_s20 }
  0xb6   :  { %608 = vrot.lane.b32.xlu1 %v3532_v46, %s3320_s20 }
  0xbe   :  { %507 = vrot.lane.b32.xlu1 %v3527_v44, %s3322_s2 }
  0xc6   :  { %505 = vrot.lane.b32.xlu1 %v3532_v46, %s3322_s2 }
 0x100   :  { %v346_v16 = vpop.permute.xlu1 %345 }
 0x108   :  { %v352_v17 = vpop.permute.xlu0 %351  ;;  %v348_v18 = vpop.permute.xlu1 %347 }
 0x109   :  { %2871 = vmatpush.xpose.msk.msra.mxu3 %vm5005_vm1, %v352_v17 }
 0x110   :  { %v3032_v19 = vpop.permute.xlu1 %3031  ;;  %v350_v20 = vpop.permute.xlu0 %349 }
 0x111   :  { %2872 = vmatpush.xpose.msk.msra.mxu3 %vm5005_vm1, %v350_v20  ;;  %v3033_v21 = vunpack.i.l.bf16 %v3032_v19  ;;  %v3034_v22 = vunpack.i.h.bf16 %v3032_v19 }
 0x113   :  { %436 = vmatpush.msra.mxu2 %v3033_v21 }
 0x114   :  { %2873 = vmatmul.msk.f32.vlgmr.msra.gmra.mxu3 %vm5005_vm1, %v346_v16 }
 0x115   :  { %3017 = vmatpush.msrb.mxu3 %v3033_v21  ;;  %437 = vmatpush.msra.mxu2 %v3034_v22 }
 0x117   :  { %3018 = vmatpush.msrb.mxu3 %v3034_v22 }
 0x118   :  { %v248_v23 = vpop.permute.xlu1 %247 }
 0x119   :  { %2865 = vmatpush.xpose.msk.msrb.mxu1 %vm5005_vm1, %v248_v23 }
 0x11c   :  { %2874 = vmatmul.msk.f32.gmra.mxu3 %vm5005_vm1, %v348_v18 }
 0x120   :  { %v611_v57 = vpop.permute.xlu1 %610 }
 0x128   :  { %v609_v58 = vpop.permute.xlu1 %608 }
 0x130   :  { %v508_v59 = vpop.permute.xlu1 %507 }
 0x131   :  { %2881 = vmatpush.xpose.msk.msrb.mxu2 %vm5005_vm1, %v508_v59 }
 0x138   :  { %v506_v60 = vpop.permute.xlu1 %505 }
 0x139   :  { %2882 = vmatpush.xpose.msk.msrb.mxu2 %vm5005_vm1, %v506_v60 }
 0x197   :  { %v378_v34 = vpop.f32.mrf.mxu3 }
 0x198   :  { %v384_v36 = vmul.f32 0.25, %v378_v34 }
 0x19a   :  { %v386_v37 = vsel %vm3516_vm3, -1e+09, %v384_v36 }
 0x19b   :  { %v388_v38 = vsel %vm5005_vm1, %v386_v37, -inf }
 0x19c   :  { %389 = vmax.xlane.f32.xlu2 %v388_v38 }
 0x19f   :  { %v381_v39 = vpop.f32.mrf.mxu3 }
 0x1a0   :  { %v385_v40 = vmul.f32 0.25, %v381_v39 }
 0x1a2   :  { %v387_v41 = vsel %vm3516_vm3, -1e+09, %v385_v40 }
 0x1a3   :  { %v391_v42 = vsel %vm5005_vm1, %v387_v41, -inf }
 0x1a4   :  { %392 = vmax.xlane.f32.xlu2 %v391_v42 }
 0x20f   :  { %v390_v47 = vpop.xlane.xlu2 %389 }
 0x210   :  { %v394_v48 = vsub.f32 %v386_v37, %v390_v47 }
 0x212   :  { %v396_v49 = vmul.f32 1.442695, %v394_v48 }
 0x214   :  { %3195 = vpow2.f32 %v396_v49 }
 0x217   :  { %v393_v50 = vpop.xlane.xlu2 %392 }
 0x218   :  { %v395_v51 = vsub.f32 %v387_v41, %v393_v50 }
 0x21a   :  { %v3196_v52 = vpop.eup %3195  ;;  %v398_v53 = vmul.f32 1.442695, %v395_v51 }
 0x21b   :  { %v400_v54 = vsel %vm5005_vm1, %v3196_v52, 0.0 }
 0x21c   :  { %3197 = vpow2.f32 %v398_v53  ;;  %401 = vadd.xlane.f32.xlu0 %v400_v54 }
 0x222   :  { %v3198_v55 = vpop.eup %3197 }
 0x223   :  { %v403_v56 = vsel %vm5005_vm1, %v3198_v55, 0.0 }
 0x224   :  { %404 = vadd.xlane.f32.xlu2 %v403_v56 }
 0x23c   :  { %245 = vrot.lane.b32.xlu2 %v3463_v12, %s3322_s2 }
 0x244   :  { %604 = vrot.lane.b32.xlu2 %v3532_v46, %s3319_s19 }
 0x24c   :  { %606 = vrot.lane.b32.xlu2 %v3527_v44, %s3319_s19 }
 0x28f   :  { %v402_v61 = vpop.xlane.xlu0 %401 }
 0x290   :  { %3199 = vrcp.f32 %v402_v61  ;;  %v3040_v61 = vpack.i.bf16 %v3532_v46, %v3527_v44 }
 0x296   :  { %v3200_v62 = vpop.eup %3199 }
 0x297   :  { %v405_v63 = vpop.xlane.xlu2 %404  ;;  %v408_v0 = vmul.f32 %v3200_v62, %v3196_v52 }
 0x298   :  { %3201 = vrcp.f32 %v405_v63 }
 0x299   :  { %2875 = vmatmul.msk.f32.vlgmr.msra.gmra.mxu2 %vm5005_vm1, %v408_v0 }
 0x29a   :  { %724 = vmatpush.msra.mxu2 %v146_v1 }
 0x29c   :  { %725 = vmatpush.msra.mxu2 %v145_v5 }
 0x29e   :  { %v3202_v2 = vpop.eup %3201 }
 0x29f   :  { %v246_v3 = vpop.permute.xlu2 %245  ;;  %v409_v4 = vmul.f32 %v3202_v2, %v3198_v55  ;;  %v3613_v2 = vld [vmem:[%s4988_s6 + $0x8] sm:$0xff] }
 0x2a0   :  { %2866 = vmatpush.xpose.msk.msrb.mxu1 %vm5005_vm1, %v246_v3  ;;  %494 = vmatpush.msra.mxu3 %v3613_v2 }
 0x2a1   :  { %2876 = vmatmul.msk.f32.vlgmr.msrb.gmra.mxu3 %vm5005_vm1, %v409_v4  ;;  %2883 = vmatmul.msk.f32.vlgmr.msrb.gmra.mxu2 %vm5005_vm1, %v3532_v46 }
 0x2a3   :  { %2867 = vmatmul.msk.f32.vlgmr.msrb.gmra.mxu1 %vm5005_vm1, %v3463_v12 }
 0x2a4   :  { %465 = vmatpush.msra.mxu1 %v146_v1 }
 0x2a6   :  { %466 = vmatpush.msra.mxu1 %v145_v5 }
 0x2a7   :  { %v605_v17 = vpop.permute.xlu2 %604 }
 0x2a8   :  { %2887 = vmatpush.xpose.msk.msrb.mxu1 %vm5005_vm1, %v611_v57 }
 0x2a9   :  { %2884 = vmatmul.msk.f32.gmra.mxu2 %vm5005_vm1, %v3527_v44 }
 0x2ab   :  { %2868 = vmatmul.msk.f32.gmra.mxu1 %vm5005_vm1, %v3468_v14 }
 0x2ac   :  { %2888 = vmatpush.xpose.msk.msrb.mxu1 %vm5005_vm1, %v609_v58 }
 0x2af   :  { %v607_v20 = vpop.permute.xlu2 %606 }
 0x31c   :  { %v439_v7 = vpop.f32.mrf.mxu2 }
 0x31d   :  { %2877 = vmatmul.msk.f32.vlgmr.msra.gmra.mxu1 %vm5005_vm1, %v439_v7 }
 0x320   :  { %v275_v8 = vpop.f32.mrf.mxu1 }
 0x321   :  { %v281_v10 = vmul.f32 0.25, %v275_v8 }
 0x323   :  { %v286_v11 = vsel %vm3516_vm3, -1e+09, %v281_v10 }
 0x324   :  { %v442_v12 = vpop.f32.mrf.mxu3  ;;  %v288_v13 = vsel %vm5005_vm1, %v286_v11, -inf  ;;  %v534_v37 = vpop.f32.mrf.mxu2 }
 0x325   :  { %2878 = vmatmul.msk.f32.gmra.mxu1 %vm5005_vm1, %v442_v12  ;;  %289 = vmax.xlane.f32.xlu0 %v288_v13  ;;  %v540_v50 = vmul.f32 0.25, %v534_v37  ;;  %v143_v12 = vld [vmem:[%s4988_s6] sm:$0xff] }
 0x326   :  { %495 = vmatpush.msra.mxu3 %v143_v12 }
 0x328   :  { %v278_v14 = vpop.f32.mrf.mxu1 }
 0x329   :  { %v282_v16 = vmul.f32 0.25, %v278_v14 }
 0x32b   :  { %v287_v18 = vsel %vm3516_vm3, -1e+09, %v282_v16 }
 0x32c   :  { %v291_v19 = vsel %vm5005_vm1, %v287_v18, -inf  ;;  %v537_v54 = vpop.f32.mrf.mxu2 }
 0x32d   :  { %292 = vmax.xlane.f32.xlu1 %v291_v19  ;;  %2889 = vmatmul.msk.f32.vlgmr.msrb.gmra.mxu1 %vm5005_vm1, %v605_v17  ;;  %v541_v58 = vmul.f32 0.25, %v537_v54 }
 0x335   :  { %2890 = vmatmul.msk.f32.gmra.mxu1 %vm5005_vm1, %v607_v20 }
 0x339   :  { %3036 = vrot.lane.b32.xlu0 %v3476_v15, %s3324_s27  ;;  %v542_v15 = vsel %vm137_vm4, 1, %v3323_v26 }
 0x33a   :  { %v543_v36 = vperm.slane %v542_v15, 0 }
 0x33c   :  { %vm3591_vm5 = vcmp.eq.s32.totalorder %v543_v36, 1 }
 0x33d   :  { %v545_v53 = vsel %vm3591_vm5, -1e+09, %v540_v50  ;;  %v546_v59 = vsel %vm3591_vm5, -1e+09, %v541_v58 }
 0x33e   :  { %v547_v56 = vsel %vm5005_vm1, %v545_v53, -inf  ;;  %v550_v60 = vsel %vm5005_vm1, %v546_v59, -inf }
 0x398   :  { %v290_v21 = vpop.xlane.xlu0 %289 }
 0x399   :  { %v294_v22 = vsub.f32 %v286_v11, %v290_v21 }
 0x39a   :  { %v3581_v23 = vpop.f32.mrf.mxu1 }
 0x39b   :  { %v296_v24 = vmul.f32 1.442695, %v294_v22 }
 0x39d   :  { %3203 = vpow2.f32 %v296_v24 }
 0x3a0   :  { %v293_v28 = vpop.xlane.xlu1 %292 }
 0x3a1   :  { %v295_v29 = vsub.f32 %v287_v18, %v293_v28 }
 0x3a2   :  { %v3586_v31 = vpop.f32.mrf.mxu1 }
 0x3a3   :  { %v3204_v32 = vpop.eup %3203  ;;  %v298_v33 = vmul.f32 1.442695, %v295_v29 }
 0x3a4   :  { %v300_v34 = vsel %vm5005_vm1, %v3204_v32, 0.0 }
 0x3a5   :  { %3205 = vpow2.f32 %v298_v33  ;;  %301 = vadd.xlane.f32.xlu2 %v300_v34 }
 0x3aa   :  { %v637_v38 = vpop.f32.mrf.mxu1 }
 0x3ab   :  { %v3206_v39 = vpop.eup %3205  ;;  %v643_v40 = vmul.f32 0.25, %v637_v38  ;;  %v3037_v41 = vpop.permute.xlu0 %3036 }
 0x3ac   :  { %v303_v42 = vsel %vm5005_vm1, %v3206_v39, 0.0  ;;  %v3038_v43 = vunpack.i.l.bf16 %v3037_v41  ;;  %v3039_v49 = vunpack.i.h.bf16 %v3037_v41 }
 0x3ad   :  { %304 = vadd.xlane.f32.xlu0 %v303_v42  ;;  %v645_v47 = vsel %vm3591_vm5, -1e+09, %v643_v40 }
 0x3ae   :  { %336 = vmatpush.msrb.mxu0 %v3038_v43  ;;  %v647_v48 = vsel %vm5005_vm1, %v645_v47, -inf }
 0x3af   :  { %648 = vmax.xlane.f32.xlu2 %v647_v48 }
 0x3b0   :  { %337 = vmatpush.msrb.mxu0 %v3039_v49 }
 0x3b2   :  { %v640_v51 = vpop.f32.mrf.mxu1 }
 0x3b3   :  { %v644_v52 = vmul.f32 0.25, %v640_v51 }
 0x3b5   :  { %v646_v55 = vsel %vm3591_vm5, -1e+09, %v644_v52 }
 0x3b6   :  { %v650_v57 = vsel %vm5005_vm1, %v646_v55, -inf }
 0x3b7   :  { %548 = vmax.xlane.f32.xlu2 %v547_v56  ;;  %651 = vmax.xlane.f32.xlu1 %v650_v57 }
 0x3bf   :  { %551 = vmax.xlane.f32.xlu1 %v550_v60 }
 0x3d8   :  { %3041 = vrot.lane.b32.xlu1 %v3040_v61, %s3321_s21 }
 0x418   :  { %v302_v62 = vpop.xlane.xlu2 %301 }
 0x419   :  { %3207 = vrcp.f32 %v302_v62 }
 0x41f   :  { %v3208_v63 = vpop.eup %3207 }
 0x420   :  { %v305_v0 = vpop.xlane.xlu0 %304  ;;  %v308_v1 = vmul.f32 %v3208_v63, %v3204_v32 }
 0x421   :  { %3209 = vrcp.f32 %v305_v0 }
 0x422   :  { %2869 = vmatmul.msk.f32.vlgmr.msrb.gmra.mxu0 %vm5005_vm1, %v308_v1  ;;  %v649_v3 = vpop.xlane.xlu2 %648 }
 0x423   :  { %v653_v4 = vsub.f32 %v645_v47, %v649_v3 }
 0x425   :  { %v655_v44 = vmul.f32 1.442695, %v653_v4  ;;  %v3325_v4 = vmov 32.0  }
 0x427   :  { %v3210_v46 = vpop.eup %3209  ;;  %3211 = vpow2.f32 %v655_v44 }
 0x428   :  { %v309_v5 = vmul.f32 %v3210_v46, %v3206_v39 }
 0x42a   :  { %v652_v7 = vpop.xlane.xlu1 %651  ;;  %2870 = vmatmul.msk.f32.gmra.mxu0 %vm5005_vm1, %v309_v5  ;;  %v549_v8 = vpop.xlane.xlu2 %548 }
 0x42b   :  { %v654_v10 = vsub.f32 %v646_v55, %v652_v7  ;;  %v553_v11 = vsub.f32 %v545_v53, %v549_v8  ;;  %v3179_v55 = vld [vmem:[%s4989_s7] ss:$0 sm:$0xff] }
 0x42c   :  { %v72_v8 = vld [vmem:[%s4985_s3] sm:$0xff] }
 0x42d   :  { %v3212_v13 = vpop.eup %3211  ;;  %v657_v14 = vmul.f32 1.442695, %v654_v10  ;;  %v555_v16 = vmul.f32 1.442695, %v553_v11  ;;  %vm76_vm6 = vcmp.gt.f32.partialorder %v72_v8, 0.5 }
 0x42e   :  { %v659_v17 = vsel %vm5005_vm1, %v3212_v13, 0.0  ;;  %v882_v11 = vsel %vm76_vm6, 1, %v3323_v26 }
 0x42f   :  { %3213 = vpow2.f32 %v657_v14  ;;  %660 = vadd.xlane.f32.xlu2 %v659_v17 }
 0x430   :  { %3215 = vpow2.f32 %v555_v16 }
 0x432   :  { %v552_v18 = vpop.xlane.xlu1 %551 }
 0x433   :  { %v554_v19 = vsub.f32 %v546_v59, %v552_v18 }
 0x435   :  { %v3214_v20 = vpop.eup %3213  ;;  %v557_v21 = vmul.f32 1.442695, %v554_v19 }
 0x436   :  { %v3216_v22 = vpop.eup %3215  ;;  %v662_v24 = vsel %vm5005_vm1, %v3214_v20, 0.0 }
 0x437   :  { %3217 = vpow2.f32 %v557_v21  ;;  %663 = vadd.xlane.f32.xlu0 %v662_v24  ;;  %v559_v25 = vsel %vm5005_vm1, %v3216_v22, 0.0 }
 0x438   :  { %560 = vadd.xlane.f32.xlu2 %v559_v25 }
 0x43d   :  { %v3218_v28 = vpop.eup %3217 }
 0x43e   :  { %v562_v29 = vsel %vm5005_vm1, %v3218_v28, 0.0 }
 0x440   :  { %563 = vadd.xlane.f32.xlu2 %v562_v29 }
 0x44a   :  { %v3042_v32 = vpop.permute.xlu1 %3041 }
 0x44b   :  { %v3043_v33 = vunpack.i.l.bf16 %v3042_v32  ;;  %3046 = vrot.lane.b32.xlu0 %v3040_v61, %s3324_s27  ;;  %v3044_v34 = vunpack.i.h.bf16 %v3042_v32 }
 0x44d   :  { %695 = vmatpush.msrb.mxu3 %v3043_v33 }
 0x44f   :  { %696 = vmatpush.msrb.mxu3 %v3044_v34 }
 0x49f   :  { %v339_v15 = vpop.f32.mrf.mxu0 }
 0x4a0   :  { %2879 = vmatmul.msk.f32.vlgmr.msra.gmra.mxu3 %vm5005_vm1, %v339_v15 }
 0x4a2   :  { %v661_v36 = vpop.xlane.xlu2 %660 }
 0x4a3   :  { %3219 = vrcp.f32 %v661_v36 }
 0x4a7   :  { %v342_v37 = vpop.f32.mrf.mxu0 }
 0x4a8   :  { %2880 = vmatmul.msk.f32.gmra.mxu3 %vm5005_vm1, %v342_v37 }
 0x4a9   :  { %v3220_v39 = vpop.eup %3219 }
 0x4aa   :  { %v664_v38 = vpop.xlane.xlu0 %663  ;;  %v667_v40 = vmul.f32 %v3220_v39, %v3212_v13  ;;  %v74_v39 = vld [vmem:[%s4985_s3 + $0x10] sm:$0xff] }
 0x4ab   :  { %3221 = vrcp.f32 %v664_v38  ;;  %v561_v42 = vpop.xlane.xlu2 %560  ;;  %vm78_vm8 = vcmp.gt.f32.partialorder %v74_v39, 0.5 }
 0x4ac   :  { %3223 = vrcp.f32 %v561_v42 }
 0x4b0   :  { %2891 = vmatmul.msk.f32.vlgmr.msrb.gmra.mxu3 %vm5005_vm1, %v667_v40 }
 0x4b1   :  { %v3222_v41 = vpop.eup %3221 }
 0x4b2   :  { %v668_v43 = vmul.f32 %v3222_v41, %v3214_v20  ;;  %v3224_v49 = vpop.eup %3223  ;;  %v884_v41 = vsel %vm78_vm8, 1, %v3323_v26 }
 0x4b3   :  { %v564_v47 = vpop.xlane.xlu2 %563  ;;  %v567_v52 = vmul.f32 %v3224_v49, %v3216_v22  ;;  %v75_v49 = vld [vmem:[%s4985_s3 + $0x18] sm:$0xff] }
 0x4b4   :  { %3225 = vrcp.f32 %v564_v47  ;;  %vm79_vm9 = vcmp.gt.f32.partialorder %v75_v49, 0.5 }
 0x4b5   :  { %3227 = vrcp.f32 %v3325_v4 }
 0x4b8   :  { %2892 = vmatmul.msk.f32.gmra.mxu3 %vm5005_vm1, %v668_v43 }
 0x4ba   :  { %v3226_v53 = vpop.eup %3225 }
 0x4bb   :  { %v568_v54 = vmul.f32 %v3226_v53, %v3218_v28 }
 0x4bd   :  { %v3047_v48 = vpop.permute.xlu0 %3046 }
 0x4be   :  { %v3048_v50 = vunpack.i.l.bf16 %v3047_v48  ;;  %v3049_v51 = vunpack.i.h.bf16 %v3047_v48 }
 0x4c0   :  { %595 = vmatpush.msra.mxu0 %v3048_v50 }
 0x4c2   :  { %596 = vmatpush.msra.mxu0 %v3049_v51  ;;  %v885_v51 = vsel %vm79_vm9, 1, %v3323_v26 }
 0x4c3   :  { %2885 = vmatmul.msk.f32.vlgmr.msra.gmra.mxu0 %vm5005_vm1, %v567_v52 }
 0x4c4   :  { %753 = vmatpush.msrb.mxu0 %v3613_v2 }
 0x4c6   :  { %754 = vmatpush.msrb.mxu0 %v143_v12 }
 0x4cb   :  { %2886 = vmatmul.msk.f32.gmra.mxu0 %vm5005_vm1, %v568_v54  ;;  %v73_v54 = vld [vmem:[%s4985_s3 + $0x8] sm:$0xff] }
 0x4cc   :  { %vm77_vm10 = vcmp.gt.f32.partialorder %v73_v54, 0.5 }
 0x523   :  { %v497_v56 = vpop.f32.mrf.mxu3 }
 0x524   :  { %v498_v57 = vadd.f32 %v497_v56, %v3581_v23 }
 0x526   :  { %v765_v58 = vadd.f32 %v3179_v55, %v498_v57 }
 0x528   :  { %v769_v59 = vadd.f32 %v765_v58, %v3443_v6 }
 0x52a   :  { %v773_v60 = vsel %vm201_vm0, %v769_v59, 0.0 }
 0x52b   :  { %v500_v61 = vpop.f32.mrf.mxu3  ;;  %774 = vadd.xlane.f32.xlu2 %v773_v60 }
 0x52c   :  { %v501_v62 = vadd.f32 %v500_v61, %v3586_v31  ;;  %v3228_v31 = vpop.eup %3227 }
 0x52d   :  { %v786_v44 = vmul.f32 32.0, %v3228_v31  ;;  %vm790_vm7 = vweird.f32 %v3228_v31 }
 0x52e   :  { %v766_v63 = vadd.f32 %v3179_v55, %v501_v62 }
 0x530   :  { %v770_v0 = vadd.f32 %v766_v63, %v3453_v9  ;;  %v787_v9 = vsub.f32 1.0, %v786_v44 }
 0x532   :  { %v776_v1 = vsel %vm201_vm0, %v770_v0, 0.0  ;;  %v788_v5 = vmul.f32 %v3228_v31, %v787_v9 }
 0x533   :  { %777 = vadd.xlane.f32.xlu1 %v776_v1  ;;  %v698_v2 = vpop.f32.mrf.mxu3  ;;  %v185_v1 = vld [vmem:[%s4992_s10 + $0x118] sm:$0xff] }
 0x534   :  { %2893 = vmatmul.msk.f32.vlgmr.msra.gmra.mxu2 %vm5005_vm1, %v698_v2  ;;  %v789_v13 = vadd.f32 %v3228_v31, %v788_v5 }
 0x535   :  { %1400 = vmatpush.msrb.mxu2 %v185_v1 }
 0x536   :  { %v3652_v18 = vsel %vm790_vm7, %v3228_v31, %v789_v13  ;;  %v182_v31 = vld [vmem:[%s4992_s10 + $0x100] sm:$0xff] }
 0x53b   :  { %v701_v3 = vpop.f32.mrf.mxu3 }
 0x53c   :  { %2894 = vmatmul.msk.f32.gmra.mxu2 %vm5005_vm1, %v701_v3  ;;  %v184_v3 = vld [vmem:[%s4992_s10 + $0x110] sm:$0xff] }
 0x53d   :  { %1401 = vmatpush.msrb.mxu2 %v184_v3 }
 0x540   :  { %v598_v23 = vpop.f32.mrf.mxu0 }
 0x541   :  { %2895 = vmatmul.msk.f32.vlgmr.msrb.gmra.mxu0 %vm5005_vm1, %v598_v23  ;;  %v183_v23 = vld [vmem:[%s4992_s10 + $0x108] sm:$0xff] }
 0x542   :  { %1402 = vmatpush.msrb.mxu2 %v183_v23 }
 0x544   :  { %1403 = vmatpush.msrb.mxu2 %v182_v31 }
 0x548   :  { %v601_v6 = vpop.f32.mrf.mxu0 }
 0x549   :  { %2896 = vmatmul.msk.f32.gmra.mxu0 %vm5005_vm1, %v601_v6 }
 0x54c   :  { %887 = vperm.xlu1 %3050, %v882_v11  }
 0x554   :  { %893 = vperm.xlu1 %3050, %v884_v41  }
 0x59e   :  { %v775_v16 = vpop.xlane.xlu2 %774 }
 0x59f   :  { %v792_v22 = vmul.f32 %v3652_v18, %v775_v16 }
 0x5a1   :  { %v3656_v28 = vsub.f32 %v769_v59, %v792_v22 }
 0x5a3   :  { %v800_v33 = vmul.f32 %v3656_v28, %v3656_v28 }
 0x5a5   :  { %v804_v15 = vsel %vm201_vm0, %v800_v33, 0.0 }
 0x5a6   :  { %v778_v32 = vpop.xlane.xlu1 %777 }
 0x5b7   :  { %v727_v46 = vpop.f32.mrf.mxu2 }
 0x5be   :  { %v756_v7 = vpop.f32.mrf.mxu0 }
 0x5bf   :  { %v757_v10 = vadd.f32 %v756_v7, %v727_v46  ;;  %v730_v19 = vpop.f32.mrf.mxu2 }
 0x5c1   :  { %v767_v12 = vadd.f32 %v3179_v55, %v757_v10 }
 0x5c3   :  { %v771_v14 = vadd.f32 %v767_v12, %v3508_v30  ;;  %v793_v30 = vmul.f32 %v3652_v18, %v778_v32 }
 0x5c5   :  { %v779_v17 = vsel %vm201_vm0, %v771_v14, 0.0  ;;  %v3662_v34 = vsub.f32 %v770_v0, %v793_v30 }
 0x5c6   :  { %v759_v20 = vpop.f32.mrf.mxu0  ;;  %780 = vadd.xlane.f32.xlu0 %v779_v17 }
 0x5c7   :  { %v760_v21 = vadd.f32 %v759_v20, %v730_v19  ;;  %v801_v36 = vmul.f32 %v3662_v34, %v3662_v34  ;;  %v3717_v19 = vld [vmem:[%s4991_s9] ss:$0 sm:$0xff] }
 0x5c9   :  { %v768_v24 = vadd.f32 %v3179_v55, %v760_v21  ;;  %v883_v55 = vsel %vm77_vm10, 1, %v3323_v26 }
 0x5cb   :  { %v772_v25 = vadd.f32 %v768_v24, %v3497_v27  ;;  %v807_v27 = vsel %vm201_vm0, %v801_v36, 0.0  ;;  %v80_v24 = vlaneseq }
 0x5cd   :  { %v782_v29 = vsel %vm201_vm0, %v772_v25, 0.0 }
 0x5ce   :  { %783 = vadd.xlane.f32.xlu2 %v782_v29 }
 0x5d6   :  { %805 = vadd.xlane.f32.xlu2 %v804_v15 }
 0x5da   :  { %896 = vperm.xlu0 %3052, %v885_v51  }
 0x5de   :  { %808 = vadd.xlane.f32.xlu2 %v807_v27 }
 0x639   :  { %v781_v37 = vpop.xlane.xlu0 %780 }
 0x63a   :  { %v794_v38 = vmul.f32 %v3652_v18, %v781_v37 }
 0x63c   :  { %v3672_v40 = vsub.f32 %v771_v14, %v794_v38  ;;  %v3711_v14 = vld [vmem:[%s4990_s8] ss:$0 sm:$0xff] }
 0x63e   :  { %v802_v42 = vmul.f32 %v3672_v40, %v3672_v40 }
 0x640   :  { %v810_v43 = vsel %vm201_vm0, %v802_v42, 0.0 }
 0x641   :  { %811 = vadd.xlane.f32.xlu2 %v810_v43  ;;  %v784_v47 = vpop.xlane.xlu2 %783 }
 0x642   :  { %v795_v48 = vmul.f32 %v3652_v18, %v784_v47 }
 0x644   :  { %v3682_v50 = vsub.f32 %v772_v25, %v795_v48  ;;  %v3721_v25 = vpop.permute.xlu1 %887 }
 0x645   :  { %vm5009_vm4 = vcmp.eq.s32.totalorder %v3721_v25, 1 }
 0x646   :  { %v803_v52 = vmul.f32 %v3682_v50, %v3682_v50 }
 0x648   :  { %v813_v53 = vsel %vm201_vm0, %v803_v52, 0.0 }
 0x649   :  { %814 = vadd.xlane.f32.xlu2 %v813_v53  ;;  %v806_v56 = vpop.xlane.xlu2 %805 }
 0x64a   :  { %v816_v57 = vmul.f32 %v806_v56, %v3652_v18 }
 0x64c   :  { %v820_v59 = vadd.f32 1e-05, %v816_v57 }
 0x64e   :  { %3229 = vrsqrt.f32 %v820_v59  ;;  %vm830_vm12 = vweird.f32 %v820_v59 }
 0x651   :  { %v809_v58 = vpop.xlane.xlu2 %808 }
 0x652   :  { %v817_v60 = vmul.f32 %v809_v58, %v3652_v18 }
 0x654   :  { %v821_v61 = vadd.f32 1e-05, %v817_v60  ;;  %v3230_v62 = vpop.eup %3229 }
 0x655   :  { %v825_v63 = vmul.f32 %v3230_v62, %v820_v59  ;;  %vm831_vm11 = vweird.f32 %v3230_v62  ;;  %v3757_v59 = vpop.permute.xlu1 %893 }
 0x656   :  { %3231 = vrsqrt.f32 %v821_v61  ;;  %vm832_vm13 = vmor %vm830_vm12, %vm831_vm11  ;;  %vm840_vm15 = vweird.f32 %v821_v61  ;;  %vm5004_vm12 = vcmp.eq.s32.totalorder %v3757_v59, 1 }
 0x657   :  { %v826_v26 = vmul.f32 %v3230_v62, %v825_v63 }
 0x659   :  { %v827_v6 = vmul.f32 0.5, %v826_v26 }
 0x65b   :  { %v828_v44 = vsub.f32 1.5, %v827_v6 }
 0x65c   :  { %v3232_v0 = vpop.eup %3231 }
 0x65d   :  { %v835_v2 = vmul.f32 %v3232_v0, %v821_v61  ;;  %v829_v46 = vmul.f32 %v3230_v62, %v828_v44  ;;  %vm841_vm14 = vweird.f32 %v3232_v0 }
 0x65e   :  { %vm842_vm2 = vmor %vm840_vm15, %vm841_vm14 }
 0x65f   :  { %v836_v4 = vmul.f32 %v3232_v0, %v835_v2  ;;  %v833_v8 = vsel %vm832_vm13, %v3230_v62, %v829_v46 }
 0x660   :  { %v864_v13 = vmul.f32 %v833_v8, %v3656_v28 }
 0x661   :  { %890 = vperm.xlu2 %3051, %v883_v55   ;;  %v837_v9 = vmul.f32 0.5, %v836_v4 }
 0x662   :  { %v871_v20 = vmul.f32 %v3711_v14, %v864_v13 }
 0x663   :  { %v838_v5 = vsub.f32 1.5, %v837_v9 }
 0x664   :  { %v878_v32 = vadd.f32 %v3717_v19, %v871_v20 }
 0x665   :  { %v839_v10 = vmul.f32 %v3232_v0, %v838_v5 }
 0x666   :  { %v3731_v27 = vsel %vm5009_vm4, 0.0, %v878_v32 }
 0x667   :  { %v843_v16 = vsel %vm842_vm2, %v3232_v0, %v839_v10  ;;  %v906_v47 = vrot.slane %v3731_v27, 4  ;;  %v980_v57 = vrot.slane %v3731_v27, 6  ;;  %v1091_v61 = vrot.slane %v3731_v27, 2 }
 0x668   :  { %v865_v17 = vmul.f32 %v843_v16, %v3662_v34  ;;  %v3726_v34 = vshrl.u32 %v80_v24, 7  ;;  %v943_v62 = vrot.slane %v3731_v27, 5  ;;  %v1054_v1 = vrot.slane %v3731_v27, 1 }
 0x669   :  { %v1017_v23 = vrot.slane %v3731_v27, 7  ;;  %v1128_v4 = vrot.slane %v3731_v27, 3 }
 0x66a   :  { %v872_v33 = vmul.f32 %v3711_v14, %v865_v17  ;;  %v82_v36 = vadd.s32 8, %v3726_v34  ;;  %vm910_vm8 = vcmp.lt.s32.totalorder %v3726_v34, 4  ;;  %v83_v53 = vadd.s32 16, %v3726_v34  ;;  %v3804_v17 = vpop.permute.xlu0 %896 }
 0x66b   :  { %v84_v26 = vadd.s32 24, %v3726_v34  ;;  %v3773_v3 = vand.u32 15, %v3726_v34  ;;  %vm5010_vm13 = vcmp.lt.s32.totalorder %v3726_v34, 5  ;;  %vm1095_vm15 = vcmp.lt.s32.totalorder %v3726_v34, 6 }
 0x66c   :  { %v879_v38 = vadd.f32 %v3717_v19, %v872_v33  ;;  %v3744_v49 = vand.u32 15, %v82_v36  ;;  %v3764_v0 = vand.u32 15, %v83_v53  ;;  %vm901_vm1 = vcmp.eq.s32.totalorder %v3804_v17, 1 }
 0x66d   :  { %v3782_v9 = vand.u32 15, %v84_v26  ;;  %v3808_v20 = vadd.s32 4294967293, %v3773_v3  ;;  %v3825_v24 = vadd.s32 4294967295, %v3773_v3 }
 0x66e   :  { %v3760_v60 = vadd.s32 3, %v3744_v49  ;;  %v3785_v46 = vadd.s32 4294967295, %v3764_v0  ;;  %v3796_v8 = vadd.s32 4294967293, %v3764_v0 }
 0x66f   :  { %vm5025_vm4 = vcmp.ge.s32.totalorder %v3825_v24, 0 }
 0x670   :  { %vm5007_vm14 = vcmp.lt.s32.totalorder %v3760_v60, 16 }
 0x6b4   :  { %v812_v7 = vpop.xlane.xlu2 %811 }
 0x6b5   :  { %v818_v11 = vmul.f32 %v812_v7, %v3652_v18  ;;  %v3793_v7 = vadd.s32 4294967294, %v3773_v3 }
 0x6b7   :  { %v822_v12 = vadd.f32 1e-05, %v818_v11 }
 0x6b9   :  { %3233 = vrsqrt.f32 %v822_v12  ;;  %vm850_vm9 = vweird.f32 %v822_v12 }
 0x6bc   :  { %v815_v21 = vpop.xlane.xlu2 %814 }
 0x6bd   :  { %v819_v22 = vmul.f32 %v815_v21, %v3652_v18  ;;  %v3812_v21 = vadd.s32 1, %v3744_v49 }
 0x6bf   :  { %v3234_v28 = vpop.eup %3233  ;;  %v823_v29 = vadd.f32 1e-05, %v819_v22 }
 0x6c0   :  { %v845_v30 = vmul.f32 %v3234_v28, %v822_v12  ;;  %vm851_vm7 = vweird.f32 %v3234_v28 }
 0x6c1   :  { %3235 = vrsqrt.f32 %v823_v29  ;;  %vm852_vm10 = vmor %vm850_vm9, %vm851_vm7  ;;  %vm860_vm2 = vweird.f32 %v823_v29 }
 0x6c2   :  { %v846_v15 = vmul.f32 %v3234_v28, %v845_v30 }
 0x6c4   :  { %v847_v37 = vmul.f32 0.5, %v846_v15  ;;  %v3734_v39 = vpop.permute.xlu2 %890  ;;  %v3843_v15 = vadd.s32 4, %v3782_v9 }
 0x6c5   :  { %vm5006_vm6 = vcmp.eq.s32.totalorder %v3734_v39, 1 }
 0x6c6   :  { %v848_v41 = vsub.f32 1.5, %v847_v37  ;;  %v3739_v42 = vsel %vm5006_vm6, 0.0, %v879_v38  ;;  %vm5011_vm6 = vcmp.ge.s32.totalorder %v3793_v7, 0 }
 0x6c7   :  { %v3236_v43 = vpop.eup %3235  ;;  %v907_v48 = vrot.slane %v3739_v42, 4  ;;  %v1129_v11 = vrot.slane %v3739_v42, 3  ;;  %v1092_v33 = vrot.slane %v3739_v42, 2  ;;  %v1055_v38 = vrot.slane %v3739_v42, 1 }
 0x6c8   :  { %v849_v51 = vmul.f32 %v3234_v28, %v848_v41  ;;  %v855_v52 = vmul.f32 %v3236_v43, %v823_v29  ;;  %vm861_vm11 = vweird.f32 %v3236_v43  ;;  %v165_v41 = vld [vmem:[%s4992_s10 + $0x78] sm:$0xff]  ;;  %v944_v53 = vrot.slane %v3739_v42, 5 }
 0x6c9   :  { %v3751_v54 = vsel %vm910_vm8, %v906_v47, %v907_v48  ;;  %vm862_vm7 = vmor %vm860_vm2, %vm861_vm11  ;;  %vm1058_vm11 = vcmp.lt.s32.totalorder %v3726_v34, 7  ;;  %vm984_vm2 = vcmp.lt.s32.totalorder %v3726_v34, 2  ;;  %1330 = vmatpush.msra.mxu1 %v165_v41 }
 0x6ca   :  { %v853_v55 = vsel %vm852_vm10, %v3234_v28, %v849_v51  ;;  %v856_v56 = vmul.f32 %v3236_v43, %v855_v52  ;;  %2897 = vmatmul.msk.f32.vlgmr.msrb.gmra.mxu2 %vm201_vm0, %v3751_v54  ;;  %vm947_vm10 = vcmp.lt.s32.totalorder %v3726_v34, 3  ;;  %v3829_v28 = vadd.s32 1, %v3782_v9 }
 0x6cb   :  { %v866_v58 = vmul.f32 %v853_v55, %v3672_v40  ;;  %v3770_v40 = vadd.s32 4, %v3744_v49  ;;  %v1098_v52 = vsel %vm1095_vm15, %v1091_v61, %v1092_v33  ;;  %v5014_v55 = vrot.slane %v3739_v42, 7 }
 0x6cc   :  { %v857_v63 = vmul.f32 0.5, %v856_v56  ;;  %v180_v56 = vld [vmem:[%s4992_s10 + $0xf0] sm:$0xff] }
 0x6cd   :  { %v873_v2 = vmul.f32 %v3711_v14, %v866_v58  ;;  %vm5008_vm9 = vcmp.lt.s32.totalorder %v3770_v40, 16 }
 0x6ce   :  { %v858_v6 = vsub.f32 1.5, %v857_v63 }
 0x6cf   :  { %v880_v31 = vadd.f32 %v3717_v19, %v873_v2 }
 0x6d0   :  { %v859_v44 = vmul.f32 %v3236_v43, %v858_v6 }
 0x6d1   :  { %v3789_v5 = vsel %vm5004_vm12, 0.0, %v880_v31  ;;  %vm5015_vm12 = vcmp.ge.s32.totalorder %v3785_v46, 0 }
 0x6d2   :  { %v863_v10 = vsel %vm862_vm7, %v3236_v43, %v859_v44  ;;  %v1130_v12 = vrot.slane %v3789_v5, 3  ;;  %v908_v13 = vrot.slane %v3789_v5, 4  ;;  %vm1021_vm7 = vcmp.lt.s32.totalorder %v3726_v34, 1  ;;  %v164_v43 = vld [vmem:[%s4992_s10 + $0x70] sm:$0xff] }
 0x6d3   :  { %v867_v16 = vmul.f32 %v863_v10, %v3682_v50  ;;  %v945_v37 = vrot.slane %v3789_v5, 5  ;;  %v1056_v2 = vrot.slane %v3789_v5, 1  ;;  %1331 = vmatpush.msra.mxu1 %v164_v43  ;;  %v982_v41 = vrot.slane %v3789_v5, 6 }
 0x6d4   :  { %v1134_v22 = vsel %vm5010_vm13, %v1129_v11, %v1130_v12  ;;  %v3822_v50 = vsel %vm910_vm8, %v907_v48, %v908_v13  ;;  %vm5023_vm13 = vcmp.lt.s32.totalorder %v3812_v21, 16  ;;  %v3864_v48 = vadd.s32 2, %v3782_v9 }
 0x6d5   :  { %v1162_v29 = vsel %vm5007_vm14, %v1134_v22, 0.0  ;;  %v1190_v32 = vsel %vm5008_vm9, %v3822_v50, 0.0  ;;  %v874_v30 = vmul.f32 %v3711_v14, %v867_v16  ;;  %vm5013_vm9 = vcmp.ge.s32.totalorder %v3808_v20, 0 }
 0x6d6   :  { %1279 = vrot.lane.b32.xlu0 %v1162_v29, %s3322_s2  ;;  %2898 = vmatmul.msk.f32.gmra.mxu2 %vm201_vm0, %v1190_v32  ;;  %v5012_v14 = vrot.slane %v3789_v5, 7  ;;  %vm5016_vm14 = vcmp.lt.s32.totalorder %v3829_v28, 16  ;;  %v949_v44 = vsel %vm947_vm10, %v944_v53, %v945_v37 }
 0x6d7   :  { %v881_v36 = vadd.f32 %v3717_v19, %v874_v30  ;;  %v181_v19 = vld [vmem:[%s4992_s10 + $0xf8] sm:$0xff] }
 0x6d8   :  { %1359 = vmatpush.msra.mxu3 %v181_v19  ;;  %v1023_v6 = vsel %vm1021_vm7, %v5014_v55, %v5012_v14 }
 0x6d9   :  { %v3868_v51 = vsel %vm901_vm1, 0.0, %v881_v36 }
 0x6da   :  { %v909_v58 = vrot.slane %v3868_v51, 4  ;;  %v983_v63 = vrot.slane %v3868_v51, 6  ;;  %v946_v26 = vrot.slane %v3868_v51, 5  ;;  %1360 = vmatpush.msra.mxu3 %v180_v56  ;;  %v1131_v31 = vrot.slane %v3868_v51, 3 }
 0x6db   :  { %v1057_v10 = vrot.slane %v3868_v51, 1  ;;  %v1020_v32 = vrot.slane %v3868_v51, 7  ;;  %v1060_v56 = vsel %vm1058_vm11, %v1055_v38, %v1056_v2 }
 0x6dc   :  { %v3897_v16 = vsel %vm910_vm8, %v908_v13, %v909_v58  ;;  %v988_v22 = vsel %vm984_vm2, %v983_v63, %v980_v57  ;;  %v951_v29 = vsel %vm947_vm10, %v946_v26, %v943_v62  ;;  %v1061_v13 = vsel %vm1058_vm11, %v1054_v1, %v1055_v38 }
 0x6dd   :  { %v1013_v30 = vsel %vm5011_vm6, %v988_v22, 0.0  ;;  %v976_v36 = vsel %vm5013_vm9, %v951_v29, 0.0  ;;  %v1094_v22 = vrot.slane %v3868_v51, 2  ;;  %v3924_v29 = vsel %vm5015_vm12, %v1023_v6, 0.0 }
 0x6de   :  { %2899 = vmatmul.msk.f32.gmra.mxu2 %vm201_vm0, %v3897_v16  ;;  %v3058_v19 = vpack.i.bf16 %v1013_v30, %v1098_v52  ;;  %v3053_v43 = vpack.i.bf16 %v976_v36, %v1061_v13  ;;  %vm5038_vm6 = vcmp.lt.s32.totalorder %v3726_v34, 5  ;;  %vm5039_vm9 = vcmp.ge.s32.totalorder %v3796_v8, 0 }
 0x6df   :  { %v3930_v14 = vsel %vm5038_vm6, %v1130_v12, %v1131_v31  ;;  %v3934_v55 = vsel %vm5039_vm9, %v949_v44, 0.0  ;;  %v3938_v52 = vsel %vm1058_vm11, %v1056_v2, %v1057_v10  ;;  %v1025_v12 = vsel %vm1021_vm7, %v1020_v32, %v1017_v23 }
 0x6e0   :  { %3059 = vrot.lane.b32.xlu1 %v3058_v19, %s3324_s27  ;;  %3054 = vrot.lane.b32.xlu2 %v3053_v43, %s3326_s23  ;;  %v3088_v38 = vpack.i.bf16 %v3924_v29, %v3930_v14  ;;  %v3078_v6 = vpack.i.bf16 %v3934_v55, %v3938_v52  ;;  %vm5018_vm6 = vcmp.lt.s32.totalorder %v3864_v48, 16  ;;  %vm5017_vm9 = vcmp.lt.s32.totalorder %v3843_v15, 16 }
 0x6e1   :  { %v3956_v2 = vsel %vm947_vm10, %v945_v37, %v946_v26  ;;  %v1062_v44 = vsel %vm1058_vm11, %v1057_v10, %v1054_v1  ;;  %v3964_v30 = vsel %vm984_vm2, %v982_v41, %v983_v63  ;;  %v3970_v36 = vsel %vm910_vm8, %v909_v58, %v906_v47 }
 0x6e2   :  { %v3974_v13 = vsel %vm5016_vm14, %v1062_v44, 0.0  ;;  %v1099_v37 = vsel %vm1095_vm15, %v1094_v22, %v1091_v61  ;;  %vm5040_vm12 = vcmp.lt.s32.totalorder %v3726_v34, 5  ;;  %v1050_v63 = vsel %vm5025_vm4, %v1025_v12, 0.0 }
 0x6e3   :  { %v3984_v1 = vsel %vm5040_vm12, %v1131_v31, %v1128_v4  ;;  %v1088_v47 = vsel %vm5023_vm13, %v1060_v56, 0.0  ;;  %v3093_v58 = vpack.i.bf16 %v3956_v2, %v3974_v13  ;;  %v3994_v26 = vsel %vm5018_vm6, %v1099_v37, 0.0 }
 0x6e4   :  { %v1093_v61 = vrot.slane %v3789_v5, 2  ;;  %v3998_v10 = vadd.s32 2, %v3744_v49  ;;  %v3098_v31 = vpack.i.bf16 %v3964_v30, %v3994_v26  ;;  %v1192_v19 = vsel %vm5017_vm9, %v3970_v36, 0.0  ;;  %v2908_v30 = vld [vmem:[%s4986_s4 + $0x38] sm:$0xff]  ;;  %v2906_v26 = vld [vmem:[%s4986_s4 + $0x28] sm:$0xff] }
 0x6e5   :  { %v1135_v43 = vsel %vm5040_vm12, %v1128_v4, %v1129_v11  ;;  %v950_v49 = vsel %vm947_vm10, %v943_v62, %v944_v53  ;;  %v981_v4 = vrot.slane %v3739_v42, 6  ;;  %v4031_v37 = vadd.s32 4294967294, %v3764_v0  ;;  %1674 = vmatpush.msra.mxu2 %v2908_v30 }
 0x6e6   :  { %2900 = vmatmul.msk.f32.gmra.mxu2 %vm201_vm0, %v1192_v19  ;;  %v3068_v56 = vpack.i.bf16 %v1050_v63, %v1135_v43  ;;  %v3063_v12 = vpack.i.bf16 %v950_v49, %v1088_v47  ;;  %v1097_v44 = vsel %vm1095_vm15, %v1092_v33, %v1093_v61  ;;  %vm5024_vm12 = vcmp.lt.s32.totalorder %v3998_v10, 16  ;;  %v179_v49 = vld [vmem:[%s4992_s10 + $0xe8] sm:$0xff] }
 0x6e7   :  { %v1125_v62 = vsel %vm5024_vm12, %v1097_v44, 0.0  ;;  %v987_v11 = vsel %vm984_vm2, %v980_v57, %v981_v4  ;;  %v5041_v63 = vrot.slane %v3739_v42, 7  ;;  %v986_v47 = vsel %vm984_vm2, %v981_v4, %v982_v41  ;;  %v162_v41 = vld [vmem:[%s4992_s10 + $0x60] sm:$0xff]  ;;  %1361 = vmatpush.msra.mxu3 %v179_v49  ;;  %v176_v44 = vld [vmem:[%s4992_s10 + $0xd0] sm:$0xff]  ;;  %v159_v4 = vld [vmem:[%s4992_s10 + $0x48] sm:$0xff] }
 0x6e8   :  { %3069 = vrot.lane.b32.xlu2 %v3068_v56, %s3322_s2  ;;  %3064 = vrot.lane.b32.xlu1 %v3063_v12, %s3326_s23  ;;  %v3073_v53 = vpack.i.bf16 %v987_v11, %v1125_v62  ;;  %vm5019_vm14 = vcmp.ge.s32.totalorder %v4031_v37, 0  ;;  %v1096_v57 = vsel %vm1095_vm15, %v1093_v61, %v1094_v22  ;;  %v178_v22 = vld [vmem:[%s4992_s10 + $0xe0] sm:$0xff]  ;;  %v161_v61 = vld [vmem:[%s4992_s10 + $0x58] sm:$0xff]  ;;  %vm5027_vm6 = vcmask 523264  }
 0x6e9   :  { %v1024_v33 = vsel %vm1021_vm7, %v1017_v23, %v5041_v63  ;;  %v1015_v19 = vsel %vm5019_vm14, %v986_v47, 0.0  ;;  %v163_v23 = vld [vmem:[%s4992_s10 + $0x68] sm:$0xff]  ;;  %v177_v56 = vld [vmem:[%s4992_s10 + $0xd8] sm:$0xff]  ;;  %1362 = vmatpush.msra.mxu3 %v178_v22  ;;  %v160_v12 = vld [vmem:[%s4992_s10 + $0x50] sm:$0xff]  ;;  %vm5026_vm14 = vcmask 785408  }
 0x6ea   :  { %v3083_v43 = vpack.i.bf16 %v1015_v19, %v1096_v57  ;;  %1332 = vmatpush.msra.mxu1 %v163_v23  ;;  %v175_v62 = vld [vmem:[%s4992_s10 + $0xc8] sm:$0xff]  ;;  %v158_v11 = vld [vmem:[%s4992_s10 + $0x40] sm:$0xff]  ;;  %v157_v63 = vld [vmem:[%s4992_s10 + $0x38] sm:$0xff] }
 0x6eb   :  { %1363 = vmatpush.msra.mxu3 %v177_v56  ;;  %v156_v47 = vld [vmem:[%s4992_s10 + $0x30] sm:$0xff]  ;;  %v155_v19 = vld [vmem:[%s4992_s10 + $0x28] sm:$0xff]  ;;  %v154_v23 = vld [vmem:[%s4992_s10 + $0x20] sm:$0xff] }
 0x6ec   :  { %1333 = vmatpush.msra.mxu1 %v162_v41  ;;  %v172_v57 = vld [vmem:[%s4992_s10 + $0xb0] sm:$0xff]  ;;  %v170_v49 = vld [vmem:[%s4992_s10 + $0xa0] sm:$0xff]  ;;  %v153_v41 = vld [vmem:[%s4992_s10 + $0x18] sm:$0xff] }
 0x6ed   :  { %1364 = vmatpush.msra.mxu3 %v176_v44  ;;  %v169_v22 = vld [vmem:[%s4992_s10 + $0x98] sm:$0xff]  ;;  %v168_v56 = vld [vmem:[%s4992_s10 + $0x90] sm:$0xff]  ;;  %v167_v44 = vld [vmem:[%s4992_s10 + $0x88] sm:$0xff] }
 0x6ee   :  { %1334 = vmatpush.msra.mxu1 %v161_v61  ;;  %v152_v61 = vld [vmem:[%s4992_s10 + $0x10] sm:$0xff] }
 0x6ef   :  { %1365 = vmatpush.msra.mxu3 %v175_v62  ;;  %v166_v62 = vld [vmem:[%s4992_s10 + $0x80] sm:$0xff] }
 0x6f0   :  { %3074 = vrot.lane.b32.xlu2 %v3073_v53, %s3324_s27  ;;  %1231 = vrot.lane.b32.xlu1 %v1024_v33, %s3322_s2  ;;  %v174_v53 = vld [vmem:[%s4992_s10 + $0xc0] sm:$0xff]  ;;  %v173_v33 = vld [vmem:[%s4992_s10 + $0xb8] sm:$0xff] }
 0x6f1   :  { %1335 = vmatpush.msra.mxu1 %v160_v12  ;;  %1366 = vmatpush.msra.mxu3 %v174_v53  ;;  %v151_v12 = vld [vmem:[%s4992_s10 + $0x8] sm:$0xff]  ;;  %v194_v53 = vld [vmem:[%s4994_s12 + $0x38] sm:$0xff] }
 0x6f2   :  { %1444 = vmatpush.msra.mxu0 %v194_v53 }
 0x6f3   :  { %1336 = vmatpush.msra.mxu1 %v159_v4  ;;  %1367 = vmatpush.msra.mxu3 %v173_v33  ;;  %v150_v4 = vld [vmem:[%s4992_s10] sm:$0xff] }
 0x6f5   :  { %1337 = vmatpush.msra.mxu1 %v158_v11  ;;  %1368 = vmatpush.msra.mxu3 %v172_v57 }
 0x6f7   :  { %1338 = vmatpush.msra.mxu1 %v157_v63  ;;  %v4137_v63 = vadd.s32 4294967292, %v3773_v3 }
 0x6f8   :  { %3084 = vrot.lane.b32.xlu1 %v3083_v43, %s3324_s27  ;;  %v171_v43 = vld [vmem:[%s4992_s10 + $0xa8] sm:$0xff] }
 0x6f9   :  { %1339 = vmatpush.msra.mxu1 %v156_v47  ;;  %1369 = vmatpush.msra.mxu3 %v171_v43  ;;  %vm5020_vm9 = vcmp.ge.s32.totalorder %v4137_v63, 0 }
 0x6fa   :  { %v939_v43 = vsel %vm5020_vm9, %v3970_v36, 0.0 }
 0x6fb   :  { %1340 = vmatpush.msra.mxu1 %v155_v19  ;;  %1370 = vmatpush.msra.mxu3 %v170_v49 }
 0x6fd   :  { %1341 = vmatpush.msra.mxu1 %v154_v23  ;;  %1371 = vmatpush.msra.mxu3 %v169_v22 }
 0x6ff   :  { %1342 = vmatpush.msra.mxu1 %v153_v41  ;;  %1372 = vmatpush.msra.mxu3 %v168_v56 }
 0x701   :  { %1343 = vmatpush.msra.mxu1 %v152_v61  ;;  %1373 = vmatpush.msra.mxu3 %v167_v44 }
 0x703   :  { %1344 = vmatpush.msra.mxu1 %v151_v12  ;;  %1374 = vmatpush.msra.mxu3 %v166_v62 }
 0x705   :  { %1345 = vmatpush.msra.mxu1 %v150_v4 }
 0x73a   :  { %v3055_v11 = vpop.permute.xlu2 %3054 }
 0x73b   :  { %v3057_v47 = vunpack.i.h.bf16 %v3055_v11  ;;  %v3056_v57 = vunpack.i.l.bf16 %v3055_v11 }
 0x73d   :  { %v1289_v41 = vsel %vm201_vm0, %v939_v43, %v3057_v47  ;;  %v1303_v3 = vsel %vm201_vm0, %v3731_v27, %v3056_v57 }
 0x742   :  { %v3070_v33 = vpop.permute.xlu2 %3069 }
 0x743   :  { %v3072_v22 = vunpack.i.h.bf16 %v3070_v33  ;;  %v3071_v61 = vunpack.i.l.bf16 %v3070_v33 }
 0x74a   :  { %v3075_v36 = vpop.permute.xlu2 %3074 }
 0x74b   :  { %v3076_v47 = vunpack.i.l.bf16 %v3075_v36 }
 0x752   :  { %v3060_v19 = vpop.permute.xlu1 %3059 }
 0x753   :  { %v3062_v23 = vunpack.i.h.bf16 %v3060_v19  ;;  %v3061_v49 = vunpack.i.l.bf16 %v3060_v19  ;;  %v1280_v19 = vpop.permute.xlu0 %1279 }
 0x755   :  { %v1294_v56 = vsel %vm5027_vm6, %v1289_v41, %v3062_v23  ;;  %v1307_v12 = vsel %vm5027_vm6, %v1303_v3, %v3061_v49  ;;  %v3077_v49 = vunpack.i.h.bf16 %v3075_v36  ;;  %v187_v36 = vld [vmem:[%s4994_s12] sm:$0xff] }
 0x756   :  { %v1299_v44 = vsel %vm5026_vm14, %v1294_v56, %v3072_v22  ;;  %v1311_v4 = vsel %vm5026_vm14, %v1307_v12, %v3071_v61  ;;  %v193_v61 = vld [vmem:[%s4994_s12 + $0x30] sm:$0xff]  ;;  %v192_v56 = vld [vmem:[%s4994_s12 + $0x28] sm:$0xff]  ;;  %v190_v12 = vld [vmem:[%s4994_s12 + $0x18] sm:$0xff] }
 0x757   :  { %1346 = vmatmul.f32.vlgmr.msra.gmra.mxu1 %v1299_v44  ;;  %1375 = vmatmul.f32.vlgmr.msra.gmra.mxu3 %v1311_v4  ;;  %v189_v44 = vld [vmem:[%s4994_s12 + $0x10] sm:$0xff]  ;;  %v188_v4 = vld [vmem:[%s4994_s12 + $0x8] sm:$0xff] }
 0x758   :  { %1445 = vmatpush.msra.mxu0 %v193_v61 }
 0x75a   :  { %v3065_v62 = vpop.permute.xlu1 %3064  ;;  %1446 = vmatpush.msra.mxu0 %v192_v56 }
 0x75b   :  { %v3067_v11 = vunpack.i.h.bf16 %v3065_v62  ;;  %v3066_v53 = vunpack.i.l.bf16 %v3065_v62  ;;  %v4182_v62 = vld [vmem:[%s4993_s11] ss:$0 sm:$0xff] }
 0x75d   :  { %v1304_v57 = vsel %vm201_vm0, %v3739_v42, %v3066_v53  ;;  %v1290_v23 = vsel %vm201_vm0, %v3751_v54, %v3067_v11  ;;  %v191_v54 = vld [vmem:[%s4994_s12 + $0x20] sm:$0xff] }
 0x75e   :  { %v1308_v33 = vsel %vm5027_vm6, %v1304_v57, %v3076_v47  ;;  %v1295_v3 = vsel %vm5027_vm6, %v1290_v23, %v3077_v49  ;;  %1447 = vmatpush.msra.mxu0 %v191_v54  ;;  %v4191_v54 = vld [vmem:[%s4995_s13] ss:$0 sm:$0xff] }
 0x75f   :  { %v1312_v43 = vsel %vm5026_vm14, %v1308_v33, %v1280_v19  ;;  %v1405_v19 = vpop.f32.mrf.mxu2 }
 0x760   :  { %1378 = vmatmul.f32.gmra.mxu3 %v1312_v43  ;;  %1448 = vmatpush.msra.mxu0 %v190_v12 }
 0x762   :  { %v1232_v41 = vpop.permute.xlu1 %1231  ;;  %1449 = vmatpush.msra.mxu0 %v189_v44 }
 0x763   :  { %v1300_v22 = vsel %vm5026_vm14, %v1295_v3, %v1232_v41 }
 0x764   :  { %1349 = vmatmul.f32.gmra.mxu1 %v1300_v22  ;;  %1450 = vmatpush.msra.mxu0 %v188_v4 }
 0x766   :  { %1451 = vmatpush.msra.mxu0 %v187_v36 }
 0x767   :  { %v1408_v22 = vpop.f32.mrf.mxu2 }
 0x7d4   :  { %v1347_v11 = vpop.f32.mrf.mxu1 }
 0x7d5   :  { %v1348_v53 = vadd.f32 %v4182_v62, %v1347_v11 }
 0x7da   :  { %v1376_v47 = vpop.f32.mrf.mxu3 }
 0x7db   :  { %v1377_v57 = vadd.f32 %v1376_v47, %v1348_v53 }
 0x7dd   :  { %v1406_v33 = vadd.f32 %v1405_v19, %v1377_v57  ;;  %v4231_v19 = vadd.s32 4294967292, %v3764_v0 }
 0x7df   :  { %v1417_v43 = vmax.f32 %v1406_v33, 0.0  ;;  %vm5021_vm9 = vcmp.ge.s32.totalorder %v4231_v19, 0  ;;  %v3085_v33 = vpop.permute.xlu1 %3084 }
 0x7e1   :  { %v1350_v23 = vpop.f32.mrf.mxu1  ;;  %2901 = vmatmul.msk.f32.vlgmr.msra.gmra.mxu0 %vm5027_vm6, %v1417_v43 }
 0x7e2   :  { %v1351_v49 = vadd.f32 %v4182_v62, %v1350_v23 }
 0x7e3   :  { %v1379_v41 = vpop.f32.mrf.mxu3 }
 0x7e4   :  { %v1380_v3 = vadd.f32 %v1379_v41, %v1351_v49 }
 0x7e6   :  { %v1409_v61 = vadd.f32 %v1408_v22, %v1380_v3  ;;  %v941_v3 = vsel %vm5021_vm9, %v3822_v50, 0.0  ;;  %v3087_v22 = vunpack.i.h.bf16 %v3085_v33 }
 0x7e8   :  { %v1418_v56 = vmax.f32 %v1409_v61, 0.0  ;;  %v3086_v61 = vunpack.i.l.bf16 %v3085_v33 }
 0x7ea   :  { %2902 = vmatmul.msk.f32.gmra.mxu0 %vm5027_vm6, %v1418_v56 }
 0x85e   :  { %v1453_v12 = vpop.f32.mrf.mxu0 }
 0x85f   :  { %v1454_v44 = vadd.f32 %v4191_v54, %v1453_v12 }
 0x861   :  { %v1465_v4 = vadd.f32 %v1454_v44, %v3731_v27  ;;  %v5042_v27 = vrot.slane %v3789_v5, 7 }
 0x863   :  { %v1469_v36 = vsel %vm201_vm0, %v1465_v4, 0.0 }
 0x864   :  { %1470 = vadd.xlane.f32.xlu2 %v1469_v36 }
 0x867   :  { %v1456_v11 = vpop.f32.mrf.mxu0 }
 0x868   :  { %v1457_v53 = vadd.f32 %v4191_v54, %v1456_v11 }
 0x86a   :  { %v1466_v47 = vadd.f32 %v1457_v53, %v3739_v42  ;;  %v1022_v42 = vsel %vm1021_vm7, %v5042_v27, %v1020_v32  ;;  %v4249_v53 = vadd.s32 3, %v3782_v9  ;;  %v2907_v9 = vld [vmem:[%s4986_s4 + $0x30] sm:$0xff] }
 0x86b   :  { %1675 = vmatpush.msra.mxu2 %v2907_v9 }
 0x86c   :  { %v1472_v57 = vsel %vm201_vm0, %v1466_v47, 0.0  ;;  %vm5022_vm9 = vcmp.lt.s32.totalorder %v4249_v53, 16 }
 0x86d   :  { %1473 = vadd.xlane.f32.xlu0 %v1472_v57  ;;  %1676 = vmatpush.msra.mxu2 %v2906_v26 }
 0x87c   :  { %3089 = vrot.lane.b32.xlu2 %v3088_v38, %s3322_s2 }
 0x881   :  { %3079 = vrot.lane.b32.xlu0 %v3078_v6, %s3326_s23 }
 0x889   :  { %3094 = vrot.lane.b32.xlu0 %v3093_v58, %s3326_s23 }
 0x891   :  { %1235 = vrot.lane.b32.xlu0 %v1022_v42, %s3322_s2 }
 0x8d7   :  { %v1471_v14 = vpop.xlane.xlu2 %1470 }
 0x8d8   :  { %v1481_v29 = vmul.f32 %v1471_v14, %v3652_v18 }
 0x8da   :  { %v4219_v38 = vsub.f32 %v1465_v4, %v1481_v29 }
 0x8dc   :  { %v1489_v55 = vmul.f32 %v4219_v38, %v4219_v38 }
 0x8de   :  { %v1493_v52 = vsel %vm201_vm0, %v1489_v55, 0.0 }
 0x8df   :  { %1494 = vadd.xlane.f32.xlu1 %v1493_v52  ;;  %v3090_v43 = vpop.permute.xlu2 %3089 }
 0x8e0   :  { %v1474_v6 = vpop.xlane.xlu0 %1473  ;;  %v3092_v56 = vunpack.i.h.bf16 %v3090_v43  ;;  %v3091_v12 = vunpack.i.l.bf16 %v3090_v43 }
 0x8e1   :  { %v1482_v2 = vmul.f32 %v1474_v6, %v3652_v18 }
 0x8e3   :  { %v4225_v13 = vsub.f32 %v1466_v47, %v1482_v2  ;;  %v1164_v47 = vsel %vm5022_vm9, %v3984_v1, 0.0  ;;  %v2905_v1 = vld [vmem:[%s4986_s4 + $0x20] sm:$0xff]  ;;  %s2848_s4 = sshll.u32 %s5000_s18, 4  ;;  %s2849_s4 = int_to_ptr.hbm [resolvable:$true] %s2848_s4 }
 0x8e4   :  { %1677 = vmatpush.msra.mxu2 %v2905_v1 }
 0x8e5   :  { %v1490_v32 = vmul.f32 %v4225_v13, %v4225_v13 }
 0x8e7   :  { %v1496_v58 = vsel %vm201_vm0, %v1490_v32, 0.0 }
 0x8e8   :  { %1497 = vadd.xlane.f32.xlu2 %v1496_v58 }
 0x8f3   :  { %v3080_v23 = vpop.permute.xlu0 %3079 }
 0x8f4   :  { %v3082_v49 = vunpack.i.h.bf16 %v3080_v23  ;;  %v3081_v41 = vunpack.i.l.bf16 %v3080_v23 }
 0x8f6   :  { %v1291_v44 = vsel %vm201_vm0, %v941_v3, %v3082_v49  ;;  %v1305_v0 = vsel %vm201_vm0, %v3789_v5, %v3081_v41  ;;  %v4273_v49 = vld [vmem:[%s4996_s14] ss:$0 sm:$0xff] }
 0x8f7   :  { %v1296_v4 = vsel %vm5027_vm6, %v1291_v44, %v3087_v22  ;;  %v1309_v36 = vsel %vm5027_vm6, %v1305_v0, %v3086_v61 }
 0x8f8   :  { %3099 = vrot.lane.b32.xlu1 %v3098_v31, %s3324_s27  ;;  %v1301_v50 = vsel %vm5026_vm14, %v1296_v4, %v3092_v56  ;;  %v1313_v11 = vsel %vm5026_vm14, %v1309_v36, %v3091_v12  ;;  %v4279_v12 = vld [vmem:[%s4997_s15] ss:$0 sm:$0xff] }
 0x8f9   :  { %1352 = vmatmul.f32.gmra.mxu1 %v1301_v50  ;;  %1381 = vmatmul.f32.gmra.mxu3 %v1313_v11 }
 0x8fb   :  { %v3095_v32 = vpop.permute.xlu0 %3094 }
 0x8fc   :  { %v3097_v41 = vunpack.i.h.bf16 %v3095_v32  ;;  %v3096_v3 = vunpack.i.l.bf16 %v3095_v32 }
 0x8fe   :  { %v1292_v11 = vsel %vm201_vm0, %v3897_v16, %v3097_v41 }
 0x900   :  { %1283 = vrot.lane.b32.xlu2 %v1164_v47, %s3322_s2  ;;  %v1306_v47 = vsel %vm201_vm0, %v3868_v51, %v3096_v3 }
 0x952   :  { %v1495_v31 = vpop.xlane.xlu1 %1494 }
 0x953   :  { %v1505_v57 = vmul.f32 %v1495_v31, %v3652_v18 }
 0x955   :  { %v1509_v27 = vadd.f32 1e-05, %v1505_v57 }
 0x957   :  { %3237 = vrsqrt.f32 %v1509_v27  ;;  %vm1519_vm13 = vweird.f32 %v1509_v27 }
 0x95b   :  { %v1498_v42 = vpop.xlane.xlu2 %1497 }
 0x95c   :  { %v1506_v14 = vmul.f32 %v1498_v42, %v3652_v18 }
 0x95d   :  { %v3238_v29 = vpop.eup %3237 }
 0x95e   :  { %v1514_v55 = vmul.f32 %v3238_v29, %v1509_v27  ;;  %v1510_v52 = vadd.f32 1e-05, %v1506_v14  ;;  %vm1520_vm9 = vweird.f32 %v3238_v29 }
 0x95f   :  { %vm1521_vm12 = vmor %vm1519_vm13, %vm1520_vm9 }
 0x960   :  { %v1515_v6 = vmul.f32 %v3238_v29, %v1514_v55  ;;  %3239 = vrsqrt.f32 %v1510_v52  ;;  %vm1529_vm9 = vweird.f32 %v1510_v52 }
 0x962   :  { %v1516_v2 = vmul.f32 0.5, %v1515_v6 }
 0x963   :  { %v1284_v9 = vpop.permute.xlu2 %1283 }
 0x964   :  { %v1517_v58 = vsub.f32 1.5, %v1516_v2 }
 0x966   :  { %v3240_v33 = vpop.eup %3239  ;;  %v1518_v43 = vmul.f32 %v3238_v29, %v1517_v58 }
 0x967   :  { %v1524_v23 = vmul.f32 %v3240_v33, %v1510_v52  ;;  %vm1530_vm13 = vweird.f32 %v3240_v33 }
 0x968   :  { %v1522_v22 = vsel %vm1521_vm12, %v3238_v29, %v1518_v43  ;;  %vm5043_vm12 = vcmp.eq.s32.totalorder %v3721_v25, 1  ;;  %vm1531_vm4 = vmor %vm1529_vm9, %vm1530_vm13 }
 0x969   :  { %v1553_v61 = vmul.f32 %v1522_v22, %v4219_v38  ;;  %v1525_v56 = vmul.f32 %v3240_v33, %v1524_v23  ;;  %v1236_v38 = vpop.permute.xlu0 %1235  ;;  %v1411_v23 = vpop.f32.mrf.mxu2  ;;  %v4312_v22 = vld [vmem:[%s4987_s5 + $0x1] ss:$0 sm:$0xff] }
 0x96a   :  { %v3100_v44 = vpop.permute.xlu1 %3099 }
 0x96b   :  { %v1526_v0 = vmul.f32 0.5, %v1525_v56  ;;  %v3102_v4 = vunpack.i.h.bf16 %v3100_v44  ;;  %v3101_v36 = vunpack.i.l.bf16 %v3100_v44  ;;  %v1560_v50 = vmul.f32 %v4273_v49, %v1553_v61 }
 0x96d   :  { %v1527_v30 = vsub.f32 1.5, %v1526_v0  ;;  %v1297_v26 = vsel %vm5027_vm6, %v1292_v11, %v3102_v4  ;;  %v1310_v31 = vsel %vm5027_vm6, %v1306_v47, %v3101_v36  ;;  %v1567_v1 = vadd.f32 %v4279_v12, %v1560_v50 }
 0x96e   :  { %v1302_v57 = vsel %vm5026_vm14, %v1297_v26, %v1236_v38  ;;  %v1314_v27 = vsel %vm5026_vm14, %v1310_v31, %v1284_v9  ;;  %vm5044_vm14 = vcmp.eq.s32.totalorder %v3734_v39, 1 }
 0x96f   :  { %v1528_v42 = vmul.f32 %v3240_v33, %v1527_v30  ;;  %1355 = vmatmul.f32.gmra.mxu1 %v1302_v57  ;;  %1384 = vmatmul.f32.gmra.mxu3 %v1314_v27  ;;  %v4293_v16 = vsel %vm5043_vm12, 0.0, %v1567_v1 }
 0x970   :  { %2965 = vmatmul.msk.f32.vlgmr.msra.gmra.mxu2 %vm201_vm0, %v4293_v16 }
 0x971   :  { %v1532_v14 = vsel %vm1531_vm4, %v3240_v33, %v1528_v42  ;;  %vm5045_vm4 = vcmask 130048  }
 0x972   :  { %v1554_v29 = vmul.f32 %v1532_v14, %v4225_v13  ;;  %v1414_v13 = vpop.f32.mrf.mxu2  ;;  %vm5047_vm13 = vmmov %vm5045_vm4 }
 0x973   :  { %vm5048_vm9 = vmmov %vm5045_vm4 }
 0x974   :  { %v1561_v55 = vmul.f32 %v4273_v49, %v1554_v29  ;;  %vm5049_vm12 = vmmov %vm5045_vm4 }
 0x976   :  { %v1568_v6 = vadd.f32 %v4279_v12, %v1561_v55  ;;  %v1353_v2 = vpop.f32.mrf.mxu1 }
 0x977   :  { %v1354_v32 = vadd.f32 %v4182_v62, %v1353_v2 }
 0x978   :  { %v4303_v52 = vsel %vm5044_vm14, 0.0, %v1568_v6  ;;  %vm5046_vm14 = vmmov %vm5045_vm4 }
 0x979   :  { %2966 = vmatmul.msk.f32.gmra.mxu2 %vm201_vm0, %v4303_v52 }
 0x97c   :  { %v1382_v58 = vpop.f32.mrf.mxu3 }
 0x97d   :  { %v1383_v43 = vadd.f32 %v1382_v58, %v1354_v32 }
 0x97f   :  { %v1412_v33 = vadd.f32 %v1411_v23, %v1383_v43 }
 0x981   :  { %v1419_v41 = vmax.f32 %v1412_v33, 0.0 }
 0x983   :  { %2903 = vmatmul.msk.f32.gmra.mxu0 %vm5027_vm6, %v1419_v41 }
 0x9ec   :  { %v1356_v3 = vpop.f32.mrf.mxu1 }
 0x9ed   :  { %v1357_v61 = vadd.f32 %v4182_v62, %v1356_v3 }
 0x9f2   :  { %v1385_v56 = vpop.f32.mrf.mxu3 }
 0x9f3   :  { %v1386_v44 = vadd.f32 %v1385_v56, %v1357_v61  ;;  %v1679_v0 = vpop.f32.mrf.mxu2 }
 0x9f4   :  { %v1680_v4 = vadd.f32 %v4312_v22, %v1679_v0 }
 0x9f5   :  { %v1415_v36 = vadd.f32 %v1414_v13, %v1386_v44 }
 0x9f6   :  { %1789 = vrot.lane.b32.xlu0 %v1680_v4, %s3319_s19  ;;  %1793 = vrot.lane.b32.xlu2 %v1680_v4, %s3320_s20 }
 0x9f7   :  { %v1420_v50 = vmax.f32 %v1415_v36, 0.0 }
 0x9f9   :  { %2904 = vmatmul.msk.f32.gmra.mxu0 %vm5027_vm6, %v1420_v50  ;;  %vm5050_vm6 = vmmov %vm5045_vm4 }
 0x9fc   :  { %v1682_v11 = vpop.f32.mrf.mxu2 }
 0x9fd   :  { %v1683_v47 = vadd.f32 %v4312_v22, %v1682_v11 }
 0x9fe   :  { %1693 = vrot.lane.b32.xlu0 %v1680_v4, %s3322_s2 }
 0x9ff   :  { %1695 = vrot.lane.b32.xlu2 %v1683_v47, %s3322_s2  ;;  %1795 = vrot.lane.b32.xlu1 %v1683_v47, %s3320_s20  ;;  %v4352_v11 = vpack.i.bf16 %v1680_v4, %v1683_v47 }
 0xa00   :  { %v1459_v62 = vpop.f32.mrf.mxu0 }
 0xa01   :  { %v1460_v38 = vadd.f32 %v4191_v54, %v1459_v62 }
 0xa03   :  { %v1467_v30 = vadd.f32 %v1460_v38, %v3789_v5 }
 0xa05   :  { %v1475_v9 = vsel %vm201_vm0, %v1467_v30, 0.0 }
 0xa07   :  { %1791 = vrot.lane.b32.xlu1 %v1683_v47, %s3319_s19 }
 0xa31   :  { %1476 = vadd.xlane.f32.xlu1 %v1475_v9 }
 0xa50   :  { %v1794_v26 = vpop.permute.xlu2 %1793 }
 0xa59   :  { %v1696_v31 = vpop.permute.xlu2 %1695 }
 0xa5a   :  { %2969 = vmatpush.xpose.msk.msrb.mxu0 %vm5045_vm4, %v1696_v31 }
 0xa68   :  { %v1790_v1 = vpop.permute.xlu0 %1789 }
 0xa70   :  { %v1694_v57 = vpop.permute.xlu0 %1693 }
 0xa71   :  { %v1796_v27 = vpop.permute.xlu1 %1795  ;;  %2970 = vmatpush.xpose.msk.msrb.mxu0 %vm5046_vm14, %v1694_v57  ;;  %vm5051_vm14 = vmmov %vm5045_vm4 }
 0xa72   :  { %2975 = vmatpush.xpose.msk.msrb.mxu3 %vm5047_vm13, %v1796_v27  ;;  %vm5053_vm13 = vmmov %vm5045_vm4 }
 0xa74   :  { %2971 = vmatmul.msk.f32.vlgmr.msrb.gmra.mxu0 %vm5048_vm9, %v1680_v4 }
 0xa76   :  { %v1462_v42 = vpop.f32.mrf.mxu0  ;;  %2976 = vmatpush.xpose.msk.msrb.mxu3 %vm5049_vm12, %v1794_v26 }
 0xa77   :  { %v1463_v5 = vadd.f32 %v4191_v54, %v1462_v42 }
 0xa79   :  { %2977 = vmatmul.msk.f32.vlgmr.msrb.gmra.mxu3 %vm5050_vm6, %v1790_v1  ;;  %v1468_v14 = vadd.f32 %v1463_v5, %v3868_v51  ;;  %v1792_v55 = vpop.permute.xlu1 %1791  ;;  %vm5052_vm6 = vmmov %vm5045_vm4 }
 0xa7b   :  { %v1478_v29 = vsel %vm201_vm0, %v1468_v14, 0.0 }
 0xa7c   :  { %2972 = vmatmul.msk.f32.gmra.mxu0 %vm5045_vm4, %v1683_v47  ;;  %1479 = vadd.xlane.f32.xlu2 %v1478_v29 }
 0xa81   :  { %2978 = vmatmul.msk.f32.gmra.mxu3 %vm5051_vm14, %v1792_v55  ;;  %vm5054_vm14 = vcmp.eq.s32.totalorder %v3757_v59, 1 }
 0xaa4   :  { %v1477_v6 = vpop.xlane.xlu1 %1476 }
 0xaa5   :  { %v1483_v2 = vmul.f32 %v1477_v6, %v3652_v18 }
 0xaa7   :  { %v1487_v32 = vsub.f32 %v1467_v30, %v1483_v2 }
 0xaa9   :  { %v1491_v58 = vmul.f32 %v1487_v32, %v1487_v32 }
 0xaab   :  { %v1499_v43 = vsel %vm201_vm0, %v1491_v58, 0.0 }
 0xaac   :  { %1500 = vadd.xlane.f32.xlu0 %v1499_v43 }
 0xaef   :  { %v1480_v54 = vpop.xlane.xlu2 %1479 }
 0xaf0   :  { %v1484_v23 = vmul.f32 %v1480_v54, %v3652_v18 }
 0xaf2   :  { %v4341_v51 = vsub.f32 %v1468_v14, %v1484_v23 }
 0xaf4   :  { %v1492_v33 = vmul.f32 %v4341_v51, %v4341_v51 }
 0xaf6   :  { %v1502_v41 = vsel %vm201_vm0, %v1492_v33, 0.0 }
 0xaf7   :  { %1503 = vadd.xlane.f32.xlu1 %v1502_v41  ;;  %v1722_v41 = vpop.f32.mrf.mxu0 }
 0xafc   :  { %v1822_v13 = vpop.f32.mrf.mxu3 }
 0xafd   :  { %v1828_v3 = vmul.f32 0.25, %v1822_v13 }
 0xaff   :  { %v1830_v61 = vsel %vm3516_vm3, -1e+09, %v1828_v3 }
 0xb00   :  { %v1832_v56 = vsel %vm5052_vm6, %v1830_v61, -inf }
 0xb01   :  { %1833 = vmax.xlane.f32.xlu2 %v1832_v56 }
 0xb04   :  { %v1825_v44 = vpop.f32.mrf.mxu3 }
 0xb05   :  { %v1829_v0 = vmul.f32 0.25, %v1825_v44 }
 0xb07   :  { %v1831_v36 = vsel %vm3516_vm3, -1e+09, %v1829_v0 }
 0xb08   :  { %v1835_v50 = vsel %vm5053_vm13, %v1831_v36, -inf }
 0xb09   :  { %1836 = vmax.xlane.f32.xlu0 %v1835_v50 }
 0xb19   :  { %3104 = vrot.lane.b32.xlu2 %v4352_v11, %s3321_s21 }
 0xb1f   :  { %v1501_v62 = vpop.xlane.xlu0 %1500 }
 0xb20   :  { %v1507_v38 = vmul.f32 %v1501_v62, %v3652_v18 }
 0xb22   :  { %v1511_v30 = vadd.f32 1e-05, %v1507_v38 }
 0xb24   :  { %3241 = vrsqrt.f32 %v1511_v30  ;;  %vm1539_vm12 = vweird.f32 %v1511_v30 }
 0xb2a   :  { %v3242_v9 = vpop.eup %3241 }
 0xb2b   :  { %v1534_v26 = vmul.f32 %v3242_v9, %v1511_v30  ;;  %vm1540_vm9 = vweird.f32 %v3242_v9 }
 0xb2c   :  { %vm1541_vm4 = vmor %vm1539_vm12, %vm1540_vm9  ;;  %vm5055_vm12 = vcmask 130048  }
 0xb2d   :  { %v1535_v31 = vmul.f32 %v3242_v9, %v1534_v26  ;;  %v1728_v26 = vmul.f32 0.25, %v1722_v41 }
 0xb2f   :  { %v1536_v1 = vmul.f32 0.5, %v1535_v31 }
 0xb31   :  { %v1537_v57 = vsub.f32 1.5, %v1536_v1 }
 0xb33   :  { %v1538_v27 = vmul.f32 %v3242_v9, %v1537_v57  ;;  %v1730_v57 = vsel %vm3516_vm3, -1e+09, %v1728_v26 }
 0xb35   :  { %v1542_v42 = vsel %vm1541_vm4, %v3242_v9, %v1538_v27  ;;  %v1725_v27 = vpop.f32.mrf.mxu0  ;;  %vm5056_vm4 = vmmov %vm5055_vm12 }
 0xb36   :  { %v1555_v4 = vmul.f32 %v1542_v42, %v1487_v32 }
 0xb38   :  { %v1562_v47 = vmul.f32 %v4273_v49, %v1555_v4 }
 0xb3a   :  { %v1569_v5 = vadd.f32 %v4279_v12, %v1562_v47  ;;  %v1732_v47 = vsel %vm5056_vm4, %v1730_v57, -inf }
 0xb3c   :  { %v4361_v14 = vsel %vm5054_vm14, 0.0, %v1569_v5  ;;  %vm5057_vm14 = vmmov %vm5056_vm4  ;;  %v1729_v5 = vmul.f32 0.25, %v1725_v27 }
 0xb3d   :  { %2967 = vmatmul.msk.f32.gmra.mxu2 %vm201_vm0, %v4361_v14 }
 0xb6a   :  { %v1504_v29 = vpop.xlane.xlu1 %1503 }
 0xb6b   :  { %v1508_v55 = vmul.f32 %v1504_v29, %v3652_v18 }
 0xb6d   :  { %v1512_v6 = vadd.f32 1e-05, %v1508_v55 }
 0xb6f   :  { %3243 = vrsqrt.f32 %v1512_v6  ;;  %vm1549_vm13 = vweird.f32 %v1512_v6 }
 0xb74   :  { %v1834_v2 = vpop.xlane.xlu2 %1833 }
 0xb75   :  { %v3244_v58 = vpop.eup %3243  ;;  %v1838_v43 = vsub.f32 %v1830_v61, %v1834_v2 }
 0xb76   :  { %v1544_v32 = vmul.f32 %v3244_v58, %v1512_v6  ;;  %vm1550_vm6 = vweird.f32 %v3244_v58 }
 0xb77   :  { %v1840_v54 = vmul.f32 1.442695, %v1838_v43  ;;  %vm1551_vm9 = vmor %vm1549_vm13, %vm1550_vm6 }
 0xb78   :  { %v1545_v23 = vmul.f32 %v3244_v58, %v1544_v32  ;;  %vm5058_vm6 = vmmov %vm5056_vm4 }
 0xb79   :  { %3245 = vpow2.f32 %v1840_v54 }
 0xb7a   :  { %v1546_v33 = vmul.f32 0.5, %v1545_v23 }
 0xb7c   :  { %v1547_v13 = vsub.f32 1.5, %v1546_v33  ;;  %v3105_v3 = vpop.permute.xlu2 %3104  ;;  %v1837_v56 = vpop.xlane.xlu0 %1836 }
 0xb7d   :  { %v3106_v44 = vunpack.i.l.bf16 %v3105_v3  ;;  %v1839_v0 = vsub.f32 %v1831_v36, %v1837_v56  ;;  %v3107_v38 = vunpack.i.h.bf16 %v3105_v3 }
 0xb7e   :  { %v1548_v50 = vmul.f32 %v3244_v58, %v1547_v13 }
 0xb7f   :  { %v3246_v62 = vpop.eup %3245  ;;  %v1842_v30 = vmul.f32 1.442695, %v1839_v0  ;;  %1880 = vmatpush.msra.mxu0 %v3106_v44 }
 0xb80   :  { %v1844_v61 = vsel %vm5055_vm12, %v3246_v62, 0.0  ;;  %v1552_v9 = vsel %vm1551_vm9, %v3244_v58, %v1548_v50 }
 0xb81   :  { %3247 = vpow2.f32 %v1842_v30  ;;  %1881 = vmatpush.msra.mxu0 %v3107_v38  ;;  %1845 = vadd.xlane.f32.xlu1 %v1844_v61  ;;  %v1556_v31 = vmul.f32 %v1552_v9, %v4341_v51  ;;  %v2912_v9 = vld [vmem:[%s4988_s6 + $0x30] sm:$0xff] }
 0xb83   :  { %v1563_v1 = vmul.f32 %v4273_v49, %v1556_v31  ;;  %v1731_v49 = vsel %vm3516_vm3, -1e+09, %v1729_v5  ;;  %vm5059_vm3 = vmmov %vm5056_vm4 }
 0xb84   :  { %vm5060_vm13 = vmmov %vm5059_vm3 }
 0xb85   :  { %v1570_v36 = vadd.f32 %v4279_v12, %v1563_v1  ;;  %v1735_v12 = vsel %vm5058_vm6, %v1731_v49, -inf  ;;  %vm5061_vm9 = vmmov %vm5059_vm3 }
 0xb86   :  { %vm5062_vm12 = vmmov %vm5059_vm3 }
 0xb87   :  { %v3248_v42 = vpop.eup %3247  ;;  %v4374_v4 = vsel %vm901_vm1, 0.0, %v1570_v36  ;;  %vm5063_vm4 = vmmov %vm5059_vm3 }
 0xb88   :  { %2968 = vmatmul.msk.f32.gmra.mxu2 %vm201_vm0, %v4374_v4  ;;  %v1847_v51 = vsel %vm5057_vm14, %v3248_v42, 0.0  ;;  %vm5064_vm14 = vmmov %vm5059_vm3 }
 0xb89   :  { %1733 = vmax.xlane.f32.xlu1 %v1732_v47  ;;  %1848 = vadd.xlane.f32.xlu0 %v1847_v51  ;;  %vm5065_vm6 = vmmov %vm5059_vm3 }
 0xb91   :  { %1736 = vmax.xlane.f32.xlu0 %v1735_v12 }
 0xba5   :  { %3109 = vrot.lane.b32.xlu0 %v4352_v11, %s3324_s27 }
 0xbc0   :  { %v1685_v29 = vpop.f32.mrf.mxu2 }
 0xbc1   :  { %v4386_v55 = vadd.f32 %v4312_v22, %v1685_v29 }
 0xbc3   :  { %2045 = vrot.lane.b32.xlu0 %v4386_v55, %s3319_s19 }
 0xbf4   :  { %v1846_v6 = vpop.xlane.xlu1 %1845 }
 0xbf5   :  { %3249 = vrcp.f32 %v1846_v6 }
 0xbfb   :  { %v3250_v2 = vpop.eup %3249 }
 0xbfc   :  { %v1852_v58 = vmul.f32 %v3250_v2, %v3246_v62  ;;  %v1849_v43 = vpop.xlane.xlu0 %1848  ;;  %v1734_v35 = vpop.xlane.xlu1 %1733  ;;  %v4430_v2 = vld [vmem:[%s4988_s6 + $0x28] sm:$0xff] }
 0xbfd   :  { %3251 = vrcp.f32 %v1849_v43  ;;  %v1738_v32 = vsub.f32 %v1730_v57, %v1734_v35  ;;  %1938 = vmatpush.msra.mxu3 %v4430_v2 }
 0xbfe   :  { %2979 = vmatmul.msk.f32.vlgmr.msra.gmra.mxu0 %vm5059_vm3, %v1852_v58  ;;  %v4436_v58 = vld [vmem:[%s4988_s6 + $0x20] sm:$0xff] }
 0xbff   :  { %v1740_v54 = vmul.f32 1.442695, %v1738_v32  ;;  %1939 = vmatpush.msra.mxu3 %v4436_v58 }
 0xc01   :  { %3253 = vpow2.f32 %v1740_v54 }
 0xc03   :  { %v3252_v11 = vpop.eup %3251 }
 0xc04   :  { %v1737_v23 = vpop.xlane.xlu0 %1736  ;;  %v1853_v33 = vmul.f32 %v3252_v11, %v3248_v42 }
 0xc05   :  { %v1739_v41 = vsub.f32 %v1731_v49, %v1737_v23 }
 0xc06   :  { %2980 = vmatmul.msk.f32.gmra.mxu0 %vm5060_vm13, %v1853_v33  ;;  %vm5066_vm13 = vmmov %vm5059_vm3 }
 0xc07   :  { %v3254_v13 = vpop.eup %3253  ;;  %v1742_v3 = vmul.f32 1.442695, %v1739_v41 }
 0xc08   :  { %v1744_v56 = vsel %vm5061_vm9, %v3254_v13, 0.0  ;;  %vm5067_vm9 = vmmov %vm5059_vm3 }
 0xc09   :  { %3255 = vpow2.f32 %v1742_v3  ;;  %1745 = vadd.xlane.f32.xlu1 %v1744_v56 }
 0xc0b   :  { %v1688_v44 = vpop.f32.mrf.mxu2 }
 0xc0c   :  { %v4394_v0 = vadd.f32 %v4312_v22, %v1688_v44  ;;  %v2913_v22 = vld [vmem:[%s4988_s6 + $0x38] sm:$0xff] }
 0xc0e   :  { %2047 = vrot.lane.b32.xlu0 %v4394_v0, %s3319_s19  ;;  %2051 = vrot.lane.b32.xlu2 %v4394_v0, %s3320_s20 }
 0xc0f   :  { %v3256_v50 = vpop.eup %3255 }
 0xc10   :  { %v1747_v62 = vsel %vm5062_vm12, %v3256_v50, 0.0  ;;  %vm5068_vm12 = vmmov %vm5059_vm3 }
 0xc11   :  { %1748 = vadd.xlane.f32.xlu1 %v1747_v62 }
 0xc16   :  { %1951 = vrot.lane.b32.xlu2 %v4394_v0, %s3322_s2 }
 0xc17   :  { %v3110_v38 = vpop.permute.xlu0 %3109 }
 0xc18   :  { %v3111_v30 = vunpack.i.l.bf16 %v3110_v38  ;;  %v3112_v61 = vunpack.i.h.bf16 %v3110_v38 }
 0xc1a   :  { %1780 = vmatpush.msrb.mxu1 %v3111_v30 }
 0xc1c   :  { %1781 = vmatpush.msrb.mxu1 %v3112_v61 }
 0xc1e   :  { %1949 = vrot.lane.b32.xlu2 %v4386_v55, %s3322_s2  ;;  %1909 = vmatpush.msra.mxu1 %v2913_v22 }
 0xc20   :  { %1910 = vmatpush.msra.mxu1 %v2912_v9 }
 0xc2a   :  { %2049 = vrot.lane.b32.xlu1 %v4386_v55, %s3320_s20 }
 0xc35   :  { %v2046_v29 = vpop.permute.xlu0 %2045 }
 0xc68   :  { %v2052_v26 = vpop.permute.xlu2 %2051 }
 0xc70   :  { %v1952_v31 = vpop.permute.xlu2 %1951 }
 0xc71   :  { %2985 = vmatpush.xpose.msk.msrb.mxu2 %vm5063_vm4, %v1952_v31  ;;  %vm5069_vm4 = vmmov %vm5059_vm3  ;;  %v3113_v31 = vpack.i.bf16 %v4386_v55, %v4394_v0 }
 0xc78   :  { %v1950_v1 = vpop.permute.xlu2 %1949 }
 0xc79   :  { %2986 = vmatpush.xpose.msk.msrb.mxu2 %vm5064_vm14, %v1950_v1  ;;  %vm5070_vm14 = vmmov %vm5059_vm3 }
 0xc7b   :  { %v1883_v5 = vpop.f32.mrf.mxu0 }
 0xc7c   :  { %2987 = vmatmul.msk.f32.vlgmr.msrb.gmra.mxu2 %vm5065_vm6, %v4386_v55  ;;  %v1746_v36 = vpop.xlane.xlu1 %1745  ;;  %vm5071_vm6 = vmmov %vm5059_vm3 }
 0xc7d   :  { %2165 = vmatpush.msra.mxu2 %v2913_v22  ;;  %3257 = vrcp.f32 %v1746_v36 }
 0xc7f   :  { %2166 = vmatpush.msra.mxu2 %v2912_v9 }
 0xc80   :  { %v2048_v6 = vpop.permute.xlu0 %2047 }
 0xc83   :  { %v3258_v57 = vpop.eup %3257  ;;  %v1886_v12 = vpop.f32.mrf.mxu0 }
 0xc84   :  { %v1752_v27 = vmul.f32 %v3258_v57, %v3254_v13  ;;  %2988 = vmatmul.msk.f32.gmra.mxu2 %vm5059_vm3, %v4394_v0  ;;  %v1749_v42 = vpop.xlane.xlu1 %1748  ;;  %v4459_v57 = vld [vmem:[%s4989_s7 + $0x1] ss:$0 sm:$0xff]  ;;  %s3329_s7 = smov 8  }
 0xc85   :  { %3259 = vrcp.f32 %v1749_v42 }
 0xc86   :  { %2973 = vmatmul.msk.f32.vlgmr.msrb.gmra.mxu1 %vm5066_vm13, %v1752_v27  ;;  %vm5072_vm13 = vmmov %vm5059_vm3 }
 0xc87   :  { %2991 = vmatpush.xpose.msk.msrb.mxu1 %vm5067_vm9, %v2052_v26  ;;  %vm5073_vm9 = vmmov %vm5059_vm3 }
 0xc8b   :  { %v3260_v47 = vpop.eup %3259 }
 0xc8c   :  { %v1753_v51 = vmul.f32 %v3260_v47, %v3256_v50 }
 0xc8e   :  { %2974 = vmatmul.msk.f32.gmra.mxu1 %vm5068_vm12, %v1753_v51  ;;  %vm5074_vm12 = vmmov %vm5059_vm3 }
 0xc96   :  { %2981 = vmatmul.msk.f32.vlgmr.msra.gmra.mxu1 %vm5069_vm4, %v1883_v5  ;;  %vm5075_vm4 = vmmov %vm5059_vm3 }
 0xc9c   :  { %v2050_v49 = vpop.permute.xlu1 %2049 }
 0xc9d   :  { %2992 = vmatpush.xpose.msk.msrb.mxu1 %vm5070_vm14, %v2050_v49  ;;  %vm5076_vm14 = vmmov %vm5059_vm3 }
 0xc9e   :  { %2982 = vmatmul.msk.f32.gmra.mxu1 %vm5071_vm6, %v1886_v12  ;;  %vm5077_vm6 = vmmov %vm5059_vm3 }
 0xca6   :  { %2993 = vmatmul.msk.f32.vlgmr.msrb.gmra.mxu1 %vm5059_vm3, %v2046_v29 }
 0xcae   :  { %2994 = vmatmul.msk.f32.gmra.mxu1 %vm5072_vm13, %v2048_v6  ;;  %vm5079_vm13 = vmmov %vm5059_vm3 }
 0xcff   :  { %v1978_v43 = vpop.f32.mrf.mxu2 }
 0xd00   :  { %v1984_v35 = vmul.f32 0.25, %v1978_v43 }
 0xd02   :  { %v1986_v32 = vsel %vm3591_vm5, -1e+09, %v1984_v35 }
 0xd03   :  { %v1783_v54 = vpop.f32.mrf.mxu1  ;;  %v1988_v11 = vsel %vm5073_vm9, %v1986_v32, -inf  ;;  %vm5080_vm9 = vmmov %vm5059_vm3 }
 0xd04   :  { %1989 = vmax.xlane.f32.xlu1 %v1988_v11  ;;  %2983 = vmatmul.msk.f32.vlgmr.msra.gmra.mxu3 %vm5074_vm12, %v1783_v54  ;;  %vm5081_vm12 = vmmov %vm5059_vm3 }
 0xd07   :  { %v1981_v56 = vpop.f32.mrf.mxu2 }
 0xd08   :  { %v1985_v62 = vmul.f32 0.25, %v1981_v56 }
 0xd0a   :  { %v1987_v61 = vsel %vm3591_vm5, -1e+09, %v1985_v62 }
 0xd0b   :  { %v1786_v23 = vpop.f32.mrf.mxu1  ;;  %v1991_v9 = vsel %vm5077_vm6, %v1987_v61, -inf  ;;  %vm5084_vm6 = vmmov %vm5059_vm3 }
 0xd0c   :  { %2984 = vmatmul.msk.f32.gmra.mxu3 %vm5075_vm4, %v1786_v23  ;;  %vm5082_vm4 = vmmov %vm5059_vm3 }
 0xd13   :  { %v1912_v33 = vpop.f32.mrf.mxu1 }
 0xd1b   :  { %v1915_v41 = vpop.f32.mrf.mxu1 }
 0xd23   :  { %v2078_v13 = vpop.f32.mrf.mxu1 }
 0xd24   :  { %v2084_v3 = vmul.f32 0.25, %v2078_v13 }
 0xd26   :  { %v2086_v44 = vsel %vm3591_vm5, -1e+09, %v2084_v3 }
 0xd27   :  { %v2088_v50 = vsel %vm5076_vm14, %v2086_v44, -inf  ;;  %vm5083_vm14 = vmmov %vm5059_vm3 }
 0xd28   :  { %2089 = vmax.xlane.f32.xlu2 %v2088_v50 }
 0xd2b   :  { %v2081_v38 = vpop.f32.mrf.mxu1 }
 0xd2c   :  { %v2085_v30 = vmul.f32 0.25, %v2081_v38 }
 0xd2e   :  { %v2087_v22 = vsel %vm3591_vm5, -1e+09, %v2085_v30  ;;  %vm5078_vm5 = vmmov %vm5059_vm3 }
 0xd2f   :  { %v2091_v26 = vsel %vm5059_vm3, %v2087_v22, -inf }
 0xd30   :  { %1992 = vmax.xlane.f32.xlu2 %v1991_v9  ;;  %2092 = vmax.xlane.f32.xlu0 %v2091_v26 }
 0xd48   :  { %3114 = vrot.lane.b32.xlu2 %v3113_v31, %s3321_s21 }
 0xd77   :  { %v1990_v55 = vpop.xlane.xlu1 %1989 }
 0xd78   :  { %v1994_v5 = vsub.f32 %v1986_v32, %v1990_v55 }
 0xd7a   :  { %v1996_v12 = vmul.f32 1.442695, %v1994_v5 }
 0xd87   :  { %v1941_v1 = vpop.f32.mrf.mxu3 }
 0xd88   :  { %v1942_v62 = vadd.f32 %v1941_v1, %v1912_v33 }
 0xd8a   :  { %v2206_v30 = vadd.f32 %v4459_v57, %v1942_v62 }
 0xd8f   :  { %v1944_v36 = vpop.f32.mrf.mxu3 }
 0xd90   :  { %v1945_v45 = vadd.f32 %v1944_v36, %v1915_v41 }
 0xd92   :  { %v2207_v27 = vadd.f32 %v4459_v57, %v1945_v45 }
 0xd94   :  { %v4463_v42 = vadd.f32 %v2207_v27, %v4303_v52 }
 0xd96   :  { %v2217_v47 = vsel %vm201_vm0, %v4463_v42, 0.0 }
 0xd97   :  { %2218 = vadd.xlane.f32.xlu2 %v2217_v47 }
 0xd9b   :  { %v2090_v0 = vpop.xlane.xlu2 %2089 }
 0xd9c   :  { %v2094_v51 = vsub.f32 %v2086_v44, %v2090_v0 }
 0xd9e   :  { %v2096_v49 = vmul.f32 1.442695, %v2094_v51 }
 0xda0   :  { %3261 = vpow2.f32 %v2096_v49 }
 0xda1   :  { %3263 = vpow2.f32 %v1996_v12 }
 0xda3   :  { %v1993_v29 = vpop.xlane.xlu2 %1992  ;;  %v2093_v6 = vpop.xlane.xlu0 %2092 }
 0xda4   :  { %v2095_v43 = vsub.f32 %v2087_v22, %v2093_v6  ;;  %v1995_v54 = vsub.f32 %v1987_v61, %v1993_v29  ;;  %v2210_v22 = vadd.f32 %v2206_v30, %v4293_v16 }
 0xda6   :  { %v3262_v35 = vpop.eup %3261  ;;  %v2098_v11 = vmul.f32 1.442695, %v2095_v43  ;;  %v1998_v23 = vmul.f32 1.442695, %v1995_v54  ;;  %v2214_v9 = vsel %vm201_vm0, %v2210_v22, 0.0 }
 0xda7   :  { %v2100_v52 = vsel %vm5078_vm5, %v3262_v35, 0.0  ;;  %v3264_v13 = vpop.eup %3263  ;;  %vm5085_vm5 = vmmov %vm5059_vm3 }
 0xda8   :  { %2101 = vadd.xlane.f32.xlu0 %v2100_v52  ;;  %3265 = vpow2.f32 %v2098_v11  ;;  %v2000_v44 = vsel %vm5079_vm13, %v3264_v13, 0.0  ;;  %vm5086_vm13 = vmmov %vm5059_vm3 }
 0xda9   :  { %3267 = vpow2.f32 %v1998_v23 }
 0xdab   :  { %v3115_v41 = vpop.permute.xlu2 %3114 }
 0xdac   :  { %v3116_v3 = vunpack.i.l.bf16 %v3115_v41  ;;  %v3117_v32 = vunpack.i.h.bf16 %v3115_v41 }
 0xdae   :  { %2136 = vmatpush.msrb.mxu3 %v3116_v3  ;;  %v3266_v56 = vpop.eup %3265 }
 0xdaf   :  { %v2103_v50 = vsel %vm5080_vm9, %v3266_v56, 0.0  ;;  %v3268_v38 = vpop.eup %3267  ;;  %vm5087_vm9 = vmmov %vm5059_vm3 }
 0xdb0   :  { %2137 = vmatpush.msrb.mxu3 %v3117_v32  ;;  %2001 = vadd.xlane.f32.xlu0 %v2000_v44  ;;  %v2003_v61 = vsel %vm5081_vm12, %v3268_v38, 0.0  ;;  %vm5088_vm12 = vmmov %vm5059_vm3 }
 0xdb1   :  { %2104 = vadd.xlane.f32.xlu1 %v2103_v50 }
 0xdb8   :  { %2004 = vadd.xlane.f32.xlu0 %v2003_v61 }
 0xdc0   :  { %2215 = vadd.xlane.f32.xlu0 %v2214_v9 }
 0xdca   :  { %3119 = vrot.lane.b32.xlu1 %v3113_v31, %s3324_s27 }
 0xe0a   :  { %v2219_v30 = vpop.xlane.xlu2 %2218 }
 0xe1b   :  { %v2102_v26 = vpop.xlane.xlu0 %2101 }
 0xe1c   :  { %3269 = vrcp.f32 %v2102_v26 }
 0xe22   :  { %v3270_v36 = vpop.eup %3269 }
 0xe23   :  { %v2108_v45 = vmul.f32 %v3270_v36, %v3262_v35  ;;  %v2002_v47 = vpop.xlane.xlu0 %2001 }
 0xe24   :  { %v2105_v27 = vpop.xlane.xlu1 %2104 }
 0xe25   :  { %3271 = vrcp.f32 %v2105_v27  ;;  %2995 = vmatmul.msk.f32.vlgmr.msrb.gmra.mxu3 %vm5082_vm4, %v2108_v45 }
 0xe26   :  { %3273 = vrcp.f32 %v2002_v47 }
 0xe2b   :  { %v3272_v33 = vpop.eup %3271  ;;  %v2005_v16 = vpop.xlane.xlu0 %2004 }
 0xe2c   :  { %v2109_v1 = vmul.f32 %v3272_v33, %v3266_v56  ;;  %v3274_v0 = vpop.eup %3273  ;;  %3275 = vrcp.f32 %v2005_v16 }
 0xe2d   :  { %v2008_v5 = vmul.f32 %v3274_v0, %v3264_v13 }
 0xe2e   :  { %2996 = vmatmul.msk.f32.gmra.mxu3 %vm5083_vm14, %v2109_v1 }
 0xe32   :  { %v3276_v49 = vpop.eup %3275 }
 0xe33   :  { %v2009_v12 = vmul.f32 %v3276_v49, %v3268_v38  ;;  %v2216_v23 = vpop.xlane.xlu0 %2215 }
 0xe34   :  { %v2226_v56 = vmul.f32 %v2216_v23, %v3652_v18 }
 0xe36   :  { %v2230_v62 = vsub.f32 %v2210_v22, %v2226_v56  ;;  %v4525_v56 = vld [vmem:[%s4990_s8 + $0x1] ss:$0 sm:$0xff] }
 0xe38   :  { %v2234_v61 = vmul.f32 %v2230_v62, %v2230_v62 }
 0xe3a   :  { %v2238_v26 = vsel %vm201_vm0, %v2234_v61, 0.0 }
 0xe3c   :  { %v3120_v55 = vpop.permute.xlu1 %3119 }
 0xe3d   :  { %v3121_v51 = vunpack.i.l.bf16 %v3120_v55  ;;  %v3122_v31 = vunpack.i.h.bf16 %v3120_v55 }
 0xe3f   :  { %2036 = vmatpush.msrb.mxu0 %v3121_v51 }
 0xe41   :  { %2037 = vmatpush.msrb.mxu0 %v3122_v31  ;;  %v2952_v31 = vld [vmem:[%s4992_s10 + $0x238] sm:$0xff] }
 0xe42   :  { %2989 = vmatmul.msk.f32.vlgmr.msrb.gmra.mxu0 %vm5084_vm6, %v2008_v5  ;;  %v2951_v5 = vld [vmem:[%s4992_s10 + $0x230] sm:$0xff]  ;;  %2613 = vmatpush.msrb.mxu2 %v2952_v31 }
 0xe43   :  { %2194 = vmatpush.msra.mxu0 %v4430_v2 }
 0xe44   :  { %2614 = vmatpush.msrb.mxu2 %v2951_v5 }
 0xe45   :  { %2195 = vmatpush.msra.mxu0 %v4436_v58 }
 0xe4a   :  { %2990 = vmatmul.msk.f32.gmra.mxu0 %vm5059_vm3, %v2009_v12  ;;  %v2950_v12 = vld [vmem:[%s4992_s10 + $0x228] sm:$0xff] }
 0xe4b   :  { %2615 = vmatpush.msrb.mxu2 %v2950_v12 }
 0xea8   :  { %v2139_v29 = vpop.f32.mrf.mxu3 }
 0xea9   :  { %2997 = vmatmul.msk.f32.vlgmr.msra.gmra.mxu2 %vm5085_vm5, %v2139_v29 }
 0xeb1   :  { %v2142_v6 = vpop.f32.mrf.mxu3 }
 0xeb2   :  { %2998 = vmatmul.msk.f32.gmra.mxu2 %vm5086_vm13, %v2142_v6 }
 0xebf   :  { %v2039_v43 = vpop.f32.mrf.mxu0 }
 0xec0   :  { %2999 = vmatmul.msk.f32.vlgmr.msra.gmra.mxu0 %vm5087_vm9, %v2039_v43  ;;  %v2949_v43 = vld [vmem:[%s4992_s10 + $0x220] sm:$0xff]  ;;  %vm5089_vm9 = vcmp.eq.s32.totalorder %v3721_v25, 1 }
 0xec1   :  { %2616 = vmatpush.msrb.mxu2 %v2949_v43 }
 0xec7   :  { %v2042_v35 = vpop.f32.mrf.mxu0 }
 0xec8   :  { %3000 = vmatmul.msk.f32.gmra.mxu0 %vm5088_vm12, %v2042_v35  ;;  %vm5090_vm12 = vcmp.eq.s32.totalorder %v3734_v39, 1 }
 0xf2c   :  { %v2168_v54 = vpop.f32.mrf.mxu2 }
 0xf35   :  { %v2171_v13 = vpop.f32.mrf.mxu2 }
 0xf3d   :  { %v2197_v2 = vpop.f32.mrf.mxu0 }
 0xf3e   :  { %v2198_v11 = vadd.f32 %v2197_v2, %v2168_v54 }
 0xf40   :  { %v2208_v58 = vadd.f32 %v4459_v57, %v2198_v11 }
 0xf42   :  { %v2212_v52 = vadd.f32 %v2208_v58, %v4361_v14  ;;  %v2227_v14 = vmul.f32 %v2219_v30, %v3652_v18  ;;  %v4530_v30 = vld [vmem:[%s4991_s9 + $0x1] ss:$0 sm:$0xff] }
 0xf44   :  { %v2220_v41 = vsel %vm201_vm0, %v2212_v52, 0.0  ;;  %v2231_v9 = vsub.f32 %v4463_v42, %v2227_v14 }
 0xf45   :  { %v2200_v3 = vpop.f32.mrf.mxu0  ;;  %2221 = vadd.xlane.f32.xlu1 %v2220_v41 }
 0xf46   :  { %v2201_v32 = vadd.f32 %v2200_v3, %v2171_v13  ;;  %v2235_v36 = vmul.f32 %v2231_v9, %v2231_v9 }
 0xf48   :  { %v2209_v44 = vadd.f32 %v4459_v57, %v2201_v32  ;;  %v2241_v45 = vsel %vm201_vm0, %v2235_v36, 0.0 }
 0xf4a   :  { %v2213_v50 = vadd.f32 %v2209_v44, %v4374_v4 }
 0xf4c   :  { %v2223_v38 = vsel %vm201_vm0, %v2213_v50, 0.0 }
 0xf4d   :  { %2224 = vadd.xlane.f32.xlu0 %v2223_v38 }
 0xf55   :  { %2239 = vadd.xlane.f32.xlu0 %v2238_v26 }
 0xf5d   :  { %2242 = vadd.xlane.f32.xlu0 %v2241_v45 }
 0xfb8   :  { %v2222_v57 = vpop.xlane.xlu1 %2221 }
 0xfb9   :  { %v2228_v22 = vmul.f32 %v2222_v57, %v3652_v18 }
 0xfbb   :  { %v4502_v47 = vsub.f32 %v2212_v52, %v2228_v22 }
 0xfbd   :  { %v2236_v51 = vmul.f32 %v4502_v47, %v4502_v47 }
 0xfbf   :  { %v2244_v49 = vsel %vm201_vm0, %v2236_v51, 0.0 }
 0xfc0   :  { %v2225_v27 = vpop.xlane.xlu0 %2224 }
 0xfc1   :  { %v2229_v4 = vmul.f32 %v2225_v27, %v3652_v18 }
 0xfc3   :  { %v4498_v33 = vsub.f32 %v2213_v50, %v2229_v4 }
 0xfc5   :  { %v2237_v1 = vmul.f32 %v4498_v33, %v4498_v33 }
 0xfc7   :  { %v2247_v42 = vsel %vm201_vm0, %v2237_v1, 0.0 }
 0xfc8   :  { %2248 = vadd.xlane.f32.xlu0 %v2247_v42  ;;  %v2240_v16 = vpop.xlane.xlu0 %2239 }
 0xfc9   :  { %v2250_v55 = vmul.f32 %v2240_v16, %v3652_v18 }
 0xfcb   :  { %v2254_v0 = vadd.f32 1e-05, %v2250_v55 }
 0xfcd   :  { %3277 = vrsqrt.f32 %v2254_v0  ;;  %vm2264_vm14 = vweird.f32 %v2254_v0 }
 0xfd0   :  { %v2243_v29 = vpop.xlane.xlu0 %2242  ;;  %2245 = vadd.xlane.f32.xlu0 %v2244_v49 }
 0xfd1   :  { %v2251_v6 = vmul.f32 %v2243_v29, %v3652_v18 }
 0xfd3   :  { %v3278_v35 = vpop.eup %3277  ;;  %v2255_v54 = vadd.f32 1e-05, %v2251_v6 }
 0xfd4   :  { %v2259_v2 = vmul.f32 %v3278_v35, %v2254_v0  ;;  %vm2265_vm4 = vweird.f32 %v3278_v35 }
 0xfd5   :  { %3279 = vrsqrt.f32 %v2255_v54  ;;  %vm2266_vm6 = vmor %vm2264_vm14, %vm2265_vm4  ;;  %vm2274_vm5 = vweird.f32 %v2255_v54 }
 0xfd6   :  { %v2260_v11 = vmul.f32 %v3278_v35, %v2259_v2 }
 0xfd8   :  { %v2261_v58 = vmul.f32 0.5, %v2260_v11 }
 0xfda   :  { %v2262_v52 = vsub.f32 1.5, %v2261_v58 }
 0xfdb   :  { %v3280_v23 = vpop.eup %3279 }
 0xfdc   :  { %v2263_v41 = vmul.f32 %v3278_v35, %v2262_v52  ;;  %v2269_v13 = vmul.f32 %v3280_v23, %v2255_v54  ;;  %vm2275_vm3 = vweird.f32 %v3280_v23 }
 0xfdd   :  { %vm2276_vm13 = vmor %vm2274_vm5, %vm2275_vm3 }
 0xfde   :  { %v2267_v3 = vsel %vm2266_vm6, %v3278_v35, %v2263_v41  ;;  %v2270_v32 = vmul.f32 %v3280_v23, %v2269_v13 }
 0xfdf   :  { %v2298_v44 = vmul.f32 %v2267_v3, %v2230_v62 }
 0xfe0   :  { %v2271_v50 = vmul.f32 0.5, %v2270_v32 }
 0xfe1   :  { %v2305_v14 = vmul.f32 %v4525_v56, %v2298_v44 }
 0xfe2   :  { %v2272_v38 = vsub.f32 1.5, %v2271_v50 }
 0xfe3   :  { %v2312_v36 = vadd.f32 %v4530_v30, %v2305_v14 }
 0xfe4   :  { %v2273_v61 = vmul.f32 %v3280_v23, %v2272_v38 }
 0xfe5   :  { %v4537_v62 = vsel %vm5089_vm9, 0.0, %v2312_v36  ;;  %vm5091_vm9 = vcmp.lt.s32.totalorder %v3726_v34, 5 }
 0xfe6   :  { %v2277_v26 = vsel %vm2276_vm13, %v3280_v23, %v2273_v61  ;;  %v2320_v22 = vrot.slane %v4537_v62, 4  ;;  %v2332_v13 = vrot.slane %v4537_v62, 5  ;;  %v2368_v32 = vrot.slane %v4537_v62, 1 }
 0xfe7   :  { %v2299_v45 = vmul.f32 %v2277_v26, %v2231_v9  ;;  %v2356_v14 = vrot.slane %v4537_v62, 7  ;;  %v2392_v26 = vrot.slane %v4537_v62, 3  ;;  %v2344_v36 = vrot.slane %v4537_v62, 6 }
 0xfe9   :  { %v2306_v57 = vmul.f32 %v4525_v56, %v2299_v45  ;;  %v2380_v45 = vrot.slane %v4537_v62, 2 }
 0xfeb   :  { %v2313_v27 = vadd.f32 %v4530_v30, %v2306_v57 }
 0xfed   :  { %v4542_v4 = vsel %vm5090_vm12, 0.0, %v2313_v27  ;;  %vm5092_vm12 = vcmp.ge.s32.totalorder %v3808_v20, 0 }
 0xfee   :  { %v2321_v1 = vrot.slane %v4542_v4, 4  ;;  %v2369_v44 = vrot.slane %v4542_v4, 1  ;;  %v2393_v50 = vrot.slane %v4542_v4, 3 }
 0xff0   :  { %v4552_v9 = vsel %vm910_vm8, %v2320_v22, %v2321_v1 }
 0xff1   :  { %3001 = vmatmul.msk.f32.vlgmr.msrb.gmra.mxu2 %vm201_vm0, %v4552_v9 }
0x103b   :  { %v2249_v42 = vpop.xlane.xlu0 %2248 }
0x103c   :  { %v2253_v16 = vmul.f32 %v2249_v42, %v3652_v18 }
0x103e   :  { %v2257_v55 = vadd.f32 1e-05, %v2253_v16 }
0x1040   :  { %3281 = vrsqrt.f32 %v2257_v55  ;;  %vm2294_vm14 = vweird.f32 %v2257_v55 }
0x1043   :  { %v2246_v0 = vpop.xlane.xlu0 %2245 }
0x1044   :  { %v2252_v51 = vmul.f32 %v2246_v0, %v3652_v18  ;;  %v2374_v0 = vsel %vm1058_vm11, %v2368_v32, %v2369_v44 }
0x1046   :  { %v3282_v31 = vpop.eup %3281  ;;  %v2256_v5 = vadd.f32 1e-05, %v2252_v51  ;;  %v2398_v51 = vsel %vm5091_vm9, %v2392_v26, %v2393_v50  ;;  %vm5099_vm9 = vcmp.ge.s32.totalorder %v4031_v37, 0 }
0x1047   :  { %v2289_v49 = vmul.f32 %v3282_v31, %v2257_v55  ;;  %vm2295_vm4 = vweird.f32 %v3282_v31 }
0x1048   :  { %3283 = vrsqrt.f32 %v2256_v5  ;;  %vm2296_vm6 = vmor %vm2294_vm14, %vm2295_vm4  ;;  %vm2284_vm5 = vweird.f32 %v2256_v5  ;;  %vm5093_vm4 = vcmp.ge.s32.totalorder %v3825_v24, 0  ;;  %vm5094_vm14 = vcmp.ge.s32.totalorder %v3793_v7, 0  ;;  %v2932_v7 = vld [vmem:[%s4992_s10 + $0x198] sm:$0xff] }
0x1049   :  { %v2290_v12 = vmul.f32 %v3282_v31, %v2289_v49  ;;  %v2948_v24 = vld [vmem:[%s4992_s10 + $0x218] sm:$0xff]  ;;  %2543 = vmatpush.msra.mxu1 %v2932_v7 }
0x104a   :  { %2572 = vmatpush.msra.mxu3 %v2948_v24 }
0x104b   :  { %v2291_v29 = vmul.f32 0.5, %v2290_v12 }
0x104d   :  { %v2292_v6 = vsub.f32 1.5, %v2291_v29 }
0x104e   :  { %v3284_v43 = vpop.eup %3283 }
0x104f   :  { %v2293_v35 = vmul.f32 %v3282_v31, %v2292_v6  ;;  %v2279_v54 = vmul.f32 %v3284_v43, %v2256_v5  ;;  %vm2285_vm3 = vweird.f32 %v3284_v43 }
0x1050   :  { %vm2286_vm13 = vmor %vm2284_vm5, %vm2285_vm3  ;;  %vm5096_vm3 = vcmp.lt.s32.totalorder %v3770_v40, 16  ;;  %vm5097_vm5 = vcmp.lt.s32.totalorder %v3998_v10, 16  ;;  %v2357_v10 = vrot.slane %v4542_v4, 7 }
0x1051   :  { %v2297_v2 = vsel %vm2296_vm6, %v3282_v31, %v2293_v35  ;;  %v2280_v11 = vmul.f32 %v3284_v43, %v2279_v54  ;;  %vm5095_vm6 = vcmp.eq.s32.totalorder %v3757_v59, 1 }
0x1052   :  { %v2301_v58 = vmul.f32 %v2297_v2, %v4498_v33  ;;  %v2381_v33 = vrot.slane %v4542_v4, 2 }
0x1053   :  { %v2281_v52 = vmul.f32 0.5, %v2280_v11 }
0x1054   :  { %v2308_v23 = vmul.f32 %v4525_v56, %v2301_v58  ;;  %v2386_v49 = vsel %vm1095_vm15, %v2380_v45, %v2381_v33  ;;  %v2345_v58 = vrot.slane %v4542_v4, 6 }
0x1055   :  { %v2282_v41 = vsub.f32 1.5, %v2281_v52  ;;  %v2333_v52 = vrot.slane %v4542_v4, 5 }
0x1056   :  { %v2315_v3 = vadd.f32 %v4530_v30, %v2308_v23 }
0x1057   :  { %v2283_v38 = vmul.f32 %v3284_v43, %v2282_v41 }
0x1058   :  { %v4569_v61 = vsel %vm901_vm1, 0.0, %v2315_v3 }
0x1059   :  { %v2287_v57 = vsel %vm2286_vm13, %v3284_v43, %v2283_v38  ;;  %v2335_v27 = vrot.slane %v4569_v61, 5  ;;  %v2359_v42 = vrot.slane %v4569_v61, 7  ;;  %v2347_v16 = vrot.slane %v4569_v61, 6  ;;  %v2947_v38 = vld [vmem:[%s4992_s10 + $0x210] sm:$0xff] }
0x105a   :  { %v2300_v55 = vmul.f32 %v2287_v57, %v4502_v47  ;;  %v2350_v57 = vsel %vm984_vm2, %v2344_v36, %v2345_v58  ;;  %vm5098_vm13 = vcmp.lt.s32.totalorder %v3812_v21, 16  ;;  %2573 = vmatpush.msra.mxu3 %v2947_v38 }
0x105b   :  { %v2339_v31 = vsel %vm947_vm10, %v2335_v27, %v2332_v13  ;;  %v2363_v47 = vsel %vm1021_vm7, %v2359_v42, %v2356_v14  ;;  %v2351_v5 = vsel %vm984_vm2, %v2347_v16, %v2344_v36 }
0x105c   :  { %v2307_v12 = vmul.f32 %v4525_v56, %v2300_v55  ;;  %v2340_v29 = vsel %vm5092_vm12, %v2339_v31, 0.0  ;;  %v2364_v6 = vsel %vm5093_vm4, %v2363_v47, 0.0  ;;  %v2352_v43 = vsel %vm5094_vm14, %v2351_v5, 0.0  ;;  %v2931_v56 = vld [vmem:[%s4992_s10 + $0x190] sm:$0xff] }
0x105d   :  { %v3123_v35 = vpack.i.bf16 %v2340_v29, %v2374_v0  ;;  %v3133_v54 = vpack.i.bf16 %v2364_v6, %v2398_v51  ;;  %v3128_v2 = vpack.i.bf16 %v2352_v43, %v2386_v49  ;;  %v2338_v55 = vsel %vm947_vm10, %v2332_v13, %v2333_v52  ;;  %2544 = vmatpush.msra.mxu1 %v2931_v56 }
0x105e   :  { %v2314_v11 = vadd.f32 %v4530_v30, %v2307_v12  ;;  %v2383_v0 = vrot.slane %v4569_v61, 2  ;;  %vm5100_vm12 = vcmp.lt.s32.totalorder %v3726_v34, 5  ;;  %v2371_v43 = vrot.slane %v4569_v61, 1  ;;  %v2945_v34 = vld [vmem:[%s4992_s10 + $0x200] sm:$0xff] }
0x105f   :  { %3124 = vrot.lane.b32.xlu2 %v3123_v35, %s3326_s23  ;;  %3134 = vrot.lane.b32.xlu1 %v3133_v54, %s3322_s2  ;;  %v2323_v35 = vrot.slane %v4569_v61, 4  ;;  %vm5101_vm4 = vcmp.lt.s32.totalorder %v3760_v60, 16  ;;  %vm5102_vm14 = vcmp.ge.s32.totalorder %v3796_v8, 0 }
0x1060   :  { %v4620_v20 = vsel %vm5095_vm6, 0.0, %v2314_v11  ;;  %3129 = vrot.lane.b32.xlu0 %v3128_v2, %s3324_s27  ;;  %vm5105_vm6 = vmmov %vm5100_vm12 }
0x1061   :  { %v2322_v30 = vrot.slane %v4620_v20, 4  ;;  %v2382_v23 = vrot.slane %v4620_v20, 2  ;;  %v2370_v41 = vrot.slane %v4620_v20, 1  ;;  %v2346_v3 = vrot.slane %v4620_v20, 6 }
0x1062   :  { %v2394_v51 = vrot.slane %v4620_v20, 3  ;;  %v2334_v12 = vrot.slane %v4620_v20, 5 }
0x1063   :  { %v4649_v31 = vsel %vm910_vm8, %v2321_v1, %v2322_v30  ;;  %v2385_v47 = vsel %vm1095_vm15, %v2381_v33, %v2382_v23  ;;  %v2373_v5 = vsel %vm1058_vm11, %v2369_v44, %v2370_v41  ;;  %v2349_v36 = vsel %vm984_vm2, %v2345_v58, %v2346_v3 }
0x1064   :  { %v2405_v13 = vsel %vm5096_vm3, %v4649_v31, 0.0  ;;  %v2389_v49 = vsel %vm5097_vm5, %v2385_v47, 0.0  ;;  %v2377_v1 = vsel %vm5098_vm13, %v2373_v5, 0.0  ;;  %v2354_v29 = vsel %vm5099_vm9, %v2349_v36, 0.0  ;;  %v2926_v47 = vld [vmem:[%s4992_s10 + $0x168] sm:$0xff]  ;;  %v2925_v36 = vld [vmem:[%s4992_s10 + $0x160] sm:$0xff] }
0x1065   :  { %3002 = vmatmul.msk.f32.gmra.mxu2 %vm201_vm0, %v2405_v13  ;;  %v3143_v44 = vpack.i.bf16 %v2350_v57, %v2389_v49  ;;  %v3138_v33 = vpack.i.bf16 %v2338_v55, %v2377_v1  ;;  %v2384_v40 = vsel %vm1095_vm15, %v2382_v23, %v2383_v0  ;;  %v2397_v21 = vsel %vm5100_vm12, %v2393_v50, %v2394_v51  ;;  %v2944_v55 = vld [vmem:[%s4992_s10 + $0x1f8] sm:$0xff]  ;;  %v2942_v5 = vld [vmem:[%s4992_s10 + $0x1e8] sm:$0xff]  ;;  %v2941_v13 = vld [vmem:[%s4992_s10 + $0x1e0] sm:$0xff] }
0x1066   :  { %v3158_v6 = vpack.i.bf16 %v2354_v29, %v2384_v40  ;;  %v2337_v37 = vsel %vm947_vm10, %v2333_v52, %v2334_v12  ;;  %v2401_v54 = vsel %vm5101_vm4, %v2397_v21, 0.0  ;;  %v2387_v50 = vsel %vm1095_vm15, %v2383_v0, %v2380_v45  ;;  %v2927_v0 = vld [vmem:[%s4992_s10 + $0x170] sm:$0xff]  ;;  %v2924_v49 = vld [vmem:[%s4992_s10 + $0x158] sm:$0xff]  ;;  %v2938_v29 = vld [vmem:[%s4992_s10 + $0x1c8] sm:$0xff] }
0x1067   :  { %3139 = vrot.lane.b32.xlu2 %v3138_v33, %s3326_s23  ;;  %v2348_v2 = vsel %vm984_vm2, %v2346_v3, %v2347_v16  ;;  %v2342_v11 = vsel %vm5102_vm14, %v2337_v37, 0.0  ;;  %v2372_v58 = vsel %vm1058_vm11, %v2370_v41, %v2371_v43  ;;  %v2358_v52 = vrot.slane %v4620_v20, 7  ;;  %v2940_v1 = vld [vmem:[%s4992_s10 + $0x1d8] sm:$0xff]  ;;  %v2922_v33 = vld [vmem:[%s4992_s10 + $0x148] sm:$0xff]  ;;  %v2921_v40 = vld [vmem:[%s4992_s10 + $0x140] sm:$0xff] }
0x1068   :  { %3144 = vrot.lane.b32.xlu0 %v3143_v44, %s3324_s27  ;;  %3159 = vrot.lane.b32.xlu1 %v3158_v6, %s3324_s27  ;;  %v4699_v60 = vsel %vm910_vm8, %v2322_v30, %v2323_v35  ;;  %v2362_v45 = vsel %vm1021_vm7, %v2356_v14, %v2357_v10  ;;  %vm5103_vm15 = vcmp.lt.s32.totalorder %v3864_v48, 16  ;;  %v3153_v24 = vpack.i.bf16 %v2342_v11, %v2372_v58  ;;  %v2939_v44 = vld [vmem:[%s4992_s10 + $0x1d0] sm:$0xff]  ;;  %v2937_v6 = vld [vmem:[%s4992_s10 + $0x1c0] sm:$0xff] }
0x1069   :  { %v3148_v16 = vpack.i.bf16 %v2362_v45, %v2401_v54  ;;  %v2391_v8 = vsel %vm5103_vm15, %v2387_v50, 0.0  ;;  %v2361_v56 = vsel %vm1021_vm7, %v2357_v10, %v2358_v52  ;;  %v2395_v14 = vrot.slane %v4569_v61, 3  ;;  %v2920_v21 = vld [vmem:[%s4992_s10 + $0x138] sm:$0xff]  ;;  %v2919_v37 = vld [vmem:[%s4992_s10 + $0x130] sm:$0xff]  ;;  %v2934_v54 = vld [vmem:[%s4992_s10 + $0x1a8] sm:$0xff] }
0x106a   :  { %v3173_v7 = vpack.i.bf16 %v2348_v2, %v2391_v8  ;;  %v4719_v30 = vsel %vm910_vm8, %v2323_v35, %v2320_v22  ;;  %vm5104_vm2 = vcmp.ge.s32.totalorder %v3785_v46, 0  ;;  %v2375_v41 = vsel %vm1058_vm11, %v2371_v43, %v2368_v32  ;;  %vm5108_vm11 = vmmov %vm5105_vm6  ;;  %v2936_v10 = vld [vmem:[%s4992_s10 + $0x1b8] sm:$0xff]  ;;  %v2935_v43 = vld [vmem:[%s4992_s10 + $0x1b0] sm:$0xff] }
0x106b   :  { %v2366_v48 = vsel %vm5104_vm2, %v2361_v56, 0.0  ;;  %v2396_v23 = vsel %vm5105_vm6, %v2394_v51, %v2395_v14  ;;  %v2336_v3 = vsel %vm947_vm10, %v2334_v12, %v2335_v27  ;;  %vm5106_vm8 = vcmp.lt.s32.totalorder %v3843_v15, 16  ;;  %v2930_v27 = vld [vmem:[%s4992_s10 + $0x188] sm:$0xff]  ;;  %v2943_v51 = vld [vmem:[%s4992_s10 + $0x1f0] sm:$0xff]  ;;  %v2917_v50 = vld [vmem:[%s4992_s10 + $0x120] sm:$0xff] }
0x106c   :  { %v2407_v22 = vsel %vm5106_vm8, %v4719_v30, 0.0  ;;  %v3163_v46 = vpack.i.bf16 %v2366_v48, %v2396_v23  ;;  %vm5107_vm3 = vcmp.lt.s32.totalorder %v3829_v28, 16  ;;  %v2399_v32 = vsel %vm5108_vm11, %v2395_v14, %v2392_v26  ;;  %v2946_v26 = vld [vmem:[%s4992_s10 + $0x208] sm:$0xff]  ;;  %2545 = vmatpush.msra.mxu1 %v2930_v27  ;;  %v2923_v12 = vld [vmem:[%s4992_s10 + $0x150] sm:$0xff]  ;;  %v2933_v2 = vld [vmem:[%s4992_s10 + $0x1a0] sm:$0xff] }
0x106d   :  { %3003 = vmatmul.msk.f32.gmra.mxu2 %vm201_vm0, %v4699_v60  ;;  %v2379_v38 = vsel %vm5107_vm3, %v2375_v41, 0.0  ;;  %vm5109_vm10 = vcmp.lt.s32.totalorder %v4249_v53, 16  ;;  %v2360_v28 = vsel %vm1021_vm7, %v2358_v52, %v2359_v42  ;;  %v2929_v53 = vld [vmem:[%s4992_s10 + $0x180] sm:$0xff]  ;;  %2574 = vmatpush.msra.mxu3 %v2946_v26  ;;  %v2928_v42 = vld [vmem:[%s4992_s10 + $0x178] sm:$0xff]  ;;  %v2918_v35 = vld [vmem:[%s4992_s10 + $0x128] sm:$0xff]  ;;  %vm5110_vm7 = vcmp.ge.s32.totalorder %v4137_v63, 0 }
0x106e   :  { %v3168_v57 = vpack.i.bf16 %v2336_v3, %v2379_v38  ;;  %v2403_v15 = vsel %vm5109_vm10, %v2399_v32, 0.0  ;;  %2546 = vmatpush.msra.mxu1 %v2929_v53  ;;  %v2328_v56 = vsel %vm5110_vm7, %v4719_v30, 0.0  ;;  %vm5111_vm5 = vcmask 523264   ;;  %v2961_v32 = vld [vmem:[%s4994_s12 + $0x78] sm:$0xff] }
0x106f   :  { %3149 = vrot.lane.b32.xlu2 %v3148_v16, %s3322_s2  ;;  %2575 = vmatpush.msra.mxu3 %v2945_v34  ;;  %vm5112_vm13 = vmmov %vm5111_vm5  ;;  %vm5113_vm9 = vcmask 785408   ;;  %vm5119_vm6 = vcmp.ge.s32.totalorder %v4231_v19, 0 }
0x1070   :  { %3174 = vrot.lane.b32.xlu1 %v3173_v7, %s3324_s27  ;;  %3154 = vrot.lane.b32.xlu0 %v3153_v24, %s3326_s23  ;;  %vm5114_vm12 = vmmov %vm5113_vm9 }
0x1071   :  { %2547 = vmatpush.msra.mxu1 %v2928_v42  ;;  %2576 = vmatpush.msra.mxu3 %v2944_v55  ;;  %vm5115_vm4 = vmmov %vm5111_vm5 }
0x1072   :  { %2657 = vmatpush.msrb.mxu0 %v2961_v32  ;;  %vm5116_vm14 = vmmov %vm5115_vm4 }
0x1073   :  { %2548 = vmatpush.msra.mxu1 %v2927_v0  ;;  %2577 = vmatpush.msra.mxu3 %v2943_v51  ;;  %vm5117_vm15 = vmmov %vm5113_vm9 }
0x1074   :  { %vm5118_vm2 = vmmov %vm5113_vm9 }
0x1075   :  { %3004 = vmatmul.msk.f32.gmra.mxu2 %vm201_vm0, %v2407_v22  ;;  %2549 = vmatpush.msra.mxu1 %v2926_v47  ;;  %vm5120_vm8 = vmmov %vm5115_vm4 }
0x1076   :  { %2578 = vmatpush.msra.mxu3 %v2942_v5  ;;  %vm5121_vm3 = vmmov %vm5115_vm4 }
0x1077   :  { %3164 = vrot.lane.b32.xlu2 %v3163_v46, %s3322_s2  ;;  %2550 = vmatpush.msra.mxu1 %v2925_v36  ;;  %vm5122_vm11 = vmmov %vm5118_vm2 }
0x1078   :  { %3169 = vrot.lane.b32.xlu0 %v3168_v57, %s3326_s23  ;;  %2579 = vmatpush.msra.mxu3 %v2941_v13  ;;  %vm5123_vm10 = vmmov %vm5118_vm2 }
0x1079   :  { %2551 = vmatpush.msra.mxu1 %v2924_v49  ;;  %vm5124_vm7 = vmmov %vm5121_vm3 }
0x107a   :  { %2580 = vmatpush.msra.mxu3 %v2940_v1 }
0x107b   :  { %2552 = vmatpush.msra.mxu1 %v2923_v12 }
0x107c   :  { %2581 = vmatpush.msra.mxu3 %v2939_v44 }
0x107d   :  { %2553 = vmatpush.msra.mxu1 %v2922_v33 }
0x107e   :  { %2582 = vmatpush.msra.mxu3 %v2938_v29 }
0x107f   :  { %2498 = vrot.lane.b32.xlu2 %v2403_v15, %s3322_s2  ;;  %2554 = vmatpush.msra.mxu1 %v2921_v40 }
0x1080   :  { %2450 = vrot.lane.b32.xlu0 %v2360_v28, %s3322_s2  ;;  %2583 = vmatpush.msra.mxu3 %v2937_v6 }
0x1081   :  { %2555 = vmatpush.msra.mxu1 %v2920_v21 }
0x1082   :  { %2584 = vmatpush.msra.mxu3 %v2936_v10 }
0x1083   :  { %2556 = vmatpush.msra.mxu1 %v2919_v37 }
0x1084   :  { %2585 = vmatpush.msra.mxu3 %v2935_v43 }
0x1085   :  { %2557 = vmatpush.msra.mxu1 %v2918_v35 }
0x1086   :  { %2586 = vmatpush.msra.mxu3 %v2934_v54 }
0x1087   :  { %2558 = vmatpush.msra.mxu1 %v2917_v50 }
0x1088   :  { %2587 = vmatpush.msra.mxu3 %v2933_v2 }
0x10b9   :  { %v3125_v11 = vpop.permute.xlu2 %3124 }
0x10ba   :  { %v3127_v52 = vunpack.i.h.bf16 %v3125_v11  ;;  %v3126_v45 = vunpack.i.l.bf16 %v3125_v11 }
0x10bc   :  { %v2504_v23 = vsel %vm201_vm0, %v2328_v56, %v3127_v52  ;;  %v2516_v41 = vsel %vm201_vm0, %v4537_v62, %v3126_v45  ;;  %v2960_v56 = vld [vmem:[%s4994_s12 + $0x70] sm:$0xff] }
0x10bd   :  { %2658 = vmatpush.msrb.mxu0 %v2960_v56 }
0x10c1   :  { %v3140_v58 = vpop.permute.xlu2 %3139 }
0x10c2   :  { %v3142_v57 = vunpack.i.h.bf16 %v3140_v58  ;;  %v3141_v63 = vunpack.i.l.bf16 %v3140_v58 }
0x10c4   :  { %v2505_v34 = vsel %vm201_vm0, %v4552_v9, %v3142_v57  ;;  %v2517_v42 = vsel %vm201_vm0, %v4542_v4, %v3141_v63  ;;  %v2330_v9 = vsel %vm5119_vm6, %v4649_v31, 0.0 }
0x10c9   :  { %v3150_v30 = vpop.permute.xlu2 %3149 }
0x10ca   :  { %v3152_v26 = vunpack.i.h.bf16 %v3150_v30  ;;  %v3151_v53 = vunpack.i.l.bf16 %v3150_v30 }
0x10d1   :  { %v3135_v16 = vpop.permute.xlu1 %3134  ;;  %v3165_v36 = vpop.permute.xlu2 %3164 }
0x10d2   :  { %v3130_v8 = vpop.permute.xlu0 %3129  ;;  %v3137_v7 = vunpack.i.h.bf16 %v3135_v16  ;;  %v3136_v24 = vunpack.i.l.bf16 %v3135_v16  ;;  %v3167_v33 = vunpack.i.h.bf16 %v3165_v36  ;;  %v3166_v29 = vunpack.i.l.bf16 %v3165_v36 }
0x10d3   :  { %v3132_v14 = vunpack.i.h.bf16 %v3130_v8  ;;  %v3131_v48 = vunpack.i.l.bf16 %v3130_v8 }
0x10d5   :  { %v2508_v3 = vsel %vm5111_vm5, %v2504_v23, %v3132_v14  ;;  %v2520_v22 = vsel %vm5112_vm13, %v2516_v41, %v3131_v48  ;;  %vm5125_vm5 = vmmov %vm5118_vm2  ;;  %v2959_v14 = vld [vmem:[%s4994_s12 + $0x68] sm:$0xff]  ;;  %v2957_v48 = vld [vmem:[%s4994_s12 + $0x58] sm:$0xff] }
0x10d6   :  { %v2512_v46 = vsel %vm5113_vm9, %v2508_v3, %v3137_v7  ;;  %v2524_v38 = vsel %vm5114_vm12, %v2520_v22, %v3136_v24  ;;  %vm5126_vm13 = vmmov %vm5121_vm3  ;;  %2659 = vmatpush.msrb.mxu0 %v2959_v14  ;;  %v2956_v23 = vld [vmem:[%s4994_s12 + $0x50] sm:$0xff]  ;;  %v2955_v41 = vld [vmem:[%s4994_s12 + $0x48] sm:$0xff] }
0x10d7   :  { %2559 = vmatmul.f32.vlgmr.msra.gmra.mxu1 %v2512_v46  ;;  %2588 = vmatmul.f32.vlgmr.msra.gmra.mxu3 %v2524_v38  ;;  %vm5127_vm9 = vmmov %vm5118_vm2  ;;  %v2954_v3 = vld [vmem:[%s4994_s12 + $0x40] sm:$0xff]  ;;  %v2618_v38 = vpop.f32.mrf.mxu2 }
0x10d8   :  { %v3190_v46 = vld [vmem:[%s4993_s11 + $0x1] ss:$0 sm:$0xff]  ;;  %vm5128_vm12 = vmmov %vm5121_vm3 }
0x10d9   :  { %v2499_v11 = vpop.permute.xlu2 %2498 }
0x10da   :  { %v3145_v15 = vpop.permute.xlu0 %3144  ;;  %v3160_v5 = vpop.permute.xlu1 %3159 }
0x10db   :  { %v3147_v28 = vunpack.i.h.bf16 %v3145_v15  ;;  %v3146_v27 = vunpack.i.l.bf16 %v3145_v15  ;;  %v3162_v12 = vunpack.i.h.bf16 %v3160_v5  ;;  %v3161_v44 = vunpack.i.l.bf16 %v3160_v5 }
0x10dd   :  { %v2509_v55 = vsel %vm5115_vm4, %v2505_v34, %v3147_v28  ;;  %v2521_v0 = vsel %vm5116_vm14, %v2517_v42, %v3146_v27  ;;  %vm5129_vm4 = vmmov %vm5121_vm3 }
0x10de   :  { %v2513_v51 = vsel %vm5117_vm15, %v2509_v55, %v3152_v26  ;;  %v2525_v47 = vsel %vm5118_vm2, %v2521_v0, %v3151_v53  ;;  %vm5130_vm14 = vmmov %vm5121_vm3 }
0x10df   :  { %2562 = vmatmul.f32.gmra.mxu1 %v2513_v51  ;;  %2591 = vmatmul.f32.gmra.mxu3 %v2525_v47  ;;  %vm5131_vm15 = vmmov %vm5121_vm3 }
0x10e2   :  { %v3155_v13 = vpop.permute.xlu0 %3154  ;;  %v3175_v19 = vpop.permute.xlu1 %3174 }
0x10e3   :  { %v3157_v49 = vunpack.i.h.bf16 %v3155_v13  ;;  %v3156_v1 = vunpack.i.l.bf16 %v3155_v13  ;;  %v3176_v50 = vunpack.i.l.bf16 %v3175_v19  ;;  %v3177_v16 = vunpack.i.h.bf16 %v3175_v19 }
0x10e5   :  { %v2506_v40 = vsel %vm201_vm0, %v2330_v9, %v3157_v49  ;;  %v2518_v6 = vsel %vm201_vm0, %v4620_v20, %v3156_v1 }
0x10e6   :  { %v2510_v21 = vsel %vm5120_vm8, %v2506_v40, %v3162_v12  ;;  %v2522_v10 = vsel %vm5121_vm3, %v2518_v6, %v3161_v44  ;;  %v3191_v6 = vld [vmem:[%s4995_s13 + $0x1] ss:$0 sm:$0xff] }
0x10e7   :  { %v2514_v37 = vsel %vm5122_vm11, %v2510_v21, %v3167_v33  ;;  %v2526_v43 = vsel %vm5123_vm10, %v2522_v10, %v3166_v29 }
0x10e8   :  { %2565 = vmatmul.f32.gmra.mxu1 %v2514_v37  ;;  %2594 = vmatmul.f32.gmra.mxu3 %v2526_v43  ;;  %v2621_v27 = vpop.f32.mrf.mxu2 }
0x10ea   :  { %v3170_v31 = vpop.permute.xlu0 %3169 }
0x10eb   :  { %v3172_v35 = vunpack.i.h.bf16 %v3170_v31  ;;  %v3171_v54 = vunpack.i.l.bf16 %v3170_v31 }
0x10ed   :  { %v2519_v2 = vsel %vm201_vm0, %v4569_v61, %v3171_v54  ;;  %v2507_v45 = vsel %vm201_vm0, %v4699_v60, %v3172_v35  ;;  %v2958_v60 = vld [vmem:[%s4994_s12 + $0x60] sm:$0xff] }
0x10ee   :  { %v2523_v58 = vsel %vm5124_vm7, %v2519_v2, %v3176_v50  ;;  %v2511_v7 = vsel %vm5126_vm13, %v2507_v45, %v3177_v16  ;;  %2660 = vmatpush.msrb.mxu0 %v2958_v60  ;;  %vm5132_vm7 = vcmp.eq.s32.totalorder %v3721_v25, 1 }
0x10ef   :  { %v2527_v52 = vsel %vm5125_vm5, %v2523_v58, %v2499_v11 }
0x10f0   :  { %2597 = vmatmul.f32.gmra.mxu3 %v2527_v52  ;;  %2661 = vmatpush.msrb.mxu0 %v2957_v48  ;;  %v2624_v47 = vpop.f32.mrf.mxu2 }
0x10f2   :  { %v2451_v8 = vpop.permute.xlu0 %2450  ;;  %2662 = vmatpush.msrb.mxu0 %v2956_v23 }
0x10f3   :  { %v2515_v24 = vsel %vm5127_vm9, %v2511_v7, %v2451_v8  ;;  %vm5133_vm9 = vcmp.eq.s32.totalorder %v3734_v39, 1 }
0x10f4   :  { %2568 = vmatmul.f32.gmra.mxu1 %v2515_v24  ;;  %2663 = vmatpush.msrb.mxu0 %v2955_v41 }
0x10f6   :  { %2664 = vmatpush.msrb.mxu0 %v2954_v3 }
0x10f8   :  { %v2627_v33 = vpop.f32.mrf.mxu2 }
0x1154   :  { %v2560_v22 = vpop.f32.mrf.mxu1 }
0x1155   :  { %v2561_v57 = vadd.f32 %v3190_v46, %v2560_v22 }
0x115a   :  { %v2589_v63 = vpop.f32.mrf.mxu3 }
0x115b   :  { %v2590_v30 = vadd.f32 %v2589_v63, %v2561_v57 }
0x115c   :  { %v2563_v15 = vpop.f32.mrf.mxu1 }
0x115d   :  { %v2619_v32 = vadd.f32 %v2618_v38, %v2590_v30  ;;  %v2564_v26 = vadd.f32 %v3190_v46, %v2563_v15  ;;  %v2791_v15 = vld [vmem:[%s4998_s16 + $0x18] sm:$0xff] }
0x115e   :  { %2820 = vmatpush.msra.mxu2 %v2791_v15 }
0x115f   :  { %v2630_v28 = vmax.f32 %v2619_v32, 0.0 }
0x1161   :  { %3005 = vmatmul.msk.f32.vlgmr.msrb.gmra.mxu0 %vm5128_vm12, %v2630_v28  ;;  %v2790_v28 = vld [vmem:[%s4998_s16 + $0x10] sm:$0xff] }
0x1162   :  { %v2592_v53 = vpop.f32.mrf.mxu3  ;;  %2821 = vmatpush.msra.mxu2 %v2790_v28  ;;  %v3194_v28 = vld [vmem:[%s4999_s17] ss:$0 sm:$0xff]  ;;  %s3328_s17 = smov 128  }
0x1163   :  { %v2593_v34 = vadd.f32 %v2592_v53, %v2564_v26 }
0x1165   :  { %v2622_v42 = vadd.f32 %v2621_v27, %v2593_v34  ;;  %v2566_v0 = vpop.f32.mrf.mxu1  ;;  %v2789_v27 = vld [vmem:[%s4998_s16 + $0x8] sm:$0xff]  ;;  %v2788_v34 = vld [vmem:[%s4998_s16] sm:$0xff] }
0x1166   :  { %v2567_v51 = vadd.f32 %v3190_v46, %v2566_v0  ;;  %2822 = vmatpush.msra.mxu2 %v2789_v27 }
0x1167   :  { %v2631_v55 = vmax.f32 %v2622_v42, 0.0 }
0x1168   :  { %2823 = vmatpush.msra.mxu2 %v2788_v34 }
0x1169   :  { %3006 = vmatmul.msk.f32.gmra.mxu0 %vm5129_vm4, %v2631_v55 }
0x116b   :  { %v2595_v5 = vpop.f32.mrf.mxu3 }
0x116c   :  { %v2596_v36 = vadd.f32 %v2595_v5, %v2567_v51 }
0x116e   :  { %v2625_v13 = vadd.f32 %v2624_v47, %v2596_v36 }
0x1170   :  { %v2632_v49 = vmax.f32 %v2625_v13, 0.0 }
0x1171   :  { %v2569_v1 = vpop.f32.mrf.mxu1 }
0x1172   :  { %v2570_v9 = vadd.f32 %v3190_v46, %v2569_v1  ;;  %3007 = vmatmul.msk.f32.gmra.mxu0 %vm5130_vm14, %v2632_v49 }
0x1173   :  { %v2598_v12 = vpop.f32.mrf.mxu3 }
0x1174   :  { %v2599_v44 = vadd.f32 %v2598_v12, %v2570_v9 }
0x1176   :  { %v2628_v29 = vadd.f32 %v2627_v33, %v2599_v44 }
0x1178   :  { %v2633_v40 = vmax.f32 %v2628_v29, 0.0 }
0x117a   :  { %3008 = vmatmul.msk.f32.gmra.mxu0 %vm5131_vm15, %v2633_v40  ;;  %v3192_v40 = vld [vmem:[%s4996_s14 + $0x1] ss:$0 sm:$0xff] }
0x11de   :  { %v2666_v21 = vpop.f32.mrf.mxu0 }
0x11df   :  { %v2667_v10 = vadd.f32 %v3191_v6, %v2666_v21 }
0x11e1   :  { %v2678_v37 = vadd.f32 %v2667_v10, %v4537_v62 }
0x11e3   :  { %v2682_v43 = vsel %vm201_vm0, %v2678_v37, 0.0 }
0x11e4   :  { %2683 = vadd.xlane.f32.xlu1 %v2682_v43 }
0x11e6   :  { %v2669_v19 = vpop.f32.mrf.mxu0 }
0x11e7   :  { %v2670_v31 = vadd.f32 %v3191_v6, %v2669_v19 }
0x11e9   :  { %v2679_v35 = vadd.f32 %v2670_v31, %v4542_v4 }
0x11eb   :  { %v2685_v54 = vsel %vm201_vm0, %v2679_v35, 0.0 }
0x11ec   :  { %2686 = vadd.xlane.f32.xlu2 %v2685_v54 }
0x11ef   :  { %v2672_v50 = vpop.f32.mrf.mxu0 }
0x11f0   :  { %v2673_v2 = vadd.f32 %v3191_v6, %v2672_v50 }
0x11f2   :  { %v2680_v11 = vadd.f32 %v2673_v2, %v4620_v20 }
0x11f4   :  { %v2688_v58 = vsel %vm201_vm0, %v2680_v11, 0.0 }
0x11f5   :  { %2689 = vadd.xlane.f32.xlu0 %v2688_v58 }
0x11f7   :  { %v2675_v52 = vpop.f32.mrf.mxu0 }
0x11f8   :  { %v2676_v45 = vadd.f32 %v3191_v6, %v2675_v52 }
0x11fa   :  { %v2681_v62 = vadd.f32 %v2676_v45, %v4569_v61 }
0x11fc   :  { %v2691_v16 = vsel %vm201_vm0, %v2681_v62, 0.0 }
0x11fd   :  { %2692 = vadd.xlane.f32.xlu1 %v2691_v16 }
0x1257   :  { %v2684_v8 = vpop.xlane.xlu1 %2683 }
0x1258   :  { %v2694_v4 = vmul.f32 %v2684_v8, %v3652_v18 }
0x125a   :  { %v2698_v7 = vsub.f32 %v2678_v37, %v2694_v4  ;;  %v3193_v37 = vld [vmem:[%s4997_s15 + $0x1] ss:$0 sm:$0xff] }
0x125c   :  { %v2702_v24 = vmul.f32 %v2698_v7, %v2698_v7 }
0x125e   :  { %v2706_v56 = vsel %vm201_vm0, %v2702_v24, 0.0 }
0x125f   :  { %v2687_v14 = vpop.xlane.xlu2 %2686  ;;  %2707 = vadd.xlane.f32.xlu2 %v2706_v56 }
0x1260   :  { %v2695_v20 = vmul.f32 %v2687_v14, %v3652_v18 }
0x1262   :  { %v4918_v60 = vsub.f32 %v2679_v35, %v2695_v20 }
0x1264   :  { %v2703_v48 = vmul.f32 %v4918_v60, %v4918_v60 }
0x1266   :  { %v2709_v61 = vsel %vm201_vm0, %v2703_v48, 0.0 }
0x1267   :  { %2710 = vadd.xlane.f32.xlu0 %v2709_v61 }
0x1268   :  { %v2690_v23 = vpop.xlane.xlu0 %2689 }
0x1269   :  { %v2696_v41 = vmul.f32 %v2690_v23, %v3652_v18 }
0x126b   :  { %v4924_v3 = vsub.f32 %v2680_v11, %v2696_v41 }
0x126d   :  { %v2704_v22 = vmul.f32 %v4924_v3, %v4924_v3 }
0x126f   :  { %v2712_v46 = vsel %vm201_vm0, %v2704_v22, 0.0 }
0x1270   :  { %2713 = vadd.xlane.f32.xlu1 %v2712_v46  ;;  %v2693_v38 = vpop.xlane.xlu1 %2692 }
0x1271   :  { %v2697_v57 = vmul.f32 %v2693_v38, %v3652_v18 }
0x1273   :  { %v4930_v63 = vsub.f32 %v2681_v62, %v2697_v57 }
0x1275   :  { %v2705_v30 = vmul.f32 %v4930_v63, %v4930_v63 }
0x1277   :  { %v2715_v32 = vsel %vm201_vm0, %v2705_v30, 0.0 }
0x1278   :  { %2716 = vadd.xlane.f32.xlu2 %v2715_v32 }
0x12d2   :  { %v2708_v26 = vpop.xlane.xlu2 %2707 }
0x12d3   :  { %v2718_v53 = vmul.f32 %v2708_v26, %v3652_v18 }
0x12d5   :  { %v2722_v42 = vadd.f32 1e-05, %v2718_v53 }
0x12d7   :  { %3285 = vrsqrt.f32 %v2722_v42  ;;  %vm2732_vm6 = vweird.f32 %v2722_v42 }
0x12da   :  { %v2711_v55 = vpop.xlane.xlu0 %2710 }
0x12db   :  { %v2719_v0 = vmul.f32 %v2711_v55, %v3652_v18 }
0x12dd   :  { %v3286_v51 = vpop.eup %3285  ;;  %v2723_v47 = vadd.f32 1e-05, %v2719_v0 }
0x12de   :  { %v2727_v5 = vmul.f32 %v3286_v51, %v2722_v42  ;;  %vm2733_vm2 = vweird.f32 %v3286_v51 }
0x12df   :  { %3287 = vrsqrt.f32 %v2723_v47  ;;  %vm2734_vm8 = vmor %vm2732_vm6, %vm2733_vm2  ;;  %vm2742_vm11 = vweird.f32 %v2723_v47  ;;  %vm5134_vm2 = vcmp.eq.s32.totalorder %v3757_v59, 1  ;;  %vm2837_vm6 = vcmask 162816  }
0x12e0   :  { %v2728_v36 = vmul.f32 %v3286_v51, %v2727_v5 }
0x12e2   :  { %v2729_v13 = vmul.f32 0.5, %v2728_v36 }
0x12e3   :  { %v2714_v49 = vpop.xlane.xlu1 %2713 }
0x12e4   :  { %v2730_v1 = vsub.f32 1.5, %v2729_v13  ;;  %v2720_v9 = vmul.f32 %v2714_v49, %v3652_v18 }
0x12e5   :  { %v3288_v12 = vpop.eup %3287 }
0x12e6   :  { %v2731_v44 = vmul.f32 %v3286_v51, %v2730_v1  ;;  %v2737_v33 = vmul.f32 %v3288_v12, %v2723_v47  ;;  %v2724_v29 = vadd.f32 1e-05, %v2720_v9  ;;  %vm2743_vm3 = vweird.f32 %v3288_v12 }
0x12e7   :  { %vm2744_vm10 = vmor %vm2742_vm11, %vm2743_vm3 }
0x12e8   :  { %v2735_v6 = vsel %vm2734_vm8, %v3286_v51, %v2731_v44  ;;  %v2738_v21 = vmul.f32 %v3288_v12, %v2737_v33  ;;  %3289 = vrsqrt.f32 %v2724_v29  ;;  %vm2752_vm13 = vweird.f32 %v2724_v29 }
0x12e9   :  { %v2766_v10 = vmul.f32 %v2735_v6, %v2698_v7 }
0x12ea   :  { %v2739_v43 = vmul.f32 0.5, %v2738_v21 }
0x12eb   :  { %v2717_v19 = vpop.xlane.xlu2 %2716  ;;  %v2773_v31 = vmul.f32 %v3192_v40, %v2766_v10 }
0x12ec   :  { %v2740_v35 = vsub.f32 1.5, %v2739_v43  ;;  %v2721_v54 = vmul.f32 %v2717_v19, %v3652_v18 }
0x12ed   :  { %v2780_v50 = vadd.f32 %v3193_v37, %v2773_v31 }
0x12ee   :  { %v3290_v2 = vpop.eup %3289  ;;  %v2741_v11 = vmul.f32 %v3288_v12, %v2740_v35  ;;  %v2725_v58 = vadd.f32 1e-05, %v2721_v54 }
0x12ef   :  { %v2747_v52 = vmul.f32 %v3290_v2, %v2724_v29  ;;  %v2784_v45 = vsel %vm5132_vm7, 0.0, %v2780_v50  ;;  %vm2753_vm5 = vweird.f32 %v3290_v2 }
0x12f0   :  { %3291 = vrsqrt.f32 %v2725_v58  ;;  %3009 = vmatmul.msk.f32.vlgmr.msra.gmra.mxu2 %vm201_vm0, %v2784_v45  ;;  %v2745_v62 = vsel %vm2744_vm10, %v3288_v12, %v2741_v11  ;;  %vm2754_vm12 = vmor %vm2752_vm13, %vm2753_vm5  ;;  %vm2762_vm14 = vweird.f32 %v2725_v58 }
0x12f1   :  { %v2748_v16 = vmul.f32 %v3290_v2, %v2747_v52  ;;  %v2767_v8 = vmul.f32 %v2745_v62, %v4918_v60 }
0x12f3   :  { %v2749_v4 = vmul.f32 0.5, %v2748_v16  ;;  %v2774_v7 = vmul.f32 %v3192_v40, %v2767_v8 }
0x12f5   :  { %v2750_v18 = vsub.f32 1.5, %v2749_v4  ;;  %v2781_v24 = vadd.f32 %v3193_v37, %v2774_v7 }
0x12f6   :  { %v3292_v56 = vpop.eup %3291 }
0x12f7   :  { %v2751_v14 = vmul.f32 %v3290_v2, %v2750_v18  ;;  %v2757_v20 = vmul.f32 %v3292_v56, %v2725_v58  ;;  %v2785_v25 = vsel %vm5133_vm9, 0.0, %v2781_v24  ;;  %vm2763_vm4 = vweird.f32 %v3292_v56 }
0x12f8   :  { %3010 = vmatmul.msk.f32.gmra.mxu2 %vm201_vm0, %v2785_v25  ;;  %vm2764_vm15 = vmor %vm2762_vm14, %vm2763_vm4 }
0x12f9   :  { %v2758_v48 = vmul.f32 %v3292_v56, %v2757_v20  ;;  %v2755_v61 = vsel %vm2754_vm12, %v3290_v2, %v2751_v14 }
0x12fa   :  { %v2768_v23 = vmul.f32 %v2755_v61, %v4924_v3 }
0x12fb   :  { %v2759_v60 = vmul.f32 0.5, %v2758_v48 }
0x12fc   :  { %v2775_v41 = vmul.f32 %v3192_v40, %v2768_v23 }
0x12fd   :  { %v2760_v22 = vsub.f32 1.5, %v2759_v60 }
0x12fe   :  { %v2782_v46 = vadd.f32 %v3193_v37, %v2775_v41 }
0x12ff   :  { %v2761_v38 = vmul.f32 %v3292_v56, %v2760_v22 }
0x1300   :  { %v2786_v57 = vsel %vm5134_vm2, 0.0, %v2782_v46 }
0x1301   :  { %v2765_v39 = vsel %vm2764_vm15, %v3292_v56, %v2761_v38  ;;  %3011 = vmatmul.msk.f32.gmra.mxu2 %vm201_vm0, %v2786_v57 }
0x1302   :  { %v2769_v30 = vmul.f32 %v2765_v39, %v4930_v63 }
0x1304   :  { %v2776_v32 = vmul.f32 %v3192_v40, %v2769_v30 }
0x1306   :  { %v2783_v15 = vadd.f32 %v3193_v37, %v2776_v32 }
0x1308   :  { %v2787_v3 = vsel %vm901_vm1, 0.0, %v2783_v15 }
0x1309   :  { %3012 = vmatmul.msk.f32.gmra.mxu2 %vm201_vm0, %v2787_v3 }
0x1373   :  { %v2825_v27 = vpop.f32.mrf.mxu2 }
0x1374   :  { %v2826_v59 = vadd.f32 %v3194_v28, %v2825_v27 }
0x1376   :  { %2838 = vst.msk [vmem:[#allocation2] sm:$0xff] %vm2837_vm6, %v2826_v59 }
0x137b   :  { %v2828_v26 = vpop.f32.mrf.mxu2 }
0x137c   :  { %v2829_v53 = vadd.f32 %v3194_v28, %v2828_v26 }
0x137e   :  { %2839 = vst.msk [vmem:[#allocation2 + $0x8] sm:$0xff] %vm2837_vm6, %v2829_v53 }
0x1384   :  { %v2831_v63 = vpop.f32.mrf.mxu2 }
0x1385   :  { %v2832_v34 = vadd.f32 %v3194_v28, %v2831_v63 }
0x1387   :  { %2840 = vst.msk [vmem:[#allocation2 + $0x10] sm:$0xff] %vm2837_vm6, %v2832_v34 }
0x138c   :  { %v2834_v17 = vpop.f32.mrf.mxu2 }
0x138d   :  { %v2835_v42 = vadd.f32 %v3194_v28, %v2834_v17 }
0x138f   :  { %2841 = vst.msk [vmem:[#allocation2 + $0x18] sm:$0xff] %vm2837_vm6, %v2835_v42 }
0x1390   :  { %2854 = dma.vmem_to_hbm [thread:$0]  %s2847_s22, 512, %s2849_s4, [#allocation3], %s3328_s17, %s3328_s17, %s3329_s7  }
0x1391   :  { %3317 = dma.done.wait [#allocation3], 512  }
0x1392   :  { %3318 = vsyncadd [#allocation3], 4294966784 }
0x1393   :  { %2859 = vsyncpa [#allocation3], 1 }

</bundles_post_ra>
